<compile_context>
chip_gen: v6e
topology: v6e:2x2x1
jax: 0.10.0
libtpu: 0.0.40
codegen_flags: <defaults>
</compile_context>

<pallas_src>
import math

import jax
import jax.numpy as jnp
from jax.experimental import pallas as pl
from jax.experimental.pallas import tpu as pltpu


# ----------------------------- small helpers -----------------------------

def _full_specs(arrays):
    """Full-array (block == array) VMEM BlockSpecs for 2-D inputs."""
    return [pl.BlockSpec(a.shape, lambda i: (0, 0)) for a in arrays]


def _layernorm(v, g, b, eps=1e-5):
    mean = jnp.mean(v, axis=-1, keepdims=True)
    var = jnp.mean((v - mean) ** 2, axis=-1, keepdims=True)
    inv = jax.lax.rsqrt(var + eps)
    return (v - mean) * inv * g + b


def _softmax_lastdim(s):
    m = jnp.max(s, axis=-1, keepdims=True)
    p = jnp.exp(s - m)
    denom = jnp.sum(p, axis=-1, keepdims=True)
    return p * pl.reciprocal(denom, approx=True)


def _mha_attend(q, k, v, nheads, scale):
    """q:(B,Lq,D)  k,v:(B,Lk,D) -> (B,Lq,D); all heads in one invocation."""
    D = q.shape[-1]
    Dh = D // nheads
    outs = []
    for h in range(nheads):
        sl = slice(h * Dh, (h + 1) * Dh)
        s = jnp.einsum('bqd,bkd->bqk', q[:, :, sl], k[:, :, sl],
                       preferred_element_type=jnp.float32) * scale
        p = _softmax_lastdim(s)
        outs.append(jnp.einsum('bqk,bkd->bqd', p, v[:, :, sl],
                               preferred_element_type=jnp.float32))
    return jnp.concatenate(outs, axis=-1)


# ----------------------------- conv (im2col + matmul kernel) -----------------------------

def matmul_bias_act_pallas(x, w, b2, activation=None):
    """y = act(x @ w + b).  x:(M,K)  w:(K,N)  b2:(1,N).  Single VMEM block."""
    M, K = x.shape
    N = w.shape[1]

    def kernel(x_ref, w_ref, b_ref, o_ref):
        acc = jnp.dot(x_ref[...], w_ref[...],
                      preferred_element_type=jnp.float32) + b_ref[...]
        if activation == "relu":
            acc = jnp.maximum(acc, 0.0)
        elif activation == "sigmoid":
            acc = jax.nn.sigmoid(acc)
        o_ref[...] = acc

    return pl.pallas_call(
        kernel,
        out_shape=jax.ShapeDtypeStruct((M, N), jnp.float32),
        grid=(1,),
        in_specs=_full_specs([x, w, b2]),
        out_specs=pl.BlockSpec((M, N), lambda i: (0, 0)),
        compiler_params=pltpu.CompilerParams(dimension_semantics=("arbitrary",)),
    )(x, w, b2)


def conv2d_nhwc(x, w, b2, stride, padding, activation=None):
    """NHWC conv. x:(B,H,W,Cin)  w:(kh,kw,Cin,Cout)  b2:(1,Cout).
    im2col is cheap XLA glue (fused under jit); the matmul is a Pallas kernel."""
    B, H, W, Cin = x.shape
    kh, kw, _, Cout = w.shape
    xp = jnp.pad(x, ((0, 0), (padding, padding), (padding, padding), (0, 0)))
    Ho = (H + 2 * padding - kh) // stride + 1
    Wo = (W + 2 * padding - kw) // stride + 1
    patches = []
    for i in range(kh):
        for j in range(kw):
            patches.append(xp[:, i:i + stride * Ho:stride,
                               j:j + stride * Wo:stride, :])
    cols = jnp.stack(patches, axis=3)                       # (B,Ho,Wo,kh*kw,Cin)
    cols = cols.reshape(B * Ho * Wo, kh * kw * Cin)
    wmat = w.reshape(kh * kw * Cin, Cout)
    y = matmul_bias_act_pallas(cols, wmat, b2, activation)  # (B*Ho*Wo, Cout)
    return y.reshape(B, Ho, Wo, Cout)


# ----------------------------- fused encoder layer -----------------------------

def encoder_layer_fused(tokens2d, pos2d, input_proj, enc, B, L, D, nheads):
    """One pallas_call: input_proj + self-attn (fused QK matmul) + FFN + 2 LayerNorms."""
    scale = 1.0 / math.sqrt(D // nheads)

    def kernel(tok_ref, pos_ref,
               wp_ref, bp_ref,
               wqk_ref, bqk_ref, wv_ref, bv_ref, wo_ref, bo_ref,
               n1g_ref, n1b_ref,
               wf1_ref, bf1_ref, wf2_ref, bf2_ref,
               n2g_ref, n2b_ref,
               out_ref):
        tok = tok_ref[...]                                   # (B*L, Cb)
        pos = pos_ref[...]                                   # (B*L, D)
        src = jnp.dot(tok, wp_ref[...],
                      preferred_element_type=jnp.float32) + bp_ref[...]
        xqk = src + pos
        qk = jnp.dot(xqk, wqk_ref[...],
                     preferred_element_type=jnp.float32) + bqk_ref[...]
        q = qk[:, :D].reshape(B, L, D)
        k = qk[:, D:].reshape(B, L, D)
        v = (jnp.dot(src, wv_ref[...],
                     preferred_element_type=jnp.float32) + bv_ref[...]).reshape(B, L, D)
        attn = _mha_attend(q, k, v, nheads, scale).reshape(B * L, D)
        attn = jnp.dot(attn, wo_ref[...],
                       preferred_element_type=jnp.float32) + bo_ref[...]
        x = _layernorm(src + attn, n1g_ref[...], n1b_ref[...])
        h = jnp.maximum(jnp.dot(x, wf1_ref[...],
                                preferred_element_type=jnp.float32) + bf1_ref[...], 0.0)
        y = jnp.dot(h, wf2_ref[...],
                    preferred_element_type=jnp.float32) + bf2_ref[...]
        out_ref[...] = _layernorm(x + y, n2g_ref[...], n2b_ref[...])

    args = [tokens2d, pos2d,
            input_proj['w'], input_proj['b'],
            enc['wqk'], enc['bqk'], enc['wv'], enc['bv'], enc['wo'], enc['bo'],
            enc['n1g'], enc['n1b'],
            enc['wf1'], enc['bf1'], enc['wf2'], enc['bf2'],
            enc['n2g'], enc['n2b']]
    return pl.pallas_call(
        kernel,
        out_shape=jax.ShapeDtypeStruct((B * L, D), jnp.float32),
        grid=(1,),
        in_specs=_full_specs(args),
        out_specs=pl.BlockSpec((B * L, D), lambda i: (0, 0)),
        compiler_params=pltpu.CompilerParams(dimension_semantics=("arbitrary",)),
    )(*args)


# ----------------------------- fused decoder layer + heads -----------------------------

def decoder_layer_heads_fused(qpos2d, memory2d, pos2d, dec, B, Q, L, D, nheads,
                              num_classes):
    """One pallas_call: decoder self-attn, cross-attn, FFN, 4 LayerNorms,
    class head and 3-layer box MLP.  tgt starts at zero (single decoder layer)."""
    scale = 1.0 / math.sqrt(D // nheads)

    def kernel(qpos_ref, mem_ref, pos_ref,
               sa_wqk_ref, sa_bqk_ref, sa_wv_ref, sa_bv_ref, sa_wo_ref, sa_bo_ref,
               n1g_ref, n1b_ref,
               ca_wq_ref, ca_bq_ref, ca_wk_ref, ca_bk_ref,
               ca_wv_ref, ca_bv_ref, ca_wo_ref, ca_bo_ref,
               n2g_ref, n2b_ref,
               wf1_ref, bf1_ref, wf2_ref, bf2_ref,
               n3g_ref, n3b_ref,
               dng_ref, dnb_ref,
               cls_w_ref, cls_b_ref,
               bb1_w_ref, bb1_b_ref, bb2_w_ref, bb2_b_ref, bb3_w_ref, bb3_b_ref,
               logits_ref, boxes_ref):
        qpos = qpos_ref[...]                                 # (B*Q, D)
        mem = mem_ref[...]                                   # (B*L, D)
        pos = pos_ref[...]                                   # (B*L, D)
        tgt = jnp.zeros((B * Q, D), jnp.float32)

        # --- self attention (q,k from tgt+query_pos, v from tgt) ---
        xqk = tgt + qpos
        qk = jnp.dot(xqk, sa_wqk_ref[...],
                     preferred_element_type=jnp.float32) + sa_bqk_ref[...]
        q = qk[:, :D].reshape(B, Q, D)
        k = qk[:, D:].reshape(B, Q, D)
        v = (jnp.dot(tgt, sa_wv_ref[...],
                     preferred_element_type=jnp.float32) + sa_bv_ref[...]).reshape(B, Q, D)
        attn = _mha_attend(q, k, v, nheads, scale).reshape(B * Q, D)
        attn = jnp.dot(attn, sa_wo_ref[...],
                       preferred_element_type=jnp.float32) + sa_bo_ref[...]
        tgt = _layernorm(tgt + attn, n1g_ref[...], n1b_ref[...])

        # --- cross attention (q from tgt+query_pos, k from memory+pos, v from memory) ---
        qc = (jnp.dot(tgt + qpos, ca_wq_ref[...],
                      preferred_element_type=jnp.float32) + ca_bq_ref[...]).reshape(B, Q, D)
        kc = (jnp.dot(mem + pos, ca_wk_ref[...],
                      preferred_element_type=jnp.float32) + ca_bk_ref[...]).reshape(B, L, D)
        vc = (jnp.dot(mem, ca_wv_ref[...],
                      preferred_element_type=jnp.float32) + ca_bv_ref[...]).reshape(B, L, D)
        attn = _mha_attend(qc, kc, vc, nheads, scale).reshape(B * Q, D)
        attn = jnp.dot(attn, ca_wo_ref[...],
                       preferred_element_type=jnp.float32) + ca_bo_ref[...]
        tgt = _layernorm(tgt + attn, n2g_ref[...], n2b_ref[...])

        # --- FFN ---
        h = jnp.maximum(jnp.dot(tgt, wf1_ref[...],
                                preferred_element_type=jnp.float32) + bf1_ref[...], 0.0)
        y = jnp.dot(h, wf2_ref[...],
                    preferred_element_type=jnp.float32) + bf2_ref[...]
        tgt = _layernorm(tgt + y, n3g_ref[...], n3b_ref[...])

        # --- final decoder LayerNorm ---
        hs = _layernorm(tgt, dng_ref[...], dnb_ref[...])

        # --- heads ---
        logits_ref[...] = jnp.dot(hs, cls_w_ref[...],
                                  preferred_element_type=jnp.float32) + cls_b_ref[...]
        hb = jnp.maximum(jnp.dot(hs, bb1_w_ref[...],
                                 preferred_element_type=jnp.float32) + bb1_b_ref[...], 0.0)
        hb = jnp.maximum(jnp.dot(hb, bb2_w_ref[...],
                                 preferred_element_type=jnp.float32) + bb2_b_ref[...], 0.0)
        boxes_ref[...] = jax.nn.sigmoid(
            jnp.dot(hb, bb3_w_ref[...],
                    preferred_element_type=jnp.float32) + bb3_b_ref[...])

    args = [qpos2d, memory2d, pos2d,
            dec['sa_wqk'], dec['sa_bqk'], dec['sa_wv'], dec['sa_bv'],
            dec['sa_wo'], dec['sa_bo'],
            dec['n1g'], dec['n1b'],
            dec['ca_wq'], dec['ca_bq'], dec['ca_wk'], dec['ca_bk'],
            dec['ca_wv'], dec['ca_bv'], dec['ca_wo'], dec['ca_bo'],
            dec['n2g'], dec['n2b'],
            dec['wf1'], dec['bf1'], dec['wf2'], dec['bf2'],
            dec['n3g'], dec['n3b'],
            dec['dng'], dec['dnb'],
            dec['cls_w'], dec['cls_b'],
            dec['bb1_w'], dec['bb1_b'], dec['bb2_w'], dec['bb2_b'],
            dec['bb3_w'], dec['bb3_b']]
    return pl.pallas_call(
        kernel,
        out_shape=(jax.ShapeDtypeStruct((B * Q, num_classes), jnp.float32),
                   jax.ShapeDtypeStruct((B * Q, 4), jnp.float32)),
        grid=(1,),
        in_specs=_full_specs(args),
        out_specs=(pl.BlockSpec((B * Q, num_classes), lambda i: (0, 0)),
                   pl.BlockSpec((B * Q, 4), lambda i: (0, 0))),
        compiler_params=pltpu.CompilerParams(dimension_semantics=("arbitrary",)),
    )(*args)


# ----------------------------- positional embedding (precomputed) -----------------------------

def sine_pos_embed(B, H, W, d_model, temperature=10000.0):
    scale = 2.0 * math.pi
    ones = jnp.ones((B, H, W), jnp.float32)
    y_embed = jnp.cumsum(ones, axis=1)
    x_embed = jnp.cumsum(ones, axis=2)
    eps = 1e-6
    y_embed = y_embed / (y_embed[:, -1:, :] + eps) * scale
    x_embed = x_embed / (x_embed[:, :, -1:] + eps) * scale
    npf = d_model // 2
    dim_t = jnp.arange(npf, dtype=jnp.float32)
    dim_t = temperature ** (2.0 * (dim_t // 2) / npf)
    pos_x = x_embed[..., None] / dim_t
    pos_y = y_embed[..., None] / dim_t
    pos_x = jnp.stack([jnp.sin(pos_x[..., 0::2]), jnp.cos(pos_x[..., 1::2])],
                      axis=4).reshape(B, H, W, -1)
    pos_y = jnp.stack([jnp.sin(pos_y[..., 0::2]), jnp.cos(pos_y[..., 1::2])],
                      axis=4).reshape(B, H, W, -1)
    pos = jnp.concatenate([pos_y, pos_x], axis=3)            # (B,H,W,d_model)
    return pos.reshape(B, H * W, d_model)


# ----------------------------- parameters -----------------------------

def _randn(key, shape, scale=0.05):
    return jax.random.normal(key, shape, jnp.float32) * scale


def init_params(key, num_classes, num_queries, d_model=32, dff=64):
    D = d_model
    keys = iter(jax.random.split(key, 48))
    nxt = lambda: next(keys)
    ones = lambda n: jnp.ones((1, n), jnp.float32)
    zeros = lambda n: jnp.zeros((1, n), jnp.float32)

    p = {}
    # backbone stem: NHWC conv weights (kh, kw, Cin, Cout), biases kept 2-D.
    p['conv1'] = {'w': _randn(nxt(), (3, 3, 3, 16)),  'b': zeros(16)}
    p['conv2'] = {'w': _randn(nxt(), (3, 3, 16, 32)), 'b': zeros(32)}
    p['conv3'] = {'w': _randn(nxt(), (3, 3, 32, 64)), 'b': zeros(64)}
    p['input_proj'] = {'w': _randn(nxt(), (64, D)), 'b': _randn(nxt(), (1, D))}
    p['query_embed'] = _randn(nxt(), (num_queries, D))

    p['enc'] = {
        'wqk': _randn(nxt(), (D, 2 * D)), 'bqk': _randn(nxt(), (1, 2 * D)),
        'wv': _randn(nxt(), (D, D)), 'bv': _randn(nxt(), (1, D)),
        'wo': _randn(nxt(), (D, D)), 'bo': _randn(nxt(), (1, D)),
        'n1g': ones(D), 'n1b': zeros(D),
        'wf1': _randn(nxt(), (D, dff)), 'bf1': _randn(nxt(), (1, dff)),
        'wf2': _randn(nxt(), (dff, D)), 'bf2': _randn(nxt(), (1, D)),
        'n2g': ones(D), 'n2b': zeros(D),
    }
    p['dec'] = {
        'sa_wqk': _randn(nxt(), (D, 2 * D)), 'sa_bqk': _randn(nxt(), (1, 2 * D)),
        'sa_wv': _randn(nxt(), (D, D)), 'sa_bv': _randn(nxt(), (1, D)),
        'sa_wo': _randn(nxt(), (D, D)), 'sa_bo': _randn(nxt(), (1, D)),
        'n1g': ones(D), 'n1b': zeros(D),
        'ca_wq': _randn(nxt(), (D, D)), 'ca_bq': _randn(nxt(), (1, D)),
        'ca_wk': _randn(nxt(), (D, D)), 'ca_bk': _randn(nxt(), (1, D)),
        'ca_wv': _randn(nxt(), (D, D)), 'ca_bv': _randn(nxt(), (1, D)),
        'ca_wo': _randn(nxt(), (D, D)), 'ca_bo': _randn(nxt(), (1, D)),
        'n2g': ones(D), 'n2b': zeros(D),
        'wf1': _randn(nxt(), (D, dff)), 'bf1': _randn(nxt(), (1, dff)),
        'wf2': _randn(nxt(), (dff, D)), 'bf2': _randn(nxt(), (1, D)),
        'n3g': ones(D), 'n3b': zeros(D),
        'dng': ones(D), 'dnb': zeros(D),
        # replaced class head (num_classes outputs, like the PyTorch module)
        'cls_w': _randn(nxt(), (D, num_classes)), 'cls_b': _randn(nxt(), (1, num_classes)),
        'bb1_w': _randn(nxt(), (D, D)), 'bb1_b': _randn(nxt(), (1, D)),
        'bb2_w': _randn(nxt(), (D, D)), 'bb2_b': _randn(nxt(), (1, D)),
        'bb3_w': _randn(nxt(), (D, 4)), 'bb3_b': _randn(nxt(), (1, 4)),
    }
    return p


# ----------------------------- forward -----------------------------

def detr_forward(params, images, pos2d, qpos2d, num_queries, num_classes,
                 d_model=32, nheads=4):
    B = images.shape[0]
    # single NCHW -> NHWC relayout, then channels-last end-to-end.
    x = jnp.transpose(images, (0, 2, 3, 1))
    x = conv2d_nhwc(x, params['conv1']['w'], params['conv1']['b'], 2, 1, "relu")
    x = conv2d_nhwc(x, params['conv2']['w'], params['conv2']['b'], 2, 1, "relu")
    x = conv2d_nhwc(x, params['conv3']['w'], params['conv3']['b'], 2, 1, "relu")
    _, H, W, C = x.shape
    L = H * W
    tokens2d = x.reshape(B * L, C)                         # free reshape (NHWC)

    memory2d = encoder_layer_fused(tokens2d, pos2d, params['input_proj'],
                                   params['enc'], B, L, d_model, nheads)
    logits2d, boxes2d = decoder_layer_heads_fused(
        qpos2d, memory2d, pos2d, params['dec'],
        B, num_queries, L, d_model, nheads, num_classes)

    return {'pred_logits': logits2d.reshape(B, num_queries, num_classes),
            'pred_boxes': boxes2d.reshape(B, num_queries, 4)}


# ----------------------------- main -----------------------------

if __name__ == "__main__":
    num_classes = 8
    num_queries = 8
    d_model = 32
    nheads = 4

    key = jax.random.PRNGKey(0)
    kparams, kimg = jax.random.split(key)
    params = init_params(kparams, num_classes, num_queries, d_model)
    images = jax.random.normal(kimg, (2, 3, 32, 32), jnp.float32)   # NCHW like PyTorch

    B = images.shape[0]
    Hf = Wf = images.shape[2] // 8          # three stride-2 convs: 32 -> 4
    # hoisted constants: sine positional embedding + broadcast query embedding
    pos2d = sine_pos_embed(B, Hf, Wf, d_model).reshape(B * Hf * Wf, d_model)
    qpos2d = jnp.broadcast_to(params['query_embed'][None],
                              (B, num_queries, d_model)).reshape(B * num_queries, d_model)

    fwd = jax.jit(lambda imgs: detr_forward(params, imgs, pos2d, qpos2d,
                                            num_queries, num_classes,
                                            d_model, nheads))
    out = fwd(images)
    jax.block_until_ready(out)

    assert out['pred_logits'].shape == (2, num_queries, num_classes)
    assert out['pred_boxes'].shape == (2, num_queries, 4)
    assert bool(jnp.all(jnp.isfinite(out['pred_logits'])))
    assert bool(jnp.all(jnp.isfinite(out['pred_boxes'])))
    assert bool(jnp.all((out['pred_boxes'] >= 0.0) & (out['pred_boxes'] <= 1.0)))
    print("KERNEL_OK")
</pallas_src>

<mosaic_0001>
module attributes {stable_mosaic.version = 11 : i64} {
  func.func @kernel(%arg0: i32, %arg1: memref<512x27xf32, #tpu.memory_space<vmem>>, %arg2: memref<27x16xf32, #tpu.memory_space<vmem>>, %arg3: memref<1x16xf32, #tpu.memory_space<vmem>>, %arg4: memref<512x16xf32, #tpu.memory_space<vmem>>) attributes {dimension_semantics = [#tpu.dimension_semantics<arbitrary>], iteration_bounds = array<i64: 1>, scalar_prefetch = 0 : i64, scratch_operands = 0 : i64, tpu.core_type = #tpu.core_type<tc>, window_params = [{pipeline_mode = #tpu.pipeline_mode<synchronous>, transform_indices = @transform_0, window_bounds = array<i64: 512, 27>}, {pipeline_mode = #tpu.pipeline_mode<synchronous>, transform_indices = @transform_1, window_bounds = array<i64: 27, 16>}, {pipeline_mode = #tpu.pipeline_mode<synchronous>, transform_indices = @transform_2, window_bounds = array<i64: 1, 16>}, {pipeline_mode = #tpu.pipeline_mode<synchronous>, transform_indices = @transform_3, window_bounds = array<i64: 512, 16>}]} {
    %c0 = arith.constant 0 : index
    %c0_0 = arith.constant 0 : index
    %0 = vector.load %arg1[%c0, %c0_0] : memref<512x27xf32, #tpu.memory_space<vmem>>, vector<512x27xf32>
    %c0_1 = arith.constant 0 : index
    %c0_2 = arith.constant 0 : index
    %1 = vector.load %arg2[%c0_1, %c0_2] : memref<27x16xf32, #tpu.memory_space<vmem>>, vector<27x16xf32>
    %cst = arith.constant dense<0.000000e+00> : vector<512x16xf32>
    %2 = tpu.matmul %0, %1, %cst {dimension_numbers = #tpu.dot_dimension_numbers<[1], [0], [0], [1], [0, 0, 1, 1], [], []>} : vector<512x27xf32>, vector<27x16xf32>, vector<512x16xf32> -> vector<512x16xf32>
    %c0_3 = arith.constant 0 : index
    %c0_4 = arith.constant 0 : index
    %3 = vector.load %arg3[%c0_3, %c0_4] : memref<1x16xf32, #tpu.memory_space<vmem>>, vector<1x16xf32>
    %4 = vector.broadcast %3 : vector<1x16xf32> to vector<512x16xf32>
    %5 = arith.addf %2, %4 : vector<512x16xf32>
    %cst_5 = arith.constant 0.000000e+00 : f32
    %6 = vector.broadcast %cst_5 : f32 to vector<512x16xf32>
    %7 = arith.maximumf %5, %6 : vector<512x16xf32>
    %c0_6 = arith.constant 0 : index
    %c0_7 = arith.constant 0 : index
    %8 = vector.load %arg4[%c0_6, %c0_7] : memref<512x16xf32, #tpu.memory_space<vmem>>, vector<512x16xf32>
    tpu.vector_store %arg4[%c0_6, %c0_7], %7 {strides = array<i32>} : memref<512x16xf32, #tpu.memory_space<vmem>>, vector<512x16xf32>,
    return
  }
  func.func @transform_0(%arg0: i32) -> (i32, i32) {
    %c0_i32 = arith.constant 0 : i32
    %c0_i32_0 = arith.constant 0 : i32
    %c0_i32_1 = arith.constant 0 : i32
    return %c0_i32, %c0_i32_0 : i32, i32
  }
  func.func @transform_1(%arg0: i32) -> (i32, i32) {
    %c0_i32 = arith.constant 0 : i32
    %c0_i32_0 = arith.constant 0 : i32
    %c0_i32_1 = arith.constant 0 : i32
    return %c0_i32, %c0_i32_0 : i32, i32
  }
  func.func @transform_2(%arg0: i32) -> (i32, i32) {
    %c0_i32 = arith.constant 0 : i32
    %c0_i32_0 = arith.constant 0 : i32
    %c0_i32_1 = arith.constant 0 : i32
    return %c0_i32, %c0_i32_0 : i32, i32
  }
  func.func @transform_3(%arg0: i32) -> (i32, i32) {
    %c0_i32 = arith.constant 0 : i32
    %c0_i32_0 = arith.constant 0 : i32
    %c0_i32_1 = arith.constant 0 : i32
    return %c0_i32, %c0_i32_0 : i32, i32
  }
}

module attributes {stable_mosaic.version = 11 : i64} {
  func.func @kernel(%arg0: i32, %arg1: memref<128x144xf32, #tpu.memory_space<vmem>>, %arg2: memref<144x32xf32, #tpu.memory_space<vmem>>, %arg3: memref<1x32xf32, #tpu.memory_space<vmem>>, %arg4: memref<128x32xf32, #tpu.memory_space<vmem>>) attributes {dimension_semantics = [#tpu.dimension_semantics<arbitrary>], iteration_bounds = array<i64: 1>, scalar_prefetch = 0 : i64, scratch_operands = 0 : i64, tpu.core_type = #tpu.core_type<tc>, window_params = [{pipeline_mode = #tpu.pipeline_mode<synchronous>, transform_indices = @transform_0, window_bounds = array<i64: 128, 144>}, {pipeline_mode = #tpu.pipeline_mode<synchronous>, transform_indices = @transform_1, window_bounds = array<i64: 144, 32>}, {pipeline_mode = #tpu.pipeline_mode<synchronous>, transform_indices = @transform_2, window_bounds = array<i64: 1, 32>}, {pipeline_mode = #tpu.pipeline_mode<synchronous>, transform_indices = @transform_3, window_bounds = array<i64: 128, 32>}]} {
    %c0 = arith.constant 0 : index
    %c0_0 = arith.constant 0 : index
    %0 = vector.load %arg1[%c0, %c0_0] : memref<128x144xf32, #tpu.memory_space<vmem>>, vector<128x144xf32>
    %c0_1 = arith.constant 0 : index
    %c0_2 = arith.constant 0 : index
    %1 = vector.load %arg2[%c0_1, %c0_2] : memref<144x32xf32, #tpu.memory_space<vmem>>, vector<144x32xf32>
    %cst = arith.constant dense<0.000000e+00> : vector<128x32xf32>
    %2 = tpu.matmul %0, %1, %cst {dimension_numbers = #tpu.dot_dimension_numbers<[1], [0], [0], [1], [0, 0, 1, 1], [], []>} : vector<128x144xf32>, vector<144x32xf32>, vector<128x32xf32> -> vector<128x32xf32>
    %c0_3 = arith.constant 0 : index
    %c0_4 = arith.constant 0 : index
    %3 = vector.load %arg3[%c0_3, %c0_4] : memref<1x32xf32, #tpu.memory_space<vmem>>, vector<1x32xf32>
    %4 = vector.broadcast %3 : vector<1x32xf32> to vector<128x32xf32>
    %5 = arith.addf %2, %4 : vector<128x32xf32>
    %cst_5 = arith.constant 0.000000e+00 : f32
    %6 = vector.broadcast %cst_5 : f32 to vector<128x32xf32>
    %7 = arith.maximumf %5, %6 : vector<128x32xf32>
    %c0_6 = arith.constant 0 : index
    %c0_7 = arith.constant 0 : index
    %8 = vector.load %arg4[%c0_6, %c0_7] : memref<128x32xf32, #tpu.memory_space<vmem>>, vector<128x32xf32>
    tpu.vector_store %arg4[%c0_6, %c0_7], %7 {strides = array<i32>} : memref<128x32xf32, #tpu.memory_space<vmem>>, vector<128x32xf32>,
    return
  }
  func.func @transform_0(%arg0: i32) -> (i32, i32) {
    %c0_i32 = arith.constant 0 : i32
    %c0_i32_0 = arith.constant 0 : i32
    %c0_i32_1 = arith.constant 0 : i32
    return %c0_i32, %c0_i32_0 : i32, i32
  }
  func.func @transform_1(%arg0: i32) -> (i32, i32) {
    %c0_i32 = arith.constant 0 : i32
    %c0_i32_0 = arith.constant 0 : i32
    %c0_i32_1 = arith.constant 0 : i32
    return %c0_i32, %c0_i32_0 : i32, i32
  }
  func.func @transform_2(%arg0: i32) -> (i32, i32) {
    %c0_i32 = arith.constant 0 : i32
    %c0_i32_0 = arith.constant 0 : i32
    %c0_i32_1 = arith.constant 0 : i32
    return %c0_i32, %c0_i32_0 : i32, i32
  }
  func.func @transform_3(%arg0: i32) -> (i32, i32) {
    %c0_i32 = arith.constant 0 : i32
    %c0_i32_0 = arith.constant 0 : i32
    %c0_i32_1 = arith.constant 0 : i32
    return %c0_i32, %c0_i32_0 : i32, i32
  }
}

module attributes {stable_mosaic.version = 11 : i64} {
  func.func @kernel(%arg0: i32, %arg1: memref<32x288xf32, #tpu.memory_space<vmem>>, %arg2: memref<288x64xf32, #tpu.memory_space<vmem>>, %arg3: memref<1x64xf32, #tpu.memory_space<vmem>>, %arg4: memref<32x64xf32, #tpu.memory_space<vmem>>) attributes {dimension_semantics = [#tpu.dimension_semantics<arbitrary>], iteration_bounds = array<i64: 1>, scalar_prefetch = 0 : i64, scratch_operands = 0 : i64, tpu.core_type = #tpu.core_type<tc>, window_params = [{pipeline_mode = #tpu.pipeline_mode<synchronous>, transform_indices = @transform_0, window_bounds = array<i64: 32, 288>}, {pipeline_mode = #tpu.pipeline_mode<synchronous>, transform_indices = @transform_1, window_bounds = array<i64: 288, 64>}, {pipeline_mode = #tpu.pipeline_mode<synchronous>, transform_indices = @transform_2, window_bounds = array<i64: 1, 64>}, {pipeline_mode = #tpu.pipeline_mode<synchronous>, transform_indices = @transform_3, window_bounds = array<i64: 32, 64>}]} {
    %c0 = arith.constant 0 : index
    %c0_0 = arith.constant 0 : index
    %0 = vector.load %arg1[%c0, %c0_0] : memref<32x288xf32, #tpu.memory_space<vmem>>, vector<32x288xf32>
    %c0_1 = arith.constant 0 : index
    %c0_2 = arith.constant 0 : index
    %1 = vector.load %arg2[%c0_1, %c0_2] : memref<288x64xf32, #tpu.memory_space<vmem>>, vector<288x64xf32>
    %cst = arith.constant dense<0.000000e+00> : vector<32x64xf32>
    %2 = tpu.matmul %0, %1, %cst {dimension_numbers = #tpu.dot_dimension_numbers<[1], [0], [0], [1], [0, 0, 1, 1], [], []>} : vector<32x288xf32>, vector<288x64xf32>, vector<32x64xf32> -> vector<32x64xf32>
    %c0_3 = arith.constant 0 : index
    %c0_4 = arith.constant 0 : index
    %3 = vector.load %arg3[%c0_3, %c0_4] : memref<1x64xf32, #tpu.memory_space<vmem>>, vector<1x64xf32>
    %4 = vector.broadcast %3 : vector<1x64xf32> to vector<32x64xf32>
    %5 = arith.addf %2, %4 : vector<32x64xf32>
    %cst_5 = arith.constant 0.000000e+00 : f32
    %6 = vector.broadcast %cst_5 : f32 to vector<32x64xf32>
    %7 = arith.maximumf %5, %6 : vector<32x64xf32>
    %c0_6 = arith.constant 0 : index
    %c0_7 = arith.constant 0 : index
    %8 = vector.load %arg4[%c0_6, %c0_7] : memref<32x64xf32, #tpu.memory_space<vmem>>, vector<32x64xf32>
    tpu.vector_store %arg4[%c0_6, %c0_7], %7 {strides = array<i32>} : memref<32x64xf32, #tpu.memory_space<vmem>>, vector<32x64xf32>,
    return
  }
  func.func @transform_0(%arg0: i32) -> (i32, i32) {
    %c0_i32 = arith.constant 0 : i32
    %c0_i32_0 = arith.constant 0 : i32
    %c0_i32_1 = arith.constant 0 : i32
    return %c0_i32, %c0_i32_0 : i32, i32
  }
  func.func @transform_1(%arg0: i32) -> (i32, i32) {
    %c0_i32 = arith.constant 0 : i32
    %c0_i32_0 = arith.constant 0 : i32
    %c0_i32_1 = arith.constant 0 : i32
    return %c0_i32, %c0_i32_0 : i32, i32
  }
  func.func @transform_2(%arg0: i32) -> (i32, i32) {
    %c0_i32 = arith.constant 0 : i32
    %c0_i32_0 = arith.constant 0 : i32
    %c0_i32_1 = arith.constant 0 : i32
    return %c0_i32, %c0_i32_0 : i32, i32
  }
  func.func @transform_3(%arg0: i32) -> (i32, i32) {
    %c0_i32 = arith.constant 0 : i32
    %c0_i32_0 = arith.constant 0 : i32
    %c0_i32_1 = arith.constant 0 : i32
    return %c0_i32, %c0_i32_0 : i32, i32
  }
}

module attributes {stable_mosaic.version = 11 : i64} {
  func.func @kernel(%arg0: i32, %arg1: memref<16x32xf32, #tpu.memory_space<vmem>>, %arg2: memref<32x32xf32, #tpu.memory_space<vmem>>, %arg3: memref<32x32xf32, #tpu.memory_space<vmem>>, %arg4: memref<32x64xf32, #tpu.memory_space<vmem>>, %arg5: memref<1x64xf32, #tpu.memory_space<vmem>>, %arg6: memref<32x32xf32, #tpu.memory_space<vmem>>, %arg7: memref<1x32xf32, #tpu.memory_space<vmem>>, %arg8: memref<32x32xf32, #tpu.memory_space<vmem>>, %arg9: memref<1x32xf32, #tpu.memory_space<vmem>>, %arg10: memref<1x32xf32, #tpu.memory_space<vmem>>, %arg11: memref<1x32xf32, #tpu.memory_space<vmem>>, %arg12: memref<32x32xf32, #tpu.memory_space<vmem>>, %arg13: memref<1x32xf32, #tpu.memory_space<vmem>>, %arg14: memref<32x32xf32, #tpu.memory_space<vmem>>, %arg15: memref<1x32xf32, #tpu.memory_space<vmem>>, %arg16: memref<32x32xf32, #tpu.memory_space<vmem>>, %arg17: memref<1x32xf32, #tpu.memory_space<vmem>>, %arg18: memref<32x32xf32, #tpu.memory_space<vmem>>, %arg19: memref<1x32xf32, #tpu.memory_space<vmem>>, %arg20: memref<1x32xf32, #tpu.memory_space<vmem>>, %arg21: memref<1x32xf32, #tpu.memory_space<vmem>>, %arg22: memref<32x64xf32, #tpu.memory_space<vmem>>, %arg23: memref<1x64xf32, #tpu.memory_space<vmem>>, %arg24: memref<64x32xf32, #tpu.memory_space<vmem>>, %arg25: memref<1x32xf32, #tpu.memory_space<vmem>>, %arg26: memref<1x32xf32, #tpu.memory_space<vmem>>, %arg27: memref<1x32xf32, #tpu.memory_space<vmem>>, %arg28: memref<1x32xf32, #tpu.memory_space<vmem>>, %arg29: memref<1x32xf32, #tpu.memory_space<vmem>>, %arg30: memref<32x8xf32, #tpu.memory_space<vmem>>, %arg31: memref<1x8xf32, #tpu.memory_space<vmem>>, %arg32: memref<32x32xf32, #tpu.memory_space<vmem>>, %arg33: memref<1x32xf32, #tpu.memory_space<vmem>>, %arg34: memref<32x32xf32, #tpu.memory_space<vmem>>, %arg35: memref<1x32xf32, #tpu.memory_space<vmem>>, %arg36: memref<32x4xf32, #tpu.memory_space<vmem>>, %arg37: memref<1x4xf32, #tpu.memory_space<vmem>>, %arg38: memref<16x8xf32, #tpu.memory_space<vmem>>, %arg39: memref<16x4xf32, #tpu.memory_space<vmem>>) attributes {dimension_semantics = [#tpu.dimension_semantics<arbitrary>], iteration_bounds = array<i64: 1>, scalar_prefetch = 0 : i64, scratch_operands = 0 : i64, tpu.core_type = #tpu.core_type<tc>, window_params = [{pipeline_mode = #tpu.pipeline_mode<synchronous>, transform_indices = @transform_0, window_bounds = array<i64: 16, 32>}, {pipeline_mode = #tpu.pipeline_mode<synchronous>, transform_indices = @transform_1, window_bounds = array<i64: 32, 32>}, {pipeline_mode = #tpu.pipeline_mode<synchronous>, transform_indices = @transform_2, window_bounds = array<i64: 32, 32>}, {pipeline_mode = #tpu.pipeline_mode<synchronous>, transform_indices = @transform_3, window_bounds = array<i64: 32, 64>}, {pipeline_mode = #tpu.pipeline_mode<synchronous>, transform_indices = @transform_4, window_bounds = array<i64: 1, 64>}, {pipeline_mode = #tpu.pipeline_mode<synchronous>, transform_indices = @transform_5, window_bounds = array<i64: 32, 32>}, {pipeline_mode = #tpu.pipeline_mode<synchronous>, transform_indices = @transform_6, window_bounds = array<i64: 1, 32>}, {pipeline_mode = #tpu.pipeline_mode<synchronous>, transform_indices = @transform_7, window_bounds = array<i64: 32, 32>}, {pipeline_mode = #tpu.pipeline_mode<synchronous>, transform_indices = @transform_8, window_bounds = array<i64: 1, 32>}, {pipeline_mode = #tpu.pipeline_mode<synchronous>, transform_indices = @transform_9, window_bounds = array<i64: 1, 32>}, {pipeline_mode = #tpu.pipeline_mode<synchronous>, transform_indices = @transform_10, window_bounds = array<i64: 1, 32>}, {pipeline_mode = #tpu.pipeline_mode<synchronous>, transform_indices = @transform_11, window_bounds = array<i64: 32, 32>}, {pipeline_mode = #tpu.pipeline_mode<synchronous>, transform_indices = @transform_12, window_bounds = array<i64: 1, 32>}, {pipeline_mode = #tpu.pipeline_mode<synchronous>, transform_indices = @transform_13, window_bounds = array<i64: 32, 32>}, {pipeline_mode = #tpu.pipeline_mode<synchronous>, transform_indices = @transform_14, window_bounds = array<i64: 1, 32>}, {pipeline_mode = #tpu.pipeline_mode<synchronous>, transform_indices = @transform_15, window_bounds = array<i64: 32, 32>}, {pipeline_mode = #tpu.pipeline_mode<synchronous>, transform_indices = @transform_16, window_bounds = array<i64: 1, 32>}, {pipeline_mode = #tpu.pipeline_mode<synchronous>, transform_indices = @transform_17, window_bounds = array<i64: 32, 32>}, {pipeline_mode = #tpu.pipeline_mode<synchronous>, transform_indices = @transform_18, window_bounds = array<i64: 1, 32>}, {pipeline_mode = #tpu.pipeline_mode<synchronous>, transform_indices = @transform_19, window_bounds = array<i64: 1, 32>}, {pipeline_mode = #tpu.pipeline_mode<synchronous>, transform_indices = @transform_20, window_bounds = array<i64: 1, 32>}, {pipeline_mode = #tpu.pipeline_mode<synchronous>, transform_indices = @transform_21, window_bounds = array<i64: 32, 64>}, {pipeline_mode = #tpu.pipeline_mode<synchronous>, transform_indices = @transform_22, window_bounds = array<i64: 1, 64>}, {pipeline_mode = #tpu.pipeline_mode<synchronous>, transform_indices = @transform_23, window_bounds = array<i64: 64, 32>}, {pipeline_mode = #tpu.pipeline_mode<synchronous>, transform_indices = @transform_24, window_bounds = array<i64: 1, 32>}, {pipeline_mode = #tpu.pipeline_mode<synchronous>, transform_indices = @transform_25, window_bounds = array<i64: 1, 32>}, {pipeline_mode = #tpu.pipeline_mode<synchronous>, transform_indices = @transform_26, window_bounds = array<i64: 1, 32>}, {pipeline_mode = #tpu.pipeline_mode<synchronous>, transform_indices = @transform_27, window_bounds = array<i64: 1, 32>}, {pipeline_mode = #tpu.pipeline_mode<synchronous>, transform_indices = @transform_28, window_bounds = array<i64: 1, 32>}, {pipeline_mode = #tpu.pipeline_mode<synchronous>, transform_indices = @transform_29, window_bounds = array<i64: 32, 8>}, {pipeline_mode = #tpu.pipeline_mode<synchronous>, transform_indices = @transform_30, window_bounds = array<i64: 1, 8>}, {pipeline_mode = #tpu.pipeline_mode<synchronous>, transform_indices = @transform_31, window_bounds = array<i64: 32, 32>}, {pipeline_mode = #tpu.pipeline_mode<synchronous>, transform_indices = @transform_32, window_bounds = array<i64: 1, 32>}, {pipeline_mode = #tpu.pipeline_mode<synchronous>, transform_indices = @transform_33, window_bounds = array<i64: 32, 32>}, {pipeline_mode = #tpu.pipeline_mode<synchronous>, transform_indices = @transform_34, window_bounds = array<i64: 1, 32>}, {pipeline_mode = #tpu.pipeline_mode<synchronous>, transform_indices = @transform_35, window_bounds = array<i64: 32, 4>}, {pipeline_mode = #tpu.pipeline_mode<synchronous>, transform_indices = @transform_36, window_bounds = array<i64: 1, 4>}, {pipeline_mode = #tpu.pipeline_mode<synchronous>, transform_indices = @transform_37, window_bounds = array<i64: 16, 8>}, {pipeline_mode = #tpu.pipeline_mode<synchronous>, transform_indices = @transform_38, window_bounds = array<i64: 16, 4>}]} {
    %c0 = arith.constant 0 : index
    %c0_0 = arith.constant 0 : index
    %0 = vector.load %arg1[%c0, %c0_0] : memref<16x32xf32, #tpu.memory_space<vmem>>, vector<16x32xf32>
    %c0_1 = arith.constant 0 : index
    %c0_2 = arith.constant 0 : index
    %1 = vector.load %arg2[%c0_1, %c0_2] : memref<32x32xf32, #tpu.memory_space<vmem>>, vector<32x32xf32>
    %c0_3 = arith.constant 0 : index
    %c0_4 = arith.constant 0 : index
    %2 = vector.load %arg3[%c0_3, %c0_4] : memref<32x32xf32, #tpu.memory_space<vmem>>, vector<32x32xf32>
    %cst = arith.constant 0.000000e+00 : f32
    %3 = vector.broadcast %cst : f32 to vector<16x32xf32>
    %4 = arith.addf %3, %0 : vector<16x32xf32>
    %c0_5 = arith.constant 0 : index
    %c0_6 = arith.constant 0 : index
    %5 = vector.load %arg4[%c0_5, %c0_6] : memref<32x64xf32, #tpu.memory_space<vmem>>, vector<32x64xf32>
    %cst_7 = arith.constant dense<0.000000e+00> : vector<16x64xf32>
    %6 = tpu.matmul %4, %5, %cst_7 {dimension_numbers = #tpu.dot_dimension_numbers<[1], [0], [0], [1], [0, 0, 1, 1], [], []>} : vector<16x32xf32>, vector<32x64xf32>, vector<16x64xf32> -> vector<16x64xf32>
    %c0_8 = arith.constant 0 : index
    %c0_9 = arith.constant 0 : index
    %7 = vector.load %arg5[%c0_8, %c0_9] : memref<1x64xf32, #tpu.memory_space<vmem>>, vector<1x64xf32>
    %8 = vector.broadcast %7 : vector<1x64xf32> to vector<16x64xf32>
    %9 = arith.addf %6, %8 : vector<16x64xf32>
    %10 = vector.extract_strided_slice %9 {offsets = [0, 0], sizes = [16, 32], strides = [1, 1]} : vector<16x64xf32> to vector<16x32xf32>
    %11 = vector.shape_cast %10 : vector<16x32xf32> to vector<2x8x32xf32>
    %12 = vector.extract_strided_slice %9 {offsets = [0, 32], sizes = [16, 32], strides = [1, 1]} : vector<16x64xf32> to vector<16x32xf32>
    %13 = vector.shape_cast %12 : vector<16x32xf32> to vector<2x8x32xf32>
    %c0_10 = arith.constant 0 : index
    %c0_11 = arith.constant 0 : index
    %14 = vector.load %arg6[%c0_10, %c0_11] : memref<32x32xf32, #tpu.memory_space<vmem>>, vector<32x32xf32>
    %cst_12 = arith.constant dense<0.000000e+00> : vector<16x32xf32>
    %15 = tpu.matmul %3, %14, %cst_12 {dimension_numbers = #tpu.dot_dimension_numbers<[1], [0], [0], [1], [0, 0, 1, 1], [], []>} : vector<16x32xf32>, vector<32x32xf32>, vector<16x32xf32> -> vector<16x32xf32>
    %c0_13 = arith.constant 0 : index
    %c0_14 = arith.constant 0 : index
    %16 = vector.load %arg7[%c0_13, %c0_14] : memref<1x32xf32, #tpu.memory_space<vmem>>, vector<1x32xf32>
    %17 = vector.broadcast %16 : vector<1x32xf32> to vector<16x32xf32>
    %18 = arith.addf %15, %17 : vector<16x32xf32>
    %19 = vector.shape_cast %18 : vector<16x32xf32> to vector<2x8x32xf32>
    %20 = vector.extract_strided_slice %11 {offsets = [0, 0, 0], sizes = [2, 8, 8], strides = [1, 1, 1]} : vector<2x8x32xf32> to vector<2x8x8xf32>
    %21 = vector.extract_strided_slice %13 {offsets = [0, 0, 0], sizes = [2, 8, 8], strides = [1, 1, 1]} : vector<2x8x32xf32> to vector<2x8x8xf32>
    "tpu.trace_start"() <{level = 10 : i32, message = "bqd,bkd->bqk"}> : () -> ()
    %cst_15 = arith.constant dense<0.000000e+00> : vector<2x8x8xf32>
    %22 = tpu.matmul %20, %21, %cst_15 {dimension_numbers = #tpu.dot_dimension_numbers<[2], [2], [1], [1], [0, 0, 0, 1, 1, 1], [0], [0]>} : vector<2x8x8xf32>, vector<2x8x8xf32>, vector<2x8x8xf32> -> vector<2x8x8xf32>
    "tpu.trace_stop"() : () -> ()
    %cst_16 = arith.constant 0.353553385 : f32
    %23 = vector.broadcast %cst_16 : f32 to vector<2x8x8xf32>
    %24 = arith.mulf %22, %23 : vector<2x8x8xf32>
    %cst_17 = arith.constant dense<0xFF800000> : vector<2x8xf32>
    %25 = vector.multi_reduction <maximumf>, %24, %cst_17 [2] : vector<2x8x8xf32> to vector<2x8xf32>
    %26 = vector.shape_cast %25 : vector<2x8xf32> to vector<2x8x1xf32>
    %27 = vector.broadcast %26 : vector<2x8x1xf32> to vector<2x8x8xf32>
    %28 = arith.subf %24, %27 : vector<2x8x8xf32>
    %29 = math.exp %28 : vector<2x8x8xf32>
    %cst_18 = arith.constant dense<0.000000e+00> : vector<2x8xf32>
    %30 = vector.multi_reduction <add>, %29, %cst_18 [2] : vector<2x8x8xf32> to vector<2x8xf32>
    %31 = vector.shape_cast %30 : vector<2x8xf32> to vector<2x8x1xf32>
    %32 = tpu.reciprocal %31 {approx = true} : vector<2x8x1xf32> -> vector<2x8x1xf32>
    %33 = vector.broadcast %32 : vector<2x8x1xf32> to vector<2x8x8xf32>
    %34 = arith.mulf %29, %33 : vector<2x8x8xf32>
    %35 = vector.extract_strided_slice %19 {offsets = [0, 0, 0], sizes = [2, 8, 8], strides = [1, 1, 1]} : vector<2x8x32xf32> to vector<2x8x8xf32>
    "tpu.trace_start"() <{level = 10 : i32, message = "bqk,bkd->bqd"}> : () -> ()
    %cst_19 = arith.constant dense<0.000000e+00> : vector<2x8x8xf32>
    %36 = tpu.matmul %34, %35, %cst_19 {dimension_numbers = #tpu.dot_dimension_numbers<[2], [1], [1], [2], [0, 0, 0, 1, 1, 2], [0], [0]>} : vector<2x8x8xf32>, vector<2x8x8xf32>, vector<2x8x8xf32> -> vector<2x8x8xf32>
    "tpu.trace_stop"() : () -> ()
    %37 = vector.extract_strided_slice %11 {offsets = [0, 0, 8], sizes = [2, 8, 8], strides = [1, 1, 1]} : vector<2x8x32xf32> to vector<2x8x8xf32>
    %38 = vector.extract_strided_slice %13 {offsets = [0, 0, 8], sizes = [2, 8, 8], strides = [1, 1, 1]} : vector<2x8x32xf32> to vector<2x8x8xf32>
    "tpu.trace_start"() <{level = 10 : i32, message = "bqd,bkd->bqk"}> : () -> ()
    %cst_20 = arith.constant dense<0.000000e+00> : vector<2x8x8xf32>
    %39 = tpu.matmul %37, %38, %cst_20 {dimension_numbers = #tpu.dot_dimension_numbers<[2], [2], [1], [1], [0, 0, 0, 1, 1, 1], [0], [0]>} : vector<2x8x8xf32>, vector<2x8x8xf32>, vector<2x8x8xf32> -> vector<2x8x8xf32>
    "tpu.trace_stop"() : () -> ()
    %cst_21 = arith.constant 0.353553385 : f32
    %40 = vector.broadcast %cst_21 : f32 to vector<2x8x8xf32>
    %41 = arith.mulf %39, %40 : vector<2x8x8xf32>
    %cst_22 = arith.constant dense<0xFF800000> : vector<2x8xf32>
    %42 = vector.multi_reduction <maximumf>, %41, %cst_22 [2] : vector<2x8x8xf32> to vector<2x8xf32>
    %43 = vector.shape_cast %42 : vector<2x8xf32> to vector<2x8x1xf32>
    %44 = vector.broadcast %43 : vector<2x8x1xf32> to vector<2x8x8xf32>
    %45 = arith.subf %41, %44 : vector<2x8x8xf32>
    %46 = math.exp %45 : vector<2x8x8xf32>
    %cst_23 = arith.constant dense<0.000000e+00> : vector<2x8xf32>
    %47 = vector.multi_reduction <add>, %46, %cst_23 [2] : vector<2x8x8xf32> to vector<2x8xf32>
    %48 = vector.shape_cast %47 : vector<2x8xf32> to vector<2x8x1xf32>
    %49 = tpu.reciprocal %48 {approx = true} : vector<2x8x1xf32> -> vector<2x8x1xf32>
    %50 = vector.broadcast %49 : vector<2x8x1xf32> to vector<2x8x8xf32>
    %51 = arith.mulf %46, %50 : vector<2x8x8xf32>
    %52 = vector.extract_strided_slice %19 {offsets = [0, 0, 8], sizes = [2, 8, 8], strides = [1, 1, 1]} : vector<2x8x32xf32> to vector<2x8x8xf32>
    "tpu.trace_start"() <{level = 10 : i32, message = "bqk,bkd->bqd"}> : () -> ()
    %cst_24 = arith.constant dense<0.000000e+00> : vector<2x8x8xf32>
    %53 = tpu.matmul %51, %52, %cst_24 {dimension_numbers = #tpu.dot_dimension_numbers<[2], [1], [1], [2], [0, 0, 0, 1, 1, 2], [0], [0]>} : vector<2x8x8xf32>, vector<2x8x8xf32>, vector<2x8x8xf32> -> vector<2x8x8xf32>
    "tpu.trace_stop"() : () -> ()
    %54 = vector.extract_strided_slice %11 {offsets = [0, 0, 16], sizes = [2, 8, 8], strides = [1, 1, 1]} : vector<2x8x32xf32> to vector<2x8x8xf32>
    %55 = vector.extract_strided_slice %13 {offsets = [0, 0, 16], sizes = [2, 8, 8], strides = [1, 1, 1]} : vector<2x8x32xf32> to vector<2x8x8xf32>
    "tpu.trace_start"() <{level = 10 : i32, message = "bqd,bkd->bqk"}> : () -> ()
    %cst_25 = arith.constant dense<0.000000e+00> : vector<2x8x8xf32>
    %56 = tpu.matmul %54, %55, %cst_25 {dimension_numbers = #tpu.dot_dimension_numbers<[2], [2], [1], [1], [0, 0, 0, 1, 1, 1], [0], [0]>} : vector<2x8x8xf32>, vector<2x8x8xf32>, vector<2x8x8xf32> -> vector<2x8x8xf32>
    "tpu.trace_stop"() : () -> ()
    %cst_26 = arith.constant 0.353553385 : f32
    %57 = vector.broadcast %cst_26 : f32 to vector<2x8x8xf32>
    %58 = arith.mulf %56, %57 : vector<2x8x8xf32>
    %cst_27 = arith.constant dense<0xFF800000> : vector<2x8xf32>
    %59 = vector.multi_reduction <maximumf>, %58, %cst_27 [2] : vector<2x8x8xf32> to vector<2x8xf32>
    %60 = vector.shape_cast %59 : vector<2x8xf32> to vector<2x8x1xf32>
    %61 = vector.broadcast %60 : vector<2x8x1xf32> to vector<2x8x8xf32>
    %62 = arith.subf %58, %61 : vector<2x8x8xf32>
    %63 = math.exp %62 : vector<2x8x8xf32>
    %cst_28 = arith.constant dense<0.000000e+00> : vector<2x8xf32>
    %64 = vector.multi_reduction <add>, %63, %cst_28 [2] : vector<2x8x8xf32> to vector<2x8xf32>
    %65 = vector.shape_cast %64 : vector<2x8xf32> to vector<2x8x1xf32>
    %66 = tpu.reciprocal %65 {approx = true} : vector<2x8x1xf32> -> vector<2x8x1xf32>
    %67 = vector.broadcast %66 : vector<2x8x1xf32> to vector<2x8x8xf32>
    %68 = arith.mulf %63, %67 : vector<2x8x8xf32>
    %69 = vector.extract_strided_slice %19 {offsets = [0, 0, 16], sizes = [2, 8, 8], strides = [1, 1, 1]} : vector<2x8x32xf32> to vector<2x8x8xf32>
    "tpu.trace_start"() <{level = 10 : i32, message = "bqk,bkd->bqd"}> : () -> ()
    %cst_29 = arith.constant dense<0.000000e+00> : vector<2x8x8xf32>
    %70 = tpu.matmul %68, %69, %cst_29 {dimension_numbers = #tpu.dot_dimension_numbers<[2], [1], [1], [2], [0, 0, 0, 1, 1, 2], [0], [0]>} : vector<2x8x8xf32>, vector<2x8x8xf32>, vector<2x8x8xf32> -> vector<2x8x8xf32>
    "tpu.trace_stop"() : () -> ()
    %71 = vector.extract_strided_slice %11 {offsets = [0, 0, 24], sizes = [2, 8, 8], strides = [1, 1, 1]} : vector<2x8x32xf32> to vector<2x8x8xf32>
    %72 = vector.extract_strided_slice %13 {offsets = [0, 0, 24], sizes = [2, 8, 8], strides = [1, 1, 1]} : vector<2x8x32xf32> to vector<2x8x8xf32>
    "tpu.trace_start"() <{level = 10 : i32, message = "bqd,bkd->bqk"}> : () -> ()
    %cst_30 = arith.constant dense<0.000000e+00> : vector<2x8x8xf32>
    %73 = tpu.matmul %71, %72, %cst_30 {dimension_numbers = #tpu.dot_dimension_numbers<[2], [2], [1], [1], [0, 0, 0, 1, 1, 1], [0], [0]>} : vector<2x8x8xf32>, vector<2x8x8xf32>, vector<2x8x8xf32> -> vector<2x8x8xf32>
    "tpu.trace_stop"() : () -> ()
    %cst_31 = arith.constant 0.353553385 : f32
    %74 = vector.broadcast %cst_31 : f32 to vector<2x8x8xf32>
    %75 = arith.mulf %73, %74 : vector<2x8x8xf32>
    %cst_32 = arith.constant dense<0xFF800000> : vector<2x8xf32>
    %76 = vector.multi_reduction <maximumf>, %75, %cst_32 [2] : vector<2x8x8xf32> to vector<2x8xf32>
    %77 = vector.shape_cast %76 : vector<2x8xf32> to vector<2x8x1xf32>
    %78 = vector.broadcast %77 : vector<2x8x1xf32> to vector<2x8x8xf32>
    %79 = arith.subf %75, %78 : vector<2x8x8xf32>
    %80 = math.exp %79 : vector<2x8x8xf32>
    %cst_33 = arith.constant dense<0.000000e+00> : vector<2x8xf32>
    %81 = vector.multi_reduction <add>, %80, %cst_33 [2] : vector<2x8x8xf32> to vector<2x8xf32>
    %82 = vector.shape_cast %81 : vector<2x8xf32> to vector<2x8x1xf32>
    %83 = tpu.reciprocal %82 {approx = true} : vector<2x8x1xf32> -> vector<2x8x1xf32>
    %84 = vector.broadcast %83 : vector<2x8x1xf32> to vector<2x8x8xf32>
    %85 = arith.mulf %80, %84 : vector<2x8x8xf32>
    %86 = vector.extract_strided_slice %19 {offsets = [0, 0, 24], sizes = [2, 8, 8], strides = [1, 1, 1]} : vector<2x8x32xf32> to vector<2x8x8xf32>
    "tpu.trace_start"() <{level = 10 : i32, message = "bqk,bkd->bqd"}> : () -> ()
    %cst_34 = arith.constant dense<0.000000e+00> : vector<2x8x8xf32>
    %87 = tpu.matmul %85, %86, %cst_34 {dimension_numbers = #tpu.dot_dimension_numbers<[2], [1], [1], [2], [0, 0, 0, 1, 1, 2], [0], [0]>} : vector<2x8x8xf32>, vector<2x8x8xf32>, vector<2x8x8xf32> -> vector<2x8x8xf32>
    "tpu.trace_stop"() : () -> ()
    %88 = tpu.concatenate %36, %53, %70, %87 in 2 : vector<2x8x8xf32>, vector<2x8x8xf32>, vector<2x8x8xf32>, vector<2x8x8xf32> -> vector<2x8x32xf32>
    %89 = vector.shape_cast %88 : vector<2x8x32xf32> to vector<16x32xf32>
    %c0_35 = arith.constant 0 : index
    %c0_36 = arith.constant 0 : index
    %90 = vector.load %arg8[%c0_35, %c0_36] : memref<32x32xf32, #tpu.memory_space<vmem>>, vector<32x32xf32>
    %cst_37 = arith.constant dense<0.000000e+00> : vector<16x32xf32>
    %91 = tpu.matmul %89, %90, %cst_37 {dimension_numbers = #tpu.dot_dimension_numbers<[1], [0], [0], [1], [0, 0, 1, 1], [], []>} : vector<16x32xf32>, vector<32x32xf32>, vector<16x32xf32> -> vector<16x32xf32>
    %c0_38 = arith.constant 0 : index
    %c0_39 = arith.constant 0 : index
    %92 = vector.load %arg9[%c0_38, %c0_39] : memref<1x32xf32, #tpu.memory_space<vmem>>, vector<1x32xf32>
    %93 = vector.broadcast %92 : vector<1x32xf32> to vector<16x32xf32>
    %94 = arith.addf %91, %93 : vector<16x32xf32>
    %95 = arith.addf %3, %94 : vector<16x32xf32>
    %c0_40 = arith.constant 0 : index
    %c0_41 = arith.constant 0 : index
    %96 = vector.load %arg10[%c0_40, %c0_41] : memref<1x32xf32, #tpu.memory_space<vmem>>, vector<1x32xf32>
    %c0_42 = arith.constant 0 : index
    %c0_43 = arith.constant 0 : index
    %97 = vector.load %arg11[%c0_42, %c0_43] : memref<1x32xf32, #tpu.memory_space<vmem>>, vector<1x32xf32>
    %cst_44 = arith.constant dense<0.000000e+00> : vector<16xf32>
    %98 = vector.multi_reduction <add>, %95, %cst_44 [1] : vector<16x32xf32> to vector<16xf32>
    %99 = vector.shape_cast %98 : vector<16xf32> to vector<16x1xf32>
    %cst_45 = arith.constant 3.200000e+01 : f32
    %100 = vector.broadcast %cst_45 : f32 to vector<16x1xf32>
    %101 = arith.divf %99, %100 : vector<16x1xf32>
    %102 = vector.broadcast %101 : vector<16x1xf32> to vector<16x32xf32>
    %103 = arith.subf %95, %102 : vector<16x32xf32>
    %104 = arith.mulf %103, %103 : vector<16x32xf32>
    %cst_46 = arith.constant dense<0.000000e+00> : vector<16xf32>
    %105 = vector.multi_reduction <add>, %104, %cst_46 [1] : vector<16x32xf32> to vector<16xf32>
    %106 = vector.shape_cast %105 : vector<16xf32> to vector<16x1xf32>
    %cst_47 = arith.constant 3.200000e+01 : f32
    %107 = vector.broadcast %cst_47 : f32 to vector<16x1xf32>
    %108 = arith.divf %106, %107 : vector<16x1xf32>
    %cst_48 = arith.constant 9.99999974E-6 : f32
    %109 = vector.broadcast %cst_48 : f32 to vector<16x1xf32>
    %110 = arith.addf %108, %109 : vector<16x1xf32>
    %111 = math.rsqrt %110 : vector<16x1xf32>
    %112 = vector.broadcast %101 : vector<16x1xf32> to vector<16x32xf32>
    %113 = arith.subf %95, %112 : vector<16x32xf32>
    %114 = vector.broadcast %111 : vector<16x1xf32> to vector<16x32xf32>
    %115 = arith.mulf %113, %114 : vector<16x32xf32>
    %116 = vector.broadcast %96 : vector<1x32xf32> to vector<16x32xf32>
    %117 = arith.mulf %115, %116 : vector<16x32xf32>
    %118 = vector.broadcast %97 : vector<1x32xf32> to vector<16x32xf32>
    %119 = arith.addf %117, %118 : vector<16x32xf32>
    %120 = arith.addf %119, %0 : vector<16x32xf32>
    %c0_49 = arith.constant 0 : index
    %c0_50 = arith.constant 0 : index
    %121 = vector.load %arg12[%c0_49, %c0_50] : memref<32x32xf32, #tpu.memory_space<vmem>>, vector<32x32xf32>
    %cst_51 = arith.constant dense<0.000000e+00> : vector<16x32xf32>
    %122 = tpu.matmul %120, %121, %cst_51 {dimension_numbers = #tpu.dot_dimension_numbers<[1], [0], [0], [1], [0, 0, 1, 1], [], []>} : vector<16x32xf32>, vector<32x32xf32>, vector<16x32xf32> -> vector<16x32xf32>
    %c0_52 = arith.constant 0 : index
    %c0_53 = arith.constant 0 : index
    %123 = vector.load %arg13[%c0_52, %c0_53] : memref<1x32xf32, #tpu.memory_space<vmem>>, vector<1x32xf32>
    %124 = vector.broadcast %123 : vector<1x32xf32> to vector<16x32xf32>
    %125 = arith.addf %122, %124 : vector<16x32xf32>
    %126 = vector.shape_cast %125 : vector<16x32xf32> to vector<2x8x32xf32>
    %127 = arith.addf %1, %2 : vector<32x32xf32>
    %c0_54 = arith.constant 0 : index
    %c0_55 = arith.constant 0 : index
    %128 = vector.load %arg14[%c0_54, %c0_55] : memref<32x32xf32, #tpu.memory_space<vmem>>, vector<32x32xf32>
    %cst_56 = arith.constant dense<0.000000e+00> : vector<32x32xf32>
    %129 = tpu.matmul %127, %128, %cst_56 {dimension_numbers = #tpu.dot_dimension_numbers<[1], [0], [0], [1], [0, 0, 1, 1], [], []>} : vector<32x32xf32>, vector<32x32xf32>, vector<32x32xf32> -> vector<32x32xf32>
    %c0_57 = arith.constant 0 : index
    %c0_58 = arith.constant 0 : index
    %130 = vector.load %arg15[%c0_57, %c0_58] : memref<1x32xf32, #tpu.memory_space<vmem>>, vector<1x32xf32>
    %131 = vector.broadcast %130 : vector<1x32xf32> to vector<32x32xf32>
    %132 = arith.addf %129, %131 : vector<32x32xf32>
    %133 = vector.shape_cast %132 : vector<32x32xf32> to vector<2x16x32xf32>
    %c0_59 = arith.constant 0 : index
    %c0_60 = arith.constant 0 : index
    %134 = vector.load %arg16[%c0_59, %c0_60] : memref<32x32xf32, #tpu.memory_space<vmem>>, vector<32x32xf32>
    %cst_61 = arith.constant dense<0.000000e+00> : vector<32x32xf32>
    %135 = tpu.matmul %1, %134, %cst_61 {dimension_numbers = #tpu.dot_dimension_numbers<[1], [0], [0], [1], [0, 0, 1, 1], [], []>} : vector<32x32xf32>, vector<32x32xf32>, vector<32x32xf32> -> vector<32x32xf32>
    %c0_62 = arith.constant 0 : index
    %c0_63 = arith.constant 0 : index
    %136 = vector.load %arg17[%c0_62, %c0_63] : memref<1x32xf32, #tpu.memory_space<vmem>>, vector<1x32xf32>
    %137 = vector.broadcast %136 : vector<1x32xf32> to vector<32x32xf32>
    %138 = arith.addf %135, %137 : vector<32x32xf32>
    %139 = vector.shape_cast %138 : vector<32x32xf32> to vector<2x16x32xf32>
    %140 = vector.extract_strided_slice %126 {offsets = [0, 0, 0], sizes = [2, 8, 8], strides = [1, 1, 1]} : vector<2x8x32xf32> to vector<2x8x8xf32>
    %141 = vector.extract_strided_slice %133 {offsets = [0, 0, 0], sizes = [2, 16, 8], strides = [1, 1, 1]} : vector<2x16x32xf32> to vector<2x16x8xf32>
    "tpu.trace_start"() <{level = 10 : i32, message = "bqd,bkd->bqk"}> : () -> ()
    %cst_64 = arith.constant dense<0.000000e+00> : vector<2x8x16xf32>
    %142 = tpu.matmul %140, %141, %cst_64 {dimension_numbers = #tpu.dot_dimension_numbers<[2], [2], [1], [1], [0, 0, 0, 1, 1, 1], [0], [0]>} : vector<2x8x8xf32>, vector<2x16x8xf32>, vector<2x8x16xf32> -> vector<2x8x16xf32>
    "tpu.trace_stop"() : () -> ()
    %cst_65 = arith.constant 0.353553385 : f32
    %143 = vector.broadcast %cst_65 : f32 to vector<2x8x16xf32>
    %144 = arith.mulf %142, %143 : vector<2x8x16xf32>
    %cst_66 = arith.constant dense<0xFF800000> : vector<2x8xf32>
    %145 = vector.multi_reduction <maximumf>, %144, %cst_66 [2] : vector<2x8x16xf32> to vector<2x8xf32>
    %146 = vector.shape_cast %145 : vector<2x8xf32> to vector<2x8x1xf32>
    %147 = vector.broadcast %146 : vector<2x8x1xf32> to vector<2x8x16xf32>
    %148 = arith.subf %144, %147 : vector<2x8x16xf32>
    %149 = math.exp %148 : vector<2x8x16xf32>
    %cst_67 = arith.constant dense<0.000000e+00> : vector<2x8xf32>
    %150 = vector.multi_reduction <add>, %149, %cst_67 [2] : vector<2x8x16xf32> to vector<2x8xf32>
    %151 = vector.shape_cast %150 : vector<2x8xf32> to vector<2x8x1xf32>
    %152 = tpu.reciprocal %151 {approx = true} : vector<2x8x1xf32> -> vector<2x8x1xf32>
    %153 = vector.broadcast %152 : vector<2x8x1xf32> to vector<2x8x16xf32>
    %154 = arith.mulf %149, %153 : vector<2x8x16xf32>
    %155 = vector.extract_strided_slice %139 {offsets = [0, 0, 0], sizes = [2, 16, 8], strides = [1, 1, 1]} : vector<2x16x32xf32> to vector<2x16x8xf32>
    "tpu.trace_start"() <{level = 10 : i32, message = "bqk,bkd->bqd"}> : () -> ()
    %cst_68 = arith.constant dense<0.000000e+00> : vector<2x8x8xf32>
    %156 = tpu.matmul %154, %155, %cst_68 {dimension_numbers = #tpu.dot_dimension_numbers<[2], [1], [1], [2], [0, 0, 0, 1, 1, 2], [0], [0]>} : vector<2x8x16xf32>, vector<2x16x8xf32>, vector<2x8x8xf32> -> vector<2x8x8xf32>
    "tpu.trace_stop"() : () -> ()
    %157 = vector.extract_strided_slice %126 {offsets = [0, 0, 8], sizes = [2, 8, 8], strides = [1, 1, 1]} : vector<2x8x32xf32> to vector<2x8x8xf32>
    %158 = vector.extract_strided_slice %133 {offsets = [0, 0, 8], sizes = [2, 16, 8], strides = [1, 1, 1]} : vector<2x16x32xf32> to vector<2x16x8xf32>
    "tpu.trace_start"() <{level = 10 : i32, message = "bqd,bkd->bqk"}> : () -> ()
    %cst_69 = arith.constant dense<0.000000e+00> : vector<2x8x16xf32>
    %159 = tpu.matmul %157, %158, %cst_69 {dimension_numbers = #tpu.dot_dimension_numbers<[2], [2], [1], [1], [0, 0, 0, 1, 1, 1], [0], [0]>} : vector<2x8x8xf32>, vector<2x16x8xf32>, vector<2x8x16xf32> -> vector<2x8x16xf32>
    "tpu.trace_stop"() : () -> ()
    %cst_70 = arith.constant 0.353553385 : f32
    %160 = vector.broadcast %cst_70 : f32 to vector<2x8x16xf32>
    %161 = arith.mulf %159, %160 : vector<2x8x16xf32>
    %cst_71 = arith.constant dense<0xFF800000> : vector<2x8xf32>
    %162 = vector.multi_reduction <maximumf>, %161, %cst_71 [2] : vector<2x8x16xf32> to vector<2x8xf32>
    %163 = vector.shape_cast %162 : vector<2x8xf32> to vector<2x8x1xf32>
    %164 = vector.broadcast %163 : vector<2x8x1xf32> to vector<2x8x16xf32>
    %165 = arith.subf %161, %164 : vector<2x8x16xf32>
    %166 = math.exp %165 : vector<2x8x16xf32>
    %cst_72 = arith.constant dense<0.000000e+00> : vector<2x8xf32>
    %167 = vector.multi_reduction <add>, %166, %cst_72 [2] : vector<2x8x16xf32> to vector<2x8xf32>
    %168 = vector.shape_cast %167 : vector<2x8xf32> to vector<2x8x1xf32>
    %169 = tpu.reciprocal %168 {approx = true} : vector<2x8x1xf32> -> vector<2x8x1xf32>
    %170 = vector.broadcast %169 : vector<2x8x1xf32> to vector<2x8x16xf32>
    %171 = arith.mulf %166, %170 : vector<2x8x16xf32>
    %172 = vector.extract_strided_slice %139 {offsets = [0, 0, 8], sizes = [2, 16, 8], strides = [1, 1, 1]} : vector<2x16x32xf32> to vector<2x16x8xf32>
    "tpu.trace_start"() <{level = 10 : i32, message = "bqk,bkd->bqd"}> : () -> ()
    %cst_73 = arith.constant dense<0.000000e+00> : vector<2x8x8xf32>
    %173 = tpu.matmul %171, %172, %cst_73 {dimension_numbers = #tpu.dot_dimension_numbers<[2], [1], [1], [2], [0, 0, 0, 1, 1, 2], [0], [0]>} : vector<2x8x16xf32>, vector<2x16x8xf32>, vector<2x8x8xf32> -> vector<2x8x8xf32>
    "tpu.trace_stop"() : () -> ()
    %174 = vector.extract_strided_slice %126 {offsets = [0, 0, 16], sizes = [2, 8, 8], strides = [1, 1, 1]} : vector<2x8x32xf32> to vector<2x8x8xf32>
    %175 = vector.extract_strided_slice %133 {offsets = [0, 0, 16], sizes = [2, 16, 8], strides = [1, 1, 1]} : vector<2x16x32xf32> to vector<2x16x8xf32>
    "tpu.trace_start"() <{level = 10 : i32, message = "bqd,bkd->bqk"}> : () -> ()
    %cst_74 = arith.constant dense<0.000000e+00> : vector<2x8x16xf32>
    %176 = tpu.matmul %174, %175, %cst_74 {dimension_numbers = #tpu.dot_dimension_numbers<[2], [2], [1], [1], [0, 0, 0, 1, 1, 1], [0], [0]>} : vector<2x8x8xf32>, vector<2x16x8xf32>, vector<2x8x16xf32> -> vector<2x8x16xf32>
    "tpu.trace_stop"() : () -> ()
    %cst_75 = arith.constant 0.353553385 : f32
    %177 = vector.broadcast %cst_75 : f32 to vector<2x8x16xf32>
    %178 = arith.mulf %176, %177 : vector<2x8x16xf32>
    %cst_76 = arith.constant dense<0xFF800000> : vector<2x8xf32>
    %179 = vector.multi_reduction <maximumf>, %178, %cst_76 [2] : vector<2x8x16xf32> to vector<2x8xf32>
    %180 = vector.shape_cast %179 : vector<2x8xf32> to vector<2x8x1xf32>
    %181 = vector.broadcast %180 : vector<2x8x1xf32> to vector<2x8x16xf32>
    %182 = arith.subf %178, %181 : vector<2x8x16xf32>
    %183 = math.exp %182 : vector<2x8x16xf32>
    %cst_77 = arith.constant dense<0.000000e+00> : vector<2x8xf32>
    %184 = vector.multi_reduction <add>, %183, %cst_77 [2] : vector<2x8x16xf32> to vector<2x8xf32>
    %185 = vector.shape_cast %184 : vector<2x8xf32> to vector<2x8x1xf32>
    %186 = tpu.reciprocal %185 {approx = true} : vector<2x8x1xf32> -> vector<2x8x1xf32>
    %187 = vector.broadcast %186 : vector<2x8x1xf32> to vector<2x8x16xf32>
    %188 = arith.mulf %183, %187 : vector<2x8x16xf32>
    %189 = vector.extract_strided_slice %139 {offsets = [0, 0, 16], sizes = [2, 16, 8], strides = [1, 1, 1]} : vector<2x16x32xf32> to vector<2x16x8xf32>
    "tpu.trace_start"() <{level = 10 : i32, message = "bqk,bkd->bqd"}> : () -> ()
    %cst_78 = arith.constant dense<0.000000e+00> : vector<2x8x8xf32>
    %190 = tpu.matmul %188, %189, %cst_78 {dimension_numbers = #tpu.dot_dimension_numbers<[2], [1], [1], [2], [0, 0, 0, 1, 1, 2], [0], [0]>} : vector<2x8x16xf32>, vector<2x16x8xf32>, vector<2x8x8xf32> -> vector<2x8x8xf32>
    "tpu.trace_stop"() : () -> ()
    %191 = vector.extract_strided_slice %126 {offsets = [0, 0, 24], sizes = [2, 8, 8], strides = [1, 1, 1]} : vector<2x8x32xf32> to vector<2x8x8xf32>
    %192 = vector.extract_strided_slice %133 {offsets = [0, 0, 24], sizes = [2, 16, 8], strides = [1, 1, 1]} : vector<2x16x32xf32> to vector<2x16x8xf32>
    "tpu.trace_start"() <{level = 10 : i32, message = "bqd,bkd->bqk"}> : () -> ()
    %cst_79 = arith.constant dense<0.000000e+00> : vector<2x8x16xf32>
    %193 = tpu.matmul %191, %192, %cst_79 {dimension_numbers = #tpu.dot_dimension_numbers<[2], [2], [1], [1], [0, 0, 0, 1, 1, 1], [0], [0]>} : vector<2x8x8xf32>, vector<2x16x8xf32>, vector<2x8x16xf32> -> vector<2x8x16xf32>
    "tpu.trace_stop"() : () -> ()
    %cst_80 = arith.constant 0.353553385 : f32
    %194 = vector.broadcast %cst_80 : f32 to vector<2x8x16xf32>
    %195 = arith.mulf %193, %194 : vector<2x8x16xf32>
    %cst_81 = arith.constant dense<0xFF800000> : vector<2x8xf32>
    %196 = vector.multi_reduction <maximumf>, %195, %cst_81 [2] : vector<2x8x16xf32> to vector<2x8xf32>
    %197 = vector.shape_cast %196 : vector<2x8xf32> to vector<2x8x1xf32>
    %198 = vector.broadcast %197 : vector<2x8x1xf32> to vector<2x8x16xf32>
    %199 = arith.subf %195, %198 : vector<2x8x16xf32>
    %200 = math.exp %199 : vector<2x8x16xf32>
    %cst_82 = arith.constant dense<0.000000e+00> : vector<2x8xf32>
    %201 = vector.multi_reduction <add>, %200, %cst_82 [2] : vector<2x8x16xf32> to vector<2x8xf32>
    %202 = vector.shape_cast %201 : vector<2x8xf32> to vector<2x8x1xf32>
    %203 = tpu.reciprocal %202 {approx = true} : vector<2x8x1xf32> -> vector<2x8x1xf32>
    %204 = vector.broadcast %203 : vector<2x8x1xf32> to vector<2x8x16xf32>
    %205 = arith.mulf %200, %204 : vector<2x8x16xf32>
    %206 = vector.extract_strided_slice %139 {offsets = [0, 0, 24], sizes = [2, 16, 8], strides = [1, 1, 1]} : vector<2x16x32xf32> to vector<2x16x8xf32>
    "tpu.trace_start"() <{level = 10 : i32, message = "bqk,bkd->bqd"}> : () -> ()
    %cst_83 = arith.constant dense<0.000000e+00> : vector<2x8x8xf32>
    %207 = tpu.matmul %205, %206, %cst_83 {dimension_numbers = #tpu.dot_dimension_numbers<[2], [1], [1], [2], [0, 0, 0, 1, 1, 2], [0], [0]>} : vector<2x8x16xf32>, vector<2x16x8xf32>, vector<2x8x8xf32> -> vector<2x8x8xf32>
    "tpu.trace_stop"() : () -> ()
    %208 = tpu.concatenate %156, %173, %190, %207 in 2 : vector<2x8x8xf32>, vector<2x8x8xf32>, vector<2x8x8xf32>, vector<2x8x8xf32> -> vector<2x8x32xf32>
    %209 = vector.shape_cast %208 : vector<2x8x32xf32> to vector<16x32xf32>
    %c0_84 = arith.constant 0 : index
    %c0_85 = arith.constant 0 : index
    %210 = vector.load %arg18[%c0_84, %c0_85] : memref<32x32xf32, #tpu.memory_space<vmem>>, vector<32x32xf32>
    %cst_86 = arith.constant dense<0.000000e+00> : vector<16x32xf32>
    %211 = tpu.matmul %209, %210, %cst_86 {dimension_numbers = #tpu.dot_dimension_numbers<[1], [0], [0], [1], [0, 0, 1, 1], [], []>} : vector<16x32xf32>, vector<32x32xf32>, vector<16x32xf32> -> vector<16x32xf32>
    %c0_87 = arith.constant 0 : index
    %c0_88 = arith.constant 0 : index
    %212 = vector.load %arg19[%c0_87, %c0_88] : memref<1x32xf32, #tpu.memory_space<vmem>>, vector<1x32xf32>
    %213 = vector.broadcast %212 : vector<1x32xf32> to vector<16x32xf32>
    %214 = arith.addf %211, %213 : vector<16x32xf32>
    %215 = arith.addf %119, %214 : vector<16x32xf32>
    %c0_89 = arith.constant 0 : index
    %c0_90 = arith.constant 0 : index
    %216 = vector.load %arg20[%c0_89, %c0_90] : memref<1x32xf32, #tpu.memory_space<vmem>>, vector<1x32xf32>
    %c0_91 = arith.constant 0 : index
    %c0_92 = arith.constant 0 : index
    %217 = vector.load %arg21[%c0_91, %c0_92] : memref<1x32xf32, #tpu.memory_space<vmem>>, vector<1x32xf32>
    %cst_93 = arith.constant dense<0.000000e+00> : vector<16xf32>
    %218 = vector.multi_reduction <add>, %215, %cst_93 [1] : vector<16x32xf32> to vector<16xf32>
    %219 = vector.shape_cast %218 : vector<16xf32> to vector<16x1xf32>
    %cst_94 = arith.constant 3.200000e+01 : f32
    %220 = vector.broadcast %cst_94 : f32 to vector<16x1xf32>
    %221 = arith.divf %219, %220 : vector<16x1xf32>
    %222 = vector.broadcast %221 : vector<16x1xf32> to vector<16x32xf32>
    %223 = arith.subf %215, %222 : vector<16x32xf32>
    %224 = arith.mulf %223, %223 : vector<16x32xf32>
    %cst_95 = arith.constant dense<0.000000e+00> : vector<16xf32>
    %225 = vector.multi_reduction <add>, %224, %cst_95 [1] : vector<16x32xf32> to vector<16xf32>
    %226 = vector.shape_cast %225 : vector<16xf32> to vector<16x1xf32>
    %cst_96 = arith.constant 3.200000e+01 : f32
    %227 = vector.broadcast %cst_96 : f32 to vector<16x1xf32>
    %228 = arith.divf %226, %227 : vector<16x1xf32>
    %cst_97 = arith.constant 9.99999974E-6 : f32
    %229 = vector.broadcast %cst_97 : f32 to vector<16x1xf32>
    %230 = arith.addf %228, %229 : vector<16x1xf32>
    %231 = math.rsqrt %230 : vector<16x1xf32>
    %232 = vector.broadcast %221 : vector<16x1xf32> to vector<16x32xf32>
    %233 = arith.subf %215, %232 : vector<16x32xf32>
    %234 = vector.broadcast %231 : vector<16x1xf32> to vector<16x32xf32>
    %235 = arith.mulf %233, %234 : vector<16x32xf32>
    %236 = vector.broadcast %216 : vector<1x32xf32> to vector<16x32xf32>
    %237 = arith.mulf %235, %236 : vector<16x32xf32>
    %238 = vector.broadcast %217 : vector<1x32xf32> to vector<16x32xf32>
    %239 = arith.addf %237, %238 : vector<16x32xf32>
    %c0_98 = arith.constant 0 : index
    %c0_99 = arith.constant 0 : index
    %240 = vector.load %arg22[%c0_98, %c0_99] : memref<32x64xf32, #tpu.memory_space<vmem>>, vector<32x64xf32>
    %cst_100 = arith.constant dense<0.000000e+00> : vector<16x64xf32>
    %241 = tpu.matmul %239, %240, %cst_100 {dimension_numbers = #tpu.dot_dimension_numbers<[1], [0], [0], [1], [0, 0, 1, 1], [], []>} : vector<16x32xf32>, vector<32x64xf32>, vector<16x64xf32> -> vector<16x64xf32>
    %c0_101 = arith.constant 0 : index
    %c0_102 = arith.constant 0 : index
    %242 = vector.load %arg23[%c0_101, %c0_102] : memref<1x64xf32, #tpu.memory_space<vmem>>, vector<1x64xf32>
    %243 = vector.broadcast %242 : vector<1x64xf32> to vector<16x64xf32>
    %244 = arith.addf %241, %243 : vector<16x64xf32>
    %cst_103 = arith.constant 0.000000e+00 : f32
    %245 = vector.broadcast %cst_103 : f32 to vector<16x64xf32>
    %246 = arith.maximumf %244, %245 : vector<16x64xf32>
    %c0_104 = arith.constant 0 : index
    %c0_105 = arith.constant 0 : index
    %247 = vector.load %arg24[%c0_104, %c0_105] : memref<64x32xf32, #tpu.memory_space<vmem>>, vector<64x32xf32>
    %cst_106 = arith.constant dense<0.000000e+00> : vector<16x32xf32>
    %248 = tpu.matmul %246, %247, %cst_106 {dimension_numbers = #tpu.dot_dimension_numbers<[1], [0], [0], [1], [0, 0, 1, 1], [], []>} : vector<16x64xf32>, vector<64x32xf32>, vector<16x32xf32> -> vector<16x32xf32>
    %c0_107 = arith.constant 0 : index
    %c0_108 = arith.constant 0 : index
    %249 = vector.load %arg25[%c0_107, %c0_108] : memref<1x32xf32, #tpu.memory_space<vmem>>, vector<1x32xf32>
    %250 = vector.broadcast %249 : vector<1x32xf32> to vector<16x32xf32>
    %251 = arith.addf %248, %250 : vector<16x32xf32>
    %252 = arith.addf %239, %251 : vector<16x32xf32>
    %c0_109 = arith.constant 0 : index
    %c0_110 = arith.constant 0 : index
    %253 = vector.load %arg26[%c0_109, %c0_110] : memref<1x32xf32, #tpu.memory_space<vmem>>, vector<1x32xf32>
    %c0_111 = arith.constant 0 : index
    %c0_112 = arith.constant 0 : index
    %254 = vector.load %arg27[%c0_111, %c0_112] : memref<1x32xf32, #tpu.memory_space<vmem>>, vector<1x32xf32>
    %cst_113 = arith.constant dense<0.000000e+00> : vector<16xf32>
    %255 = vector.multi_reduction <add>, %252, %cst_113 [1] : vector<16x32xf32> to vector<16xf32>
    %256 = vector.shape_cast %255 : vector<16xf32> to vector<16x1xf32>
    %cst_114 = arith.constant 3.200000e+01 : f32
    %257 = vector.broadcast %cst_114 : f32 to vector<16x1xf32>
    %258 = arith.divf %256, %257 : vector<16x1xf32>
    %259 = vector.broadcast %258 : vector<16x1xf32> to vector<16x32xf32>
    %260 = arith.subf %252, %259 : vector<16x32xf32>
    %261 = arith.mulf %260, %260 : vector<16x32xf32>
    %cst_115 = arith.constant dense<0.000000e+00> : vector<16xf32>
    %262 = vector.multi_reduction <add>, %261, %cst_115 [1] : vector<16x32xf32> to vector<16xf32>
    %263 = vector.shape_cast %262 : vector<16xf32> to vector<16x1xf32>
    %cst_116 = arith.constant 3.200000e+01 : f32
    %264 = vector.broadcast %cst_116 : f32 to vector<16x1xf32>
    %265 = arith.divf %263, %264 : vector<16x1xf32>
    %cst_117 = arith.constant 9.99999974E-6 : f32
    %266 = vector.broadcast %cst_117 : f32 to vector<16x1xf32>
    %267 = arith.addf %265, %266 : vector<16x1xf32>
    %268 = math.rsqrt %267 : vector<16x1xf32>
    %269 = vector.broadcast %258 : vector<16x1xf32> to vector<16x32xf32>
    %270 = arith.subf %252, %269 : vector<16x32xf32>
    %271 = vector.broadcast %268 : vector<16x1xf32> to vector<16x32xf32>
    %272 = arith.mulf %270, %271 : vector<16x32xf32>
    %273 = vector.broadcast %253 : vector<1x32xf32> to vector<16x32xf32>
    %274 = arith.mulf %272, %273 : vector<16x32xf32>
    %275 = vector.broadcast %254 : vector<1x32xf32> to vector<16x32xf32>
    %276 = arith.addf %274, %275 : vector<16x32xf32>
    %c0_118 = arith.constant 0 : index
    %c0_119 = arith.constant 0 : index
    %277 = vector.load %arg28[%c0_118, %c0_119] : memref<1x32xf32, #tpu.memory_space<vmem>>, vector<1x32xf32>
    %c0_120 = arith.constant 0 : index
    %c0_121 = arith.constant 0 : index
    %278 = vector.load %arg29[%c0_120, %c0_121] : memref<1x32xf32, #tpu.memory_space<vmem>>, vector<1x32xf32>
    %cst_122 = arith.constant dense<0.000000e+00> : vector<16xf32>
    %279 = vector.multi_reduction <add>, %276, %cst_122 [1] : vector<16x32xf32> to vector<16xf32>
    %280 = vector.shape_cast %279 : vector<16xf32> to vector<16x1xf32>
    %cst_123 = arith.constant 3.200000e+01 : f32
    %281 = vector.broadcast %cst_123 : f32 to vector<16x1xf32>
    %282 = arith.divf %280, %281 : vector<16x1xf32>
    %283 = vector.broadcast %282 : vector<16x1xf32> to vector<16x32xf32>
    %284 = arith.subf %276, %283 : vector<16x32xf32>
    %285 = arith.mulf %284, %284 : vector<16x32xf32>
    %cst_124 = arith.constant dense<0.000000e+00> : vector<16xf32>
    %286 = vector.multi_reduction <add>, %285, %cst_124 [1] : vector<16x32xf32> to vector<16xf32>
    %287 = vector.shape_cast %286 : vector<16xf32> to vector<16x1xf32>
    %cst_125 = arith.constant 3.200000e+01 : f32
    %288 = vector.broadcast %cst_125 : f32 to vector<16x1xf32>
    %289 = arith.divf %287, %288 : vector<16x1xf32>
    %cst_126 = arith.constant 9.99999974E-6 : f32
    %290 = vector.broadcast %cst_126 : f32 to vector<16x1xf32>
    %291 = arith.addf %289, %290 : vector<16x1xf32>
    %292 = math.rsqrt %291 : vector<16x1xf32>
    %293 = vector.broadcast %282 : vector<16x1xf32> to vector<16x32xf32>
    %294 = arith.subf %276, %293 : vector<16x32xf32>
    %295 = vector.broadcast %292 : vector<16x1xf32> to vector<16x32xf32>
    %296 = arith.mulf %294, %295 : vector<16x32xf32>
    %297 = vector.broadcast %277 : vector<1x32xf32> to vector<16x32xf32>
    %298 = arith.mulf %296, %297 : vector<16x32xf32>
    %299 = vector.broadcast %278 : vector<1x32xf32> to vector<16x32xf32>
    %300 = arith.addf %298, %299 : vector<16x32xf32>
    %c0_127 = arith.constant 0 : index
    %c0_128 = arith.constant 0 : index
    %301 = vector.load %arg30[%c0_127, %c0_128] : memref<32x8xf32, #tpu.memory_space<vmem>>, vector<32x8xf32>
    %cst_129 = arith.constant dense<0.000000e+00> : vector<16x8xf32>
    %302 = tpu.matmul %300, %301, %cst_129 {dimension_numbers = #tpu.dot_dimension_numbers<[1], [0], [0], [1], [0, 0, 1, 1], [], []>} : vector<16x32xf32>, vector<32x8xf32>, vector<16x8xf32> -> vector<16x8xf32>
    %c0_130 = arith.constant 0 : index
    %c0_131 = arith.constant 0 : index
    %303 = vector.load %arg31[%c0_130, %c0_131] : memref<1x8xf32, #tpu.memory_space<vmem>>, vector<1x8xf32>
    %304 = vector.broadcast %303 : vector<1x8xf32> to vector<16x8xf32>
    %305 = arith.addf %302, %304 : vector<16x8xf32>
    %c0_132 = arith.constant 0 : index
    %c0_133 = arith.constant 0 : index
    %306 = vector.load %arg38[%c0_132, %c0_133] : memref<16x8xf32, #tpu.memory_space<vmem>>, vector<16x8xf32>
    tpu.vector_store %arg38[%c0_132, %c0_133], %305 {strides = array<i32>} : memref<16x8xf32, #tpu.memory_space<vmem>>, vector<16x8xf32>,
    %c0_134 = arith.constant 0 : index
    %c0_135 = arith.constant 0 : index
    %307 = vector.load %arg32[%c0_134, %c0_135] : memref<32x32xf32, #tpu.memory_space<vmem>>, vector<32x32xf32>
    %cst_136 = arith.constant dense<0.000000e+00> : vector<16x32xf32>
    %308 = tpu.matmul %300, %307, %cst_136 {dimension_numbers = #tpu.dot_dimension_numbers<[1], [0], [0], [1], [0, 0, 1, 1], [], []>} : vector<16x32xf32>, vector<32x32xf32>, vector<16x32xf32> -> vector<16x32xf32>
    %c0_137 = arith.constant 0 : index
    %c0_138 = arith.constant 0 : index
    %309 = vector.load %arg33[%c0_137, %c0_138] : memref<1x32xf32, #tpu.memory_space<vmem>>, vector<1x32xf32>
    %310 = vector.broadcast %309 : vector<1x32xf32> to vector<16x32xf32>
    %311 = arith.addf %308, %310 : vector<16x32xf32>
    %cst_139 = arith.constant 0.000000e+00 : f32
    %312 = vector.broadcast %cst_139 : f32 to vector<16x32xf32>
    %313 = arith.maximumf %311, %312 : vector<16x32xf32>
    %c0_140 = arith.constant 0 : index
    %c0_141 = arith.constant 0 : index
    %314 = vector.load %arg34[%c0_140, %c0_141] : memref<32x32xf32, #tpu.memory_space<vmem>>, vector<32x32xf32>
    %cst_142 = arith.constant dense<0.000000e+00> : vector<16x32xf32>
    %315 = tpu.matmul %313, %314, %cst_142 {dimension_numbers = #tpu.dot_dimension_numbers<[1], [0], [0], [1], [0, 0, 1, 1], [], []>} : vector<16x32xf32>, vector<32x32xf32>, vector<16x32xf32> -> vector<16x32xf32>
    %c0_143 = arith.constant 0 : index
    %c0_144 = arith.constant 0 : index
    %316 = vector.load %arg35[%c0_143, %c0_144] : memref<1x32xf32, #tpu.memory_space<vmem>>, vector<1x32xf32>
    %317 = vector.broadcast %316 : vector<1x32xf32> to vector<16x32xf32>
    %318 = arith.addf %315, %317 : vector<16x32xf32>
    %cst_145 = arith.constant 0.000000e+00 : f32
    %319 = vector.broadcast %cst_145 : f32 to vector<16x32xf32>
    %320 = arith.maximumf %318, %319 : vector<16x32xf32>
    %c0_146 = arith.constant 0 : index
    %c0_147 = arith.constant 0 : index
    %321 = vector.load %arg36[%c0_146, %c0_147] : memref<32x4xf32, #tpu.memory_space<vmem>>, vector<32x4xf32>
    %cst_148 = arith.constant dense<0.000000e+00> : vector<16x4xf32>
    %322 = tpu.matmul %320, %321, %cst_148 {dimension_numbers = #tpu.dot_dimension_numbers<[1], [0], [0], [1], [0, 0, 1, 1], [], []>} : vector<16x32xf32>, vector<32x4xf32>, vector<16x4xf32> -> vector<16x4xf32>
    %c0_149 = arith.constant 0 : index
    %c0_150 = arith.constant 0 : index
    %323 = vector.load %arg37[%c0_149, %c0_150] : memref<1x4xf32, #tpu.memory_space<vmem>>, vector<1x4xf32>
    %324 = vector.broadcast %323 : vector<1x4xf32> to vector<16x4xf32>
    %325 = arith.addf %322, %324 : vector<16x4xf32>
    %326 = arith.negf %325 : vector<16x4xf32>
    %327 = math.exp %326 : vector<16x4xf32>
    %cst_151 = arith.constant 1.000000e+00 : f32
    %328 = vector.broadcast %cst_151 : f32 to vector<16x4xf32>
    %329 = arith.addf %328, %327 : vector<16x4xf32>
    %330 = arith.divf %328, %329 : vector<16x4xf32>
    %c0_152 = arith.constant 0 : index
    %c0_153 = arith.constant 0 : index
    %331 = vector.load %arg39[%c0_152, %c0_153] : memref<16x4xf32, #tpu.memory_space<vmem>>, vector<16x4xf32>
    tpu.vector_store %arg39[%c0_152, %c0_153], %330 {strides = array<i32>} : memref<16x4xf32, #tpu.memory_space<vmem>>, vector<16x4xf32>,
    return
  }
  func.func @transform_0(%arg0: i32) -> (i32, i32) {
    %c0_i32 = arith.constant 0 : i32
    %c0_i32_0 = arith.constant 0 : i32
    %c0_i32_1 = arith.constant 0 : i32
    return %c0_i32, %c0_i32_0 : i32, i32
  }
  func.func @transform_1(%arg0: i32) -> (i32, i32) {
    %c0_i32 = arith.constant 0 : i32
    %c0_i32_0 = arith.constant 0 : i32
    %c0_i32_1 = arith.constant 0 : i32
    return %c0_i32, %c0_i32_0 : i32, i32
  }
  func.func @transform_2(%arg0: i32) -> (i32, i32) {
    %c0_i32 = arith.constant 0 : i32
    %c0_i32_0 = arith.constant 0 : i32
    %c0_i32_1 = arith.constant 0 : i32
    return %c0_i32, %c0_i32_0 : i32, i32
  }
  func.func @transform_3(%arg0: i32) -> (i32, i32) {
    %c0_i32 = arith.constant 0 : i32
    %c0_i32_0 = arith.constant 0 : i32
    %c0_i32_1 = arith.constant 0 : i32
    return %c0_i32, %c0_i32_0 : i32, i32
  }
  func.func @transform_4(%arg0: i32) -> (i32, i32) {
    %c0_i32 = arith.constant 0 : i32
    %c0_i32_0 = arith.constant 0 : i32
    %c0_i32_1 = arith.constant 0 : i32
    return %c0_i32, %c0_i32_0 : i32, i32
  }
  func.func @transform_5(%arg0: i32) -> (i32, i32) {
    %c0_i32 = arith.constant 0 : i32
    %c0_i32_0 = arith.constant 0 : i32
    %c0_i32_1 = arith.constant 0 : i32
    return %c0_i32, %c0_i32_0 : i32, i32
  }
  func.func @transform_6(%arg0: i32) -> (i32, i32) {
    %c0_i32 = arith.constant 0 : i32
    %c0_i32_0 = arith.constant 0 : i32
    %c0_i32_1 = arith.constant 0 : i32
    return %c0_i32, %c0_i32_0 : i32, i32
  }
  func.func @transform_7(%arg0: i32) -> (i32, i32) {
    %c0_i32 = arith.constant 0 : i32
    %c0_i32_0 = arith.constant 0 : i32
    %c0_i32_1 = arith.constant 0 : i32
    return %c0_i32, %c0_i32_0 : i32, i32
  }
  func.func @transform_8(%arg0: i32) -> (i32, i32) {
    %c0_i32 = arith.constant 0 : i32
    %c0_i32_0 = arith.constant 0 : i32
    %c0_i32_1 = arith.constant 0 : i32
    return %c0_i32, %c0_i32_0 : i32, i32
  }
  func.func @transform_9(%arg0: i32) -> (i32, i32) {
    %c0_i32 = arith.constant 0 : i32
    %c0_i32_0 = arith.constant 0 : i32
    %c0_i32_1 = arith.constant 0 : i32
    return %c0_i32, %c0_i32_0 : i32, i32
  }
  func.func @transform_10(%arg0: i32) -> (i32, i32) {
    %c0_i32 = arith.constant 0 : i32
    %c0_i32_0 = arith.constant 0 : i32
    %c0_i32_1 = arith.constant 0 : i32
    return %c0_i32, %c0_i32_0 : i32, i32
  }
  func.func @transform_11(%arg0: i32) -> (i32, i32) {
    %c0_i32 = arith.constant 0 : i32
    %c0_i32_0 = arith.constant 0 : i32
    %c0_i32_1 = arith.constant 0 : i32
    return %c0_i32, %c0_i32_0 : i32, i32
  }
  func.func @transform_12(%arg0: i32) -> (i32, i32) {
    %c0_i32 = arith.constant 0 : i32
    %c0_i32_0 = arith.constant 0 : i32
    %c0_i32_1 = arith.constant 0 : i32
    return %c0_i32, %c0_i32_0 : i32, i32
  }
  func.func @transform_13(%arg0: i32) -> (i32, i32) {
    %c0_i32 = arith.constant 0 : i32
    %c0_i32_0 = arith.constant 0 : i32
    %c0_i32_1 = arith.constant 0 : i32
    return %c0_i32, %c0_i32_0 : i32, i32
  }
  func.func @transform_14(%arg0: i32) -> (i32, i32) {
    %c0_i32 = arith.constant 0 : i32
    %c0_i32_0 = arith.constant 0 : i32
    %c0_i32_1 = arith.constant 0 : i32
    return %c0_i32, %c0_i32_0 : i32, i32
  }
  func.func @transform_15(%arg0: i32) -> (i32, i32) {
    %c0_i32 = arith.constant 0 : i32
    %c0_i32_0 = arith.constant 0 : i32
    %c0_i32_1 = arith.constant 0 : i32
    return %c0_i32, %c0_i32_0 : i32, i32
  }
  func.func @transform_16(%arg0: i32) -> (i32, i32) {
    %c0_i32 = arith.constant 0 : i32
    %c0_i32_0 = arith.constant 0 : i32
    %c0_i32_1 = arith.constant 0 : i32
    return %c0_i32, %c0_i32_0 : i32, i32
  }
  func.func @transform_17(%arg0: i32) -> (i32, i32) {
    %c0_i32 = arith.constant 0 : i32
    %c0_i32_0 = arith.constant 0 : i32
    %c0_i32_1 = arith.constant 0 : i32
    return %c0_i32, %c0_i32_0 : i32, i32
  }
  func.func @transform_18(%arg0: i32) -> (i32, i32) {
    %c0_i32 = arith.constant 0 : i32
    %c0_i32_0 = arith.constant 0 : i32
    %c0_i32_1 = arith.constant 0 : i32
    return %c0_i32, %c0_i32_0 : i32, i32
  }
  func.func @transform_19(%arg0: i32) -> (i32, i32) {
    %c0_i32 = arith.constant 0 : i32
    %c0_i32_0 = arith.constant 0 : i32
    %c0_i32_1 = arith.constant 0 : i32
    return %c0_i32, %c0_i32_0 : i32, i32
  }
  func.func @transform_20(%arg0: i32) -> (i32, i32) {
    %c0_i32 = arith.constant 0 : i32
    %c0_i32_0 = arith.constant 0 : i32
    %c0_i32_1 = arith.constant 0 : i32
    return %c0_i32, %c0_i32_0 : i32, i32
  }
  func.func @transform_21(%arg0: i32) -> (i32, i32) {
    %c0_i32 = arith.constant 0 : i32
    %c0_i32_0 = arith.constant 0 : i32
    %c0_i32_1 = arith.constant 0 : i32
    return %c0_i32, %c0_i32_0 : i32, i32
  }
  func.func @transform_22(%arg0: i32) -> (i32, i32) {
    %c0_i32 = arith.constant 0 : i32
    %c0_i32_0 = arith.constant 0 : i32
    %c0_i32_1 = arith.constant 0 : i32
    return %c0_i32, %c0_i32_0 : i32, i32
  }
  func.func @transform_23(%arg0: i32) -> (i32, i32) {
    %c0_i32 = arith.constant 0 : i32
    %c0_i32_0 = arith.constant 0 : i32
    %c0_i32_1 = arith.constant 0 : i32
    return %c0_i32, %c0_i32_0 : i32, i32
  }
  func.func @transform_24(%arg0: i32) -> (i32, i32) {
    %c0_i32 = arith.constant 0 : i32
    %c0_i32_0 = arith.constant 0 : i32
    %c0_i32_1 = arith.constant 0 : i32
    return %c0_i32, %c0_i32_0 : i32, i32
  }
  func.func @transform_25(%arg0: i32) -> (i32, i32) {
    %c0_i32 = arith.constant 0 : i32
    %c0_i32_0 = arith.constant 0 : i32
    %c0_i32_1 = arith.constant 0 : i32
    return %c0_i32, %c0_i32_0 : i32, i32
  }
  func.func @transform_26(%arg0: i32) -> (i32, i32) {
    %c0_i32 = arith.constant 0 : i32
    %c0_i32_0 = arith.constant 0 : i32
    %c0_i32_1 = arith.constant 0 : i32
    return %c0_i32, %c0_i32_0 : i32, i32
  }
  func.func @transform_27(%arg0: i32) -> (i32, i32) {
    %c0_i32 = arith.constant 0 : i32
    %c0_i32_0 = arith.constant 0 : i32
    %c0_i32_1 = arith.constant 0 : i32
    return %c0_i32, %c0_i32_0 : i32, i32
  }
  func.func @transform_28(%arg0: i32) -> (i32, i32) {
    %c0_i32 = arith.constant 0 : i32
    %c0_i32_0 = arith.constant 0 : i32
    %c0_i32_1 = arith.constant 0 : i32
    return %c0_i32, %c0_i32_0 : i32, i32
  }
  func.func @transform_29(%arg0: i32) -> (i32, i32) {
    %c0_i32 = arith.constant 0 : i32
    %c0_i32_0 = arith.constant 0 : i32
    %c0_i32_1 = arith.constant 0 : i32
    return %c0_i32, %c0_i32_0 : i32, i32
  }
  func.func @transform_30(%arg0: i32) -> (i32, i32) {
    %c0_i32 = arith.constant 0 : i32
    %c0_i32_0 = arith.constant 0 : i32
    %c0_i32_1 = arith.constant 0 : i32
    return %c0_i32, %c0_i32_0 : i32, i32
  }
  func.func @transform_31(%arg0: i32) -> (i32, i32) {
    %c0_i32 = arith.constant 0 : i32
    %c0_i32_0 = arith.constant 0 : i32
    %c0_i32_1 = arith.constant 0 : i32
    return %c0_i32, %c0_i32_0 : i32, i32
  }
  func.func @transform_32(%arg0: i32) -> (i32, i32) {
    %c0_i32 = arith.constant 0 : i32
    %c0_i32_0 = arith.constant 0 : i32
    %c0_i32_1 = arith.constant 0 : i32
    return %c0_i32, %c0_i32_0 : i32, i32
  }
  func.func @transform_33(%arg0: i32) -> (i32, i32) {
    %c0_i32 = arith.constant 0 : i32
    %c0_i32_0 = arith.constant 0 : i32
    %c0_i32_1 = arith.constant 0 : i32
    return %c0_i32, %c0_i32_0 : i32, i32
  }
  func.func @transform_34(%arg0: i32) -> (i32, i32) {
    %c0_i32 = arith.constant 0 : i32
    %c0_i32_0 = arith.constant 0 : i32
    %c0_i32_1 = arith.constant 0 : i32
    return %c0_i32, %c0_i32_0 : i32, i32
  }
  func.func @transform_35(%arg0: i32) -> (i32, i32) {
    %c0_i32 = arith.constant 0 : i32
    %c0_i32_0 = arith.constant 0 : i32
    %c0_i32_1 = arith.constant 0 : i32
    return %c0_i32, %c0_i32_0 : i32, i32
  }
  func.func @transform_36(%arg0: i32) -> (i32, i32) {
    %c0_i32 = arith.constant 0 : i32
    %c0_i32_0 = arith.constant 0 : i32
    %c0_i32_1 = arith.constant 0 : i32
    return %c0_i32, %c0_i32_0 : i32, i32
  }
  func.func @transform_37(%arg0: i32) -> (i32, i32) {
    %c0_i32 = arith.constant 0 : i32
    %c0_i32_0 = arith.constant 0 : i32
    %c0_i32_1 = arith.constant 0 : i32
    return %c0_i32, %c0_i32_0 : i32, i32
  }
  func.func @transform_38(%arg0: i32) -> (i32, i32) {
    %c0_i32 = arith.constant 0 : i32
    %c0_i32_0 = arith.constant 0 : i32
    %c0_i32_1 = arith.constant 0 : i32
    return %c0_i32, %c0_i32_0 : i32, i32
  }
}

module attributes {stable_mosaic.version = 11 : i64} {
  func.func @kernel(%arg0: i32, %arg1: memref<32x64xf32, #tpu.memory_space<vmem>>, %arg2: memref<32x32xf32, #tpu.memory_space<vmem>>, %arg3: memref<64x32xf32, #tpu.memory_space<vmem>>, %arg4: memref<1x32xf32, #tpu.memory_space<vmem>>, %arg5: memref<32x64xf32, #tpu.memory_space<vmem>>, %arg6: memref<1x64xf32, #tpu.memory_space<vmem>>, %arg7: memref<32x32xf32, #tpu.memory_space<vmem>>, %arg8: memref<1x32xf32, #tpu.memory_space<vmem>>, %arg9: memref<32x32xf32, #tpu.memory_space<vmem>>, %arg10: memref<1x32xf32, #tpu.memory_space<vmem>>, %arg11: memref<1x32xf32, #tpu.memory_space<vmem>>, %arg12: memref<1x32xf32, #tpu.memory_space<vmem>>, %arg13: memref<32x64xf32, #tpu.memory_space<vmem>>, %arg14: memref<1x64xf32, #tpu.memory_space<vmem>>, %arg15: memref<64x32xf32, #tpu.memory_space<vmem>>, %arg16: memref<1x32xf32, #tpu.memory_space<vmem>>, %arg17: memref<1x32xf32, #tpu.memory_space<vmem>>, %arg18: memref<1x32xf32, #tpu.memory_space<vmem>>, %arg19: memref<32x32xf32, #tpu.memory_space<vmem>>) attributes {dimension_semantics = [#tpu.dimension_semantics<arbitrary>], iteration_bounds = array<i64: 1>, scalar_prefetch = 0 : i64, scratch_operands = 0 : i64, tpu.core_type = #tpu.core_type<tc>, window_params = [{pipeline_mode = #tpu.pipeline_mode<synchronous>, transform_indices = @transform_0, window_bounds = array<i64: 32, 64>}, {pipeline_mode = #tpu.pipeline_mode<synchronous>, transform_indices = @transform_1, window_bounds = array<i64: 32, 32>}, {pipeline_mode = #tpu.pipeline_mode<synchronous>, transform_indices = @transform_2, window_bounds = array<i64: 64, 32>}, {pipeline_mode = #tpu.pipeline_mode<synchronous>, transform_indices = @transform_3, window_bounds = array<i64: 1, 32>}, {pipeline_mode = #tpu.pipeline_mode<synchronous>, transform_indices = @transform_4, window_bounds = array<i64: 32, 64>}, {pipeline_mode = #tpu.pipeline_mode<synchronous>, transform_indices = @transform_5, window_bounds = array<i64: 1, 64>}, {pipeline_mode = #tpu.pipeline_mode<synchronous>, transform_indices = @transform_6, window_bounds = array<i64: 32, 32>}, {pipeline_mode = #tpu.pipeline_mode<synchronous>, transform_indices = @transform_7, window_bounds = array<i64: 1, 32>}, {pipeline_mode = #tpu.pipeline_mode<synchronous>, transform_indices = @transform_8, window_bounds = array<i64: 32, 32>}, {pipeline_mode = #tpu.pipeline_mode<synchronous>, transform_indices = @transform_9, window_bounds = array<i64: 1, 32>}, {pipeline_mode = #tpu.pipeline_mode<synchronous>, transform_indices = @transform_10, window_bounds = array<i64: 1, 32>}, {pipeline_mode = #tpu.pipeline_mode<synchronous>, transform_indices = @transform_11, window_bounds = array<i64: 1, 32>}, {pipeline_mode = #tpu.pipeline_mode<synchronous>, transform_indices = @transform_12, window_bounds = array<i64: 32, 64>}, {pipeline_mode = #tpu.pipeline_mode<synchronous>, transform_indices = @transform_13, window_bounds = array<i64: 1, 64>}, {pipeline_mode = #tpu.pipeline_mode<synchronous>, transform_indices = @transform_14, window_bounds = array<i64: 64, 32>}, {pipeline_mode = #tpu.pipeline_mode<synchronous>, transform_indices = @transform_15, window_bounds = array<i64: 1, 32>}, {pipeline_mode = #tpu.pipeline_mode<synchronous>, transform_indices = @transform_16, window_bounds = array<i64: 1, 32>}, {pipeline_mode = #tpu.pipeline_mode<synchronous>, transform_indices = @transform_17, window_bounds = array<i64: 1, 32>}, {pipeline_mode = #tpu.pipeline_mode<synchronous>, transform_indices = @transform_18, window_bounds = array<i64: 32, 32>}]} {
    %c0 = arith.constant 0 : index
    %c0_0 = arith.constant 0 : index
    %0 = vector.load %arg1[%c0, %c0_0] : memref<32x64xf32, #tpu.memory_space<vmem>>, vector<32x64xf32>
    %c0_1 = arith.constant 0 : index
    %c0_2 = arith.constant 0 : index
    %1 = vector.load %arg2[%c0_1, %c0_2] : memref<32x32xf32, #tpu.memory_space<vmem>>, vector<32x32xf32>
    %c0_3 = arith.constant 0 : index
    %c0_4 = arith.constant 0 : index
    %2 = vector.load %arg3[%c0_3, %c0_4] : memref<64x32xf32, #tpu.memory_space<vmem>>, vector<64x32xf32>
    %cst = arith.constant dense<0.000000e+00> : vector<32x32xf32>
    %3 = tpu.matmul %0, %2, %cst {dimension_numbers = #tpu.dot_dimension_numbers<[1], [0], [0], [1], [0, 0, 1, 1], [], []>} : vector<32x64xf32>, vector<64x32xf32>, vector<32x32xf32> -> vector<32x32xf32>
    %c0_5 = arith.constant 0 : index
    %c0_6 = arith.constant 0 : index
    %4 = vector.load %arg4[%c0_5, %c0_6] : memref<1x32xf32, #tpu.memory_space<vmem>>, vector<1x32xf32>
    %5 = vector.broadcast %4 : vector<1x32xf32> to vector<32x32xf32>
    %6 = arith.addf %3, %5 : vector<32x32xf32>
    %7 = arith.addf %6, %1 : vector<32x32xf32>
    %c0_7 = arith.constant 0 : index
    %c0_8 = arith.constant 0 : index
    %8 = vector.load %arg5[%c0_7, %c0_8] : memref<32x64xf32, #tpu.memory_space<vmem>>, vector<32x64xf32>
    %cst_9 = arith.constant dense<0.000000e+00> : vector<32x64xf32>
    %9 = tpu.matmul %7, %8, %cst_9 {dimension_numbers = #tpu.dot_dimension_numbers<[1], [0], [0], [1], [0, 0, 1, 1], [], []>} : vector<32x32xf32>, vector<32x64xf32>, vector<32x64xf32> -> vector<32x64xf32>
    %c0_10 = arith.constant 0 : index
    %c0_11 = arith.constant 0 : index
    %10 = vector.load %arg6[%c0_10, %c0_11] : memref<1x64xf32, #tpu.memory_space<vmem>>, vector<1x64xf32>
    %11 = vector.broadcast %10 : vector<1x64xf32> to vector<32x64xf32>
    %12 = arith.addf %9, %11 : vector<32x64xf32>
    %13 = vector.extract_strided_slice %12 {offsets = [0, 0], sizes = [32, 32], strides = [1, 1]} : vector<32x64xf32> to vector<32x32xf32>
    %14 = vector.shape_cast %13 : vector<32x32xf32> to vector<2x16x32xf32>
    %15 = vector.extract_strided_slice %12 {offsets = [0, 32], sizes = [32, 32], strides = [1, 1]} : vector<32x64xf32> to vector<32x32xf32>
    %16 = vector.shape_cast %15 : vector<32x32xf32> to vector<2x16x32xf32>
    %c0_12 = arith.constant 0 : index
    %c0_13 = arith.constant 0 : index
    %17 = vector.load %arg7[%c0_12, %c0_13] : memref<32x32xf32, #tpu.memory_space<vmem>>, vector<32x32xf32>
    %cst_14 = arith.constant dense<0.000000e+00> : vector<32x32xf32>
    %18 = tpu.matmul %6, %17, %cst_14 {dimension_numbers = #tpu.dot_dimension_numbers<[1], [0], [0], [1], [0, 0, 1, 1], [], []>} : vector<32x32xf32>, vector<32x32xf32>, vector<32x32xf32> -> vector<32x32xf32>
    %c0_15 = arith.constant 0 : index
    %c0_16 = arith.constant 0 : index
    %19 = vector.load %arg8[%c0_15, %c0_16] : memref<1x32xf32, #tpu.memory_space<vmem>>, vector<1x32xf32>
    %20 = vector.broadcast %19 : vector<1x32xf32> to vector<32x32xf32>
    %21 = arith.addf %18, %20 : vector<32x32xf32>
    %22 = vector.shape_cast %21 : vector<32x32xf32> to vector<2x16x32xf32>
    %23 = vector.extract_strided_slice %14 {offsets = [0, 0, 0], sizes = [2, 16, 8], strides = [1, 1, 1]} : vector<2x16x32xf32> to vector<2x16x8xf32>
    %24 = vector.extract_strided_slice %16 {offsets = [0, 0, 0], sizes = [2, 16, 8], strides = [1, 1, 1]} : vector<2x16x32xf32> to vector<2x16x8xf32>
    "tpu.trace_start"() <{level = 10 : i32, message = "bqd,bkd->bqk"}> : () -> ()
    %cst_17 = arith.constant dense<0.000000e+00> : vector<2x16x16xf32>
    %25 = tpu.matmul %23, %24, %cst_17 {dimension_numbers = #tpu.dot_dimension_numbers<[2], [2], [1], [1], [0, 0, 0, 1, 1, 1], [0], [0]>} : vector<2x16x8xf32>, vector<2x16x8xf32>, vector<2x16x16xf32> -> vector<2x16x16xf32>
    "tpu.trace_stop"() : () -> ()
    %cst_18 = arith.constant 0.353553385 : f32
    %26 = vector.broadcast %cst_18 : f32 to vector<2x16x16xf32>
    %27 = arith.mulf %25, %26 : vector<2x16x16xf32>
    %cst_19 = arith.constant dense<0xFF800000> : vector<2x16xf32>
    %28 = vector.multi_reduction <maximumf>, %27, %cst_19 [2] : vector<2x16x16xf32> to vector<2x16xf32>
    %29 = vector.shape_cast %28 : vector<2x16xf32> to vector<2x16x1xf32>
    %30 = vector.broadcast %29 : vector<2x16x1xf32> to vector<2x16x16xf32>
    %31 = arith.subf %27, %30 : vector<2x16x16xf32>
    %32 = math.exp %31 : vector<2x16x16xf32>
    %cst_20 = arith.constant dense<0.000000e+00> : vector<2x16xf32>
    %33 = vector.multi_reduction <add>, %32, %cst_20 [2] : vector<2x16x16xf32> to vector<2x16xf32>
    %34 = vector.shape_cast %33 : vector<2x16xf32> to vector<2x16x1xf32>
    %35 = tpu.reciprocal %34 {approx = true} : vector<2x16x1xf32> -> vector<2x16x1xf32>
    %36 = vector.broadcast %35 : vector<2x16x1xf32> to vector<2x16x16xf32>
    %37 = arith.mulf %32, %36 : vector<2x16x16xf32>
    %38 = vector.extract_strided_slice %22 {offsets = [0, 0, 0], sizes = [2, 16, 8], strides = [1, 1, 1]} : vector<2x16x32xf32> to vector<2x16x8xf32>
    "tpu.trace_start"() <{level = 10 : i32, message = "bqk,bkd->bqd"}> : () -> ()
    %cst_21 = arith.constant dense<0.000000e+00> : vector<2x16x8xf32>
    %39 = tpu.matmul %37, %38, %cst_21 {dimension_numbers = #tpu.dot_dimension_numbers<[2], [1], [1], [2], [0, 0, 0, 1, 1, 2], [0], [0]>} : vector<2x16x16xf32>, vector<2x16x8xf32>, vector<2x16x8xf32> -> vector<2x16x8xf32>
    "tpu.trace_stop"() : () -> ()
    %40 = vector.extract_strided_slice %14 {offsets = [0, 0, 8], sizes = [2, 16, 8], strides = [1, 1, 1]} : vector<2x16x32xf32> to vector<2x16x8xf32>
    %41 = vector.extract_strided_slice %16 {offsets = [0, 0, 8], sizes = [2, 16, 8], strides = [1, 1, 1]} : vector<2x16x32xf32> to vector<2x16x8xf32>
    "tpu.trace_start"() <{level = 10 : i32, message = "bqd,bkd->bqk"}> : () -> ()
    %cst_22 = arith.constant dense<0.000000e+00> : vector<2x16x16xf32>
    %42 = tpu.matmul %40, %41, %cst_22 {dimension_numbers = #tpu.dot_dimension_numbers<[2], [2], [1], [1], [0, 0, 0, 1, 1, 1], [0], [0]>} : vector<2x16x8xf32>, vector<2x16x8xf32>, vector<2x16x16xf32> -> vector<2x16x16xf32>
    "tpu.trace_stop"() : () -> ()
    %cst_23 = arith.constant 0.353553385 : f32
    %43 = vector.broadcast %cst_23 : f32 to vector<2x16x16xf32>
    %44 = arith.mulf %42, %43 : vector<2x16x16xf32>
    %cst_24 = arith.constant dense<0xFF800000> : vector<2x16xf32>
    %45 = vector.multi_reduction <maximumf>, %44, %cst_24 [2] : vector<2x16x16xf32> to vector<2x16xf32>
    %46 = vector.shape_cast %45 : vector<2x16xf32> to vector<2x16x1xf32>
    %47 = vector.broadcast %46 : vector<2x16x1xf32> to vector<2x16x16xf32>
    %48 = arith.subf %44, %47 : vector<2x16x16xf32>
    %49 = math.exp %48 : vector<2x16x16xf32>
    %cst_25 = arith.constant dense<0.000000e+00> : vector<2x16xf32>
    %50 = vector.multi_reduction <add>, %49, %cst_25 [2] : vector<2x16x16xf32> to vector<2x16xf32>
    %51 = vector.shape_cast %50 : vector<2x16xf32> to vector<2x16x1xf32>
    %52 = tpu.reciprocal %51 {approx = true} : vector<2x16x1xf32> -> vector<2x16x1xf32>
    %53 = vector.broadcast %52 : vector<2x16x1xf32> to vector<2x16x16xf32>
    %54 = arith.mulf %49, %53 : vector<2x16x16xf32>
    %55 = vector.extract_strided_slice %22 {offsets = [0, 0, 8], sizes = [2, 16, 8], strides = [1, 1, 1]} : vector<2x16x32xf32> to vector<2x16x8xf32>
    "tpu.trace_start"() <{level = 10 : i32, message = "bqk,bkd->bqd"}> : () -> ()
    %cst_26 = arith.constant dense<0.000000e+00> : vector<2x16x8xf32>
    %56 = tpu.matmul %54, %55, %cst_26 {dimension_numbers = #tpu.dot_dimension_numbers<[2], [1], [1], [2], [0, 0, 0, 1, 1, 2], [0], [0]>} : vector<2x16x16xf32>, vector<2x16x8xf32>, vector<2x16x8xf32> -> vector<2x16x8xf32>
    "tpu.trace_stop"() : () -> ()
    %57 = vector.extract_strided_slice %14 {offsets = [0, 0, 16], sizes = [2, 16, 8], strides = [1, 1, 1]} : vector<2x16x32xf32> to vector<2x16x8xf32>
    %58 = vector.extract_strided_slice %16 {offsets = [0, 0, 16], sizes = [2, 16, 8], strides = [1, 1, 1]} : vector<2x16x32xf32> to vector<2x16x8xf32>
    "tpu.trace_start"() <{level = 10 : i32, message = "bqd,bkd->bqk"}> : () -> ()
    %cst_27 = arith.constant dense<0.000000e+00> : vector<2x16x16xf32>
    %59 = tpu.matmul %57, %58, %cst_27 {dimension_numbers = #tpu.dot_dimension_numbers<[2], [2], [1], [1], [0, 0, 0, 1, 1, 1], [0], [0]>} : vector<2x16x8xf32>, vector<2x16x8xf32>, vector<2x16x16xf32> -> vector<2x16x16xf32>
    "tpu.trace_stop"() : () -> ()
    %cst_28 = arith.constant 0.353553385 : f32
    %60 = vector.broadcast %cst_28 : f32 to vector<2x16x16xf32>
    %61 = arith.mulf %59, %60 : vector<2x16x16xf32>
    %cst_29 = arith.constant dense<0xFF800000> : vector<2x16xf32>
    %62 = vector.multi_reduction <maximumf>, %61, %cst_29 [2] : vector<2x16x16xf32> to vector<2x16xf32>
    %63 = vector.shape_cast %62 : vector<2x16xf32> to vector<2x16x1xf32>
    %64 = vector.broadcast %63 : vector<2x16x1xf32> to vector<2x16x16xf32>
    %65 = arith.subf %61, %64 : vector<2x16x16xf32>
    %66 = math.exp %65 : vector<2x16x16xf32>
    %cst_30 = arith.constant dense<0.000000e+00> : vector<2x16xf32>
    %67 = vector.multi_reduction <add>, %66, %cst_30 [2] : vector<2x16x16xf32> to vector<2x16xf32>
    %68 = vector.shape_cast %67 : vector<2x16xf32> to vector<2x16x1xf32>
    %69 = tpu.reciprocal %68 {approx = true} : vector<2x16x1xf32> -> vector<2x16x1xf32>
    %70 = vector.broadcast %69 : vector<2x16x1xf32> to vector<2x16x16xf32>
    %71 = arith.mulf %66, %70 : vector<2x16x16xf32>
    %72 = vector.extract_strided_slice %22 {offsets = [0, 0, 16], sizes = [2, 16, 8], strides = [1, 1, 1]} : vector<2x16x32xf32> to vector<2x16x8xf32>
    "tpu.trace_start"() <{level = 10 : i32, message = "bqk,bkd->bqd"}> : () -> ()
    %cst_31 = arith.constant dense<0.000000e+00> : vector<2x16x8xf32>
    %73 = tpu.matmul %71, %72, %cst_31 {dimension_numbers = #tpu.dot_dimension_numbers<[2], [1], [1], [2], [0, 0, 0, 1, 1, 2], [0], [0]>} : vector<2x16x16xf32>, vector<2x16x8xf32>, vector<2x16x8xf32> -> vector<2x16x8xf32>
    "tpu.trace_stop"() : () -> ()
    %74 = vector.extract_strided_slice %14 {offsets = [0, 0, 24], sizes = [2, 16, 8], strides = [1, 1, 1]} : vector<2x16x32xf32> to vector<2x16x8xf32>
    %75 = vector.extract_strided_slice %16 {offsets = [0, 0, 24], sizes = [2, 16, 8], strides = [1, 1, 1]} : vector<2x16x32xf32> to vector<2x16x8xf32>
    "tpu.trace_start"() <{level = 10 : i32, message = "bqd,bkd->bqk"}> : () -> ()
    %cst_32 = arith.constant dense<0.000000e+00> : vector<2x16x16xf32>
    %76 = tpu.matmul %74, %75, %cst_32 {dimension_numbers = #tpu.dot_dimension_numbers<[2], [2], [1], [1], [0, 0, 0, 1, 1, 1], [0], [0]>} : vector<2x16x8xf32>, vector<2x16x8xf32>, vector<2x16x16xf32> -> vector<2x16x16xf32>
    "tpu.trace_stop"() : () -> ()
    %cst_33 = arith.constant 0.353553385 : f32
    %77 = vector.broadcast %cst_33 : f32 to vector<2x16x16xf32>
    %78 = arith.mulf %76, %77 : vector<2x16x16xf32>
    %cst_34 = arith.constant dense<0xFF800000> : vector<2x16xf32>
    %79 = vector.multi_reduction <maximumf>, %78, %cst_34 [2] : vector<2x16x16xf32> to vector<2x16xf32>
    %80 = vector.shape_cast %79 : vector<2x16xf32> to vector<2x16x1xf32>
    %81 = vector.broadcast %80 : vector<2x16x1xf32> to vector<2x16x16xf32>
    %82 = arith.subf %78, %81 : vector<2x16x16xf32>
    %83 = math.exp %82 : vector<2x16x16xf32>
    %cst_35 = arith.constant dense<0.000000e+00> : vector<2x16xf32>
    %84 = vector.multi_reduction <add>, %83, %cst_35 [2] : vector<2x16x16xf32> to vector<2x16xf32>
    %85 = vector.shape_cast %84 : vector<2x16xf32> to vector<2x16x1xf32>
    %86 = tpu.reciprocal %85 {approx = true} : vector<2x16x1xf32> -> vector<2x16x1xf32>
    %87 = vector.broadcast %86 : vector<2x16x1xf32> to vector<2x16x16xf32>
    %88 = arith.mulf %83, %87 : vector<2x16x16xf32>
    %89 = vector.extract_strided_slice %22 {offsets = [0, 0, 24], sizes = [2, 16, 8], strides = [1, 1, 1]} : vector<2x16x32xf32> to vector<2x16x8xf32>
    "tpu.trace_start"() <{level = 10 : i32, message = "bqk,bkd->bqd"}> : () -> ()
    %cst_36 = arith.constant dense<0.000000e+00> : vector<2x16x8xf32>
    %90 = tpu.matmul %88, %89, %cst_36 {dimension_numbers = #tpu.dot_dimension_numbers<[2], [1], [1], [2], [0, 0, 0, 1, 1, 2], [0], [0]>} : vector<2x16x16xf32>, vector<2x16x8xf32>, vector<2x16x8xf32> -> vector<2x16x8xf32>
    "tpu.trace_stop"() : () -> ()
    %91 = tpu.concatenate %39, %56, %73, %90 in 2 : vector<2x16x8xf32>, vector<2x16x8xf32>, vector<2x16x8xf32>, vector<2x16x8xf32> -> vector<2x16x32xf32>
    %92 = vector.shape_cast %91 : vector<2x16x32xf32> to vector<32x32xf32>
    %c0_37 = arith.constant 0 : index
    %c0_38 = arith.constant 0 : index
    %93 = vector.load %arg9[%c0_37, %c0_38] : memref<32x32xf32, #tpu.memory_space<vmem>>, vector<32x32xf32>
    %cst_39 = arith.constant dense<0.000000e+00> : vector<32x32xf32>
    %94 = tpu.matmul %92, %93, %cst_39 {dimension_numbers = #tpu.dot_dimension_numbers<[1], [0], [0], [1], [0, 0, 1, 1], [], []>} : vector<32x32xf32>, vector<32x32xf32>, vector<32x32xf32> -> vector<32x32xf32>
    %c0_40 = arith.constant 0 : index
    %c0_41 = arith.constant 0 : index
    %95 = vector.load %arg10[%c0_40, %c0_41] : memref<1x32xf32, #tpu.memory_space<vmem>>, vector<1x32xf32>
    %96 = vector.broadcast %95 : vector<1x32xf32> to vector<32x32xf32>
    %97 = arith.addf %94, %96 : vector<32x32xf32>
    %98 = arith.addf %6, %97 : vector<32x32xf32>
    %c0_42 = arith.constant 0 : index
    %c0_43 = arith.constant 0 : index
    %99 = vector.load %arg11[%c0_42, %c0_43] : memref<1x32xf32, #tpu.memory_space<vmem>>, vector<1x32xf32>
    %c0_44 = arith.constant 0 : index
    %c0_45 = arith.constant 0 : index
    %100 = vector.load %arg12[%c0_44, %c0_45] : memref<1x32xf32, #tpu.memory_space<vmem>>, vector<1x32xf32>
    %cst_46 = arith.constant dense<0.000000e+00> : vector<32xf32>
    %101 = vector.multi_reduction <add>, %98, %cst_46 [1] : vector<32x32xf32> to vector<32xf32>
    %102 = vector.shape_cast %101 : vector<32xf32> to vector<32x1xf32>
    %cst_47 = arith.constant 3.200000e+01 : f32
    %103 = vector.broadcast %cst_47 : f32 to vector<32x1xf32>
    %104 = arith.divf %102, %103 : vector<32x1xf32>
    %105 = vector.broadcast %104 : vector<32x1xf32> to vector<32x32xf32>
    %106 = arith.subf %98, %105 : vector<32x32xf32>
    %107 = arith.mulf %106, %106 : vector<32x32xf32>
    %cst_48 = arith.constant dense<0.000000e+00> : vector<32xf32>
    %108 = vector.multi_reduction <add>, %107, %cst_48 [1] : vector<32x32xf32> to vector<32xf32>
    %109 = vector.shape_cast %108 : vector<32xf32> to vector<32x1xf32>
    %cst_49 = arith.constant 3.200000e+01 : f32
    %110 = vector.broadcast %cst_49 : f32 to vector<32x1xf32>
    %111 = arith.divf %109, %110 : vector<32x1xf32>
    %cst_50 = arith.constant 9.99999974E-6 : f32
    %112 = vector.broadcast %cst_50 : f32 to vector<32x1xf32>
    %113 = arith.addf %111, %112 : vector<32x1xf32>
    %114 = math.rsqrt %113 : vector<32x1xf32>
    %115 = vector.broadcast %104 : vector<32x1xf32> to vector<32x32xf32>
    %116 = arith.subf %98, %115 : vector<32x32xf32>
    %117 = vector.broadcast %114 : vector<32x1xf32> to vector<32x32xf32>
    %118 = arith.mulf %116, %117 : vector<32x32xf32>
    %119 = vector.broadcast %99 : vector<1x32xf32> to vector<32x32xf32>
    %120 = arith.mulf %118, %119 : vector<32x32xf32>
    %121 = vector.broadcast %100 : vector<1x32xf32> to vector<32x32xf32>
    %122 = arith.addf %120, %121 : vector<32x32xf32>
    %c0_51 = arith.constant 0 : index
    %c0_52 = arith.constant 0 : index
    %123 = vector.load %arg13[%c0_51, %c0_52] : memref<32x64xf32, #tpu.memory_space<vmem>>, vector<32x64xf32>
    %cst_53 = arith.constant dense<0.000000e+00> : vector<32x64xf32>
    %124 = tpu.matmul %122, %123, %cst_53 {dimension_numbers = #tpu.dot_dimension_numbers<[1], [0], [0], [1], [0, 0, 1, 1], [], []>} : vector<32x32xf32>, vector<32x64xf32>, vector<32x64xf32> -> vector<32x64xf32>
    %c0_54 = arith.constant 0 : index
    %c0_55 = arith.constant 0 : index
    %125 = vector.load %arg14[%c0_54, %c0_55] : memref<1x64xf32, #tpu.memory_space<vmem>>, vector<1x64xf32>
    %126 = vector.broadcast %125 : vector<1x64xf32> to vector<32x64xf32>
    %127 = arith.addf %124, %126 : vector<32x64xf32>
    %cst_56 = arith.constant 0.000000e+00 : f32
    %128 = vector.broadcast %cst_56 : f32 to vector<32x64xf32>
    %129 = arith.maximumf %127, %128 : vector<32x64xf32>
    %c0_57 = arith.constant 0 : index
    %c0_58 = arith.constant 0 : index
    %130 = vector.load %arg15[%c0_57, %c0_58] : memref<64x32xf32, #tpu.memory_space<vmem>>, vector<64x32xf32>
    %cst_59 = arith.constant dense<0.000000e+00> : vector<32x32xf32>
    %131 = tpu.matmul %129, %130, %cst_59 {dimension_numbers = #tpu.dot_dimension_numbers<[1], [0], [0], [1], [0, 0, 1, 1], [], []>} : vector<32x64xf32>, vector<64x32xf32>, vector<32x32xf32> -> vector<32x32xf32>
    %c0_60 = arith.constant 0 : index
    %c0_61 = arith.constant 0 : index
    %132 = vector.load %arg16[%c0_60, %c0_61] : memref<1x32xf32, #tpu.memory_space<vmem>>, vector<1x32xf32>
    %133 = vector.broadcast %132 : vector<1x32xf32> to vector<32x32xf32>
    %134 = arith.addf %131, %133 : vector<32x32xf32>
    %135 = arith.addf %122, %134 : vector<32x32xf32>
    %c0_62 = arith.constant 0 : index
    %c0_63 = arith.constant 0 : index
    %136 = vector.load %arg17[%c0_62, %c0_63] : memref<1x32xf32, #tpu.memory_space<vmem>>, vector<1x32xf32>
    %c0_64 = arith.constant 0 : index
    %c0_65 = arith.constant 0 : index
    %137 = vector.load %arg18[%c0_64, %c0_65] : memref<1x32xf32, #tpu.memory_space<vmem>>, vector<1x32xf32>
    %cst_66 = arith.constant dense<0.000000e+00> : vector<32xf32>
    %138 = vector.multi_reduction <add>, %135, %cst_66 [1] : vector<32x32xf32> to vector<32xf32>
    %139 = vector.shape_cast %138 : vector<32xf32> to vector<32x1xf32>
    %cst_67 = arith.constant 3.200000e+01 : f32
    %140 = vector.broadcast %cst_67 : f32 to vector<32x1xf32>
    %141 = arith.divf %139, %140 : vector<32x1xf32>
    %142 = vector.broadcast %141 : vector<32x1xf32> to vector<32x32xf32>
    %143 = arith.subf %135, %142 : vector<32x32xf32>
    %144 = arith.mulf %143, %143 : vector<32x32xf32>
    %cst_68 = arith.constant dense<0.000000e+00> : vector<32xf32>
    %145 = vector.multi_reduction <add>, %144, %cst_68 [1] : vector<32x32xf32> to vector<32xf32>
    %146 = vector.shape_cast %145 : vector<32xf32> to vector<32x1xf32>
    %cst_69 = arith.constant 3.200000e+01 : f32
    %147 = vector.broadcast %cst_69 : f32 to vector<32x1xf32>
    %148 = arith.divf %146, %147 : vector<32x1xf32>
    %cst_70 = arith.constant 9.99999974E-6 : f32
    %149 = vector.broadcast %cst_70 : f32 to vector<32x1xf32>
    %150 = arith.addf %148, %149 : vector<32x1xf32>
    %151 = math.rsqrt %150 : vector<32x1xf32>
    %152 = vector.broadcast %141 : vector<32x1xf32> to vector<32x32xf32>
    %153 = arith.subf %135, %152 : vector<32x32xf32>
    %154 = vector.broadcast %151 : vector<32x1xf32> to vector<32x32xf32>
    %155 = arith.mulf %153, %154 : vector<32x32xf32>
    %156 = vector.broadcast %136 : vector<1x32xf32> to vector<32x32xf32>
    %157 = arith.mulf %155, %156 : vector<32x32xf32>
    %158 = vector.broadcast %137 : vector<1x32xf32> to vector<32x32xf32>
    %159 = arith.addf %157, %158 : vector<32x32xf32>
    %c0_71 = arith.constant 0 : index
    %c0_72 = arith.constant 0 : index
    %160 = vector.load %arg19[%c0_71, %c0_72] : memref<32x32xf32, #tpu.memory_space<vmem>>, vector<32x32xf32>
    tpu.vector_store %arg19[%c0_71, %c0_72], %159 {strides = array<i32>} : memref<32x32xf32, #tpu.memory_space<vmem>>, vector<32x32xf32>,
    return
  }
  func.func @transform_0(%arg0: i32) -> (i32, i32) {
    %c0_i32 = arith.constant 0 : i32
    %c0_i32_0 = arith.constant 0 : i32
    %c0_i32_1 = arith.constant 0 : i32
    return %c0_i32, %c0_i32_0 : i32, i32
  }
  func.func @transform_1(%arg0: i32) -> (i32, i32) {
    %c0_i32 = arith.constant 0 : i32
    %c0_i32_0 = arith.constant 0 : i32
    %c0_i32_1 = arith.constant 0 : i32
    return %c0_i32, %c0_i32_0 : i32, i32
  }
  func.func @transform_2(%arg0: i32) -> (i32, i32) {
    %c0_i32 = arith.constant 0 : i32
    %c0_i32_0 = arith.constant 0 : i32
    %c0_i32_1 = arith.constant 0 : i32
    return %c0_i32, %c0_i32_0 : i32, i32
  }
  func.func @transform_3(%arg0: i32) -> (i32, i32) {
    %c0_i32 = arith.constant 0 : i32
    %c0_i32_0 = arith.constant 0 : i32
    %c0_i32_1 = arith.constant 0 : i32
    return %c0_i32, %c0_i32_0 : i32, i32
  }
  func.func @transform_4(%arg0: i32) -> (i32, i32) {
    %c0_i32 = arith.constant 0 : i32
    %c0_i32_0 = arith.constant 0 : i32
    %c0_i32_1 = arith.constant 0 : i32
    return %c0_i32, %c0_i32_0 : i32, i32
  }
  func.func @transform_5(%arg0: i32) -> (i32, i32) {
    %c0_i32 = arith.constant 0 : i32
    %c0_i32_0 = arith.constant 0 : i32
    %c0_i32_1 = arith.constant 0 : i32
    return %c0_i32, %c0_i32_0 : i32, i32
  }
  func.func @transform_6(%arg0: i32) -> (i32, i32) {
    %c0_i32 = arith.constant 0 : i32
    %c0_i32_0 = arith.constant 0 : i32
    %c0_i32_1 = arith.constant 0 : i32
    return %c0_i32, %c0_i32_0 : i32, i32
  }
  func.func @transform_7(%arg0: i32) -> (i32, i32) {
    %c0_i32 = arith.constant 0 : i32
    %c0_i32_0 = arith.constant 0 : i32
    %c0_i32_1 = arith.constant 0 : i32
    return %c0_i32, %c0_i32_0 : i32, i32
  }
  func.func @transform_8(%arg0: i32) -> (i32, i32) {
    %c0_i32 = arith.constant 0 : i32
    %c0_i32_0 = arith.constant 0 : i32
    %c0_i32_1 = arith.constant 0 : i32
    return %c0_i32, %c0_i32_0 : i32, i32
  }
  func.func @transform_9(%arg0: i32) -> (i32, i32) {
    %c0_i32 = arith.constant 0 : i32
    %c0_i32_0 = arith.constant 0 : i32
    %c0_i32_1 = arith.constant 0 : i32
    return %c0_i32, %c0_i32_0 : i32, i32
  }
  func.func @transform_10(%arg0: i32) -> (i32, i32) {
    %c0_i32 = arith.constant 0 : i32
    %c0_i32_0 = arith.constant 0 : i32
    %c0_i32_1 = arith.constant 0 : i32
    return %c0_i32, %c0_i32_0 : i32, i32
  }
  func.func @transform_11(%arg0: i32) -> (i32, i32) {
    %c0_i32 = arith.constant 0 : i32
    %c0_i32_0 = arith.constant 0 : i32
    %c0_i32_1 = arith.constant 0 : i32
    return %c0_i32, %c0_i32_0 : i32, i32
  }
  func.func @transform_12(%arg0: i32) -> (i32, i32) {
    %c0_i32 = arith.constant 0 : i32
    %c0_i32_0 = arith.constant 0 : i32
    %c0_i32_1 = arith.constant 0 : i32
    return %c0_i32, %c0_i32_0 : i32, i32
  }
  func.func @transform_13(%arg0: i32) -> (i32, i32) {
    %c0_i32 = arith.constant 0 : i32
    %c0_i32_0 = arith.constant 0 : i32
    %c0_i32_1 = arith.constant 0 : i32
    return %c0_i32, %c0_i32_0 : i32, i32
  }
  func.func @transform_14(%arg0: i32) -> (i32, i32) {
    %c0_i32 = arith.constant 0 : i32
    %c0_i32_0 = arith.constant 0 : i32
    %c0_i32_1 = arith.constant 0 : i32
    return %c0_i32, %c0_i32_0 : i32, i32
  }
  func.func @transform_15(%arg0: i32) -> (i32, i32) {
    %c0_i32 = arith.constant 0 : i32
    %c0_i32_0 = arith.constant 0 : i32
    %c0_i32_1 = arith.constant 0 : i32
    return %c0_i32, %c0_i32_0 : i32, i32
  }
  func.func @transform_16(%arg0: i32) -> (i32, i32) {
    %c0_i32 = arith.constant 0 : i32
    %c0_i32_0 = arith.constant 0 : i32
    %c0_i32_1 = arith.constant 0 : i32
    return %c0_i32, %c0_i32_0 : i32, i32
  }
  func.func @transform_17(%arg0: i32) -> (i32, i32) {
    %c0_i32 = arith.constant 0 : i32
    %c0_i32_0 = arith.constant 0 : i32
    %c0_i32_1 = arith.constant 0 : i32
    return %c0_i32, %c0_i32_0 : i32, i32
  }
  func.func @transform_18(%arg0: i32) -> (i32, i32) {
    %c0_i32 = arith.constant 0 : i32
    %c0_i32_0 = arith.constant 0 : i32
    %c0_i32_1 = arith.constant 0 : i32
    return %c0_i32, %c0_i32_0 : i32, i32
  }
}

</mosaic_0001>

<bundles_post_ra>
// kernel: _lambda_.5
= control target key start
LH: loop header
LB: loop body
LE: loop exit
PB: predicated region body
PF: predicated region fallthrough
CT: control target
= control target key end

     0   :  { %vm282_vm0 = vcmask 1042432   ;;  %vm89_vm1 = vcmask 220160   ;;  %vm735_vm2 = vcmask 130048   ;;  %s1663_s1 = inlined_call_operand.vmem [shape: f32[27,16], index: 1, kind: input, shape index: {}]   ;;  %s1664_s0 = inlined_call_operand.vmem [shape: f32[512,27], index: 0, kind: input, shape index: {}]   ;;  %s1665_s2 = inlined_call_operand.vmem [shape: f32[1,16], index: 2, kind: input, shape index: {}]   ;;  %s1666_s3 = inlined_call_operand.vmem [shape: f32[512,16], index: 3, kind: output, shape index: {}]  }
   0x1   :  { %v81_v0 = vld [vmem:[%s1663_s1 + $0x18] sm:$0x7]  ;;  %v80_v1 = vld [vmem:[%s1663_s1 + $0x10] sm:$0xff]  ;;  %v79_v2 = vld [vmem:[%s1663_s1 + $0x8] sm:$0xff] }
   0x2   :  { %938 = vmatprep.subr.msk.mxu0 %vm282_vm0, %v81_v0  ;;  %1042 = vmatprep.subr.msk.mxu1 %vm282_vm0, %v81_v0  ;;  %v78_v3 = vld [vmem:[%s1663_s1] sm:$0xff]  ;;  %v15_v6 = vld [vmem:[%s1664_s0 + $0x8] sm:$0xff]  ;;  %v16_v8 = vld [vmem:[%s1664_s0 + $0x10] sm:$0xff] }
   0x3   :  { %939 = vmatpush3.msk.msra.mxu0 %vm282_vm0, %v81_v0  ;;  %1046 = vmatpush3.msk.msra.mxu1 %vm282_vm0, %v81_v0  ;;  %v14_v4 = vld [vmem:[%s1664_s0] sm:$0xff]  ;;  %v47_v7 = vld [vmem:[%s1664_s0 + $0x108] sm:$0xff]  ;;  %v48_v9 = vld [vmem:[%s1664_s0 + $0x110] sm:$0xff] }
   0x4   :  { %940 = vmatprep.subr.mxu0 %v80_v1  ;;  %1043 = vmatprep.subr.mxu1 %v80_v1  ;;  %v46_v5 = vld [vmem:[%s1664_s0 + $0x100] sm:$0xff]  ;;  %v17_v10 = vld [vmem:[%s1664_s0 + $0x18] sm:$0xff]  ;;  %v19_v14 = vld [vmem:[%s1664_s0 + $0x28] sm:$0xff] }
   0x5   :  { %941 = vmatpush3.msra.mxu0 %v80_v1  ;;  %1047 = vmatpush3.msra.mxu1 %v80_v1  ;;  %v49_v11 = vld [vmem:[%s1664_s0 + $0x118] sm:$0xff]  ;;  %v18_v12 = vld [vmem:[%s1664_s0 + $0x20] sm:$0xff]  ;;  %v51_v15 = vld [vmem:[%s1664_s0 + $0x128] sm:$0xff] }
   0x6   :  { %942 = vmatprep.subr.mxu0 %v79_v2  ;;  %1044 = vmatprep.subr.mxu1 %v79_v2  ;;  %v50_v13 = vld [vmem:[%s1664_s0 + $0x120] sm:$0xff]  ;;  %v20_v16 = vld [vmem:[%s1664_s0 + $0x30] sm:$0xff]  ;;  %v21_v18 = vld [vmem:[%s1664_s0 + $0x38] sm:$0xff] }
   0x7   :  { %943 = vmatpush3.msra.mxu0 %v79_v2  ;;  %1048 = vmatpush3.msra.mxu1 %v79_v2  ;;  %v52_v17 = vld [vmem:[%s1664_s0 + $0x130] sm:$0xff]  ;;  %v53_v19 = vld [vmem:[%s1664_s0 + $0x138] sm:$0xff]  ;;  %v22_v20 = vld [vmem:[%s1664_s0 + $0x40] sm:$0xff] }
   0x8   :  { %944 = vmatprep.subr.mxu0 %v78_v3  ;;  %1045 = vmatprep.subr.mxu1 %v78_v3  ;;  %v54_v21 = vld [vmem:[%s1664_s0 + $0x140] sm:$0xff]  ;;  %v23_v22 = vld [vmem:[%s1664_s0 + $0x48] sm:$0xff]  ;;  %v24_v24 = vld [vmem:[%s1664_s0 + $0x50] sm:$0xff] }
   0x9   :  { %945 = vmatpush3.msra.mxu0 %v78_v3  ;;  %1049 = vmatpush3.msra.mxu1 %v78_v3  ;;  %v55_v23 = vld [vmem:[%s1664_s0 + $0x148] sm:$0xff]  ;;  %v56_v25 = vld [vmem:[%s1664_s0 + $0x150] sm:$0xff]  ;;  %v25_v26 = vld [vmem:[%s1664_s0 + $0x58] sm:$0xff] }
   0xa   :  { %946 = vmatprep.mubr.msk.f32.mxu0 %vm89_vm1, %v14_v4  ;;  %994 = vmatprep.mubr.msk.f32.mxu1 %vm89_vm1, %v46_v5  ;;  %v57_v27 = vld [vmem:[%s1664_s0 + $0x158] sm:$0xff]  ;;  %v26_v28 = vld [vmem:[%s1664_s0 + $0x60] sm:$0xff]  ;;  %v27_v30 = vld [vmem:[%s1664_s0 + $0x68] sm:$0xff] }
   0xb   :  { %947 = vmatmul.mubr.msk.f32.vlgmr.msra.gmra.mxu0 %vm89_vm1, %v15_v6  ;;  %995 = vmatmul.mubr.msk.f32.vlgmr.msra.gmra.mxu1 %vm89_vm1, %v47_v7  ;;  %v58_v29 = vld [vmem:[%s1664_s0 + $0x160] sm:$0xff]  ;;  %v59_v31 = vld [vmem:[%s1664_s0 + $0x168] sm:$0xff]  ;;  %v28_v32 = vld [vmem:[%s1664_s0 + $0x70] sm:$0xff] }
   0xc   :  { %949 = vmatprep.mubr.msk.f32.mxu0 %vm89_vm1, %v16_v8  ;;  %997 = vmatprep.mubr.msk.f32.mxu1 %vm89_vm1, %v48_v9  ;;  %v60_v33 = vld [vmem:[%s1664_s0 + $0x170] sm:$0xff]  ;;  %v29_v34 = vld [vmem:[%s1664_s0 + $0x78] sm:$0xff]  ;;  %v30_v36 = vld [vmem:[%s1664_s0 + $0x80] sm:$0xff] }
   0xd   :  { %v61_v35 = vld [vmem:[%s1664_s0 + $0x178] sm:$0xff]  ;;  %v62_v37 = vld [vmem:[%s1664_s0 + $0x180] sm:$0xff]  ;;  %v31_v38 = vld [vmem:[%s1664_s0 + $0x88] sm:$0xff] }
   0xe   :  { %v63_v39 = vld [vmem:[%s1664_s0 + $0x188] sm:$0xff]  ;;  %v32_v40 = vld [vmem:[%s1664_s0 + $0x90] sm:$0xff]  ;;  %v33_v42 = vld [vmem:[%s1664_s0 + $0x98] sm:$0xff] }
   0xf   :  { %950 = vmatmul.mubr.msk.f32.gmra.mxu0 %vm89_vm1, %v17_v10  ;;  %998 = vmatmul.mubr.msk.f32.gmra.mxu1 %vm89_vm1, %v49_v11  ;;  %v64_v41 = vld [vmem:[%s1664_s0 + $0x190] sm:$0xff]  ;;  %v65_v43 = vld [vmem:[%s1664_s0 + $0x198] sm:$0xff]  ;;  %v34_v44 = vld [vmem:[%s1664_s0 + $0xa0] sm:$0xff] }
  0x10   :  { %952 = vmatprep.mubr.msk.f32.mxu0 %vm89_vm1, %v18_v12  ;;  %1000 = vmatprep.mubr.msk.f32.mxu1 %vm89_vm1, %v50_v13  ;;  %v66_v45 = vld [vmem:[%s1664_s0 + $0x1a0] sm:$0xff]  ;;  %v35_v46 = vld [vmem:[%s1664_s0 + $0xa8] sm:$0xff]  ;;  %v36_v48 = vld [vmem:[%s1664_s0 + $0xb0] sm:$0xff] }
  0x11   :  { %v67_v47 = vld [vmem:[%s1664_s0 + $0x1a8] sm:$0xff]  ;;  %v68_v49 = vld [vmem:[%s1664_s0 + $0x1b0] sm:$0xff]  ;;  %v37_v50 = vld [vmem:[%s1664_s0 + $0xb8] sm:$0xff] }
  0x12   :  { %v69_v51 = vld [vmem:[%s1664_s0 + $0x1b8] sm:$0xff]  ;;  %v38_v52 = vld [vmem:[%s1664_s0 + $0xc0] sm:$0xff]  ;;  %v39_v54 = vld [vmem:[%s1664_s0 + $0xc8] sm:$0xff] }
  0x13   :  { %953 = vmatmul.mubr.msk.f32.gmra.mxu0 %vm89_vm1, %v19_v14  ;;  %1001 = vmatmul.mubr.msk.f32.gmra.mxu1 %vm89_vm1, %v51_v15  ;;  %v70_v53 = vld [vmem:[%s1664_s0 + $0x1c0] sm:$0xff]  ;;  %v71_v55 = vld [vmem:[%s1664_s0 + $0x1c8] sm:$0xff]  ;;  %v40_v56 = vld [vmem:[%s1664_s0 + $0xd0] sm:$0xff] }
  0x14   :  { %955 = vmatprep.mubr.msk.f32.mxu0 %vm89_vm1, %v20_v16  ;;  %1003 = vmatprep.mubr.msk.f32.mxu1 %vm89_vm1, %v52_v17  ;;  %v72_v57 = vld [vmem:[%s1664_s0 + $0x1d0] sm:$0xff]  ;;  %v41_v58 = vld [vmem:[%s1664_s0 + $0xd8] sm:$0xff]  ;;  %v42_v60 = vld [vmem:[%s1664_s0 + $0xe0] sm:$0xff] }
  0x15   :  { %v73_v59 = vld [vmem:[%s1664_s0 + $0x1d8] sm:$0xff]  ;;  %v74_v61 = vld [vmem:[%s1664_s0 + $0x1e0] sm:$0xff]  ;;  %v43_v62 = vld [vmem:[%s1664_s0 + $0xe8] sm:$0xff] }
  0x16   :  { %v75_v63 = vld [vmem:[%s1664_s0 + $0x1e8] sm:$0xff]  ;;  %v44_v0 = vld [vmem:[%s1664_s0 + $0xf0] sm:$0xff]  ;;  %v45_v2 = vld [vmem:[%s1664_s0 + $0xf8] sm:$0xff] }
  0x17   :  { %956 = vmatmul.mubr.msk.f32.gmra.mxu0 %vm89_vm1, %v21_v18  ;;  %1004 = vmatmul.mubr.msk.f32.gmra.mxu1 %vm89_vm1, %v53_v19  ;;  %v76_v1 = vld [vmem:[%s1664_s0 + $0x1f0] sm:$0xff]  ;;  %v77_v3 = vld [vmem:[%s1664_s0 + $0x1f8] sm:$0xff]  ;;  %v1341_v4 = vld [vmem:[%s1665_s2] ss:$0 sm:$0xff] }
  0x18   :  { %958 = vmatprep.mubr.msk.f32.mxu0 %vm89_vm1, %v22_v20  ;;  %1006 = vmatprep.mubr.msk.f32.mxu1 %vm89_vm1, %v54_v21 }
  0x1b   :  { %959 = vmatmul.mubr.msk.f32.gmra.mxu0 %vm89_vm1, %v23_v22  ;;  %1007 = vmatmul.mubr.msk.f32.gmra.mxu1 %vm89_vm1, %v55_v23 }
  0x1c   :  { %961 = vmatprep.mubr.msk.f32.mxu0 %vm89_vm1, %v24_v24  ;;  %1009 = vmatprep.mubr.msk.f32.mxu1 %vm89_vm1, %v56_v25 }
  0x1f   :  { %962 = vmatmul.mubr.msk.f32.gmra.mxu0 %vm89_vm1, %v25_v26  ;;  %1010 = vmatmul.mubr.msk.f32.gmra.mxu1 %vm89_vm1, %v57_v27 }
  0x20   :  { %964 = vmatprep.mubr.msk.f32.mxu0 %vm89_vm1, %v26_v28  ;;  %1012 = vmatprep.mubr.msk.f32.mxu1 %vm89_vm1, %v58_v29 }
  0x23   :  { %965 = vmatmul.mubr.msk.f32.gmra.mxu0 %vm89_vm1, %v27_v30  ;;  %1013 = vmatmul.mubr.msk.f32.gmra.mxu1 %vm89_vm1, %v59_v31 }
  0x24   :  { %967 = vmatprep.mubr.msk.f32.mxu0 %vm89_vm1, %v28_v32  ;;  %1015 = vmatprep.mubr.msk.f32.mxu1 %vm89_vm1, %v60_v33 }
  0x27   :  { %968 = vmatmul.mubr.msk.f32.gmra.mxu0 %vm89_vm1, %v29_v34  ;;  %1016 = vmatmul.mubr.msk.f32.gmra.mxu1 %vm89_vm1, %v61_v35 }
  0x28   :  { %970 = vmatprep.mubr.msk.f32.mxu0 %vm89_vm1, %v30_v36  ;;  %1018 = vmatprep.mubr.msk.f32.mxu1 %vm89_vm1, %v62_v37 }
  0x2b   :  { %971 = vmatmul.mubr.msk.f32.gmra.mxu0 %vm89_vm1, %v31_v38  ;;  %1019 = vmatmul.mubr.msk.f32.gmra.mxu1 %vm89_vm1, %v63_v39 }
  0x2c   :  { %973 = vmatprep.mubr.msk.f32.mxu0 %vm89_vm1, %v32_v40  ;;  %1021 = vmatprep.mubr.msk.f32.mxu1 %vm89_vm1, %v64_v41 }
  0x2f   :  { %974 = vmatmul.mubr.msk.f32.gmra.mxu0 %vm89_vm1, %v33_v42  ;;  %1022 = vmatmul.mubr.msk.f32.gmra.mxu1 %vm89_vm1, %v65_v43 }
  0x30   :  { %976 = vmatprep.mubr.msk.f32.mxu0 %vm89_vm1, %v34_v44  ;;  %1024 = vmatprep.mubr.msk.f32.mxu1 %vm89_vm1, %v66_v45 }
  0x33   :  { %977 = vmatmul.mubr.msk.f32.gmra.mxu0 %vm89_vm1, %v35_v46  ;;  %1025 = vmatmul.mubr.msk.f32.gmra.mxu1 %vm89_vm1, %v67_v47 }
  0x34   :  { %979 = vmatprep.mubr.msk.f32.mxu0 %vm89_vm1, %v36_v48  ;;  %1027 = vmatprep.mubr.msk.f32.mxu1 %vm89_vm1, %v68_v49 }
  0x37   :  { %980 = vmatmul.mubr.msk.f32.gmra.mxu0 %vm89_vm1, %v37_v50  ;;  %1028 = vmatmul.mubr.msk.f32.gmra.mxu1 %vm89_vm1, %v69_v51 }
  0x38   :  { %982 = vmatprep.mubr.msk.f32.mxu0 %vm89_vm1, %v38_v52  ;;  %1030 = vmatprep.mubr.msk.f32.mxu1 %vm89_vm1, %v70_v53 }
  0x3b   :  { %983 = vmatmul.mubr.msk.f32.gmra.mxu0 %vm89_vm1, %v39_v54  ;;  %1031 = vmatmul.mubr.msk.f32.gmra.mxu1 %vm89_vm1, %v71_v55 }
  0x3c   :  { %985 = vmatprep.mubr.msk.f32.mxu0 %vm89_vm1, %v40_v56  ;;  %1033 = vmatprep.mubr.msk.f32.mxu1 %vm89_vm1, %v72_v57 }
  0x3f   :  { %986 = vmatmul.mubr.msk.f32.gmra.mxu0 %vm89_vm1, %v41_v58  ;;  %1034 = vmatmul.mubr.msk.f32.gmra.mxu1 %vm89_vm1, %v73_v59 }
  0x40   :  { %988 = vmatprep.mubr.msk.f32.mxu0 %vm89_vm1, %v42_v60  ;;  %1036 = vmatprep.mubr.msk.f32.mxu1 %vm89_vm1, %v74_v61 }
  0x43   :  { %989 = vmatmul.mubr.msk.f32.gmra.mxu0 %vm89_vm1, %v43_v62  ;;  %1037 = vmatmul.mubr.msk.f32.gmra.mxu1 %vm89_vm1, %v75_v63 }
  0x44   :  { %991 = vmatprep.mubr.msk.f32.mxu0 %vm89_vm1, %v44_v0  ;;  %1039 = vmatprep.mubr.msk.f32.mxu1 %vm89_vm1, %v76_v1 }
  0x47   :  { %992 = vmatmul.mubr.msk.f32.gmra.mxu0 %vm89_vm1, %v45_v2  ;;  %1040 = vmatmul.mubr.msk.f32.gmra.mxu1 %vm89_vm1, %v77_v3 }
  0xcb   :  { %v948_v5 = vpop.f32.mrf.mxu0  ;;  %v996_v6 = vpop.f32.mrf.mxu1 }
  0xcc   :  { %v358_v7 = vadd.f32 %v948_v5, %v1341_v4  ;;  %v518_v8 = vadd.f32 %v996_v6, %v1341_v4 }
  0xcd   :  { %v352_v9 = vpop.f32.mrf.mxu0  ;;  %v512_v10 = vpop.f32.mrf.mxu1 }
  0xce   :  { %v672_v11 = vmax.f32 %v358_v7, 0.0  ;;  %v704_v12 = vmax.f32 %v518_v8, 0.0  ;;  %v353_v13 = vadd.f32 %v1341_v4, %v352_v9  ;;  %v513_v14 = vadd.f32 %v1341_v4, %v512_v10 }
  0xcf   :  { %v951_v15 = vpop.f32.mrf.mxu0  ;;  %v999_v16 = vpop.f32.mrf.mxu1 }
  0xd0   :  { %737 = vst.msk [vmem:[%s1666_s3 + $0x8] sm:$0xff] %vm735_vm2, %v672_v11  ;;  %769 = vst.msk [vmem:[%s1666_s3 + $0x108] sm:$0xff] %vm735_vm2, %v704_v12  ;;  %v671_v17 = vmax.f32 %v353_v13, 0.0  ;;  %v703_v18 = vmax.f32 %v513_v14, 0.0  ;;  %v368_v19 = vadd.f32 %v951_v15, %v1341_v4  ;;  %v528_v20 = vadd.f32 %v999_v16, %v1341_v4 }
  0xd1   :  { %v362_v21 = vpop.f32.mrf.mxu0  ;;  %v522_v22 = vpop.f32.mrf.mxu1 }
  0xd2   :  { %736 = vst.msk [vmem:[%s1666_s3] sm:$0xff] %vm735_vm2, %v671_v17  ;;  %768 = vst.msk [vmem:[%s1666_s3 + $0x100] sm:$0xff] %vm735_vm2, %v703_v18  ;;  %v674_v23 = vmax.f32 %v368_v19, 0.0  ;;  %v706_v24 = vmax.f32 %v528_v20, 0.0  ;;  %v363_v25 = vadd.f32 %v1341_v4, %v362_v21  ;;  %v523_v26 = vadd.f32 %v1341_v4, %v522_v22 }
  0xd3   :  { %v954_v27 = vpop.f32.mrf.mxu0  ;;  %v1002_v28 = vpop.f32.mrf.mxu1 }
  0xd4   :  { %739 = vst.msk [vmem:[%s1666_s3 + $0x18] sm:$0xff] %vm735_vm2, %v674_v23  ;;  %771 = vst.msk [vmem:[%s1666_s3 + $0x118] sm:$0xff] %vm735_vm2, %v706_v24  ;;  %v673_v29 = vmax.f32 %v363_v25, 0.0  ;;  %v705_v30 = vmax.f32 %v523_v26, 0.0  ;;  %v378_v31 = vadd.f32 %v954_v27, %v1341_v4  ;;  %v538_v32 = vadd.f32 %v1002_v28, %v1341_v4 }
  0xd5   :  { %v372_v33 = vpop.f32.mrf.mxu0  ;;  %v532_v34 = vpop.f32.mrf.mxu1 }
  0xd6   :  { %738 = vst.msk [vmem:[%s1666_s3 + $0x10] sm:$0xff] %vm735_vm2, %v673_v29  ;;  %770 = vst.msk [vmem:[%s1666_s3 + $0x110] sm:$0xff] %vm735_vm2, %v705_v30  ;;  %v676_v35 = vmax.f32 %v378_v31, 0.0  ;;  %v708_v36 = vmax.f32 %v538_v32, 0.0  ;;  %v373_v37 = vadd.f32 %v1341_v4, %v372_v33  ;;  %v533_v38 = vadd.f32 %v1341_v4, %v532_v34 }
  0xd7   :  { %v957_v39 = vpop.f32.mrf.mxu0  ;;  %v1005_v40 = vpop.f32.mrf.mxu1 }
  0xd8   :  { %741 = vst.msk [vmem:[%s1666_s3 + $0x28] sm:$0xff] %vm735_vm2, %v676_v35  ;;  %773 = vst.msk [vmem:[%s1666_s3 + $0x128] sm:$0xff] %vm735_vm2, %v708_v36  ;;  %v675_v41 = vmax.f32 %v373_v37, 0.0  ;;  %v707_v42 = vmax.f32 %v533_v38, 0.0  ;;  %v388_v43 = vadd.f32 %v957_v39, %v1341_v4  ;;  %v548_v44 = vadd.f32 %v1005_v40, %v1341_v4 }
  0xd9   :  { %v382_v45 = vpop.f32.mrf.mxu0  ;;  %v542_v46 = vpop.f32.mrf.mxu1 }
  0xda   :  { %740 = vst.msk [vmem:[%s1666_s3 + $0x20] sm:$0xff] %vm735_vm2, %v675_v41  ;;  %772 = vst.msk [vmem:[%s1666_s3 + $0x120] sm:$0xff] %vm735_vm2, %v707_v42  ;;  %v678_v47 = vmax.f32 %v388_v43, 0.0  ;;  %v710_v48 = vmax.f32 %v548_v44, 0.0  ;;  %v383_v49 = vadd.f32 %v1341_v4, %v382_v45  ;;  %v543_v50 = vadd.f32 %v1341_v4, %v542_v46 }
  0xdb   :  { %v960_v51 = vpop.f32.mrf.mxu0  ;;  %v1008_v52 = vpop.f32.mrf.mxu1 }
  0xdc   :  { %743 = vst.msk [vmem:[%s1666_s3 + $0x38] sm:$0xff] %vm735_vm2, %v678_v47  ;;  %775 = vst.msk [vmem:[%s1666_s3 + $0x138] sm:$0xff] %vm735_vm2, %v710_v48  ;;  %v677_v53 = vmax.f32 %v383_v49, 0.0  ;;  %v709_v54 = vmax.f32 %v543_v50, 0.0  ;;  %v398_v55 = vadd.f32 %v960_v51, %v1341_v4  ;;  %v558_v56 = vadd.f32 %v1008_v52, %v1341_v4 }
  0xdd   :  { %v392_v57 = vpop.f32.mrf.mxu0  ;;  %v552_v58 = vpop.f32.mrf.mxu1 }
  0xde   :  { %742 = vst.msk [vmem:[%s1666_s3 + $0x30] sm:$0xff] %vm735_vm2, %v677_v53  ;;  %774 = vst.msk [vmem:[%s1666_s3 + $0x130] sm:$0xff] %vm735_vm2, %v709_v54  ;;  %v680_v59 = vmax.f32 %v398_v55, 0.0  ;;  %v712_v60 = vmax.f32 %v558_v56, 0.0  ;;  %v393_v61 = vadd.f32 %v1341_v4, %v392_v57  ;;  %v553_v62 = vadd.f32 %v1341_v4, %v552_v58 }
  0xdf   :  { %v963_v63 = vpop.f32.mrf.mxu0  ;;  %v1011_v0 = vpop.f32.mrf.mxu1 }
  0xe0   :  { %745 = vst.msk [vmem:[%s1666_s3 + $0x48] sm:$0xff] %vm735_vm2, %v680_v59  ;;  %777 = vst.msk [vmem:[%s1666_s3 + $0x148] sm:$0xff] %vm735_vm2, %v712_v60  ;;  %v679_v1 = vmax.f32 %v393_v61, 0.0  ;;  %v711_v2 = vmax.f32 %v553_v62, 0.0  ;;  %v408_v3 = vadd.f32 %v963_v63, %v1341_v4  ;;  %v568_v5 = vadd.f32 %v1011_v0, %v1341_v4 }
  0xe1   :  { %v402_v6 = vpop.f32.mrf.mxu0  ;;  %v562_v7 = vpop.f32.mrf.mxu1 }
  0xe2   :  { %744 = vst.msk [vmem:[%s1666_s3 + $0x40] sm:$0xff] %vm735_vm2, %v679_v1  ;;  %776 = vst.msk [vmem:[%s1666_s3 + $0x140] sm:$0xff] %vm735_vm2, %v711_v2  ;;  %v682_v8 = vmax.f32 %v408_v3, 0.0  ;;  %v714_v9 = vmax.f32 %v568_v5, 0.0  ;;  %v403_v10 = vadd.f32 %v1341_v4, %v402_v6  ;;  %v563_v11 = vadd.f32 %v1341_v4, %v562_v7 }
  0xe3   :  { %v966_v12 = vpop.f32.mrf.mxu0  ;;  %v1014_v13 = vpop.f32.mrf.mxu1 }
  0xe4   :  { %747 = vst.msk [vmem:[%s1666_s3 + $0x58] sm:$0xff] %vm735_vm2, %v682_v8  ;;  %779 = vst.msk [vmem:[%s1666_s3 + $0x158] sm:$0xff] %vm735_vm2, %v714_v9  ;;  %v681_v14 = vmax.f32 %v403_v10, 0.0  ;;  %v713_v15 = vmax.f32 %v563_v11, 0.0  ;;  %v418_v16 = vadd.f32 %v966_v12, %v1341_v4  ;;  %v578_v17 = vadd.f32 %v1014_v13, %v1341_v4 }
  0xe5   :  { %v412_v18 = vpop.f32.mrf.mxu0  ;;  %v572_v19 = vpop.f32.mrf.mxu1 }
  0xe6   :  { %746 = vst.msk [vmem:[%s1666_s3 + $0x50] sm:$0xff] %vm735_vm2, %v681_v14  ;;  %778 = vst.msk [vmem:[%s1666_s3 + $0x150] sm:$0xff] %vm735_vm2, %v713_v15  ;;  %v684_v20 = vmax.f32 %v418_v16, 0.0  ;;  %v716_v21 = vmax.f32 %v578_v17, 0.0  ;;  %v413_v22 = vadd.f32 %v1341_v4, %v412_v18  ;;  %v573_v23 = vadd.f32 %v1341_v4, %v572_v19 }
  0xe7   :  { %v969_v24 = vpop.f32.mrf.mxu0  ;;  %v1017_v25 = vpop.f32.mrf.mxu1 }
  0xe8   :  { %749 = vst.msk [vmem:[%s1666_s3 + $0x68] sm:$0xff] %vm735_vm2, %v684_v20  ;;  %781 = vst.msk [vmem:[%s1666_s3 + $0x168] sm:$0xff] %vm735_vm2, %v716_v21  ;;  %v683_v26 = vmax.f32 %v413_v22, 0.0  ;;  %v715_v27 = vmax.f32 %v573_v23, 0.0  ;;  %v428_v28 = vadd.f32 %v969_v24, %v1341_v4  ;;  %v588_v29 = vadd.f32 %v1017_v25, %v1341_v4 }
  0xe9   :  { %v422_v30 = vpop.f32.mrf.mxu0  ;;  %v582_v31 = vpop.f32.mrf.mxu1 }
  0xea   :  { %748 = vst.msk [vmem:[%s1666_s3 + $0x60] sm:$0xff] %vm735_vm2, %v683_v26  ;;  %780 = vst.msk [vmem:[%s1666_s3 + $0x160] sm:$0xff] %vm735_vm2, %v715_v27  ;;  %v686_v32 = vmax.f32 %v428_v28, 0.0  ;;  %v718_v33 = vmax.f32 %v588_v29, 0.0  ;;  %v423_v34 = vadd.f32 %v1341_v4, %v422_v30  ;;  %v583_v35 = vadd.f32 %v1341_v4, %v582_v31 }
  0xeb   :  { %v972_v36 = vpop.f32.mrf.mxu0  ;;  %v1020_v37 = vpop.f32.mrf.mxu1 }
  0xec   :  { %751 = vst.msk [vmem:[%s1666_s3 + $0x78] sm:$0xff] %vm735_vm2, %v686_v32  ;;  %783 = vst.msk [vmem:[%s1666_s3 + $0x178] sm:$0xff] %vm735_vm2, %v718_v33  ;;  %v685_v38 = vmax.f32 %v423_v34, 0.0  ;;  %v717_v39 = vmax.f32 %v583_v35, 0.0  ;;  %v438_v40 = vadd.f32 %v972_v36, %v1341_v4  ;;  %v598_v41 = vadd.f32 %v1020_v37, %v1341_v4 }
  0xed   :  { %v432_v42 = vpop.f32.mrf.mxu0  ;;  %v592_v43 = vpop.f32.mrf.mxu1 }
  0xee   :  { %750 = vst.msk [vmem:[%s1666_s3 + $0x70] sm:$0xff] %vm735_vm2, %v685_v38  ;;  %782 = vst.msk [vmem:[%s1666_s3 + $0x170] sm:$0xff] %vm735_vm2, %v717_v39  ;;  %v688_v44 = vmax.f32 %v438_v40, 0.0  ;;  %v720_v45 = vmax.f32 %v598_v41, 0.0  ;;  %v433_v46 = vadd.f32 %v1341_v4, %v432_v42  ;;  %v593_v47 = vadd.f32 %v1341_v4, %v592_v43 }
  0xef   :  { %v975_v48 = vpop.f32.mrf.mxu0  ;;  %v1023_v49 = vpop.f32.mrf.mxu1 }
  0xf0   :  { %753 = vst.msk [vmem:[%s1666_s3 + $0x88] sm:$0xff] %vm735_vm2, %v688_v44  ;;  %785 = vst.msk [vmem:[%s1666_s3 + $0x188] sm:$0xff] %vm735_vm2, %v720_v45  ;;  %v687_v50 = vmax.f32 %v433_v46, 0.0  ;;  %v719_v51 = vmax.f32 %v593_v47, 0.0  ;;  %v448_v52 = vadd.f32 %v975_v48, %v1341_v4  ;;  %v608_v53 = vadd.f32 %v1023_v49, %v1341_v4 }
  0xf1   :  { %v442_v54 = vpop.f32.mrf.mxu0  ;;  %v602_v55 = vpop.f32.mrf.mxu1 }
  0xf2   :  { %752 = vst.msk [vmem:[%s1666_s3 + $0x80] sm:$0xff] %vm735_vm2, %v687_v50  ;;  %784 = vst.msk [vmem:[%s1666_s3 + $0x180] sm:$0xff] %vm735_vm2, %v719_v51  ;;  %v690_v56 = vmax.f32 %v448_v52, 0.0  ;;  %v722_v57 = vmax.f32 %v608_v53, 0.0  ;;  %v443_v58 = vadd.f32 %v1341_v4, %v442_v54  ;;  %v603_v59 = vadd.f32 %v1341_v4, %v602_v55 }
  0xf3   :  { %v978_v60 = vpop.f32.mrf.mxu0  ;;  %v1026_v61 = vpop.f32.mrf.mxu1 }
  0xf4   :  { %755 = vst.msk [vmem:[%s1666_s3 + $0x98] sm:$0xff] %vm735_vm2, %v690_v56  ;;  %787 = vst.msk [vmem:[%s1666_s3 + $0x198] sm:$0xff] %vm735_vm2, %v722_v57  ;;  %v689_v62 = vmax.f32 %v443_v58, 0.0  ;;  %v721_v63 = vmax.f32 %v603_v59, 0.0  ;;  %v458_v0 = vadd.f32 %v978_v60, %v1341_v4  ;;  %v618_v1 = vadd.f32 %v1026_v61, %v1341_v4 }
  0xf5   :  { %v452_v2 = vpop.f32.mrf.mxu0  ;;  %v612_v3 = vpop.f32.mrf.mxu1 }
  0xf6   :  { %754 = vst.msk [vmem:[%s1666_s3 + $0x90] sm:$0xff] %vm735_vm2, %v689_v62  ;;  %786 = vst.msk [vmem:[%s1666_s3 + $0x190] sm:$0xff] %vm735_vm2, %v721_v63  ;;  %v692_v5 = vmax.f32 %v458_v0, 0.0  ;;  %v724_v6 = vmax.f32 %v618_v1, 0.0  ;;  %v453_v7 = vadd.f32 %v1341_v4, %v452_v2  ;;  %v613_v8 = vadd.f32 %v1341_v4, %v612_v3 }
  0xf7   :  { %v981_v9 = vpop.f32.mrf.mxu0  ;;  %v1029_v10 = vpop.f32.mrf.mxu1 }
  0xf8   :  { %757 = vst.msk [vmem:[%s1666_s3 + $0xa8] sm:$0xff] %vm735_vm2, %v692_v5  ;;  %789 = vst.msk [vmem:[%s1666_s3 + $0x1a8] sm:$0xff] %vm735_vm2, %v724_v6  ;;  %v691_v11 = vmax.f32 %v453_v7, 0.0  ;;  %v723_v12 = vmax.f32 %v613_v8, 0.0  ;;  %v468_v13 = vadd.f32 %v981_v9, %v1341_v4  ;;  %v628_v14 = vadd.f32 %v1029_v10, %v1341_v4 }
  0xf9   :  { %v462_v15 = vpop.f32.mrf.mxu0  ;;  %v622_v16 = vpop.f32.mrf.mxu1 }
  0xfa   :  { %756 = vst.msk [vmem:[%s1666_s3 + $0xa0] sm:$0xff] %vm735_vm2, %v691_v11  ;;  %788 = vst.msk [vmem:[%s1666_s3 + $0x1a0] sm:$0xff] %vm735_vm2, %v723_v12  ;;  %v694_v17 = vmax.f32 %v468_v13, 0.0  ;;  %v726_v18 = vmax.f32 %v628_v14, 0.0  ;;  %v463_v19 = vadd.f32 %v1341_v4, %v462_v15  ;;  %v623_v20 = vadd.f32 %v1341_v4, %v622_v16 }
  0xfb   :  { %v984_v21 = vpop.f32.mrf.mxu0  ;;  %v1032_v22 = vpop.f32.mrf.mxu1 }
  0xfc   :  { %759 = vst.msk [vmem:[%s1666_s3 + $0xb8] sm:$0xff] %vm735_vm2, %v694_v17  ;;  %791 = vst.msk [vmem:[%s1666_s3 + $0x1b8] sm:$0xff] %vm735_vm2, %v726_v18  ;;  %v693_v23 = vmax.f32 %v463_v19, 0.0  ;;  %v725_v24 = vmax.f32 %v623_v20, 0.0  ;;  %v478_v25 = vadd.f32 %v984_v21, %v1341_v4  ;;  %v638_v26 = vadd.f32 %v1032_v22, %v1341_v4 }
  0xfd   :  { %v472_v27 = vpop.f32.mrf.mxu0  ;;  %v632_v28 = vpop.f32.mrf.mxu1 }
  0xfe   :  { %758 = vst.msk [vmem:[%s1666_s3 + $0xb0] sm:$0xff] %vm735_vm2, %v693_v23  ;;  %790 = vst.msk [vmem:[%s1666_s3 + $0x1b0] sm:$0xff] %vm735_vm2, %v725_v24  ;;  %v696_v29 = vmax.f32 %v478_v25, 0.0  ;;  %v728_v30 = vmax.f32 %v638_v26, 0.0  ;;  %v473_v31 = vadd.f32 %v1341_v4, %v472_v27  ;;  %v633_v32 = vadd.f32 %v1341_v4, %v632_v28 }
  0xff   :  { %v987_v33 = vpop.f32.mrf.mxu0  ;;  %v1035_v34 = vpop.f32.mrf.mxu1 }
 0x100   :  { %761 = vst.msk [vmem:[%s1666_s3 + $0xc8] sm:$0xff] %vm735_vm2, %v696_v29  ;;  %793 = vst.msk [vmem:[%s1666_s3 + $0x1c8] sm:$0xff] %vm735_vm2, %v728_v30  ;;  %v695_v35 = vmax.f32 %v473_v31, 0.0  ;;  %v727_v36 = vmax.f32 %v633_v32, 0.0  ;;  %v488_v37 = vadd.f32 %v987_v33, %v1341_v4  ;;  %v648_v38 = vadd.f32 %v1035_v34, %v1341_v4 }
 0x101   :  { %v482_v39 = vpop.f32.mrf.mxu0  ;;  %v642_v40 = vpop.f32.mrf.mxu1 }
 0x102   :  { %760 = vst.msk [vmem:[%s1666_s3 + $0xc0] sm:$0xff] %vm735_vm2, %v695_v35  ;;  %792 = vst.msk [vmem:[%s1666_s3 + $0x1c0] sm:$0xff] %vm735_vm2, %v727_v36  ;;  %v698_v41 = vmax.f32 %v488_v37, 0.0  ;;  %v730_v42 = vmax.f32 %v648_v38, 0.0  ;;  %v483_v43 = vadd.f32 %v1341_v4, %v482_v39  ;;  %v643_v44 = vadd.f32 %v1341_v4, %v642_v40 }
 0x103   :  { %v990_v45 = vpop.f32.mrf.mxu0  ;;  %v1038_v46 = vpop.f32.mrf.mxu1 }
 0x104   :  { %763 = vst.msk [vmem:[%s1666_s3 + $0xd8] sm:$0xff] %vm735_vm2, %v698_v41  ;;  %795 = vst.msk [vmem:[%s1666_s3 + $0x1d8] sm:$0xff] %vm735_vm2, %v730_v42  ;;  %v697_v47 = vmax.f32 %v483_v43, 0.0  ;;  %v729_v48 = vmax.f32 %v643_v44, 0.0  ;;  %v498_v49 = vadd.f32 %v990_v45, %v1341_v4  ;;  %v658_v50 = vadd.f32 %v1038_v46, %v1341_v4 }
 0x105   :  { %v492_v51 = vpop.f32.mrf.mxu0  ;;  %v652_v52 = vpop.f32.mrf.mxu1 }
 0x106   :  { %762 = vst.msk [vmem:[%s1666_s3 + $0xd0] sm:$0xff] %vm735_vm2, %v697_v47  ;;  %794 = vst.msk [vmem:[%s1666_s3 + $0x1d0] sm:$0xff] %vm735_vm2, %v729_v48  ;;  %v700_v53 = vmax.f32 %v498_v49, 0.0  ;;  %v732_v54 = vmax.f32 %v658_v50, 0.0  ;;  %v493_v55 = vadd.f32 %v1341_v4, %v492_v51  ;;  %v653_v56 = vadd.f32 %v1341_v4, %v652_v52 }
 0x107   :  { %v993_v57 = vpop.f32.mrf.mxu0  ;;  %v1041_v58 = vpop.f32.mrf.mxu1 }
 0x108   :  { %765 = vst.msk [vmem:[%s1666_s3 + $0xe8] sm:$0xff] %vm735_vm2, %v700_v53  ;;  %797 = vst.msk [vmem:[%s1666_s3 + $0x1e8] sm:$0xff] %vm735_vm2, %v732_v54  ;;  %v699_v59 = vmax.f32 %v493_v55, 0.0  ;;  %v731_v60 = vmax.f32 %v653_v56, 0.0  ;;  %v508_v61 = vadd.f32 %v993_v57, %v1341_v4  ;;  %v668_v62 = vadd.f32 %v1041_v58, %v1341_v4 }
 0x109   :  { %v502_v63 = vpop.f32.mrf.mxu0  ;;  %v662_v0 = vpop.f32.mrf.mxu1 }
 0x10a   :  { %764 = vst.msk [vmem:[%s1666_s3 + $0xe0] sm:$0xff] %vm735_vm2, %v699_v59  ;;  %796 = vst.msk [vmem:[%s1666_s3 + $0x1e0] sm:$0xff] %vm735_vm2, %v731_v60  ;;  %v702_v1 = vmax.f32 %v508_v61, 0.0  ;;  %v734_v2 = vmax.f32 %v668_v62, 0.0  ;;  %v503_v3 = vadd.f32 %v1341_v4, %v502_v63  ;;  %v663_v5 = vadd.f32 %v1341_v4, %v662_v0 }
 0x10c   :  { %767 = vst.msk [vmem:[%s1666_s3 + $0xf8] sm:$0xff] %vm735_vm2, %v702_v1  ;;  %799 = vst.msk [vmem:[%s1666_s3 + $0x1f8] sm:$0xff] %vm735_vm2, %v734_v2  ;;  %v701_v6 = vmax.f32 %v503_v3, 0.0  ;;  %v733_v7 = vmax.f32 %v663_v5, 0.0 }
 0x10e   :  { %766 = vst.msk [vmem:[%s1666_s3 + $0xf0] sm:$0xff] %vm735_vm2, %v701_v6  ;;  %798 = vst.msk [vmem:[%s1666_s3 + $0x1f0] sm:$0xff] %vm735_vm2, %v733_v7 }

// kernel: _lambda_.6
= control target key start
LH: loop header
LB: loop body
LE: loop exit
PB: predicated region body
PF: predicated region fallthrough
CT: control target
= control target key end

     0   :  { %v356_v0 = vmov 0.0   ;;  %vm71_vm0 = vcmask 130048   ;;  %vm281_vm1 = vcmask 261120   ;;  %s664_s1 = inlined_call_operand.vmem [shape: f32[144,32], index: 1, kind: input, shape index: {}]   ;;  %s665_s0 = inlined_call_operand.vmem [shape: f32[128,144], index: 0, kind: input, shape index: {}]   ;;  %s666_s2 = inlined_call_operand.vmem [shape: f32[1,32], index: 2, kind: input, shape index: {}]   ;;  %s667_s3 = inlined_call_operand.vmem [shape: f32[128,32], index: 3, kind: output, shape index: {}]  }
   0x1   :  { %120 = vmatprep.subr.mxu0 %v356_v0  ;;  %319 = vmatprep.subr.mxu1 %v356_v0  ;;  %v61_v1 = vld [vmem:[%s664_s1 + $0x78] sm:$0xff]  ;;  %v60_v2 = vld [vmem:[%s664_s1 + $0x70] sm:$0xff]  ;;  %v59_v3 = vld [vmem:[%s664_s1 + $0x68] sm:$0xff] }
   0x2   :  { %121 = vmatpush1.msra.mxu0 %v61_v1  ;;  %337 = vmatpush1.msra.mxu1 %v61_v1  ;;  %v58_v4 = vld [vmem:[%s664_s1 + $0x60] sm:$0xff]  ;;  %v57_v5 = vld [vmem:[%s664_s1 + $0x58] sm:$0xff]  ;;  %v56_v6 = vld [vmem:[%s664_s1 + $0x50] sm:$0xff] }
   0x3   :  { %122 = vmatprep.subr.mxu0 %v356_v0  ;;  %320 = vmatprep.subr.mxu1 %v356_v0  ;;  %v55_v7 = vld [vmem:[%s664_s1 + $0x48] sm:$0xff]  ;;  %v54_v8 = vld [vmem:[%s664_s1 + $0x40] sm:$0xff]  ;;  %v53_v9 = vld [vmem:[%s664_s1 + $0x38] sm:$0xff] }
   0x4   :  { %123 = vmatpush1.msra.mxu0 %v60_v2  ;;  %338 = vmatpush1.msra.mxu1 %v60_v2  ;;  %v52_v10 = vld [vmem:[%s664_s1 + $0x30] sm:$0xff]  ;;  %v51_v11 = vld [vmem:[%s664_s1 + $0x28] sm:$0xff]  ;;  %v50_v12 = vld [vmem:[%s664_s1 + $0x20] sm:$0xff] }
   0x5   :  { %124 = vmatprep.subr.mxu0 %v356_v0  ;;  %321 = vmatprep.subr.mxu1 %v356_v0  ;;  %v49_v13 = vld [vmem:[%s664_s1 + $0x18] sm:$0xff]  ;;  %v48_v14 = vld [vmem:[%s664_s1 + $0x10] sm:$0xff]  ;;  %v47_v15 = vld [vmem:[%s664_s1 + $0x8] sm:$0xff] }
   0x6   :  { %125 = vmatpush1.msra.mxu0 %v59_v3  ;;  %339 = vmatpush1.msra.mxu1 %v59_v3  ;;  %v46_v16 = vld [vmem:[%s664_s1] sm:$0xff]  ;;  %v63_v17 = vld [vmem:[%s664_s1 + $0x88] sm:$0xff]  ;;  %v17_v23 = vld [vmem:[%s665_s0 + $0x18] sm:$0xff] }
   0x7   :  { %126 = vmatprep.subr.mxu0 %v356_v0  ;;  %322 = vmatprep.subr.mxu1 %v356_v0  ;;  %v62_v18 = vld [vmem:[%s664_s1 + $0x80] sm:$0xff]  ;;  %v15_v19 = vld [vmem:[%s665_s0 + $0x8] sm:$0xff]  ;;  %v33_v24 = vld [vmem:[%s665_s0 + $0x98] sm:$0xff] }
   0x8   :  { %127 = vmatpush1.msra.mxu0 %v58_v4  ;;  %340 = vmatpush1.msra.mxu1 %v58_v4  ;;  %v31_v20 = vld [vmem:[%s665_s0 + $0x88] sm:$0xff]  ;;  %v14_v21 = vld [vmem:[%s665_s0] sm:$0xff]  ;;  %v16_v25 = vld [vmem:[%s665_s0 + $0x10] sm:$0xff] }
   0x9   :  { %128 = vmatprep.subr.mxu0 %v356_v0  ;;  %323 = vmatprep.subr.mxu1 %v356_v0  ;;  %v30_v22 = vld [vmem:[%s665_s0 + $0x80] sm:$0xff]  ;;  %v32_v26 = vld [vmem:[%s665_s0 + $0x90] sm:$0xff]  ;;  %v19_v27 = vld [vmem:[%s665_s0 + $0x28] sm:$0xff] }
   0xa   :  { %129 = vmatpush1.msra.mxu0 %v57_v5  ;;  %341 = vmatpush1.msra.mxu1 %v57_v5  ;;  %v35_v28 = vld [vmem:[%s665_s0 + $0xa8] sm:$0xff]  ;;  %v18_v29 = vld [vmem:[%s665_s0 + $0x20] sm:$0xff]  ;;  %v21_v31 = vld [vmem:[%s665_s0 + $0x38] sm:$0xff] }
   0xb   :  { %130 = vmatprep.subr.mxu0 %v356_v0  ;;  %324 = vmatprep.subr.mxu1 %v356_v0  ;;  %v34_v30 = vld [vmem:[%s665_s0 + $0xa0] sm:$0xff]  ;;  %v37_v32 = vld [vmem:[%s665_s0 + $0xb8] sm:$0xff]  ;;  %v20_v33 = vld [vmem:[%s665_s0 + $0x30] sm:$0xff] }
   0xc   :  { %131 = vmatpush1.msra.mxu0 %v56_v6  ;;  %342 = vmatpush1.msra.mxu1 %v56_v6  ;;  %v36_v34 = vld [vmem:[%s665_s0 + $0xb0] sm:$0xff]  ;;  %v23_v35 = vld [vmem:[%s665_s0 + $0x48] sm:$0xff]  ;;  %v22_v37 = vld [vmem:[%s665_s0 + $0x40] sm:$0xff] }
   0xd   :  { %132 = vmatprep.subr.mxu0 %v356_v0  ;;  %325 = vmatprep.subr.mxu1 %v356_v0  ;;  %v39_v36 = vld [vmem:[%s665_s0 + $0xc8] sm:$0xff]  ;;  %v38_v38 = vld [vmem:[%s665_s0 + $0xc0] sm:$0xff]  ;;  %v25_v39 = vld [vmem:[%s665_s0 + $0x58] sm:$0xff] }
   0xe   :  { %133 = vmatpush1.msra.mxu0 %v55_v7  ;;  %343 = vmatpush1.msra.mxu1 %v55_v7  ;;  %v41_v40 = vld [vmem:[%s665_s0 + $0xd8] sm:$0xff]  ;;  %v24_v41 = vld [vmem:[%s665_s0 + $0x50] sm:$0xff]  ;;  %v27_v43 = vld [vmem:[%s665_s0 + $0x68] sm:$0xff] }
   0xf   :  { %134 = vmatprep.subr.mxu0 %v356_v0  ;;  %326 = vmatprep.subr.mxu1 %v356_v0  ;;  %v40_v42 = vld [vmem:[%s665_s0 + $0xd0] sm:$0xff]  ;;  %v43_v44 = vld [vmem:[%s665_s0 + $0xe8] sm:$0xff]  ;;  %v26_v45 = vld [vmem:[%s665_s0 + $0x60] sm:$0xff] }
  0x10   :  { %135 = vmatpush1.msra.mxu0 %v54_v8  ;;  %344 = vmatpush1.msra.mxu1 %v54_v8  ;;  %v42_v46 = vld [vmem:[%s665_s0 + $0xe0] sm:$0xff]  ;;  %v29_v47 = vld [vmem:[%s665_s0 + $0x78] sm:$0xff]  ;;  %v28_v49 = vld [vmem:[%s665_s0 + $0x70] sm:$0xff] }
  0x11   :  { %136 = vmatprep.subr.mxu0 %v356_v0  ;;  %327 = vmatprep.subr.mxu1 %v356_v0  ;;  %v45_v48 = vld [vmem:[%s665_s0 + $0xf8] sm:$0xff]  ;;  %v44_v50 = vld [vmem:[%s665_s0 + $0xf0] sm:$0xff]  ;;  %v582_v51 = vld [vmem:[%s666_s2] ss:$0 sm:$0xff] }
  0x12   :  { %137 = vmatpush1.msra.mxu0 %v53_v9  ;;  %345 = vmatpush1.msra.mxu1 %v53_v9 }
  0x13   :  { %138 = vmatprep.subr.mxu0 %v356_v0  ;;  %328 = vmatprep.subr.mxu1 %v356_v0 }
  0x14   :  { %139 = vmatpush1.msra.mxu0 %v52_v10  ;;  %346 = vmatpush1.msra.mxu1 %v52_v10 }
  0x15   :  { %140 = vmatprep.subr.mxu0 %v356_v0  ;;  %329 = vmatprep.subr.mxu1 %v356_v0 }
  0x16   :  { %141 = vmatpush1.msra.mxu0 %v51_v11  ;;  %347 = vmatpush1.msra.mxu1 %v51_v11 }
  0x17   :  { %142 = vmatprep.subr.mxu0 %v356_v0  ;;  %330 = vmatprep.subr.mxu1 %v356_v0 }
  0x18   :  { %143 = vmatpush1.msra.mxu0 %v50_v12  ;;  %348 = vmatpush1.msra.mxu1 %v50_v12 }
  0x19   :  { %144 = vmatprep.subr.mxu0 %v356_v0  ;;  %331 = vmatprep.subr.mxu1 %v356_v0 }
  0x1a   :  { %145 = vmatpush1.msra.mxu0 %v49_v13  ;;  %349 = vmatpush1.msra.mxu1 %v49_v13 }
  0x1b   :  { %146 = vmatprep.subr.mxu0 %v356_v0  ;;  %332 = vmatprep.subr.mxu1 %v356_v0 }
  0x1c   :  { %147 = vmatpush1.msra.mxu0 %v48_v14  ;;  %350 = vmatpush1.msra.mxu1 %v48_v14 }
  0x1d   :  { %148 = vmatprep.subr.mxu0 %v356_v0  ;;  %333 = vmatprep.subr.mxu1 %v356_v0 }
  0x1e   :  { %149 = vmatpush1.msra.mxu0 %v47_v15  ;;  %351 = vmatpush1.msra.mxu1 %v47_v15 }
  0x1f   :  { %150 = vmatprep.subr.mxu0 %v356_v0  ;;  %334 = vmatprep.subr.mxu1 %v356_v0 }
  0x20   :  { %151 = vmatpush1.msra.mxu0 %v46_v16  ;;  %352 = vmatpush1.msra.mxu1 %v46_v16 }
  0x21   :  { %180 = vmatprep.subr.mxu0 %v356_v0  ;;  %335 = vmatprep.subr.mxu1 %v356_v0 }
  0x22   :  { %181 = vmatpush2.msra.mxu0 %v63_v17  ;;  %353 = vmatpush2.msra.mxu1 %v63_v17 }
  0x23   :  { %182 = vmatprep.subr.mxu0 %v356_v0  ;;  %336 = vmatprep.subr.mxu1 %v356_v0 }
  0x24   :  { %183 = vmatpush2.msra.mxu0 %v62_v18  ;;  %354 = vmatpush2.msra.mxu1 %v62_v18 }
  0x25   :  { %303 = vmatprep.mubr.msk.f32.mxu0 %vm71_vm0, %v15_v19  ;;  %311 = vmatprep.mubr.msk.f32.mxu1 %vm71_vm0, %v31_v20 }
  0x26   :  { %185 = vmatmul.mubr.f32.vlgmr.msra.gmra.mxu0 %v14_v21  ;;  %225 = vmatmul.mubr.f32.vlgmr.msra.gmra.mxu1 %v30_v22 }
  0x27   :  { %304 = vmatprep.mubr.msk.f32.mxu0 %vm71_vm0, %v17_v23  ;;  %312 = vmatprep.mubr.msk.f32.mxu1 %vm71_vm0, %v33_v24 }
  0x2a   :  { %190 = vmatmul.mubr.f32.gmra.mxu0 %v16_v25  ;;  %230 = vmatmul.mubr.f32.gmra.mxu1 %v32_v26 }
  0x2b   :  { %305 = vmatprep.mubr.msk.f32.mxu0 %vm71_vm0, %v19_v27  ;;  %313 = vmatprep.mubr.msk.f32.mxu1 %vm71_vm0, %v35_v28 }
  0x2e   :  { %195 = vmatmul.mubr.f32.gmra.mxu0 %v18_v29  ;;  %235 = vmatmul.mubr.f32.gmra.mxu1 %v34_v30 }
  0x2f   :  { %306 = vmatprep.mubr.msk.f32.mxu0 %vm71_vm0, %v21_v31  ;;  %314 = vmatprep.mubr.msk.f32.mxu1 %vm71_vm0, %v37_v32 }
  0x32   :  { %200 = vmatmul.mubr.f32.gmra.mxu0 %v20_v33  ;;  %240 = vmatmul.mubr.f32.gmra.mxu1 %v36_v34 }
  0x33   :  { %307 = vmatprep.mubr.msk.f32.mxu0 %vm71_vm0, %v23_v35  ;;  %315 = vmatprep.mubr.msk.f32.mxu1 %vm71_vm0, %v39_v36 }
  0x36   :  { %205 = vmatmul.mubr.f32.gmra.mxu0 %v22_v37  ;;  %245 = vmatmul.mubr.f32.gmra.mxu1 %v38_v38 }
  0x37   :  { %308 = vmatprep.mubr.msk.f32.mxu0 %vm71_vm0, %v25_v39  ;;  %316 = vmatprep.mubr.msk.f32.mxu1 %vm71_vm0, %v41_v40 }
  0x3a   :  { %210 = vmatmul.mubr.f32.gmra.mxu0 %v24_v41  ;;  %250 = vmatmul.mubr.f32.gmra.mxu1 %v40_v42 }
  0x3b   :  { %309 = vmatprep.mubr.msk.f32.mxu0 %vm71_vm0, %v27_v43  ;;  %317 = vmatprep.mubr.msk.f32.mxu1 %vm71_vm0, %v43_v44 }
  0x3e   :  { %215 = vmatmul.mubr.f32.gmra.mxu0 %v26_v45  ;;  %255 = vmatmul.mubr.f32.gmra.mxu1 %v42_v46 }
  0x3f   :  { %310 = vmatprep.mubr.msk.f32.mxu0 %vm71_vm0, %v29_v47  ;;  %318 = vmatprep.mubr.msk.f32.mxu1 %vm71_vm0, %v45_v48 }
  0x42   :  { %220 = vmatmul.mubr.f32.gmra.mxu0 %v28_v49  ;;  %260 = vmatmul.mubr.f32.gmra.mxu1 %v44_v50 }
  0xe6   :  { %v186_v52 = vpop.f32.mrf.mxu0  ;;  %v226_v53 = vpop.f32.mrf.mxu1 }
  0xe7   :  { %v187_v54 = vadd.f32 %v582_v51, %v186_v52  ;;  %v227_v55 = vadd.f32 %v582_v51, %v226_v53 }
  0xe8   :  { %v188_v56 = vpop.f32.mrf.mxu0  ;;  %v228_v57 = vpop.f32.mrf.mxu1 }
  0xe9   :  { %v265_v58 = vmax.f32 %v187_v54, 0.0  ;;  %v273_v59 = vmax.f32 %v227_v55, 0.0 }
  0xea   :  { %v191_v60 = vpop.f32.mrf.mxu0  ;;  %v231_v61 = vpop.f32.mrf.mxu1 }
  0xeb   :  { %282 = vst.msk [vmem:[%s667_s3] sm:$0xff] %vm281_vm1, %v265_v58  ;;  %290 = vst.msk [vmem:[%s667_s3 + $0x40] sm:$0xff] %vm281_vm1, %v273_v59  ;;  %v192_v62 = vadd.f32 %v582_v51, %v191_v60  ;;  %v232_v63 = vadd.f32 %v582_v51, %v231_v61 }
  0xec   :  { %v193_v0 = vpop.f32.mrf.mxu0  ;;  %v233_v1 = vpop.f32.mrf.mxu1 }
  0xed   :  { %v266_v2 = vmax.f32 %v192_v62, 0.0  ;;  %v274_v3 = vmax.f32 %v232_v63, 0.0 }
  0xee   :  { %v196_v4 = vpop.f32.mrf.mxu0  ;;  %v236_v5 = vpop.f32.mrf.mxu1 }
  0xef   :  { %283 = vst.msk [vmem:[%s667_s3 + $0x8] sm:$0xff] %vm281_vm1, %v266_v2  ;;  %291 = vst.msk [vmem:[%s667_s3 + $0x48] sm:$0xff] %vm281_vm1, %v274_v3  ;;  %v197_v6 = vadd.f32 %v582_v51, %v196_v4  ;;  %v237_v7 = vadd.f32 %v582_v51, %v236_v5 }
  0xf0   :  { %v198_v8 = vpop.f32.mrf.mxu0  ;;  %v238_v9 = vpop.f32.mrf.mxu1 }
  0xf1   :  { %v267_v10 = vmax.f32 %v197_v6, 0.0  ;;  %v275_v11 = vmax.f32 %v237_v7, 0.0 }
  0xf2   :  { %v201_v12 = vpop.f32.mrf.mxu0  ;;  %v241_v13 = vpop.f32.mrf.mxu1 }
  0xf3   :  { %284 = vst.msk [vmem:[%s667_s3 + $0x10] sm:$0xff] %vm281_vm1, %v267_v10  ;;  %292 = vst.msk [vmem:[%s667_s3 + $0x50] sm:$0xff] %vm281_vm1, %v275_v11  ;;  %v202_v14 = vadd.f32 %v582_v51, %v201_v12  ;;  %v242_v15 = vadd.f32 %v582_v51, %v241_v13 }
  0xf4   :  { %v203_v16 = vpop.f32.mrf.mxu0  ;;  %v243_v17 = vpop.f32.mrf.mxu1 }
  0xf5   :  { %v268_v18 = vmax.f32 %v202_v14, 0.0  ;;  %v276_v19 = vmax.f32 %v242_v15, 0.0 }
  0xf6   :  { %v206_v20 = vpop.f32.mrf.mxu0  ;;  %v246_v21 = vpop.f32.mrf.mxu1 }
  0xf7   :  { %285 = vst.msk [vmem:[%s667_s3 + $0x18] sm:$0xff] %vm281_vm1, %v268_v18  ;;  %293 = vst.msk [vmem:[%s667_s3 + $0x58] sm:$0xff] %vm281_vm1, %v276_v19  ;;  %v207_v22 = vadd.f32 %v582_v51, %v206_v20  ;;  %v247_v23 = vadd.f32 %v582_v51, %v246_v21 }
  0xf8   :  { %v208_v24 = vpop.f32.mrf.mxu0  ;;  %v248_v25 = vpop.f32.mrf.mxu1 }
  0xf9   :  { %v269_v26 = vmax.f32 %v207_v22, 0.0  ;;  %v277_v27 = vmax.f32 %v247_v23, 0.0 }
  0xfa   :  { %v211_v28 = vpop.f32.mrf.mxu0  ;;  %v251_v29 = vpop.f32.mrf.mxu1 }
  0xfb   :  { %286 = vst.msk [vmem:[%s667_s3 + $0x20] sm:$0xff] %vm281_vm1, %v269_v26  ;;  %294 = vst.msk [vmem:[%s667_s3 + $0x60] sm:$0xff] %vm281_vm1, %v277_v27  ;;  %v212_v30 = vadd.f32 %v582_v51, %v211_v28  ;;  %v252_v31 = vadd.f32 %v582_v51, %v251_v29 }
  0xfc   :  { %v213_v32 = vpop.f32.mrf.mxu0  ;;  %v253_v33 = vpop.f32.mrf.mxu1 }
  0xfd   :  { %v270_v34 = vmax.f32 %v212_v30, 0.0  ;;  %v278_v35 = vmax.f32 %v252_v31, 0.0 }
  0xfe   :  { %v216_v36 = vpop.f32.mrf.mxu0  ;;  %v256_v37 = vpop.f32.mrf.mxu1 }
  0xff   :  { %287 = vst.msk [vmem:[%s667_s3 + $0x28] sm:$0xff] %vm281_vm1, %v270_v34  ;;  %295 = vst.msk [vmem:[%s667_s3 + $0x68] sm:$0xff] %vm281_vm1, %v278_v35  ;;  %v217_v38 = vadd.f32 %v582_v51, %v216_v36  ;;  %v257_v39 = vadd.f32 %v582_v51, %v256_v37 }
 0x100   :  { %v218_v40 = vpop.f32.mrf.mxu0  ;;  %v258_v41 = vpop.f32.mrf.mxu1 }
 0x101   :  { %v271_v42 = vmax.f32 %v217_v38, 0.0  ;;  %v279_v43 = vmax.f32 %v257_v39, 0.0 }
 0x102   :  { %v221_v44 = vpop.f32.mrf.mxu0  ;;  %v261_v45 = vpop.f32.mrf.mxu1 }
 0x103   :  { %288 = vst.msk [vmem:[%s667_s3 + $0x30] sm:$0xff] %vm281_vm1, %v271_v42  ;;  %296 = vst.msk [vmem:[%s667_s3 + $0x70] sm:$0xff] %vm281_vm1, %v279_v43  ;;  %v222_v46 = vadd.f32 %v582_v51, %v221_v44  ;;  %v262_v47 = vadd.f32 %v582_v51, %v261_v45 }
 0x104   :  { %v223_v48 = vpop.f32.mrf.mxu0  ;;  %v263_v49 = vpop.f32.mrf.mxu1 }
 0x105   :  { %v272_v50 = vmax.f32 %v222_v46, 0.0  ;;  %v280_v52 = vmax.f32 %v262_v47, 0.0 }
 0x107   :  { %289 = vst.msk [vmem:[%s667_s3 + $0x38] sm:$0xff] %vm281_vm1, %v272_v50  ;;  %297 = vst.msk [vmem:[%s667_s3 + $0x78] sm:$0xff] %vm281_vm1, %v280_v52 }

// kernel: _lambda_.7
= control target key start
LH: loop header
LB: loop body
LE: loop exit
PB: predicated region body
PF: predicated region fallthrough
CT: control target
= control target key end

     0   :  { %vm69_vm0 = vcmask 261120   ;;  %vm256_vm1 = vcmask 523264   ;;  %s523_s1 = inlined_call_operand.vmem [shape: f32[288,64], index: 1, kind: input, shape index: {}]   ;;  %s524_s0 = inlined_call_operand.vmem [shape: f32[32,288], index: 0, kind: input, shape index: {}]   ;;  %s525_s2 = inlined_call_operand.vmem [shape: f32[1,64], index: 2, kind: input, shape index: {}]   ;;  %s526_s3 = inlined_call_operand.vmem [shape: f32[32,64], index: 3, kind: output, shape index: {}]  }
   0x1   :  { %v57_v0 = vld [vmem:[%s523_s1 + $0xf8] sm:$0xff]  ;;  %v56_v2 = vld [vmem:[%s523_s1 + $0xf0] sm:$0xff]  ;;  %v55_v4 = vld [vmem:[%s523_s1 + $0xe8] sm:$0xff] }
   0x2   :  { %v41_v1 = vld [vmem:[%s523_s1 + $0x78] sm:$0xff]  ;;  %270 = vmatprep.subr.mxu0 %v57_v0  ;;  %v40_v3 = vld [vmem:[%s523_s1 + $0x70] sm:$0xff]  ;;  %v39_v5 = vld [vmem:[%s523_s1 + $0x68] sm:$0xff] }
   0x3   :  { %271 = vmatpush3.msra.mxu0 %v41_v1  ;;  %v54_v6 = vld [vmem:[%s523_s1 + $0xe0] sm:$0xff]  ;;  %v53_v8 = vld [vmem:[%s523_s1 + $0xd8] sm:$0xff]  ;;  %v52_v10 = vld [vmem:[%s523_s1 + $0xd0] sm:$0xff] }
   0x4   :  { %272 = vmatprep.subr.mxu0 %v56_v2  ;;  %v38_v7 = vld [vmem:[%s523_s1 + $0x60] sm:$0xff]  ;;  %v37_v9 = vld [vmem:[%s523_s1 + $0x58] sm:$0xff]  ;;  %v36_v11 = vld [vmem:[%s523_s1 + $0x50] sm:$0xff] }
   0x5   :  { %273 = vmatpush3.msra.mxu0 %v40_v3  ;;  %v61_v12 = vld [vmem:[%s523_s1 + $0x118] sm:$0xff]  ;;  %v51_v13 = vld [vmem:[%s523_s1 + $0xc8] sm:$0xff]  ;;  %v60_v14 = vld [vmem:[%s523_s1 + $0x110] sm:$0xff] }
   0x6   :  { %274 = vmatprep.subr.mxu0 %v55_v4  ;;  %322 = vmatprep.subr.mxu1 %v61_v12  ;;  %v35_v15 = vld [vmem:[%s523_s1 + $0x48] sm:$0xff]  ;;  %v50_v17 = vld [vmem:[%s523_s1 + $0xc0] sm:$0xff]  ;;  %v49_v20 = vld [vmem:[%s523_s1 + $0xb8] sm:$0xff] }
   0x7   :  { %275 = vmatpush3.msra.mxu0 %v39_v5  ;;  %323 = vmatpush3.msra.mxu1 %v61_v12  ;;  %v15_v16 = vld [vmem:[%s524_s0 + $0x8] sm:$0xff]  ;;  %v34_v19 = vld [vmem:[%s523_s1 + $0x40] sm:$0xff]  ;;  %v33_v22 = vld [vmem:[%s523_s1 + $0x38] sm:$0xff] }
   0x8   :  { %276 = vmatprep.subr.mxu0 %v54_v6  ;;  %324 = vmatprep.subr.mxu1 %v60_v14  ;;  %v59_v18 = vld [vmem:[%s523_s1 + $0x108] sm:$0xff]  ;;  %v58_v21 = vld [vmem:[%s523_s1 + $0x100] sm:$0xff]  ;;  %v48_v23 = vld [vmem:[%s523_s1 + $0xb0] sm:$0xff] }
   0x9   :  { %277 = vmatpush3.msra.mxu0 %v38_v7  ;;  %146 = vmatprep.mubr.f32.mxu0 %v15_v16  ;;  %v16_v24 = vld [vmem:[%s524_s0 + $0x10] sm:$0xff]  ;;  %v19_v26 = vld [vmem:[%s524_s0 + $0x28] sm:$0xff]  ;;  %v22_v28 = vld [vmem:[%s524_s0 + $0x40] sm:$0xff] }
   0xa   :  { %278 = vmatprep.subr.mxu0 %v53_v8  ;;  %325 = vmatpush3.msra.mxu1 %v60_v14  ;;  %v32_v25 = vld [vmem:[%s523_s1 + $0x30] sm:$0xff]  ;;  %v47_v27 = vld [vmem:[%s523_s1 + $0xa8] sm:$0xff]  ;;  %v46_v30 = vld [vmem:[%s523_s1 + $0xa0] sm:$0xff] }
   0xb   :  { %279 = vmatpush3.msra.mxu0 %v37_v9  ;;  %326 = vmatprep.subr.mxu1 %v59_v18  ;;  %v31_v29 = vld [vmem:[%s523_s1 + $0x28] sm:$0xff]  ;;  %v30_v31 = vld [vmem:[%s523_s1 + $0x20] sm:$0xff]  ;;  %v25_v32 = vld [vmem:[%s524_s0 + $0x58] sm:$0xff] }
   0xc   :  { %280 = vmatprep.subr.mxu0 %v52_v10  ;;  %327 = vmatpush3.msra.mxu1 %v59_v18  ;;  %v45_v33 = vld [vmem:[%s523_s1 + $0x98] sm:$0xff]  ;;  %v44_v35 = vld [vmem:[%s523_s1 + $0x90] sm:$0xff]  ;;  %v43_v37 = vld [vmem:[%s523_s1 + $0x88] sm:$0xff] }
   0xd   :  { %281 = vmatpush3.msra.mxu0 %v36_v11  ;;  %328 = vmatprep.subr.mxu1 %v58_v21  ;;  %v29_v34 = vld [vmem:[%s523_s1 + $0x18] sm:$0xff]  ;;  %v28_v36 = vld [vmem:[%s523_s1 + $0x10] sm:$0xff]  ;;  %v27_v38 = vld [vmem:[%s523_s1 + $0x8] sm:$0xff] }
   0xe   :  { %282 = vmatprep.subr.mxu0 %v51_v13  ;;  %329 = vmatpush3.msra.mxu1 %v58_v21  ;;  %v42_v39 = vld [vmem:[%s523_s1 + $0x80] sm:$0xff]  ;;  %v17_v43 = vld [vmem:[%s524_s0 + $0x18] sm:$0xff]  ;;  %v20_v45 = vld [vmem:[%s524_s0 + $0x30] sm:$0xff] }
   0xf   :  { %283 = vmatpush3.msra.mxu0 %v35_v15  ;;  %330 = vmatprep.mubr.msk.f32.mxu1 %vm69_vm0, %v16_v24  ;;  %v26_v40 = vld [vmem:[%s523_s1] sm:$0xff]  ;;  %v21_v44 = vld [vmem:[%s524_s0 + $0x38] sm:$0xff]  ;;  %v24_v46 = vld [vmem:[%s524_s0 + $0x50] sm:$0xff] }
  0x10   :  { %284 = vmatprep.subr.mxu0 %v50_v17  ;;  %331 = vmatmul.mubr.msk.f32.vlgmr.msra.gmra.mxu1 %vm69_vm0, %v19_v26  ;;  %v14_v41 = vld [vmem:[%s524_s0] sm:$0xff]  ;;  %v23_v47 = vld [vmem:[%s524_s0 + $0x48] sm:$0xff] }
  0x11   :  { %285 = vmatpush3.msra.mxu0 %v34_v19  ;;  %333 = vmatprep.mubr.msk.f32.mxu1 %vm69_vm0, %v22_v28  ;;  %v18_v42 = vld [vmem:[%s524_s0 + $0x20] sm:$0xff] }
  0x12   :  { %286 = vmatprep.subr.mxu0 %v49_v20  ;;  %v265_v51 = vld [vmem:[%s525_s2] ss:$0 sm:$0xff] }
  0x13   :  { %287 = vmatpush3.msra.mxu0 %v33_v22 }
  0x14   :  { %288 = vmatprep.subr.mxu0 %v48_v23  ;;  %334 = vmatmul.mubr.msk.f32.gmra.mxu1 %vm69_vm0, %v25_v32 }
  0x15   :  { %289 = vmatpush3.msra.mxu0 %v32_v25 }
  0x16   :  { %290 = vmatprep.subr.mxu0 %v47_v27 }
  0x17   :  { %291 = vmatpush3.msra.mxu0 %v31_v29 }
  0x18   :  { %292 = vmatprep.subr.mxu0 %v46_v30 }
  0x19   :  { %293 = vmatpush3.msra.mxu0 %v30_v31 }
  0x1a   :  { %294 = vmatprep.subr.mxu0 %v45_v33 }
  0x1b   :  { %295 = vmatpush3.msra.mxu0 %v29_v34 }
  0x1c   :  { %296 = vmatprep.subr.mxu0 %v44_v35 }
  0x1d   :  { %297 = vmatpush3.msra.mxu0 %v28_v36 }
  0x1e   :  { %298 = vmatprep.subr.mxu0 %v43_v37 }
  0x1f   :  { %299 = vmatpush3.msra.mxu0 %v27_v38 }
  0x20   :  { %300 = vmatprep.subr.mxu0 %v42_v39 }
  0x21   :  { %301 = vmatpush3.msra.mxu0 %v26_v40 }
  0x22   :  { %147 = vmatmul.mubr.f32.vlgmr.msra.gmra.mxu0 %v14_v41 }
  0x23   :  { %151 = vmatprep.mubr.f32.mxu0 %v18_v42 }
  0x26   :  { %152 = vmatmul.mubr.f32.gmra.mxu0 %v17_v43 }
  0x27   :  { %156 = vmatprep.mubr.f32.mxu0 %v21_v44 }
  0x2a   :  { %157 = vmatmul.mubr.f32.gmra.mxu0 %v20_v45 }
  0x2b   :  { %161 = vmatprep.mubr.f32.mxu0 %v24_v46 }
  0x2e   :  { %162 = vmatmul.mubr.f32.gmra.mxu0 %v23_v47 }
  0xd0   :  { %v332_v49 = vpop.f32.mrf.mxu1 }
  0xd2   :  { %v233_v54 = vpop.f32.mrf.mxu1 }
  0xd4   :  { %v335_v60 = vpop.f32.mrf.mxu1 }
  0xd6   :  { %v243_v3 = vpop.f32.mrf.mxu1 }
  0xe2   :  { %v302_v48 = vpop.f32.mrf.mxu0 }
  0xe4   :  { %v303_v50 = vpop.f32.mrf.mxu0 }
  0xe5   :  { %v304_v52 = vadd.f32 %v303_v50, %v302_v48 }
  0xe6   :  { %v305_v53 = vpop.f32.mrf.mxu0 }
  0xe7   :  { %v149_v55 = vadd.f32 %v304_v52, %v265_v51 }
  0xe8   :  { %v306_v56 = vpop.f32.mrf.mxu0 }
  0xe9   :  { %v307_v57 = vadd.f32 %v306_v56, %v305_v53  ;;  %v234_v58 = vadd.f32 %v233_v54, %v149_v55 }
  0xea   :  { %v308_v59 = vpop.f32.mrf.mxu0 }
  0xeb   :  { %v154_v61 = vadd.f32 %v307_v57, %v265_v51  ;;  %v252_v62 = vmax.f32 %v234_v58, 0.0 }
  0xec   :  { %v309_v63 = vpop.f32.mrf.mxu0 }
  0xed   :  { %v239_v0 = vadd.f32 %v332_v49, %v154_v61  ;;  %257 = vst.msk [vmem:[%s526_s3] sm:$0xff] %vm256_vm1, %v252_v62  ;;  %v310_v1 = vadd.f32 %v309_v63, %v308_v59 }
  0xee   :  { %v311_v2 = vpop.f32.mrf.mxu0 }
  0xef   :  { %v253_v4 = vmax.f32 %v239_v0, 0.0  ;;  %v159_v5 = vadd.f32 %v310_v1, %v265_v51 }
  0xf0   :  { %v312_v6 = vpop.f32.mrf.mxu0 }
  0xf1   :  { %258 = vst.msk [vmem:[%s526_s3 + $0x8] sm:$0xff] %vm256_vm1, %v253_v4  ;;  %v313_v7 = vadd.f32 %v312_v6, %v311_v2  ;;  %v244_v8 = vadd.f32 %v243_v3, %v159_v5 }
  0xf3   :  { %v164_v9 = vadd.f32 %v313_v7, %v265_v51  ;;  %v254_v10 = vmax.f32 %v244_v8, 0.0 }
  0xf5   :  { %v249_v11 = vadd.f32 %v335_v60, %v164_v9  ;;  %259 = vst.msk [vmem:[%s526_s3 + $0x10] sm:$0xff] %vm256_vm1, %v254_v10 }
  0xf7   :  { %v255_v12 = vmax.f32 %v249_v11, 0.0 }
  0xf9   :  { %260 = vst.msk [vmem:[%s526_s3 + $0x18] sm:$0xff] %vm256_vm1, %v255_v12 }

// kernel: _lambda_.8
= control target key start
LH: loop header
LB: loop body
LE: loop exit
PB: predicated region body
PF: predicated region fallthrough
CT: control target
= control target key end

     0   :  { %s3681_s0 = inlined_call_operand.vmem [shape: f32[32,64], index: 0, kind: input, shape index: {}]   ;;  %s3682_s1 = inlined_call_operand.vmem [shape: f32[32,32], index: 1, kind: input, shape index: {}]   ;;  %s3683_s2 = inlined_call_operand.vmem [shape: f32[64,32], index: 2, kind: input, shape index: {}]   ;;  %s3684_s3 = inlined_call_operand.vmem [shape: f32[1,32], index: 3, kind: input, shape index: {}]   ;;  %s3685_s4 = inlined_call_operand.vmem [shape: f32[32,64], index: 4, kind: input, shape index: {}]   ;;  %s3686_s5 = inlined_call_operand.vmem [shape: f32[1,64], index: 5, kind: input, shape index: {}]   ;;  %s3687_s6 = inlined_call_operand.vmem [shape: f32[32,32], index: 6, kind: input, shape index: {}]   ;;  %s3688_s7 = inlined_call_operand.vmem [shape: f32[1,32], index: 7, kind: input, shape index: {}]   ;;  %s3689_s8 = inlined_call_operand.vmem [shape: f32[32,32], index: 8, kind: input, shape index: {}]   ;;  %s3690_s9 = inlined_call_operand.vmem [shape: f32[1,32], index: 9, kind: input, shape index: {}]   ;;  %s3691_s10 = inlined_call_operand.vmem [shape: f32[1,32], index: 10, kind: input, shape index: {}, may-alias: {10,16}]   ;;  %s3692_s11 = inlined_call_operand.vmem [shape: f32[1,32], index: 11, kind: input, shape index: {}, may-alias: {11,17}]   ;;  %s3693_s12 = inlined_call_operand.vmem [shape: f32[32,64], index: 12, kind: input, shape index: {}]   ;;  %s3694_s13 = inlined_call_operand.vmem [shape: f32[1,64], index: 13, kind: input, shape index: {}]   ;;  %s3695_s14 = inlined_call_operand.vmem [shape: f32[64,32], index: 14, kind: input, shape index: {}]   ;;  %s3696_s15 = inlined_call_operand.hbm [shape: f32[1,32], index: 15, kind: input, shape index: {}]   ;;  %s3697_s16 = inlined_call_operand.vmem [shape: f32[1,32], index: 16, kind: input, shape index: {}, may-alias: {10,16}]   ;;  %s3698_s17 = inlined_call_operand.vmem [shape: f32[1,32], index: 17, kind: input, shape index: {}, may-alias: {11,17}]   ;;  %s3699_s18 = inlined_call_operand.vmem [shape: f32[32,32], index: 18, kind: output, shape index: {}]  }
   0x1   :  { %3703 = sst [smem:[#allocation5_spill]] %s3681_s0 }
   0x2   :  { %3704 = sst [smem:[#allocation6_spill]] %s3682_s1 }
   0x3   :  { %3705 = sst [smem:[#allocation7_spill]] %s3683_s2 }
   0x4   :  { %23 = vsyncpa [#allocation3], 0  ;;  %s3105_s27 = smov [#allocation2]  }
   0x5   :  { %s60_s28 = sshll.u32 %s3105_s27, 4  ;;  %s61_s28 = int_to_ptr.vmem [resolvable:$true] %s60_s28 }
   0x6   :  { %s3091_s29 = scalar_lea.vmem %s61_s28, 16  ;;  %s3095_s30 = scalar_lea.vmem %s61_s28, 32 }
   0x7   :  { %p3092_p0 = scmp.ne.s32.totalorder %s61_s28, %s3091_s29  ;;  %p3096_p1 = scmp.lt.s32.totalorder %s61_s28, %s61_s28 }
   0x8   :  { %p3097_p2 = scmp.lt.s32.totalorder %s3095_s30, %s3091_s29 }
   0xa   :  { %p3098_p3 = por %p3097_p2, %p3096_p1 }
   0xc   :  { %p3099_p4 = pnand %p3098_p3, %p3092_p0 }
   0xe   :  { %3102 = shalt.err (!%p3099_p4)
}
   0xf   :  { %63 = dma.hbm_to_vmem [thread:$0]  %s3696_s15, 16, %s61_s28, [#allocation3]  }
  0x10   :  { %3103 = dma.done.wait [#allocation3], 16  }
  0x11   :  { %3104 = vsyncadd [#allocation3], 4294967280  ;;  %s3706_s21 = sld [smem:[#allocation7_spill]]  ;;  %vm94_vm0 = vcmask 523264   ;;  %v199_v12 = vld [vmem:[%s3685_s4 + $0x18] sm:$0xff]  ;;  %v198_v13 = vld [vmem:[%s3685_s4 + $0x10] sm:$0xff] }
  0x12   :  { %s3707_s15 = sld [smem:[#allocation5_spill]]  ;;  %2802 = vmatprep.subr.mxu1 %v199_v12  ;;  %v197_v14 = vld [vmem:[%s3685_s4 + $0x8] sm:$0xff]  ;;  %v196_v15 = vld [vmem:[%s3685_s4] sm:$0xff]  ;;  %v308_v16 = vld [vmem:[%s3687_s6 + $0x18] sm:$0xff]  ;;  %vm207_vm1 = vcmask 261120   ;;  %vm419_vm2 = vcmask 64512  }
  0x13   :  { %2803 = vmatpush3.msra.mxu1 %v199_v12  ;;  %v2578_v17 = vld [vmem:[%s3684_s3] ss:$0 sm:$0xff]  ;;  %s3708_s27 = sld [smem:[#allocation6_spill]]  ;;  %v307_v32 = vld [vmem:[%s3687_s6 + $0x10] sm:$0xff]  ;;  %v306_v34 = vld [vmem:[%s3687_s6 + $0x8] sm:$0xff]  ;;  %vm596_vm3 = vcmask 130048  }
  0x14   :  { %2804 = vmatprep.subr.mxu1 %v198_v13  ;;  %v305_v36 = vld [vmem:[%s3687_s6] sm:$0xff]  ;;  %s3108_s25 = smov 88   ;;  %s3109_s26 = smov 80   ;;  %vm2075_vm4 = vcmask 195584  }
  0x15   :  { %2805 = vmatpush3.msra.mxu1 %v198_v13  ;;  %v2583_v37 = vld [vmem:[%s3686_s5] ss:$0 sm:$0xff]  ;;  %s3106_s5 = smov 96   ;;  %s3111_s4 = smov 72  }
  0x16   :  { %2806 = vmatprep.subr.mxu1 %v197_v14  ;;  %v2588_v45 = vld [vmem:[%s3688_s7] ss:$0 sm:$0xff]  ;;  %s3107_s7 = smov 120   ;;  %s3112_s28 = smov 104  }
  0x17   :  { %v86_v0 = vld [vmem:[%s3706_s21 + $0x38] sm:$0xff]  ;;  %v85_v1 = vld [vmem:[%s3706_s21 + $0x30] sm:$0xff]  ;;  %v84_v2 = vld [vmem:[%s3706_s21 + $0x28] sm:$0xff]  ;;  %2807 = vmatpush3.msra.mxu1 %v197_v14  ;;  %s3113_s3 = smov 8   ;;  %s3115_s2 = smov 24  }
  0x18   :  { %2780 = vmatprep.subr.mxu0 %v86_v0  ;;  %v71_v3 = vld [vmem:[%s3707_s15] sm:$0xff]  ;;  %v82_v5 = vld [vmem:[%s3706_s21 + $0x18] sm:$0xff]  ;;  %v81_v6 = vld [vmem:[%s3706_s21 + $0x10] sm:$0xff]  ;;  %2808 = vmatprep.subr.mxu1 %v196_v15 }
  0x19   :  { %2781 = vmatpush3.msra.mxu0 %v86_v0  ;;  %2796 = vmatprep.mubr.msk.f32.mxu0 %vm94_vm0, %v71_v3  ;;  %v83_v4 = vld [vmem:[%s3706_s21 + $0x20] sm:$0xff]  ;;  %v80_v7 = vld [vmem:[%s3706_s21 + $0x8] sm:$0xff]  ;;  %v73_v10 = vld [vmem:[%s3707_s15 + $0x10] sm:$0xff] }
  0x1a   :  { %2782 = vmatprep.subr.mxu0 %v85_v1  ;;  %v79_v8 = vld [vmem:[%s3706_s21] sm:$0xff]  ;;  %v72_v9 = vld [vmem:[%s3707_s15 + $0x8] sm:$0xff]  ;;  %v74_v11 = vld [vmem:[%s3707_s15 + $0x18] sm:$0xff]  ;;  %2809 = vmatpush3.msra.mxu1 %v196_v15  ;;  %s3114_s21 = smov 16  }
  0x1b   :  { %2783 = vmatpush3.msra.mxu0 %v85_v1  ;;  %2816 = vmatprep.subr.mxu1 %v308_v16  ;;  %v75_v21 = vld [vmem:[%s3708_s27] sm:$0xff]  ;;  %v76_v22 = vld [vmem:[%s3708_s27 + $0x8] sm:$0xff]  ;;  %v77_v28 = vld [vmem:[%s3708_s27 + $0x10] sm:$0xff] }
  0x1c   :  { %2784 = vmatprep.subr.mxu0 %v84_v2  ;;  %v78_v30 = vld [vmem:[%s3708_s27 + $0x18] sm:$0xff]  ;;  %s3110_s27 = smov 112  }
  0x1d   :  { %2785 = vmatpush3.msra.mxu0 %v84_v2 }
  0x1e   :  { %2786 = vmatprep.subr.mxu0 %v83_v4 }
  0x1f   :  { %2787 = vmatpush3.msra.mxu0 %v83_v4 }
  0x20   :  { %2788 = vmatprep.subr.mxu0 %v82_v5 }
  0x21   :  { %2789 = vmatpush3.msra.mxu0 %v82_v5 }
  0x22   :  { %2790 = vmatprep.subr.mxu0 %v81_v6 }
  0x23   :  { %2791 = vmatpush3.msra.mxu0 %v81_v6 }
  0x24   :  { %2792 = vmatprep.subr.mxu0 %v80_v7 }
  0x25   :  { %2793 = vmatpush3.msra.mxu0 %v80_v7 }
  0x26   :  { %2794 = vmatprep.subr.mxu0 %v79_v8 }
  0x27   :  { %2795 = vmatpush3.msra.mxu0 %v79_v8 }
  0x28   :  { %2797 = vmatmul.mubr.msk.f32.vlgmr.msra.gmra.mxu0 %vm94_vm0, %v72_v9 }
  0x29   :  { %2799 = vmatprep.mubr.msk.f32.mxu0 %vm94_vm0, %v73_v10 }
  0x2c   :  { %2800 = vmatmul.mubr.msk.f32.gmra.mxu0 %vm94_vm0, %v74_v11 }
  0xe8   :  { %v2798_v18 = vpop.f32.mrf.mxu0 }
  0xe9   :  { %v3272_v19 = vadd.f32 %v2798_v18, %v2578_v17 }
  0xea   :  { %v173_v20 = vpop.f32.mrf.mxu0 }
  0xeb   :  { %v3280_v23 = vadd.f32 %v2578_v17, %v173_v20  ;;  %v193_v26 = vadd.f32 %v3272_v19, %v76_v22 }
  0xec   :  { %v2801_v24 = vpop.f32.mrf.mxu0 }
  0xed   :  { %v192_v25 = vadd.f32 %v3280_v23, %v75_v21  ;;  %v3284_v27 = vadd.f32 %v2801_v24, %v2578_v17 }
  0xee   :  { %v183_v29 = vpop.f32.mrf.mxu0 }
  0xef   :  { %v3292_v31 = vadd.f32 %v2578_v17, %v183_v29  ;;  %2810 = vmatprep.mubr.msk.f32.mxu1 %vm207_vm1, %v192_v25  ;;  %v195_v35 = vadd.f32 %v3284_v27, %v78_v30 }
  0xf0   :  { %2811 = vmatmul.mubr.msk.f32.vlgmr.msra.gmra.mxu1 %vm207_vm1, %v193_v26 }
  0xf1   :  { %v194_v33 = vadd.f32 %v3292_v31, %v77_v28  ;;  %2817 = vmatpush3.msra.mxu1 %v308_v16 }
  0xf2   :  { %2818 = vmatprep.subr.mxu1 %v307_v32 }
  0xf3   :  { %2813 = vmatprep.mubr.msk.f32.mxu1 %vm207_vm1, %v194_v33  ;;  %2819 = vmatpush3.msra.mxu1 %v307_v32 }
  0xf4   :  { %2814 = vmatmul.mubr.msk.f32.gmra.mxu1 %vm207_vm1, %v195_v35  ;;  %2820 = vmatprep.subr.mxu1 %v306_v34 }
  0xf5   :  { %2821 = vmatpush3.msra.mxu1 %v306_v34  ;;  %2824 = vmatprep.mubr.msk.f32.mxu1 %vm207_vm1, %v3280_v23 }
  0xf6   :  { %2822 = vmatprep.subr.mxu1 %v305_v36 }
  0xf7   :  { %2823 = vmatpush3.msra.mxu1 %v305_v36 }
  0xf8   :  { %2825 = vmatmul.mubr.msk.f32.vlgmr.msra.gmra.mxu1 %vm207_vm1, %v3272_v19 }
  0xf9   :  { %2827 = vmatprep.mubr.msk.f32.mxu1 %vm207_vm1, %v3292_v31 }
  0xfc   :  { %2828 = vmatmul.mubr.msk.f32.gmra.mxu1 %vm207_vm1, %v3284_v27 }
 0x1b0   :  { %v2812_v38 = vpop.f32.mrf.mxu1 }
 0x1b1   :  { %v3320_v39 = vadd.f32 %v2812_v38, %v2583_v37 }
 0x1b2   :  { %v286_v40 = vpop.f32.mrf.mxu1 }
 0x1b3   :  { %v3322_v41 = vadd.f32 %v2583_v37, %v286_v40 }
 0x1b4   :  { %v2815_v42 = vpop.f32.mrf.mxu1 }
 0x1b5   :  { %v3324_v43 = vadd.f32 %v2815_v42, %v2583_v37  ;;  %2834 = vmatprep.mubr.msk.f32.mxu0 %vm419_vm2, %v3322_v41 }
 0x1b6   :  { %v296_v44 = vpop.f32.mrf.mxu1 }
 0x1b7   :  { %v3331_v46 = vadd.f32 %v2583_v37, %v296_v44  ;;  %507 = vrot.lane.b32.xlu0 %v3324_v43, %s3106_s5 }
 0x1b8   :  { %v2826_v47 = vpop.f32.mrf.mxu1 }
 0x1b9   :  { %v3335_v48 = vadd.f32 %v2826_v47, %v2588_v45  ;;  %2841 = vmatprep.mubr.msk.f32.mxu1 %vm419_vm2, %v3331_v46 }
 0x1ba   :  { %v394_v49 = vpop.f32.mrf.mxu1 }
 0x1bb   :  { %v3339_v50 = vadd.f32 %v2588_v45, %v394_v49  ;;  %505 = vrot.lane.b32.xlu0 %v3331_v46, %s3106_s5 }
 0x1bc   :  { %v2829_v52 = vpop.f32.mrf.mxu1 }
 0x1bd   :  { %v3345_v54 = vadd.f32 %v2829_v52, %v2588_v45 }
 0x1be   :  { %v404_v55 = vpop.f32.mrf.mxu1 }
 0x1bf   :  { %v3350_v56 = vadd.f32 %v2588_v45, %v404_v55 }
 0x229   :  { %v508_v51 = vpop.permute.xlu0 %507 }
 0x22a   :  { %2837 = vmatprep.subr.msk.mxu1 %vm419_vm2, %v508_v51 }
 0x22b   :  { %2838 = vmatpush3.xpose.msk.msra.mxu1 %vm419_vm2, %v508_v51 }
 0x22d   :  { %v506_v53 = vpop.permute.xlu0 %505 }
 0x22e   :  { %2839 = vmatprep.subr.msk.mxu1 %vm419_vm2, %v506_v53 }
 0x22f   :  { %2840 = vmatpush3.xpose.msk.msra.mxu1 %vm419_vm2, %v506_v53 }
 0x230   :  { %2851 = vmatprep.subr.mxu1 %v3345_v54 }
 0x232   :  { %2842 = vmatmul.mubr.msk.f32.vlgmr.msra.gmra.mxu1 %vm419_vm2, %v3324_v43 }
 0x233   :  { %2852 = vmatpush3.msra.mxu1 %v3345_v54 }
 0x234   :  { %2853 = vmatprep.subr.mxu1 %v3350_v56 }
 0x235   :  { %2854 = vmatpush3.msra.mxu1 %v3350_v56 }
 0x2f2   :  { %v2843_v57 = vpop.f32.mrf.mxu1 }
 0x2f3   :  { %v595_v60 = vmul.f32 0.35355338, %v2843_v57 }
 0x2f4   :  { %v583_v58 = vpop.f32.mrf.mxu1 }
 0x2f5   :  { %v594_v59 = vmul.f32 0.35355338, %v583_v58  ;;  %v606_v62 = vsel %vm596_vm3, %v595_v60, -inf }
 0x2f7   :  { %v603_v61 = vsel %vm596_vm3, %v594_v59, -inf }
 0x2f8   :  { %604 = vmax.xlane.f32.xlu1 %v603_v61 }
 0x2fc   :  { %607 = vmax.xlane.f32.xlu1 %v606_v62 }
 0x381   :  { %v605_v63 = vpop.xlane.xlu1 %604 }
 0x382   :  { %v611_v0 = vsub.f32 %v594_v59, %v605_v63 }
 0x384   :  { %v617_v1 = vmul.f32 1.442695, %v611_v0 }
 0x385   :  { %v608_v2 = vpop.xlane.xlu1 %607 }
 0x386   :  { %3003 = vpow2.f32 %v617_v1  ;;  %v612_v3 = vsub.f32 %v595_v60, %v608_v2 }
 0x388   :  { %v619_v4 = vmul.f32 1.442695, %v612_v3 }
 0x38a   :  { %3005 = vpow2.f32 %v619_v4 }
 0x393   :  { %v3004_v5 = vpop.eup %3003 }
 0x394   :  { %v627_v6 = vsel %vm596_vm3, %v3004_v5, 0.0 }
 0x395   :  { %628 = vadd.xlane.f32.xlu0 %v627_v6 }
 0x397   :  { %v3006_v7 = vpop.eup %3005 }
 0x398   :  { %v630_v8 = vsel %vm596_vm3, %v3006_v7, 0.0 }
 0x399   :  { %631 = vadd.xlane.f32.xlu1 %v630_v8 }
 0x3aa   :  { %417 = vrot.lane.b32.xlu1 %v3320_v39, %s3106_s5 }
 0x3ab   :  { %803 = vrot.lane.b32.xlu0 %v3322_v41, %s3107_s7 }
 0x3ae   :  { %809 = vrot.lane.b32.xlu1 %v3320_v39, %s3108_s25 }
 0x3b2   :  { %415 = vrot.lane.b32.xlu1 %v3322_v41, %s3106_s5 }
 0x3b6   :  { %807 = vrot.lane.b32.xlu1 %v3322_v41, %s3108_s25 }
 0x3ba   :  { %900 = vrot.lane.b32.xlu1 %v3324_v43, %s3108_s25 }
 0x3be   :  { %805 = vrot.lane.b32.xlu1 %v3320_v39, %s3107_s7 }
 0x3c2   :  { %898 = vrot.lane.b32.xlu1 %v3331_v46, %s3108_s25 }
 0x3c6   :  { %894 = vrot.lane.b32.xlu1 %v3331_v46, %s3107_s7 }
 0x3ca   :  { %896 = vrot.lane.b32.xlu1 %v3324_v43, %s3107_s7 }
 0x41e   :  { %v629_v9 = vpop.xlane.xlu0 %628 }
 0x41f   :  { %3007 = vrcp.f32 %v629_v9 }
 0x422   :  { %v632_v10 = vpop.xlane.xlu1 %631  ;;  %v804_v20 = vpop.permute.xlu0 %803 }
 0x423   :  { %3009 = vrcp.f32 %v632_v10 }
 0x426   :  { %v418_v11 = vpop.permute.xlu1 %417 }
 0x427   :  { %2830 = vmatprep.subr.msk.mxu0 %vm419_vm2, %v418_v11 }
 0x428   :  { %2831 = vmatpush3.xpose.msk.msra.mxu0 %vm419_vm2, %v418_v11 }
 0x42a   :  { %v810_v12 = vpop.permute.xlu1 %809 }
 0x42b   :  { %2858 = vmatprep.subr.msk.mxu1 %vm419_vm2, %v810_v12 }
 0x42c   :  { %v3008_v13 = vpop.eup %3007 }
 0x42d   :  { %v639_v14 = vmul.f32 %v3008_v13, %v3004_v5 }
 0x42e   :  { %v416_v15 = vpop.permute.xlu1 %415 }
 0x42f   :  { %2832 = vmatprep.subr.msk.mxu0 %vm419_vm2, %v416_v15  ;;  %2855 = vmatprep.mubr.msk.f32.mxu1 %vm596_vm3, %v639_v14 }
 0x430   :  { %v3010_v16 = vpop.eup %3009  ;;  %2833 = vmatpush3.xpose.msk.msra.mxu0 %vm419_vm2, %v416_v15 }
 0x431   :  { %2844 = vmatprep.subr.mxu0 %v3335_v48  ;;  %v640_v17 = vmul.f32 %v3010_v16, %v3006_v7 }
 0x432   :  { %v808_v18 = vpop.permute.xlu1 %807 }
 0x433   :  { %2835 = vmatmul.mubr.msk.f32.vlgmr.msra.gmra.mxu0 %vm419_vm2, %v3320_v39  ;;  %2856 = vmatmul.mubr.msk.f32.vlgmr.msra.gmra.mxu1 %vm596_vm3, %v640_v17 }
 0x434   :  { %2859 = vmatpush3.xpose.msk.msra.mxu1 %vm419_vm2, %v810_v12  ;;  %2845 = vmatpush3.msra.mxu0 %v3335_v48 }
 0x435   :  { %2860 = vmatprep.subr.msk.mxu1 %vm419_vm2, %v808_v18  ;;  %2862 = vmatprep.mubr.msk.f32.mxu1 %vm419_vm2, %v804_v20 }
 0x436   :  { %2846 = vmatprep.subr.mxu0 %v3339_v50  ;;  %v901_v21 = vpop.permute.xlu1 %900 }
 0x437   :  { %2847 = vmatpush3.msra.mxu0 %v3339_v50 }
 0x438   :  { %2861 = vmatpush3.xpose.msk.msra.mxu1 %vm419_vm2, %v808_v18 }
 0x439   :  { %2865 = vmatprep.subr.msk.mxu1 %vm419_vm2, %v901_v21 }
 0x43a   :  { %v806_v22 = vpop.permute.xlu1 %805 }
 0x43b   :  { %2863 = vmatmul.mubr.msk.f32.vlgmr.msra.gmra.mxu1 %vm419_vm2, %v806_v22 }
 0x43c   :  { %2866 = vmatpush3.xpose.msk.msra.mxu1 %vm419_vm2, %v901_v21 }
 0x43e   :  { %v899_v24 = vpop.permute.xlu1 %898 }
 0x43f   :  { %2867 = vmatprep.subr.msk.mxu1 %vm419_vm2, %v899_v24 }
 0x440   :  { %2868 = vmatpush3.xpose.msk.msra.mxu1 %vm419_vm2, %v899_v24 }
 0x442   :  { %v895_v25 = vpop.permute.xlu1 %894 }
 0x443   :  { %2869 = vmatprep.mubr.msk.f32.mxu1 %vm419_vm2, %v895_v25 }
 0x446   :  { %v897_v26 = vpop.permute.xlu1 %896 }
 0x447   :  { %2870 = vmatmul.mubr.msk.f32.vlgmr.msra.gmra.mxu1 %vm419_vm2, %v897_v26 }
 0x4f3   :  { %v2836_v28 = vpop.f32.mrf.mxu0  ;;  %v3401_v30 = vpop.f32.mrf.mxu1 }
 0x4f4   :  { %v593_v29 = vmul.f32 0.35355338, %v2836_v28 }
 0x4f5   :  { %v494_v32 = vpop.f32.mrf.mxu0  ;;  %v3405_v36 = vpop.f32.mrf.mxu1 }
 0x4f6   :  { %v592_v33 = vmul.f32 0.35355338, %v494_v32  ;;  %v600_v34 = vsel %vm596_vm3, %v593_v29, -inf }
 0x4f7   :  { %601 = vmax.xlane.f32.xlu1 %v600_v34 }
 0x4f8   :  { %v597_v35 = vsel %vm596_vm3, %v592_v33, -inf }
 0x4f9   :  { %598 = vmax.xlane.f32.xlu0 %v597_v35 }
 0x4fb   :  { %v2864_v37 = vpop.f32.mrf.mxu1 }
 0x4fc   :  { %v986_v42 = vmul.f32 0.35355338, %v2864_v37 }
 0x4fd   :  { %v885_v38 = vpop.f32.mrf.mxu1 }
 0x4fe   :  { %v985_v40 = vmul.f32 0.35355338, %v885_v38  ;;  %v992_v45 = vsel %vm596_vm3, %v986_v42, -inf }
 0x500   :  { %v989_v44 = vsel %vm596_vm3, %v985_v40, -inf }
 0x501   :  { %990 = vmax.xlane.f32.xlu0 %v989_v44 }
 0x505   :  { %993 = vmax.xlane.f32.xlu0 %v992_v45 }
 0x507   :  { %v2871_v47 = vpop.f32.mrf.mxu1 }
 0x508   :  { %v988_v49 = vmul.f32 0.35355338, %v2871_v47 }
 0x509   :  { %v976_v8 = vpop.f32.mrf.mxu1 }
 0x50a   :  { %v998_v51 = vsel %vm596_vm3, %v988_v49, -inf  ;;  %v987_v11 = vmul.f32 0.35355338, %v976_v8 }
 0x50b   :  { %999 = vmax.xlane.f32.xlu0 %v998_v51 }
 0x50c   :  { %v995_v13 = vsel %vm596_vm3, %v987_v11, -inf }
 0x580   :  { %v602_v52 = vpop.xlane.xlu1 %601 }
 0x581   :  { %v610_v53 = vsub.f32 %v593_v29, %v602_v52 }
 0x582   :  { %v599_v55 = vpop.xlane.xlu0 %598 }
 0x583   :  { %v615_v57 = vmul.f32 1.442695, %v610_v53  ;;  %v609_v58 = vsub.f32 %v592_v33, %v599_v55 }
 0x585   :  { %3011 = vpow2.f32 %v615_v57  ;;  %v613_v59 = vmul.f32 1.442695, %v609_v58 }
 0x587   :  { %3013 = vpow2.f32 %v613_v59 }
 0x58a   :  { %v991_v0 = vpop.xlane.xlu0 %990 }
 0x58b   :  { %v1001_v14 = vsub.f32 %v985_v40, %v991_v0 }
 0x58d   :  { %v1005_v15 = vmul.f32 1.442695, %v1001_v14 }
 0x58e   :  { %v994_v1 = vpop.xlane.xlu0 %993 }
 0x58f   :  { %v1002_v2 = vsub.f32 %v986_v42, %v994_v1 }
 0x591   :  { %v1007_v4 = vmul.f32 1.442695, %v1002_v2 }
 0x592   :  { %v3012_v60 = vpop.eup %3011 }
 0x593   :  { %v624_v61 = vsel %vm596_vm3, %v3012_v60, 0.0  ;;  %3015 = vpow2.f32 %v1007_v4 }
 0x594   :  { %v3014_v62 = vpop.eup %3013  ;;  %625 = vadd.xlane.f32.xlu0 %v624_v61  ;;  %v1000_v3 = vpop.xlane.xlu0 %999 }
 0x595   :  { %v621_v63 = vsel %vm596_vm3, %v3014_v62, 0.0  ;;  %v1004_v5 = vsub.f32 %v988_v49, %v1000_v3 }
 0x596   :  { %622 = vadd.xlane.f32.xlu1 %v621_v63 }
 0x597   :  { %v1011_v6 = vmul.f32 1.442695, %v1004_v5 }
 0x599   :  { %3017 = vpow2.f32 %v1011_v6 }
 0x59a   :  { %3019 = vpow2.f32 %v1005_v15 }
 0x5a0   :  { %v3426_v7 = vpop.eup %3015 }
 0x5a1   :  { %v1016_v9 = vsel %vm596_vm3, %v3426_v7, 0.0 }
 0x5a6   :  { %v3430_v10 = vpop.eup %3017 }
 0x5a7   :  { %1037 = vrot.lane.b32.xlu1 %v3335_v48, %s3107_s7  ;;  %v1022_v12 = vsel %vm596_vm3, %v3430_v10, 0.0  ;;  %v3020_v16 = vpop.eup %3019 }
 0x5a8   :  { %v1013_v17 = vsel %vm596_vm3, %v3020_v16, 0.0 }
 0x5aa   :  { %1035 = vrot.lane.b32.xlu0 %v3339_v50, %s3107_s7 }
 0x5ab   :  { %1126 = vrot.lane.b32.xlu1 %v3345_v54, %s3107_s7 }
 0x5ae   :  { %1124 = vrot.lane.b32.xlu0 %v3350_v56, %s3107_s7 }
 0x5af   :  { %1217 = vrot.lane.b32.xlu1 %v3320_v39, %s3109_s26 }
 0x5b2   :  { %1308 = vrot.lane.b32.xlu0 %v3324_v43, %s3109_s26 }
 0x5b3   :  { %1215 = vrot.lane.b32.xlu1 %v3322_v41, %s3109_s26 }
 0x5d1   :  { %1017 = vadd.xlane.f32.xlu0 %v1016_v9 }
 0x5d5   :  { %1023 = vadd.xlane.f32.xlu0 %v1022_v12 }
 0x5d7   :  { %996 = vmax.xlane.f32.xlu1 %v995_v13 }
 0x5e8   :  { %1211 = vrot.lane.b32.xlu1 %v3322_v41, %s3110_s27 }
 0x5eb   :  { %1213 = vrot.lane.b32.xlu0 %v3320_v39, %s3110_s27 }
 0x5ef   :  { %1302 = vrot.lane.b32.xlu0 %v3331_v46, %s3110_s27 }
 0x60c   :  { %1014 = vadd.xlane.f32.xlu1 %v1013_v17 }
 0x61d   :  { %1306 = vrot.lane.b32.xlu1 %v3331_v46, %s3109_s26  ;;  %v626_v18 = vpop.xlane.xlu0 %625 }
 0x61e   :  { %3021 = vrcp.f32 %v626_v18 }
 0x61f   :  { %v623_v20 = vpop.xlane.xlu1 %622 }
 0x620   :  { %3023 = vrcp.f32 %v623_v20 }
 0x621   :  { %v1036_v21 = vpop.permute.xlu0 %1035 }
 0x623   :  { %v1038_v22 = vpop.permute.xlu1 %1037 }
 0x624   :  { %2872 = vmatprep.subr.mxu0 %v1038_v22 }
 0x625   :  { %v1125_v24 = vpop.permute.xlu0 %1124 }
 0x627   :  { %v1127_v25 = vpop.permute.xlu1 %1126 }
 0x628   :  { %2879 = vmatprep.subr.mxu1 %v1127_v25 }
 0x629   :  { %2880 = vmatpush3.msra.mxu1 %v1127_v25  ;;  %v1309_v26 = vpop.permute.xlu0 %1308 }
 0x62a   :  { %2881 = vmatprep.subr.mxu1 %v1125_v24 }
 0x62b   :  { %2882 = vmatpush3.msra.mxu1 %v1125_v24  ;;  %v3022_v28 = vpop.eup %3021  ;;  %v1218_v34 = vpop.permute.xlu1 %1217 }
 0x62c   :  { %2893 = vmatprep.subr.msk.mxu1 %vm419_vm2, %v1309_v26  ;;  %v638_v33 = vmul.f32 %v3022_v28, %v3012_v60 }
 0x62d   :  { %v3024_v29 = vpop.eup %3023 }
 0x62e   :  { %v637_v32 = vmul.f32 %v3024_v29, %v3014_v62 }
 0x62f   :  { %v1216_v35 = vpop.permute.xlu1 %1215 }
 0x630   :  { %2848 = vmatprep.mubr.msk.f32.mxu0 %vm596_vm3, %v637_v32 }
 0x631   :  { %2849 = vmatmul.mubr.msk.f32.vlgmr.msra.gmra.mxu0 %vm596_vm3, %v638_v33 }
 0x632   :  { %2873 = vmatpush3.msra.mxu0 %v1038_v22 }
 0x633   :  { %2874 = vmatprep.subr.mxu0 %v1036_v21 }
 0x634   :  { %2875 = vmatpush3.msra.mxu0 %v1036_v21 }
 0x635   :  { %2886 = vmatprep.subr.msk.mxu0 %vm419_vm2, %v1218_v34 }
 0x65a   :  { %v1018_v47 = vpop.xlane.xlu0 %1017 }
 0x65e   :  { %v1024_v57 = vpop.xlane.xlu0 %1023 }
 0x660   :  { %v997_v37 = vpop.xlane.xlu1 %996 }
 0x661   :  { %v1003_v38 = vsub.f32 %v987_v11, %v997_v37 }
 0x662   :  { %v1214_v58 = vpop.permute.xlu0 %1213 }
 0x663   :  { %v1009_v40 = vmul.f32 1.442695, %v1003_v38 }
 0x664   :  { %v1212_v45 = vpop.permute.xlu1 %1211 }
 0x665   :  { %3025 = vpow2.f32 %v1009_v40 }
 0x666   :  { %3027 = vrcp.f32 %v1018_v47  ;;  %v1303_v1 = vpop.permute.xlu0 %1302 }
 0x672   :  { %v3026_v42 = vpop.eup %3025 }
 0x673   :  { %v1019_v44 = vsel %vm596_vm3, %v3026_v42, 0.0  ;;  %v3028_v51 = vpop.eup %3027 }
 0x674   :  { %1020 = vadd.xlane.f32.xlu1 %v1019_v44  ;;  %v1030_v55 = vmul.f32 %v3028_v51, %v3426_v7 }
 0x685   :  { %1304 = vrot.lane.b32.xlu1 %v3324_v43, %s3110_s27 }
 0x695   :  { %v1015_v49 = vpop.xlane.xlu1 %1014 }
 0x696   :  { %3029 = vrcp.f32 %v1015_v49 }
 0x697   :  { %3031 = vrcp.f32 %v1024_v57 }
 0x699   :  { %v1307_v59 = vpop.permute.xlu1 %1306 }
 0x6a3   :  { %v3030_v52 = vpop.eup %3029 }
 0x6a4   :  { %v1029_v53 = vmul.f32 %v3030_v52, %v3020_v16  ;;  %v3032_v61 = vpop.eup %3031 }
 0x6a5   :  { %v1032_v0 = vmul.f32 %v3032_v61, %v3430_v10 }
 0x6a6   :  { %2876 = vmatprep.mubr.msk.f32.mxu0 %vm596_vm3, %v1029_v53 }
 0x6a7   :  { %2877 = vmatmul.mubr.msk.f32.vlgmr.msra.gmra.mxu0 %vm596_vm3, %v1030_v55 }
 0x6a8   :  { %2887 = vmatpush3.xpose.msk.msra.mxu0 %vm419_vm2, %v1218_v34  ;;  %2890 = vmatprep.mubr.msk.f32.mxu0 %vm419_vm2, %v1212_v45 }
 0x6a9   :  { %2888 = vmatprep.subr.msk.mxu0 %vm419_vm2, %v1216_v35 }
 0x6ac   :  { %2889 = vmatpush3.xpose.msk.msra.mxu0 %vm419_vm2, %v1216_v35 }
 0x6af   :  { %2891 = vmatmul.mubr.msk.f32.vlgmr.msra.gmra.mxu0 %vm419_vm2, %v1214_v58 }
 0x6f1   :  { %v3467_v3 = vpop.f32.mrf.mxu0 }
 0x6f3   :  { %v3469_v4 = vpop.f32.mrf.mxu0 }
 0x6fd   :  { %v1021_v60 = vpop.xlane.xlu1 %1020 }
 0x6fe   :  { %3033 = vrcp.f32 %v1021_v60 }
 0x701   :  { %v1305_v2 = vpop.permute.xlu1 %1304 }
 0x70b   :  { %v3034_v62 = vpop.eup %3033 }
 0x70c   :  { %v1031_v63 = vmul.f32 %v3034_v62, %v3026_v42 }
 0x70e   :  { %2883 = vmatprep.mubr.msk.f32.mxu1 %vm596_vm3, %v1031_v63 }
 0x70f   :  { %2884 = vmatmul.mubr.msk.f32.vlgmr.msra.gmra.mxu1 %vm596_vm3, %v1032_v0 }
 0x710   :  { %2894 = vmatpush3.xpose.msk.msra.mxu1 %vm419_vm2, %v1309_v26  ;;  %2897 = vmatprep.mubr.msk.f32.mxu1 %vm419_vm2, %v1303_v1 }
 0x711   :  { %2895 = vmatprep.subr.msk.mxu1 %vm419_vm2, %v1307_v59 }
 0x714   :  { %2896 = vmatpush3.xpose.msk.msra.mxu1 %vm419_vm2, %v1307_v59 }
 0x717   :  { %2898 = vmatmul.mubr.msk.f32.vlgmr.msra.gmra.mxu1 %vm419_vm2, %v1305_v2 }
 0x767   :  { %v3471_v5 = vpop.f32.mrf.mxu0 }
 0x769   :  { %v3473_v6 = vpop.f32.mrf.mxu0 }
 0x76f   :  { %v2892_v7 = vpop.f32.mrf.mxu0 }
 0x770   :  { %v1394_v8 = vmul.f32 0.35355338, %v2892_v7 }
 0x771   :  { %v1293_v9 = vpop.f32.mrf.mxu0 }
 0x772   :  { %v1393_v10 = vmul.f32 0.35355338, %v1293_v9  ;;  %v1400_v11 = vsel %vm596_vm3, %v1394_v8, -inf }
 0x773   :  { %1401 = vmax.xlane.f32.xlu1 %v1400_v11 }
 0x774   :  { %v1397_v12 = vsel %vm596_vm3, %v1393_v10, -inf }
 0x775   :  { %1398 = vmax.xlane.f32.xlu0 %v1397_v12 }
 0x784   :  { %1443 = vrot.lane.b32.xlu1 %v3335_v48, %s3110_s27 }
 0x788   :  { %1530 = vrot.lane.b32.xlu1 %v3345_v54, %s3110_s27 }
 0x78c   :  { %1621 = vrot.lane.b32.xlu1 %v3320_v39, %s3111_s4 }
 0x790   :  { %1619 = vrot.lane.b32.xlu1 %v3322_v41, %s3111_s4 }
 0x794   :  { %1615 = vrot.lane.b32.xlu1 %v3322_v41, %s3112_s28 }
 0x7cf   :  { %v3487_v13 = vpop.f32.mrf.mxu1 }
 0x7d1   :  { %v3489_v14 = vpop.f32.mrf.mxu1 }
 0x7d7   :  { %v2899_v15 = vpop.f32.mrf.mxu1 }
 0x7d8   :  { %v1396_v18 = vmul.f32 0.35355338, %v2899_v15 }
 0x7d9   :  { %v1384_v16 = vpop.f32.mrf.mxu1 }
 0x7da   :  { %v1395_v17 = vmul.f32 0.35355338, %v1384_v16  ;;  %v1406_v21 = vsel %vm596_vm3, %v1396_v18, -inf }
 0x7dc   :  { %v1403_v20 = vsel %vm596_vm3, %v1395_v17, -inf }
 0x7dd   :  { %1404 = vmax.xlane.f32.xlu0 %v1403_v20 }
 0x7e1   :  { %1407 = vmax.xlane.f32.xlu0 %v1406_v21 }
 0x7f7   :  { %1441 = vrot.lane.b32.xlu0 %v3339_v50, %s3110_s27 }
 0x7fb   :  { %1528 = vrot.lane.b32.xlu0 %v3350_v56, %s3110_s27 }
 0x7fc   :  { %v1402_v41 = vpop.xlane.xlu1 %1401 }
 0x7fd   :  { %v1410_v29 = vsub.f32 %v1394_v8, %v1402_v41 }
 0x7fe   :  { %v1399_v22 = vpop.xlane.xlu0 %1398 }
 0x7ff   :  { %v1409_v24 = vsub.f32 %v1393_v10, %v1399_v22  ;;  %1712 = vrot.lane.b32.xlu0 %v3324_v43, %s3111_s4  ;;  %v1415_v32 = vmul.f32 1.442695, %v1410_v29 }
 0x800   :  { %v1444_v25 = vpop.permute.xlu1 %1443 }
 0x801   :  { %v1413_v26 = vmul.f32 1.442695, %v1409_v24  ;;  %2900 = vmatprep.subr.mxu0 %v1444_v25 }
 0x802   :  { %2901 = vmatpush3.msra.mxu0 %v1444_v25 }
 0x803   :  { %3035 = vpow2.f32 %v1413_v26 }
 0x804   :  { %v1531_v28 = vpop.permute.xlu1 %1530  ;;  %3037 = vpow2.f32 %v1415_v32 }
 0x805   :  { %2907 = vmatprep.subr.mxu1 %v1531_v28 }
 0x806   :  { %2908 = vmatpush3.msra.mxu1 %v1531_v28 }
 0x808   :  { %v1622_v51 = vpop.permute.xlu1 %1621 }
 0x80c   :  { %v1620_v60 = vpop.permute.xlu1 %1619 }
 0x810   :  { %v3036_v33 = vpop.eup %3035  ;;  %v1616_v61 = vpop.permute.xlu1 %1615 }
 0x811   :  { %v1421_v34 = vsel %vm596_vm3, %v3036_v33, 0.0  ;;  %v3038_v35 = vpop.eup %3037 }
 0x812   :  { %1422 = vadd.xlane.f32.xlu1 %v1421_v34  ;;  %v1424_v37 = vsel %vm596_vm3, %v3038_v35, 0.0 }
 0x81e   :  { %1425 = vadd.xlane.f32.xlu0 %v1424_v37 }
 0x823   :  { %1710 = vrot.lane.b32.xlu1 %v3331_v46, %s3111_s4 }
 0x866   :  { %v1405_v38 = vpop.xlane.xlu0 %1404 }
 0x867   :  { %v1411_v40 = vsub.f32 %v1395_v17, %v1405_v38 }
 0x869   :  { %v1417_v42 = vmul.f32 1.442695, %v1411_v40 }
 0x86a   :  { %v1408_v44 = vpop.xlane.xlu0 %1407 }
 0x86b   :  { %3039 = vpow2.f32 %v1417_v42  ;;  %v1412_v45 = vsub.f32 %v1396_v18, %v1408_v44 }
 0x86d   :  { %v1419_v47 = vmul.f32 1.442695, %v1412_v45 }
 0x86e   :  { %v1442_v49 = vpop.permute.xlu0 %1441 }
 0x86f   :  { %3041 = vpow2.f32 %v1419_v47  ;;  %2902 = vmatprep.subr.mxu0 %v1442_v49 }
 0x870   :  { %2903 = vmatpush3.msra.mxu0 %v1442_v49 }
 0x871   :  { %2914 = vmatprep.subr.msk.mxu0 %vm419_vm2, %v1622_v51 }
 0x872   :  { %v1529_v52 = vpop.permute.xlu0 %1528 }
 0x873   :  { %2909 = vmatprep.subr.mxu1 %v1529_v52 }
 0x874   :  { %2910 = vmatpush3.msra.mxu1 %v1529_v52 }
 0x876   :  { %v1713_v53 = vpop.permute.xlu0 %1712 }
 0x877   :  { %2921 = vmatprep.subr.msk.mxu1 %vm419_vm2, %v1713_v53 }
 0x878   :  { %v3040_v55 = vpop.eup %3039 }
 0x879   :  { %v1427_v57 = vsel %vm596_vm3, %v3040_v55, 0.0 }
 0x87a   :  { %1428 = vadd.xlane.f32.xlu1 %v1427_v57 }
 0x87c   :  { %v3042_v58 = vpop.eup %3041 }
 0x87d   :  { %v1430_v59 = vsel %vm596_vm3, %v3042_v58, 0.0 }
 0x87e   :  { %1431 = vadd.xlane.f32.xlu0 %v1430_v59 }
 0x88b   :  { %1708 = vrot.lane.b32.xlu1 %v3324_v43, %s3112_s28 }
 0x894   :  { %1617 = vrot.lane.b32.xlu0 %v3320_v39, %s3112_s28 }
 0x898   :  { %1706 = vrot.lane.b32.xlu0 %v3331_v46, %s3112_s28 }
 0x89b   :  { %v1423_v62 = vpop.xlane.xlu1 %1422 }
 0x89c   :  { %3043 = vrcp.f32 %v1423_v62 }
 0x89f   :  { %v1711_v39 = vpop.permute.xlu1 %1710 }
 0x8a7   :  { %v1426_v63 = vpop.xlane.xlu0 %1425 }
 0x8a8   :  { %3045 = vrcp.f32 %v1426_v63 }
 0x8a9   :  { %v3044_v0 = vpop.eup %3043 }
 0x8aa   :  { %v1437_v1 = vmul.f32 %v3044_v0, %v3036_v33 }
 0x8ac   :  { %2904 = vmatprep.mubr.msk.f32.mxu0 %vm596_vm3, %v1437_v1 }
 0x8b5   :  { %v3046_v2 = vpop.eup %3045 }
 0x8b6   :  { %v1438_v7 = vmul.f32 %v3046_v2, %v3038_v35 }
 0x8b8   :  { %2905 = vmatmul.mubr.msk.f32.vlgmr.msra.gmra.mxu0 %vm596_vm3, %v1438_v7 }
 0x8b9   :  { %2915 = vmatpush3.xpose.msk.msra.mxu0 %vm419_vm2, %v1622_v51  ;;  %2918 = vmatprep.mubr.msk.f32.mxu0 %vm419_vm2, %v1616_v61 }
 0x8ba   :  { %2916 = vmatprep.subr.msk.mxu0 %vm419_vm2, %v1620_v60 }
 0x8bd   :  { %2917 = vmatpush3.xpose.msk.msra.mxu0 %vm419_vm2, %v1620_v60 }
 0x903   :  { %v1429_v43 = vpop.xlane.xlu1 %1428 }
 0x904   :  { %3047 = vrcp.f32 %v1429_v43 }
 0x907   :  { %v1432_v46 = vpop.xlane.xlu0 %1431  ;;  %v1709_v16 = vpop.permute.xlu1 %1708 }
 0x908   :  { %3049 = vrcp.f32 %v1432_v46 }
 0x90b   :  { %v1618_v8 = vpop.permute.xlu0 %1617 }
 0x90c   :  { %2919 = vmatmul.mubr.msk.f32.vlgmr.msra.gmra.mxu0 %vm419_vm2, %v1618_v8 }
 0x90f   :  { %v1707_v15 = vpop.permute.xlu0 %1706 }
 0x911   :  { %v3048_v9 = vpop.eup %3047 }
 0x912   :  { %v1439_v10 = vmul.f32 %v3048_v9, %v3040_v55 }
 0x914   :  { %2911 = vmatprep.mubr.msk.f32.mxu1 %vm596_vm3, %v1439_v10 }
 0x915   :  { %v3050_v11 = vpop.eup %3049 }
 0x916   :  { %v1440_v12 = vmul.f32 %v3050_v11, %v3042_v58  ;;  %v2083_v11 = vld [vmem:[%s3689_s8 + $0x18] sm:$0xff] }
 0x918   :  { %2912 = vmatmul.mubr.msk.f32.vlgmr.msra.gmra.mxu1 %vm596_vm3, %v1440_v12  ;;  %v2082_v12 = vld [vmem:[%s3689_s8 + $0x10] sm:$0xff] }
 0x919   :  { %2922 = vmatpush3.xpose.msk.msra.mxu1 %vm419_vm2, %v1713_v53  ;;  %2925 = vmatprep.mubr.msk.f32.mxu1 %vm419_vm2, %v1707_v15  ;;  %v2081_v15 = vld [vmem:[%s3689_s8 + $0x8] sm:$0xff] }
 0x91a   :  { %2923 = vmatprep.subr.msk.mxu1 %vm419_vm2, %v1711_v39 }
 0x91d   :  { %2924 = vmatpush3.xpose.msk.msra.mxu1 %vm419_vm2, %v1711_v39 }
 0x920   :  { %2926 = vmatmul.mubr.msk.f32.vlgmr.msra.gmra.mxu1 %vm419_vm2, %v1709_v16  ;;  %v2080_v16 = vld [vmem:[%s3689_s8] sm:$0xff] }
 0x978   :  { %v2906_v17 = vpop.f32.mrf.mxu0 }
 0x97a   :  { %v1519_v18 = vpop.f32.mrf.mxu0 }
 0x9cc   :  { %v2920_v20 = vpop.f32.mrf.mxu0 }
 0x9cd   :  { %v1798_v21 = vmul.f32 0.35355338, %v2920_v20 }
 0x9ce   :  { %v1697_v41 = vpop.f32.mrf.mxu0 }
 0x9cf   :  { %v1797_v22 = vmul.f32 0.35355338, %v1697_v41  ;;  %v1804_v24 = vsel %vm596_vm3, %v1798_v21, -inf }
 0x9d0   :  { %1805 = vmax.xlane.f32.xlu1 %v1804_v24 }
 0x9d1   :  { %v1801_v25 = vsel %vm596_vm3, %v1797_v22, -inf }
 0x9d2   :  { %1802 = vmax.xlane.f32.xlu0 %v1801_v25 }
 0x9d8   :  { %v2913_v26 = vpop.f32.mrf.mxu1 }
 0x9da   :  { %v1606_v28 = vpop.f32.mrf.mxu1 }
 0x9e0   :  { %v2927_v29 = vpop.f32.mrf.mxu1 }
 0x9e1   :  { %1847 = vrot.lane.b32.xlu1 %v3335_v48, %s3112_s28  ;;  %v1800_v34 = vmul.f32 0.35355338, %v2927_v29 }
 0x9e2   :  { %v1788_v32 = vpop.f32.mrf.mxu1 }
 0x9e3   :  { %v1799_v33 = vmul.f32 0.35355338, %v1788_v32  ;;  %v1810_v37 = vsel %vm596_vm3, %v1800_v34, -inf }
 0x9e5   :  { %v1807_v35 = vsel %vm596_vm3, %v1799_v33, -inf }
 0x9e6   :  { %1808 = vmax.xlane.f32.xlu0 %v1807_v35 }
 0x9ea   :  { %1811 = vmax.xlane.f32.xlu0 %v1810_v37 }
 0xa59   :  { %v1806_v38 = vpop.xlane.xlu1 %1805 }
 0xa5a   :  { %v1814_v40 = vsub.f32 %v1798_v21, %v1806_v38 }
 0xa5b   :  { %v1803_v42 = vpop.xlane.xlu0 %1802 }
 0xa5c   :  { %v1819_v44 = vmul.f32 1.442695, %v1814_v40  ;;  %v1813_v45 = vsub.f32 %v1797_v22, %v1803_v42 }
 0xa5d   :  { %v1848_v47 = vpop.permute.xlu1 %1847 }
 0xa5e   :  { %3051 = vpow2.f32 %v1819_v44  ;;  %v1817_v49 = vmul.f32 1.442695, %v1813_v45  ;;  %2928 = vmatprep.subr.mxu0 %v1848_v47 }
 0xa5f   :  { %2929 = vmatpush3.msra.mxu0 %v1848_v47 }
 0xa60   :  { %3053 = vpow2.f32 %v1817_v49 }
 0xa6b   :  { %v3052_v48 = vpop.eup %3051 }
 0xa6c   :  { %v1828_v51 = vsel %vm596_vm3, %v3052_v48, 0.0 }
 0xa6d   :  { %v3054_v52 = vpop.eup %3053  ;;  %1829 = vadd.xlane.f32.xlu0 %v1828_v51 }
 0xa6e   :  { %v1825_v53 = vsel %vm596_vm3, %v3054_v52, 0.0 }
 0xa6f   :  { %v1809_v55 = vpop.xlane.xlu0 %1808  ;;  %1826 = vadd.xlane.f32.xlu1 %v1825_v53 }
 0xa70   :  { %v1815_v62 = vsub.f32 %v1799_v33, %v1809_v55 }
 0xa72   :  { %v1821_v63 = vmul.f32 1.442695, %v1815_v62 }
 0xa73   :  { %v1812_v57 = vpop.xlane.xlu0 %1811 }
 0xa74   :  { %v1816_v58 = vsub.f32 %v1800_v34, %v1812_v57 }
 0xa76   :  { %v1823_v59 = vmul.f32 1.442695, %v1816_v58 }
 0xa78   :  { %3055 = vpow2.f32 %v1823_v59 }
 0xa79   :  { %3057 = vpow2.f32 %v1821_v63 }
 0xa80   :  { %1934 = vrot.lane.b32.xlu1 %v3345_v54, %s3112_s28 }
 0xa85   :  { %v3056_v60 = vpop.eup %3055 }
 0xa86   :  { %v1834_v61 = vsel %vm596_vm3, %v3056_v60, 0.0  ;;  %v3058_v0 = vpop.eup %3057 }
 0xa87   :  { %1835 = vadd.xlane.f32.xlu0 %v1834_v61  ;;  %v1831_v1 = vsel %vm596_vm3, %v3058_v0, 0.0 }
 0xa9d   :  { %1845 = vrot.lane.b32.xlu0 %v3339_v50, %s3112_s28 }
 0xaa1   :  { %2023 = vrot.lane.b32.xlu0 %v3473_v6, %s3113_s3 }
 0xaa4   :  { %1832 = vadd.xlane.f32.xlu1 %v1831_v1 }
 0xaa5   :  { %2039 = vrot.lane.b32.xlu0 %v1519_v18, %s3114_s21 }
 0xaa9   :  { %2027 = vrot.lane.b32.xlu0 %v3489_v14, %s3113_s3 }
 0xaad   :  { %2043 = vrot.lane.b32.xlu0 %v1606_v28, %s3114_s21 }
 0xab5   :  { %1932 = vrot.lane.b32.xlu1 %v3350_v56, %s3112_s28 }
 0xab9   :  { %2025 = vrot.lane.b32.xlu1 %v3471_v5, %s3113_s3 }
 0xabd   :  { %2041 = vrot.lane.b32.xlu1 %v2906_v17, %s3114_s21 }
 0xac1   :  { %2029 = vrot.lane.b32.xlu1 %v3487_v13, %s3113_s3 }
 0xac5   :  { %2045 = vrot.lane.b32.xlu1 %v2913_v26, %s3114_s21 }
 0xaf6   :  { %v1830_v6 = vpop.xlane.xlu0 %1829 }
 0xaf8   :  { %v1827_v50 = vpop.xlane.xlu1 %1826 }
 0xaf9   :  { %3059 = vrcp.f32 %v1827_v50 }
 0xafa   :  { %3061 = vrcp.f32 %v1830_v6 }
 0xafc   :  { %v1935_v54 = vpop.permute.xlu1 %1934 }
 0xafd   :  { %2935 = vmatprep.subr.mxu1 %v1935_v54 }
 0xafe   :  { %2936 = vmatpush3.msra.mxu1 %v1935_v54 }
 0xb06   :  { %v3060_v2 = vpop.eup %3059 }
 0xb07   :  { %v1841_v7 = vmul.f32 %v3060_v2, %v3054_v52  ;;  %v3062_v39 = vpop.eup %3061 }
 0xb08   :  { %v1842_v5 = vmul.f32 %v3062_v39, %v3052_v48 }
 0xb09   :  { %2932 = vmatprep.mubr.msk.f32.mxu0 %vm596_vm3, %v1841_v7 }
 0xb10   :  { %v1836_v14 = vpop.xlane.xlu0 %1835 }
 0xb11   :  { %3063 = vrcp.f32 %v1836_v14 }
 0xb14   :  { %v1846_v56 = vpop.permute.xlu0 %1845 }
 0xb15   :  { %2930 = vmatprep.subr.mxu0 %v1846_v56 }
 0xb16   :  { %2931 = vmatpush3.msra.mxu0 %v1846_v56 }
 0xb17   :  { %2933 = vmatmul.mubr.msk.f32.vlgmr.msra.gmra.mxu0 %vm596_vm3, %v1842_v5  ;;  %2942 = vmatprep.subr.mxu0 %v2083_v11 }
 0xb18   :  { %2943 = vmatpush3.msra.mxu0 %v2083_v11  ;;  %v2024_v22 = vpop.permute.xlu0 %2023 }
 0xb19   :  { %2944 = vmatprep.subr.mxu0 %v2082_v12  ;;  %v2067_v33 = vsel %vm419_vm2, %v3469_v4, %v2024_v22  ;;  %v2386_v22 = vld [vmem:[%s3695_s14 + $0x38] sm:$0xff] }
 0xb1a   :  { %2945 = vmatpush3.msra.mxu0 %v2082_v12 }
 0xb1b   :  { %2946 = vmatprep.subr.mxu0 %v2081_v15 }
 0xb1c   :  { %2947 = vmatpush3.msra.mxu0 %v2081_v15  ;;  %v2040_v25 = vpop.permute.xlu0 %2039 }
 0xb1d   :  { %2948 = vmatprep.subr.mxu0 %v2080_v16  ;;  %v2071_v35 = vsel %vm596_vm3, %v2067_v33, %v2040_v25  ;;  %v2384_v25 = vld [vmem:[%s3695_s14 + $0x28] sm:$0xff] }
 0xb1e   :  { %v3064_v46 = vpop.eup %3063  ;;  %2949 = vmatpush3.msra.mxu0 %v2080_v16 }
 0xb1f   :  { %v1844_v10 = vmul.f32 %v3064_v46, %v3056_v60  ;;  %v2269_v46 = vld [vmem:[%s3693_s12 + $0x10] sm:$0xff]  ;;  %2970 = vmatprep.subr.mxu0 %v2386_v22 }
 0xb20   :  { %v2028_v28 = vpop.permute.xlu0 %2027 }
 0xb21   :  { %v2069_v4 = vsel %vm419_vm2, %v3405_v36, %v2028_v28  ;;  %v2641_v36 = vld [vmem:[%s3690_s9] ss:$0 sm:$0xff] }
 0xb24   :  { %v2044_v32 = vpop.permute.xlu0 %2043 }
 0xb25   :  { %v2073_v47 = vsel %vm596_vm3, %v2069_v4, %v2044_v32 }
 0xb2d   :  { %v1833_v13 = vpop.xlane.xlu1 %1832 }
 0xb2e   :  { %3065 = vrcp.f32 %v1833_v13 }
 0xb31   :  { %v1933_v43 = vpop.permute.xlu1 %1932 }
 0xb32   :  { %2937 = vmatprep.subr.mxu1 %v1933_v43 }
 0xb33   :  { %2938 = vmatpush3.msra.mxu1 %v1933_v43 }
 0xb35   :  { %v2026_v41 = vpop.permute.xlu1 %2025 }
 0xb36   :  { %v2068_v37 = vsel %vm419_vm2, %v3467_v3, %v2026_v41 }
 0xb39   :  { %v2042_v24 = vpop.permute.xlu1 %2041 }
 0xb3a   :  { %v2072_v40 = vsel %vm596_vm3, %v2068_v37, %v2042_v24  ;;  %v2385_v24 = vld [vmem:[%s3695_s14 + $0x30] sm:$0xff] }
 0xb3b   :  { %v3066_v8 = vpop.eup %3065 }
 0xb3c   :  { %v1843_v9 = vmul.f32 %v3066_v8, %v3058_v0  ;;  %v2268_v8 = vld [vmem:[%s3693_s12 + $0x8] sm:$0xff] }
 0xb3d   :  { %v2030_v26 = vpop.permute.xlu1 %2029 }
 0xb3e   :  { %2939 = vmatprep.mubr.msk.f32.mxu1 %vm596_vm3, %v1843_v9  ;;  %v2070_v3 = vsel %vm419_vm2, %v3401_v30, %v2030_v26  ;;  %v2267_v9 = vld [vmem:[%s3693_s12] sm:$0xff] }
 0xb3f   :  { %2940 = vmatmul.mubr.msk.f32.vlgmr.msra.gmra.mxu1 %vm596_vm3, %v1844_v10  ;;  %v2383_v26 = vld [vmem:[%s3695_s14 + $0x20] sm:$0xff] }
 0xb41   :  { %v2046_v29 = vpop.permute.xlu1 %2045 }
 0xb42   :  { %v2074_v48 = vsel %vm596_vm3, %v2070_v3, %v2046_v29 }
 0xbd7   :  { %v2934_v17 = vpop.f32.mrf.mxu0 }
 0xbd8   :  { %2057 = vrot.lane.b32.xlu1 %v2934_v17, %s3115_s2 }
 0xbd9   :  { %v1923_v18 = vpop.f32.mrf.mxu0 }
 0xbda   :  { %2055 = vrot.lane.b32.xlu0 %v1923_v18, %s3115_s2 }
 0xbff   :  { %v2941_v20 = vpop.f32.mrf.mxu1 }
 0xc00   :  { %2061 = vrot.lane.b32.xlu1 %v2941_v20, %s3115_s2 }
 0xc01   :  { %v2010_v21 = vpop.f32.mrf.mxu1 }
 0xc02   :  { %2059 = vrot.lane.b32.xlu0 %v2010_v21, %s3115_s2 }
 0xc4a   :  { %v2058_v34 = vpop.permute.xlu1 %2057 }
 0xc4b   :  { %v2077_v44 = vsel %vm2075_vm4, %v2072_v40, %v2058_v34  ;;  %v2646_v40 = vld [vmem:[%s3691_s10] ss:$0 sm:$0xff] }
 0xc4c   :  { %v2056_v38 = vpop.permute.xlu0 %2055 }
 0xc4d   :  { %v2076_v42 = vsel %vm2075_vm4, %v2071_v35, %v2056_v38 }
 0xc4e   :  { %2950 = vmatprep.mubr.msk.f32.mxu0 %vm207_vm1, %v2076_v42 }
 0xc4f   :  { %2951 = vmatmul.mubr.msk.f32.vlgmr.msra.gmra.mxu0 %vm207_vm1, %v2077_v44 }
 0xc50   :  { %2971 = vmatpush3.msra.mxu0 %v2386_v22 }
 0xc51   :  { %2972 = vmatprep.subr.mxu0 %v2385_v24 }
 0xc52   :  { %2973 = vmatpush3.msra.mxu0 %v2385_v24 }
 0xc53   :  { %2974 = vmatprep.subr.mxu0 %v2384_v25 }
 0xc54   :  { %2975 = vmatpush3.msra.mxu0 %v2384_v25 }
 0xc55   :  { %2976 = vmatprep.subr.mxu0 %v2383_v26 }
 0xc56   :  { %2977 = vmatpush3.msra.mxu0 %v2383_v26 }
 0xc72   :  { %v2062_v45 = vpop.permute.xlu1 %2061 }
 0xc73   :  { %v2079_v52 = vsel %vm2075_vm4, %v2074_v48, %v2062_v45  ;;  %v2647_v45 = vld [vmem:[%s3692_s11] ss:$0 sm:$0xff] }
 0xc74   :  { %v2060_v49 = vpop.permute.xlu0 %2059 }
 0xc75   :  { %v2078_v51 = vsel %vm2075_vm4, %v2073_v47, %v2060_v49 }
 0xc76   :  { %2953 = vmatprep.mubr.msk.f32.mxu0 %vm207_vm1, %v2078_v51 }
 0xc77   :  { %2954 = vmatmul.mubr.msk.f32.gmra.mxu0 %vm207_vm1, %v2079_v52 }
 0xd0f   :  { %v2952_v53 = vpop.f32.mrf.mxu0 }
 0xd10   :  { %v2175_v55 = vadd.f32 %v2952_v53, %v2641_v36 }
 0xd11   :  { %v2169_v57 = vpop.f32.mrf.mxu0 }
 0xd12   :  { %v2170_v58 = vadd.f32 %v2641_v36, %v2169_v57  ;;  %v2189_v30 = vadd.f32 %v2175_v55, %v3272_v19 }
 0xd14   :  { %v2197_v59 = vsel %vm207_vm1, %v2189_v30, 0.0  ;;  %v2188_v60 = vadd.f32 %v2170_v58, %v3280_v23 }
 0xd15   :  { %2198 = vadd.xlane.f32.xlu1 %v2197_v59 }
 0xd16   :  { %v2194_v61 = vsel %vm207_vm1, %v2188_v60, 0.0 }
 0xd17   :  { %2195 = vadd.xlane.f32.xlu0 %v2194_v61 }
 0xd37   :  { %v2955_v62 = vpop.f32.mrf.mxu0 }
 0xd38   :  { %v2185_v0 = vadd.f32 %v2955_v62, %v2641_v36 }
 0xd39   :  { %v2179_v63 = vpop.f32.mrf.mxu0 }
 0xd3a   :  { %v2180_v1 = vadd.f32 %v2641_v36, %v2179_v63  ;;  %v2191_v6 = vadd.f32 %v2185_v0, %v3284_v27  ;;  %v2270_v27 = vld [vmem:[%s3693_s12 + $0x18] sm:$0xff] }
 0xd3b   :  { %2956 = vmatprep.subr.mxu1 %v2270_v27  ;;  %v2382_v0 = vld [vmem:[%s3695_s14 + $0x18] sm:$0xff] }
 0xd3c   :  { %v2190_v50 = vadd.f32 %v2180_v1, %v3292_v31  ;;  %v2203_v19 = vsel %vm207_vm1, %v2191_v6, 0.0  ;;  %2957 = vmatpush3.msra.mxu1 %v2270_v27  ;;  %2978 = vmatprep.subr.mxu0 %v2382_v0  ;;  %v2381_v1 = vld [vmem:[%s3695_s14 + $0x10] sm:$0xff] }
 0xd3d   :  { %2958 = vmatprep.subr.mxu1 %v2269_v46  ;;  %2979 = vmatpush3.msra.mxu0 %v2382_v0  ;;  %v2659_v0 = vld [vmem:[%s3698_s17] ss:$0 sm:$0xff] }
 0xd3e   :  { %v2200_v54 = vsel %vm207_vm1, %v2190_v50, 0.0  ;;  %2959 = vmatpush3.msra.mxu1 %v2269_v46  ;;  %2980 = vmatprep.subr.mxu0 %v2381_v1  ;;  %v2653_v46 = vld [vmem:[#allocation2] ss:$0 sm:$0xff] }
 0xd3f   :  { %2201 = vadd.xlane.f32.xlu0 %v2200_v54  ;;  %2960 = vmatprep.subr.mxu1 %v2268_v8  ;;  %v2379_v54 = vld [vmem:[%s3695_s14] sm:$0xff] }
 0xd40   :  { %2961 = vmatpush3.msra.mxu1 %v2268_v8  ;;  %2981 = vmatpush3.msra.mxu0 %v2381_v1 }
 0xd41   :  { %2962 = vmatprep.subr.mxu1 %v2267_v9 }
 0xd42   :  { %2963 = vmatpush3.msra.mxu1 %v2267_v9 }
 0xd43   :  { %2204 = vadd.xlane.f32.xlu0 %v2203_v19 }
 0xd9e   :  { %v2199_v2 = vpop.xlane.xlu1 %2198 }
 0xd9f   :  { %v2208_v23 = vmul.f32 0.03125, %v2199_v2 }
 0xda0   :  { %v2196_v7 = vpop.xlane.xlu0 %2195 }
 0xda1   :  { %v2212_v14 = vsub.f32 %v2189_v30, %v2208_v23  ;;  %v2207_v39 = vmul.f32 0.03125, %v2196_v7 }
 0xda3   :  { %v2211_v56 = vsub.f32 %v2188_v60, %v2207_v39  ;;  %v2216_v5 = vmul.f32 %v2212_v14, %v2212_v14 }
 0xda5   :  { %v2222_v13 = vsel %vm207_vm1, %v2216_v5, 0.0  ;;  %v2215_v43 = vmul.f32 %v2211_v56, %v2211_v56 }
 0xda6   :  { %2223 = vadd.xlane.f32.xlu0 %v2222_v13 }
 0xda7   :  { %v2219_v31 = vsel %vm207_vm1, %v2215_v43, 0.0 }
 0xda8   :  { %2220 = vadd.xlane.f32.xlu1 %v2219_v31 }
 0xdc8   :  { %v2202_v10 = vpop.xlane.xlu0 %2201 }
 0xdc9   :  { %v2209_v11 = vmul.f32 0.03125, %v2202_v10 }
 0xdcb   :  { %v2213_v12 = vsub.f32 %v2190_v50, %v2209_v11  ;;  %v2380_v50 = vld [vmem:[%s3695_s14 + $0x8] sm:$0xff] }
 0xdcc   :  { %v2205_v15 = vpop.xlane.xlu0 %2204  ;;  %2982 = vmatprep.subr.mxu0 %v2380_v50 }
 0xdcd   :  { %v2210_v16 = vmul.f32 0.03125, %v2205_v15  ;;  %v2217_v17 = vmul.f32 %v2213_v12, %v2213_v12  ;;  %2983 = vmatpush3.msra.mxu0 %v2380_v50 }
 0xdce   :  { %2984 = vmatprep.subr.mxu0 %v2379_v54 }
 0xdcf   :  { %v2214_v18 = vsub.f32 %v2191_v6, %v2210_v16  ;;  %v2225_v20 = vsel %vm207_vm1, %v2217_v17, 0.0  ;;  %2985 = vmatpush3.msra.mxu0 %v2379_v54  ;;  %v2648_v6 = vld [vmem:[%s3694_s13] ss:$0 sm:$0xff] }
 0xdd0   :  { %2226 = vadd.xlane.f32.xlu1 %v2225_v20 }
 0xdd1   :  { %v2218_v21 = vmul.f32 %v2214_v18, %v2214_v18 }
 0xdd3   :  { %v2228_v41 = vsel %vm207_vm1, %v2218_v21, 0.0 }
 0xdd4   :  { %2229 = vadd.xlane.f32.xlu0 %v2228_v41 }
 0xe2f   :  { %v2224_v28 = vpop.xlane.xlu0 %2223 }
 0xe30   :  { %v2232_v29 = vmul.f32 0.03125, %v2224_v28 }
 0xe31   :  { %v2221_v32 = vpop.xlane.xlu1 %2220 }
 0xe32   :  { %v2236_v33 = vadd.f32 1e-05, %v2232_v29  ;;  %v2231_v34 = vmul.f32 0.03125, %v2221_v32 }
 0xe34   :  { %3067 = vrsqrt.f32 %v2236_v33  ;;  %v2235_v35 = vadd.f32 1e-05, %v2231_v34 }
 0xe36   :  { %3069 = vrsqrt.f32 %v2235_v35 }
 0xe41   :  { %v3068_v37 = vpop.eup %3067 }
 0xe42   :  { %v2244_v38 = vmul.f32 %v3068_v37, %v2212_v14 }
 0xe43   :  { %v3070_v42 = vpop.eup %3069 }
 0xe44   :  { %v2243_v44 = vmul.f32 %v3070_v42, %v2211_v56  ;;  %v2254_v4 = vmul.f32 %v2646_v40, %v2244_v38 }
 0xe46   :  { %v2253_v47 = vmul.f32 %v2646_v40, %v2243_v44  ;;  %v2264_v49 = vadd.f32 %v2647_v45, %v2254_v4 }
 0xe48   :  { %v2263_v3 = vadd.f32 %v2647_v45, %v2253_v47 }
 0xe4a   :  { %2964 = vmatprep.mubr.msk.f32.mxu1 %vm207_vm1, %v2263_v3 }
 0xe4b   :  { %2965 = vmatmul.mubr.msk.f32.vlgmr.msra.gmra.mxu1 %vm207_vm1, %v2264_v49 }
 0xe59   :  { %v2227_v48 = vpop.xlane.xlu1 %2226 }
 0xe5a   :  { %v2233_v51 = vmul.f32 0.03125, %v2227_v48 }
 0xe5c   :  { %v2237_v52 = vadd.f32 1e-05, %v2233_v51 }
 0xe5d   :  { %v2230_v36 = vpop.xlane.xlu0 %2229 }
 0xe5e   :  { %3071 = vrsqrt.f32 %v2237_v52  ;;  %v2234_v53 = vmul.f32 0.03125, %v2230_v36 }
 0xe60   :  { %v2238_v55 = vadd.f32 1e-05, %v2234_v53 }
 0xe62   :  { %3073 = vrsqrt.f32 %v2238_v55 }
 0xe6b   :  { %v3072_v57 = vpop.eup %3071 }
 0xe6c   :  { %v2245_v58 = vmul.f32 %v3072_v57, %v2213_v12 }
 0xe6e   :  { %v2255_v30 = vmul.f32 %v2646_v40, %v2245_v58 }
 0xe6f   :  { %v3074_v59 = vpop.eup %3073 }
 0xe70   :  { %v2265_v60 = vadd.f32 %v2647_v45, %v2255_v30  ;;  %v2246_v61 = vmul.f32 %v3074_v59, %v2214_v18 }
 0xe72   :  { %2967 = vmatprep.mubr.msk.f32.mxu1 %vm207_vm1, %v2265_v60  ;;  %v2256_v62 = vmul.f32 %v2646_v40, %v2246_v61  ;;  %v2658_v61 = vld [vmem:[%s3697_s16] ss:$0 sm:$0xff] }
 0xe74   :  { %v2266_v63 = vadd.f32 %v2647_v45, %v2256_v62 }
 0xe76   :  { %2968 = vmatmul.mubr.msk.f32.gmra.mxu1 %vm207_vm1, %v2266_v63 }
 0xf0b   :  { %v2966_v19 = vpop.f32.mrf.mxu1 }
 0xf0c   :  { %v2362_v2 = vadd.f32 %v2966_v19, %v2648_v6 }
 0xf0d   :  { %v2356_v23 = vpop.f32.mrf.mxu1 }
 0xf0e   :  { %v2357_v7 = vadd.f32 %v2648_v6, %v2356_v23  ;;  %v2376_v39 = vmax.f32 %v2362_v2, 0.0 }
 0xf10   :  { %v2375_v14 = vmax.f32 %v2357_v7, 0.0 }
 0xf12   :  { %2986 = vmatprep.mubr.msk.f32.mxu0 %vm94_vm0, %v2375_v14 }
 0xf13   :  { %2987 = vmatmul.mubr.msk.f32.vlgmr.msra.gmra.mxu0 %vm94_vm0, %v2376_v39 }
 0xf36   :  { %v2969_v56 = vpop.f32.mrf.mxu1 }
 0xf37   :  { %v2372_v5 = vadd.f32 %v2969_v56, %v2648_v6 }
 0xf38   :  { %v2366_v13 = vpop.f32.mrf.mxu1 }
 0xf39   :  { %v2367_v43 = vadd.f32 %v2648_v6, %v2366_v13  ;;  %v2378_v27 = vmax.f32 %v2372_v5, 0.0 }
 0xf3b   :  { %v2377_v31 = vmax.f32 %v2367_v43, 0.0 }
 0xf3d   :  { %2989 = vmatprep.mubr.msk.f32.mxu0 %vm94_vm0, %v2377_v31 }
 0xf3e   :  { %2990 = vmatmul.mubr.msk.f32.gmra.mxu0 %vm94_vm0, %v2378_v27 }
 0xfd3   :  { %v2988_v8 = vpop.f32.mrf.mxu0 }
 0xfd4   :  { %v2478_v9 = vadd.f32 %v2988_v8, %v2653_v46 }
 0xfd5   :  { %v2472_v10 = vpop.f32.mrf.mxu0 }
 0xfd6   :  { %v2473_v11 = vadd.f32 %v2653_v46, %v2472_v10  ;;  %v2492_v12 = vadd.f32 %v2478_v9, %v2264_v49 }
 0xfd8   :  { %v2491_v15 = vadd.f32 %v2473_v11, %v2263_v3  ;;  %v2500_v16 = vsel %vm207_vm1, %v2492_v12, 0.0 }
 0xfd9   :  { %2501 = vadd.xlane.f32.xlu0 %v2500_v16 }
 0xfda   :  { %v2497_v17 = vsel %vm207_vm1, %v2491_v15, 0.0 }
 0xfdb   :  { %2498 = vadd.xlane.f32.xlu1 %v2497_v17 }
 0xffe   :  { %v2991_v18 = vpop.f32.mrf.mxu0 }
 0xfff   :  { %v2488_v20 = vadd.f32 %v2991_v18, %v2653_v46 }
0x1000   :  { %v2482_v21 = vpop.f32.mrf.mxu0 }
0x1001   :  { %v2483_v41 = vadd.f32 %v2653_v46, %v2482_v21  ;;  %v2494_v22 = vadd.f32 %v2488_v20, %v2266_v63 }
0x1003   :  { %v2493_v24 = vadd.f32 %v2483_v41, %v2265_v60  ;;  %v2506_v25 = vsel %vm207_vm1, %v2494_v22, 0.0 }
0x1004   :  { %2507 = vadd.xlane.f32.xlu0 %v2506_v25 }
0x1005   :  { %v2503_v26 = vsel %vm207_vm1, %v2493_v24, 0.0 }
0x1006   :  { %2504 = vadd.xlane.f32.xlu1 %v2503_v26 }
0x1062   :  { %v2502_v28 = vpop.xlane.xlu0 %2501 }
0x1063   :  { %v2510_v29 = vmul.f32 0.03125, %v2502_v28 }
0x1064   :  { %v2499_v32 = vpop.xlane.xlu1 %2498 }
0x1065   :  { %v2514_v33 = vsub.f32 %v2492_v12, %v2510_v29  ;;  %v2509_v34 = vmul.f32 0.03125, %v2499_v32 }
0x1067   :  { %v2513_v35 = vsub.f32 %v2491_v15, %v2509_v34  ;;  %v2518_v37 = vmul.f32 %v2514_v33, %v2514_v33 }
0x1069   :  { %v2524_v38 = vsel %vm207_vm1, %v2518_v37, 0.0  ;;  %v2517_v40 = vmul.f32 %v2513_v35, %v2513_v35 }
0x106a   :  { %2525 = vadd.xlane.f32.xlu0 %v2524_v38 }
0x106b   :  { %v2521_v42 = vsel %vm207_vm1, %v2517_v40, 0.0 }
0x106c   :  { %2522 = vadd.xlane.f32.xlu1 %v2521_v42 }
0x108d   :  { %v2508_v44 = vpop.xlane.xlu0 %2507 }
0x108e   :  { %v2512_v4 = vmul.f32 0.03125, %v2508_v44 }
0x108f   :  { %v2505_v45 = vpop.xlane.xlu1 %2504 }
0x1090   :  { %v2516_v47 = vsub.f32 %v2494_v22, %v2512_v4  ;;  %v2511_v3 = vmul.f32 0.03125, %v2505_v45 }
0x1092   :  { %v2515_v49 = vsub.f32 %v2493_v24, %v2511_v3  ;;  %v2520_v48 = vmul.f32 %v2516_v47, %v2516_v47 }
0x1094   :  { %v2530_v51 = vsel %vm207_vm1, %v2520_v48, 0.0  ;;  %v2519_v52 = vmul.f32 %v2515_v49, %v2515_v49 }
0x1095   :  { %2531 = vadd.xlane.f32.xlu0 %v2530_v51 }
0x1096   :  { %v2527_v36 = vsel %vm207_vm1, %v2519_v52, 0.0 }
0x1097   :  { %2528 = vadd.xlane.f32.xlu1 %v2527_v36 }
0x10f3   :  { %v2526_v53 = vpop.xlane.xlu0 %2525 }
0x10f4   :  { %v2534_v55 = vmul.f32 0.03125, %v2526_v53 }
0x10f5   :  { %v2523_v57 = vpop.xlane.xlu1 %2522 }
0x10f6   :  { %v2538_v58 = vadd.f32 1e-05, %v2534_v55  ;;  %v2533_v30 = vmul.f32 0.03125, %v2523_v57 }
0x10f8   :  { %3075 = vrsqrt.f32 %v2538_v58  ;;  %v2537_v59 = vadd.f32 1e-05, %v2533_v30 }
0x10fa   :  { %3077 = vrsqrt.f32 %v2537_v59 }
0x1105   :  { %v3076_v60 = vpop.eup %3075 }
0x1106   :  { %v2546_v62 = vmul.f32 %v3076_v60, %v2514_v33 }
0x1107   :  { %v3078_v63 = vpop.eup %3077 }
0x1108   :  { %v2556_v1 = vmul.f32 %v2658_v61, %v2546_v62  ;;  %v2545_v50 = vmul.f32 %v3078_v63, %v2513_v35 }
0x110a   :  { %v2566_v54 = vadd.f32 %v2659_v0, %v2556_v1  ;;  %v2555_v6 = vmul.f32 %v2658_v61, %v2545_v50 }
0x110c   :  { %2570 = vst.msk [vmem:[%s3699_s18 + $0x8] sm:$0xff] %vm207_vm1, %v2566_v54  ;;  %v2565_v19 = vadd.f32 %v2659_v0, %v2555_v6 }
0x110e   :  { %2569 = vst.msk [vmem:[%s3699_s18] sm:$0xff] %vm207_vm1, %v2565_v19 }
0x111e   :  { %v2532_v2 = vpop.xlane.xlu0 %2531 }
0x111f   :  { %v2536_v23 = vmul.f32 0.03125, %v2532_v2 }
0x1120   :  { %v2529_v7 = vpop.xlane.xlu1 %2528 }
0x1121   :  { %v2540_v14 = vadd.f32 1e-05, %v2536_v23  ;;  %v2535_v39 = vmul.f32 0.03125, %v2529_v7 }
0x1123   :  { %3079 = vrsqrt.f32 %v2540_v14  ;;  %v2539_v56 = vadd.f32 1e-05, %v2535_v39 }
0x1125   :  { %3081 = vrsqrt.f32 %v2539_v56 }
0x1130   :  { %v3080_v5 = vpop.eup %3079 }
0x1131   :  { %v2548_v13 = vmul.f32 %v3080_v5, %v2516_v47 }
0x1132   :  { %v3082_v43 = vpop.eup %3081 }
0x1133   :  { %v2558_v31 = vmul.f32 %v2658_v61, %v2548_v13  ;;  %v2547_v27 = vmul.f32 %v3082_v43, %v2515_v49 }
0x1135   :  { %v2568_v46 = vadd.f32 %v2659_v0, %v2558_v31  ;;  %v2557_v8 = vmul.f32 %v2658_v61, %v2547_v27 }
0x1137   :  { %2572 = vst.msk [vmem:[%s3699_s18 + $0x18] sm:$0xff] %vm207_vm1, %v2568_v46  ;;  %v2567_v9 = vadd.f32 %v2659_v0, %v2557_v8 }
0x1139   :  { %2571 = vst.msk [vmem:[%s3699_s18 + $0x10] sm:$0xff] %vm207_vm1, %v2567_v9 }
0x113a   :  { %2577 = vsyncpa [#allocation3], 1 }

// kernel: _lambda_.9
= control target key start
LH: loop header
LB: loop body
LE: loop exit
PB: predicated region body
PF: predicated region fallthrough
CT: control target
= control target key end

     0   :  { %s5204_s6 = smov 1   ;;  %s5205_s10 = smov 2   ;;  %s6013_s0 = inlined_call_operand.smem [shape: u32[39], index: -1, kind: input, shape index: {}] }
   0x1   :  { %s5264_s5 = sld [smem:[%s6013_s0]]   ;;  %s5206_s14 = smov 3  }
   0x2   :  { %s5269_s9 = sld [smem:[%s6013_s0 + %s5204_s6]]   ;;  %s5207_s18 = smov 4  }
   0x3   :  { %s5274_s13 = sld [smem:[%s6013_s0 + %s5205_s10]]   ;;  %s5208_s22 = smov 5  }
   0x4   :  { %s5279_s17 = sld [smem:[%s6013_s0 + %s5206_s14]]   ;;  %s5209_s26 = smov 6  }
   0x5   :  { %s5284_s21 = sld [smem:[%s6013_s0 + %s5207_s18]]   ;;  %s5210_s30 = smov 7  }
   0x6   :  { %s5289_s25 = sld [smem:[%s6013_s0 + %s5208_s22]]   ;;  %s5211_s4 = smov 8  }
   0x7   :  { %s5294_s29 = sld [smem:[%s6013_s0 + %s5209_s26]]   ;;  %s5212_s10 = smov 9  }
   0x8   :  { %s5299_s3 = sld [smem:[%s6013_s0 + %s5210_s30]]   ;;  %s5213_s15 = smov 10  }
   0x9   :  { %s5304_s8 = sld [smem:[%s6013_s0 + %s5211_s4]]   ;;  %s5214_s20 = smov 11  }
   0xa   :  { %s5309_s14 = sld [smem:[%s6013_s0 + %s5212_s10]]   ;;  %s5215_s26 = smov 12  }
   0xb   :  { %s5314_s19 = sld [smem:[%s6013_s0 + %s5213_s15]]   ;;  %s5216_s1 = smov 13  }
   0xc   :  { %s5319_s24 = sld [smem:[%s6013_s0 + %s5214_s20]]   ;;  %s5217_s7 = smov 14  }
   0xd   :  { %s5324_s30 = sld [smem:[%s6013_s0 + %s5215_s26]]   ;;  %s5218_s15 = smov 15  }
   0xe   :  { %s5329_s6 = sld [smem:[%s6013_s0 + %s5216_s1]]   ;;  %s5219_s22 = smov 16  }
   0xf   :  { %s5334_s12 = sld [smem:[%s6013_s0 + %s5217_s7]]   ;;  %s5220_s28 = smov 17  }
  0x10   :  { %s5339_s20 = sld [smem:[%s6013_s0 + %s5218_s15]]   ;;  %s5221_s7 = smov 18  }
  0x11   :  { %s5344_s27 = sld [smem:[%s6013_s0 + %s5219_s22]]   ;;  %s5222_s15 = smov 19  }
  0x12   :  { %s5349_s4 = sld [smem:[%s6013_s0 + %s5220_s28]]   ;;  %s5223_s22 = smov 20  }
  0x13   :  { %6020 = sst [smem:[#allocation5_spill]] %s5324_s30  ;;  %s5224_s28 = smov 21  }
  0x14   :  { %s5354_s30 = sld [smem:[%s6013_s0 + %s5221_s7]]   ;;  %s5225_s7 = smov 22  }
  0x15   :  { %6021 = sst [smem:[#allocation6_spill]] %s5334_s12 }
  0x16   :  { %s5359_s12 = sld [smem:[%s6013_s0 + %s5222_s15]]   ;;  %s5226_s15 = smov 23  }
  0x17   :  { %6022 = sst [smem:[#allocation7_spill]] %s5344_s27 }
  0x18   :  { %6023 = sst [smem:[#allocation8_spill]] %s5349_s4 }
  0x19   :  { %s5364_s27 = sld [smem:[%s6013_s0 + %s5223_s22]]   ;;  %s5227_s22 = smov 24  }
  0x1a   :  { %6024 = sst [smem:[#allocation9_spill]] %s5354_s30 }
  0x1b   :  { %s5369_s4 = sld [smem:[%s6013_s0 + %s5224_s28]]   ;;  %s5228_s28 = smov 25  }
  0x1c   :  { %6025 = sst [smem:[#allocation10_spill]] %s5359_s12 }
  0x1d   :  { %s5374_s30 = sld [smem:[%s6013_s0 + %s5225_s7]]   ;;  %s5229_s7 = smov 26  }
  0x1e   :  { %s5379_s12 = sld [smem:[%s6013_s0 + %s5226_s15]]   ;;  %s5230_s15 = smov 27  }
  0x1f   :  { %6026 = sst [smem:[#allocation11_spill]] %s5364_s27 }
  0x20   :  { %s5384_s27 = sld [smem:[%s6013_s0 + %s5227_s22]]   ;;  %s5231_s22 = smov 28  }
  0x21   :  { %6027 = sst [smem:[#allocation12_spill]] %s5369_s4 }
  0x22   :  { %s5389_s4 = sld [smem:[%s6013_s0 + %s5228_s28]]   ;;  %s5232_s28 = smov 29  }
  0x23   :  { %6028 = sst [smem:[#allocation13_spill]] %s5374_s30 }
  0x24   :  { %6029 = sst [smem:[#allocation14_spill]] %s5379_s12 }
  0x25   :  { %s5394_s30 = sld [smem:[%s6013_s0 + %s5229_s7]]   ;;  %s5233_s7 = smov 30  }
  0x26   :  { %6030 = sst [smem:[#allocation15_spill]] %s5384_s27 }
  0x27   :  { %s5399_s12 = sld [smem:[%s6013_s0 + %s5230_s15]]   ;;  %s5234_s15 = smov 31  }
  0x28   :  { %6031 = sst [smem:[#allocation16_spill]] %s5389_s4 }
  0x29   :  { %s5404_s27 = sld [smem:[%s6013_s0 + %s5231_s22]]   ;;  %s5235_s22 = smov 32  }
  0x2a   :  { %s5409_s4 = sld [smem:[%s6013_s0 + %s5232_s28]]   ;;  %s5236_s28 = smov 33  }
  0x2b   :  { %6032 = sst [smem:[#allocation17_spill]] %s5394_s30 }
  0x2c   :  { %s5414_s30 = sld [smem:[%s6013_s0 + %s5233_s7]]   ;;  %s5237_s7 = smov 34  }
  0x2d   :  { %6033 = sst [smem:[#allocation18_spill]] %s5399_s12 }
  0x2e   :  { %s5419_s12 = sld [smem:[%s6013_s0 + %s5234_s15]]   ;;  %s5238_s15 = smov 35  }
  0x2f   :  { %6034 = sst [smem:[#allocation19_spill]] %s5404_s27 }
  0x30   :  { %6035 = sst [smem:[#allocation20_spill]] %s5409_s4 }
  0x31   :  { %s5424_s27 = sld [smem:[%s6013_s0 + %s5235_s22]]   ;;  %s5239_s22 = smov 36  }
  0x32   :  { %6036 = sst [smem:[#allocation21_spill]] %s5414_s30 }
  0x33   :  { %s5429_s4 = sld [smem:[%s6013_s0 + %s5236_s28]]   ;;  %s5240_s28 = smov 37  }
  0x34   :  { %6037 = sst [smem:[#allocation22_spill]] %s5419_s12 }
  0x35   :  { %s5434_s30 = sld [smem:[%s6013_s0 + %s5237_s7]]   ;;  %s5241_s7 = smov 38  }
  0x36   :  { %s5439_s12 = sld [smem:[%s6013_s0 + %s5238_s15]]  }
  0x37   :  { %6038 = sst [smem:[#allocation23_spill]] %s5424_s27 }
  0x38   :  { %s5444_s27 = sld [smem:[%s6013_s0 + %s5239_s22]]  }
  0x39   :  { %6039 = sst [smem:[#allocation24_spill]] %s5429_s4 }
  0x3a   :  { %s5449_s4 = sld [smem:[%s6013_s0 + %s5240_s28]]  }
  0x3b   :  { %6040 = sst [smem:[#allocation25_spill]] %s5434_s30 }
  0x3c   :  { %s5454_s30 = sld [smem:[%s6013_s0 + %s5241_s7]]  }
  0x3d   :  { %v173_v0 = vld [vmem:[%s5279_s17 + $0x18] sm:$0xff]  ;;  %v172_v1 = vld [vmem:[%s5279_s17 + $0x10] sm:$0xff]  ;;  %vm181_vm0 = vcmask 261120   ;;  %v5459_v2 = vld [vmem:[%s5264_s5] sm:$0xff] }
  0x3e   :  { %4693 = vmatprep.subr.mxu0 %v173_v0  ;;  %v171_v3 = vld [vmem:[%s5279_s17 + $0x8] sm:$0xff]  ;;  %4701 = vmatprep.mubr.msk.f32.mxu0 %vm181_vm0, %v5459_v2 }
  0x3f   :  { %4694 = vmatpush3.msra.mxu0 %v173_v0 }
  0x40   :  { %83 = vsyncpa [#allocation3], 0  ;;  %4695 = vmatprep.subr.mxu0 %v172_v1  ;;  %v170_v4 = vld [vmem:[%s5279_s17] sm:$0xff]  ;;  %v5466_v5 = vld [vmem:[%s5264_s5 + $0x8] sm:$0xff]  ;;  %v5242_v8 = vmov 0.0   ;;  %vm5243_vm1 = vmmov 0  }
  0x41   :  { %4696 = vmatpush3.msra.mxu0 %v172_v1  ;;  %v266_v6 = vld [vmem:[%s5289_s25 + $0x18] sm:$0xff]  ;;  %v265_v7 = vld [vmem:[%s5289_s25 + $0x10] sm:$0xff]  ;;  %v264_v9 = vld [vmem:[%s5289_s25 + $0x8] sm:$0xff]  ;;  %4712 = vmatprep.mubr.f32.mxu1 %v5242_v8  ;;  %s5244_s0 = smov 96   ;;  %vm355_vm2 = vcmask 64512   ;;  %s5245_s5 = smov 88  }
  0x42   :  { %4697 = vmatprep.subr.mxu0 %v171_v3  ;;  %4704 = vmatprep.subr.mxu1 %v266_v6  ;;  %v263_v10 = vld [vmem:[%s5289_s25] sm:$0xff]  ;;  %s5246_s17 = smov 120   ;;  %s5248_s25 = smov 112   ;;  %vm1701_vm3 = vcmask 130048   ;;  %vm1704_vm4 = vcmask 195584   ;;  %vm3807_vm5 = vcmask 523264  }
  0x43   :  { %4698 = vmatpush3.msra.mxu0 %v171_v3  ;;  %4705 = vmatpush3.msra.mxu1 %v266_v6  ;;  %v4420_v12 = vld [vmem:[%s5284_s21] ss:$0 sm:$0xff]  ;;  %s5247_s21 = smov 80   ;;  %s5250_s15 = smov 104  }
  0x44   :  { %4699 = vmatprep.subr.mxu0 %v170_v4  ;;  %4706 = vmatprep.subr.mxu1 %v265_v7  ;;  %v4423_v18 = vld [vmem:[%s5294_s29] ss:$0 sm:$0xff]  ;;  %s5249_s29 = smov 72   ;;  %s5251_s16 = smov 8  }
  0x45   :  { %4700 = vmatpush3.msra.mxu0 %v170_v4  ;;  %4707 = vmatpush3.msra.mxu1 %v265_v7  ;;  %s5252_s18 = smov 16   ;;  %s5253_s22 = smov 24  }
  0x46   :  { %4702 = vmatmul.mubr.msk.f32.vlgmr.msra.gmra.mxu0 %vm181_vm0, %v5466_v5  ;;  %4715 = vmatprep.subr.mxu0 %v5242_v8  ;;  %s6050_s23 = sld [smem:[#allocation13_spill]] }
  0x47   :  { %4708 = vmatprep.subr.mxu1 %v264_v9  ;;  %4717 = vmatprep.mubr.msk.f32.mxu0 %vm5243_vm1, %v5242_v8  ;;  %s6051_s26 = sld [smem:[#allocation15_spill]] }
  0x48   :  { %4709 = vmatpush3.msra.mxu1 %v264_v9  ;;  %s6052_s28 = sld [smem:[#allocation16_spill]] }
  0x49   :  { %4710 = vmatprep.subr.mxu1 %v263_v10  ;;  %s6053_s1 = sld [smem:[#allocation17_spill]] }
  0x4a   :  { %4711 = vmatpush3.msra.mxu1 %v263_v10  ;;  %s6054_s2 = sld [smem:[#allocation20_spill]] }
  0x4b   :  { %4713 = vmatmul.mubr.f32.vlgmr.msra.gmra.mxu1 %v5242_v8  ;;  %4720 = vmatprep.subr.mxu1 %v5242_v8  ;;  %s6055_s7 = sld [smem:[#allocation22_spill]] }
  0x4c   :  { %4722 = vmatprep.mubr.msk.f32.mxu1 %vm5243_vm1, %v5242_v8  ;;  %s6056_s10 = sld [smem:[#allocation18_spill]] }
  0x4d   :  { %s6057_s11 = sld [smem:[#allocation19_spill]] }
 0x106   :  { %v4703_v11 = vpop.f32.mrf.mxu0 }
 0x107   :  { %v5486_v15 = vadd.f32 %v4703_v11, %v4420_v12 }
 0x108   :  { %v254_v13 = vpop.f32.mrf.mxu0 }
 0x109   :  { %v5483_v14 = vadd.f32 %v4420_v12, %v254_v13 }
 0x10b   :  { %353 = vrot.lane.b32.xlu0 %v5483_v14, %s5244_s0  ;;  %v4714_v19 = vpop.f32.mrf.mxu1 }
 0x10c   :  { %v5502_v20 = vadd.f32 %v4714_v19, %v4423_v18 }
 0x10d   :  { %v343_v21 = vpop.f32.mrf.mxu1 }
 0x10e   :  { %v5504_v22 = vadd.f32 %v4423_v18, %v343_v21 }
 0x10f   :  { %431 = vrot.lane.b32.xlu0 %v5486_v15, %s5244_s0  ;;  %s6058_s0 = sld [smem:[#allocation24_spill]] }
 0x17d   :  { %v354_v16 = vpop.permute.xlu0 %353 }
 0x17e   :  { %4716 = vmatpush3.xpose.msk.msra.mxu0 %vm355_vm2, %v354_v16 }
 0x17f   :  { %4725 = vmatprep.subr.mxu0 %v5242_v8 }
 0x181   :  { %4718 = vmatmul.mubr.msk.f32.vlgmr.msra.gmra.mxu0 %vm355_vm2, %v5483_v14  ;;  %v432_v17 = vpop.permute.xlu0 %431 }
 0x182   :  { %4721 = vmatpush3.xpose.msk.msra.mxu1 %vm355_vm2, %v432_v17  ;;  %4727 = vmatprep.mubr.msk.f32.mxu0 %vm5243_vm1, %v5242_v8 }
 0x183   :  { %4730 = vmatprep.subr.mxu1 %v5242_v8  ;;  %4726 = vmatpush3.msra.mxu0 %v5504_v22 }
 0x184   :  { %4735 = vmatprep.subr.mxu0 %v5242_v8 }
 0x185   :  { %4723 = vmatmul.mubr.msk.f32.vlgmr.msra.gmra.mxu1 %vm355_vm2, %v5486_v15 }
 0x186   :  { %4732 = vmatprep.mubr.msk.f32.mxu1 %vm5243_vm1, %v5242_v8  ;;  %4731 = vmatpush3.msra.mxu1 %v5502_v20 }
 0x187   :  { %4740 = vmatprep.subr.mxu1 %v5242_v8 }
 0x241   :  { %v426_v23 = vpop.f32.mrf.mxu0 }
 0x242   :  { %v507_v24 = vmul.f32 0.35355338, %v426_v23 }
 0x243   :  { %v4719_v25 = vpop.f32.mrf.mxu0 }
 0x244   :  { %v509_v26 = vsel %vm355_vm2, %v507_v24, -inf }
 0x245   :  { %510 = vmax.xlane.f32.xlu1 %v509_v26  ;;  %v503_v27 = vpop.f32.mrf.mxu1 }
 0x246   :  { %v508_v28 = vmul.f32 0.35355338, %v503_v27 }
 0x247   :  { %v4724_v29 = vpop.f32.mrf.mxu1 }
 0x248   :  { %v512_v30 = vsel %vm355_vm2, %v508_v28, -inf }
 0x249   :  { %513 = vmax.xlane.f32.xlu1 %v512_v30 }
 0x2ce   :  { %v511_v31 = vpop.xlane.xlu1 %510 }
 0x2cf   :  { %v515_v32 = vsub.f32 %v507_v24, %v511_v31 }
 0x2d1   :  { %v517_v33 = vmul.f32 1.442695, %v515_v32 }
 0x2d2   :  { %v514_v34 = vpop.xlane.xlu1 %513 }
 0x2d3   :  { %5094 = vpow2.f32 %v517_v33  ;;  %v516_v35 = vsub.f32 %v508_v28, %v514_v34 }
 0x2d5   :  { %v519_v36 = vmul.f32 1.442695, %v516_v35 }
 0x2d7   :  { %5096 = vpow2.f32 %v519_v36 }
 0x2e0   :  { %v5095_v37 = vpop.eup %5094 }
 0x2e1   :  { %v521_v38 = vsel %vm355_vm2, %v5095_v37, 0.0 }
 0x2e2   :  { %522 = vadd.xlane.f32.xlu0 %v521_v38 }
 0x2e4   :  { %v5097_v39 = vpop.eup %5096 }
 0x2e5   :  { %v524_v40 = vsel %vm355_vm2, %v5097_v39, 0.0 }
 0x2e6   :  { %525 = vadd.xlane.f32.xlu1 %v524_v40 }
 0x2f7   :  { %679 = vrot.lane.b32.xlu1 %v5483_v14, %s5245_s5 }
 0x2fb   :  { %757 = vrot.lane.b32.xlu1 %v5486_v15, %s5245_s5  ;;  %s6059_s5 = sld [smem:[#allocation21_spill]] }
 0x2ff   :  { %677 = vrot.lane.b32.xlu1 %v5483_v14, %s5246_s17 }
 0x303   :  { %755 = vrot.lane.b32.xlu1 %v5486_v15, %s5246_s17 }
 0x36b   :  { %v523_v41 = vpop.xlane.xlu0 %522 }
 0x36c   :  { %5098 = vrcp.f32 %v523_v41 }
 0x36f   :  { %v526_v42 = vpop.xlane.xlu1 %525 }
 0x370   :  { %5100 = vrcp.f32 %v526_v42 }
 0x373   :  { %v680_v43 = vpop.permute.xlu1 %679 }
 0x377   :  { %v758_v44 = vpop.permute.xlu1 %757 }
 0x379   :  { %v5099_v45 = vpop.eup %5098 }
 0x37a   :  { %v529_v46 = vmul.f32 %v5099_v45, %v5095_v37 }
 0x37b   :  { %v678_v48 = vpop.permute.xlu1 %677 }
 0x37c   :  { %4728 = vmatmul.mubr.msk.f32.vlgmr.msra.gmra.mxu0 %vm355_vm2, %v529_v46 }
 0x37d   :  { %v5101_v47 = vpop.eup %5100  ;;  %4736 = vmatpush3.xpose.msk.msra.mxu0 %vm355_vm2, %v680_v43  ;;  %4737 = vmatprep.mubr.msk.f32.mxu0 %vm5243_vm1, %v5242_v8 }
 0x37e   :  { %v530_v49 = vmul.f32 %v5101_v47, %v5097_v39  ;;  %4745 = vmatprep.subr.mxu0 %v5242_v8 }
 0x37f   :  { %v756_v50 = vpop.permute.xlu1 %755 }
 0x380   :  { %4733 = vmatmul.mubr.msk.f32.vlgmr.msra.gmra.mxu1 %vm355_vm2, %v530_v49  ;;  %4738 = vmatmul.mubr.msk.f32.vlgmr.msra.gmra.mxu0 %vm355_vm2, %v678_v48 }
 0x381   :  { %4741 = vmatpush3.xpose.msk.msra.mxu1 %vm355_vm2, %v758_v44  ;;  %4742 = vmatprep.mubr.msk.f32.mxu1 %vm5243_vm1, %v5242_v8 }
 0x382   :  { %4750 = vmatprep.subr.mxu1 %v5242_v8  ;;  %4747 = vmatprep.mubr.msk.f32.mxu0 %vm5243_vm1, %v5242_v8 }
 0x384   :  { %4743 = vmatmul.mubr.msk.f32.vlgmr.msra.gmra.mxu1 %vm355_vm2, %v756_v50 }
 0x385   :  { %4752 = vmatprep.mubr.msk.f32.mxu1 %vm5243_vm1, %v5242_v8 }
 0x43c   :  { %v5536_v51 = vpop.f32.mrf.mxu0 }
 0x43e   :  { %v4729_v52 = vpop.f32.mrf.mxu0 }
 0x440   :  { %v5538_v53 = vpop.f32.mrf.mxu1  ;;  %v751_v54 = vpop.f32.mrf.mxu0 }
 0x441   :  { %v833_v55 = vmul.f32 0.35355338, %v751_v54 }
 0x442   :  { %v4734_v56 = vpop.f32.mrf.mxu1  ;;  %v4739_v57 = vpop.f32.mrf.mxu0 }
 0x443   :  { %v835_v58 = vsel %vm355_vm2, %v833_v55, -inf }
 0x444   :  { %v829_v59 = vpop.f32.mrf.mxu1  ;;  %836 = vmax.xlane.f32.xlu0 %v835_v58 }
 0x445   :  { %v834_v60 = vmul.f32 0.35355338, %v829_v59 }
 0x446   :  { %v4744_v61 = vpop.f32.mrf.mxu1 }
 0x447   :  { %v838_v62 = vsel %vm355_vm2, %v834_v60, -inf }
 0x448   :  { %839 = vmax.xlane.f32.xlu1 %v838_v62 }
 0x459   :  { %1091 = vrot.lane.b32.xlu1 %v5486_v15, %s5247_s21 }
 0x45a   :  { %858 = vrot.lane.b32.xlu0 %v5504_v22, %s5246_s17 }
 0x45e   :  { %935 = vrot.lane.b32.xlu0 %v5502_v20, %s5246_s17 }
 0x462   :  { %1013 = vrot.lane.b32.xlu0 %v5483_v14, %s5247_s21  ;;  %s6061_s21 = sld [smem:[#allocation25_spill]] }
 0x4cd   :  { %v837_v63 = vpop.xlane.xlu0 %836 }
 0x4ce   :  { %v841_v0 = vsub.f32 %v833_v55, %v837_v63 }
 0x4d0   :  { %v843_v6 = vmul.f32 1.442695, %v841_v0 }
 0x4d1   :  { %v840_v1 = vpop.xlane.xlu1 %839  ;;  %v859_v3 = vpop.permute.xlu0 %858 }
 0x4d2   :  { %v842_v4 = vsub.f32 %v834_v60, %v840_v1  ;;  %4746 = vmatpush3.msra.mxu0 %v859_v3 }
 0x4d3   :  { %4755 = vmatprep.subr.mxu0 %v5242_v8 }
 0x4d4   :  { %v845_v7 = vmul.f32 1.442695, %v842_v4 }
 0x4d5   :  { %v936_v9 = vpop.permute.xlu0 %935  ;;  %v1092_v24 = vpop.permute.xlu1 %1091 }
 0x4d6   :  { %5102 = vpow2.f32 %v845_v7  ;;  %4751 = vmatpush3.msra.mxu1 %v936_v9 }
 0x4d7   :  { %4760 = vmatprep.subr.mxu1 %v5242_v8  ;;  %5104 = vpow2.f32 %v843_v6 }
 0x4d9   :  { %v1014_v16 = vpop.permute.xlu0 %1013 }
 0x4e3   :  { %v5103_v10 = vpop.eup %5102 }
 0x4e4   :  { %v850_v11 = vsel %vm355_vm2, %v5103_v10, 0.0  ;;  %v5105_v12 = vpop.eup %5104 }
 0x4e5   :  { %851 = vadd.xlane.f32.xlu0 %v850_v11  ;;  %v847_v13 = vsel %vm355_vm2, %v5105_v12, 0.0 }
 0x4e9   :  { %848 = vadd.xlane.f32.xlu0 %v847_v13 }
 0x4ff   :  { %1011 = vrot.lane.b32.xlu0 %v5483_v14, %s5248_s25 }
 0x503   :  { %1089 = vrot.lane.b32.xlu0 %v5486_v15, %s5248_s25 }
 0x56e   :  { %v852_v17 = vpop.xlane.xlu0 %851 }
 0x56f   :  { %5106 = vrcp.f32 %v852_v17 }
 0x572   :  { %v849_v18 = vpop.xlane.xlu0 %848 }
 0x573   :  { %5108 = vrcp.f32 %v849_v18 }
 0x576   :  { %v1012_v21 = vpop.permute.xlu0 %1011 }
 0x57a   :  { %v1090_v27 = vpop.permute.xlu0 %1089 }
 0x57c   :  { %v5107_v19 = vpop.eup %5106 }
 0x57d   :  { %v856_v23 = vmul.f32 %v5107_v19, %v5103_v10 }
 0x57f   :  { %4753 = vmatmul.mubr.msk.f32.vlgmr.msra.gmra.mxu1 %vm355_vm2, %v856_v23 }
 0x580   :  { %v5109_v25 = vpop.eup %5108  ;;  %4761 = vmatpush3.xpose.msk.msra.mxu1 %vm355_vm2, %v1092_v24  ;;  %4762 = vmatprep.mubr.msk.f32.mxu1 %vm5243_vm1, %v5242_v8 }
 0x581   :  { %v855_v26 = vmul.f32 %v5109_v25, %v5105_v12  ;;  %4770 = vmatprep.subr.mxu1 %v5242_v8 }
 0x583   :  { %4748 = vmatmul.mubr.msk.f32.vlgmr.msra.gmra.mxu0 %vm355_vm2, %v855_v26  ;;  %4763 = vmatmul.mubr.msk.f32.vlgmr.msra.gmra.mxu1 %vm355_vm2, %v1090_v27 }
 0x584   :  { %4756 = vmatpush3.xpose.msk.msra.mxu0 %vm355_vm2, %v1014_v16  ;;  %4757 = vmatprep.mubr.msk.f32.mxu0 %vm5243_vm1, %v5242_v8 }
 0x585   :  { %4765 = vmatprep.subr.mxu0 %v5242_v8  ;;  %4772 = vmatprep.mubr.msk.f32.mxu1 %vm5243_vm1, %v5242_v8 }
 0x587   :  { %4758 = vmatmul.mubr.msk.f32.vlgmr.msra.gmra.mxu0 %vm355_vm2, %v1012_v21 }
 0x588   :  { %4767 = vmatprep.mubr.msk.f32.mxu0 %vm5243_vm1, %v5242_v8 }
 0x63f   :  { %v5572_v28 = vpop.f32.mrf.mxu1 }
 0x641   :  { %v4754_v29 = vpop.f32.mrf.mxu1 }
 0x643   :  { %v5574_v30 = vpop.f32.mrf.mxu0  ;;  %v1163_v31 = vpop.f32.mrf.mxu1 }
 0x644   :  { %v1168_v32 = vmul.f32 0.35355338, %v1163_v31 }
 0x645   :  { %v4749_v33 = vpop.f32.mrf.mxu0  ;;  %v4764_v34 = vpop.f32.mrf.mxu1 }
 0x646   :  { %v1172_v35 = vsel %vm355_vm2, %v1168_v32, -inf  ;;  %v1710_v33 = vld [vmem:[%s5299_s3 + $0x18] sm:$0xff]  ;;  %v1709_v34 = vld [vmem:[%s5299_s3 + $0x10] sm:$0xff] }
 0x647   :  { %1173 = vmax.xlane.f32.xlu1 %v1172_v35  ;;  %v1085_v36 = vpop.f32.mrf.mxu0  ;;  %v1708_v35 = vld [vmem:[%s5299_s3 + $0x8] sm:$0xff] }
 0x648   :  { %v1167_v37 = vmul.f32 0.35355338, %v1085_v36  ;;  %v1707_v36 = vld [vmem:[%s5299_s3] sm:$0xff]  ;;  %s6043_s3 = sld [smem:[#allocation7_spill]] }
 0x649   :  { %v4759_v38 = vpop.f32.mrf.mxu0 }
 0x64a   :  { %v1169_v39 = vsel %vm355_vm2, %v1167_v37, -inf }
 0x64b   :  { %1170 = vmax.xlane.f32.xlu0 %v1169_v39 }
 0x658   :  { %1267 = vrot.lane.b32.xlu1 %v5502_v20, %s5248_s25 }
 0x65c   :  { %1345 = vrot.lane.b32.xlu1 %v5483_v14, %s5249_s29 }
 0x660   :  { %1343 = vrot.lane.b32.xlu1 %v5483_v14, %s5250_s15 }
 0x661   :  { %1191 = vrot.lane.b32.xlu0 %v5504_v22, %s5248_s25 }
 0x6d0   :  { %v1174_v40 = vpop.xlane.xlu1 %1173 }
 0x6d1   :  { %v1176_v41 = vsub.f32 %v1168_v32, %v1174_v40 }
 0x6d3   :  { %v1179_v42 = vmul.f32 1.442695, %v1176_v41 }
 0x6d4   :  { %v1268_v43 = vpop.permute.xlu1 %1267  ;;  %v1171_v44 = vpop.xlane.xlu0 %1170 }
 0x6d5   :  { %5110 = vpow2.f32 %v1179_v42  ;;  %v1175_v45 = vsub.f32 %v1167_v37, %v1171_v44  ;;  %4771 = vmatpush3.msra.mxu1 %v1268_v43 }
 0x6d6   :  { %4780 = vmatprep.subr.mxu1 %v5242_v8 }
 0x6d7   :  { %v1177_v46 = vmul.f32 1.442695, %v1175_v45 }
 0x6d8   :  { %v1192_v47 = vpop.permute.xlu0 %1191  ;;  %v1346_v59 = vpop.permute.xlu1 %1345 }
 0x6d9   :  { %5112 = vpow2.f32 %v1177_v46  ;;  %4766 = vmatpush3.msra.mxu0 %v1192_v47 }
 0x6da   :  { %4775 = vmatprep.subr.mxu0 %v5242_v8 }
 0x6dc   :  { %v1344_v61 = vpop.permute.xlu1 %1343 }
 0x6e2   :  { %v5111_v14 = vpop.eup %5110 }
 0x6e3   :  { %v1184_v48 = vsel %vm355_vm2, %v5111_v14, 0.0 }
 0x6e4   :  { %1185 = vadd.xlane.f32.xlu0 %v1184_v48 }
 0x6e6   :  { %v5113_v49 = vpop.eup %5112 }
 0x6e7   :  { %v1181_v50 = vsel %vm355_vm2, %v5113_v49, 0.0 }
 0x6e8   :  { %1182 = vadd.xlane.f32.xlu0 %v1181_v50 }
 0x6fe   :  { %1423 = vrot.lane.b32.xlu0 %v5486_v15, %s5249_s29 }
 0x702   :  { %1421 = vrot.lane.b32.xlu0 %v5486_v15, %s5250_s15 }
 0x76d   :  { %v1186_v52 = vpop.xlane.xlu0 %1185 }
 0x76e   :  { %5114 = vrcp.f32 %v1186_v52 }
 0x771   :  { %v1183_v54 = vpop.xlane.xlu0 %1182 }
 0x772   :  { %5116 = vrcp.f32 %v1183_v54  ;;  %v4448_v54 = vld [vmem:[%s5304_s8] ss:$0 sm:$0xff]  ;;  %s6044_s8 = sld [smem:[#allocation8_spill]] }
 0x775   :  { %v1424_v56 = vpop.permute.xlu0 %1423 }
 0x779   :  { %v1422_v15 = vpop.permute.xlu0 %1421 }
 0x77b   :  { %v5115_v55 = vpop.eup %5114 }
 0x77c   :  { %v1190_v57 = vmul.f32 %v5115_v55, %v5111_v14 }
 0x77e   :  { %4773 = vmatmul.mubr.msk.f32.vlgmr.msra.gmra.mxu1 %vm355_vm2, %v1190_v57 }
 0x77f   :  { %v5117_v58 = vpop.eup %5116  ;;  %4781 = vmatpush3.xpose.msk.msra.mxu1 %vm355_vm2, %v1424_v56  ;;  %4782 = vmatprep.mubr.msk.f32.mxu1 %vm5243_vm1, %v5242_v8 }
 0x780   :  { %v1189_v60 = vmul.f32 %v5117_v58, %v5113_v49  ;;  %4790 = vmatprep.subr.mxu1 %v5242_v8 }
 0x782   :  { %4768 = vmatmul.mubr.msk.f32.vlgmr.msra.gmra.mxu0 %vm355_vm2, %v1189_v60  ;;  %4783 = vmatmul.mubr.msk.f32.vlgmr.msra.gmra.mxu1 %vm355_vm2, %v1422_v15 }
 0x783   :  { %4776 = vmatpush3.xpose.msk.msra.mxu0 %vm355_vm2, %v1346_v59  ;;  %4777 = vmatprep.mubr.msk.f32.mxu0 %vm5243_vm1, %v5242_v8 }
 0x784   :  { %4785 = vmatprep.subr.mxu0 %v5242_v8  ;;  %4792 = vmatprep.mubr.msk.f32.mxu1 %vm5243_vm1, %v5242_v8 }
 0x786   :  { %4778 = vmatmul.mubr.msk.f32.vlgmr.msra.gmra.mxu0 %vm355_vm2, %v1344_v61 }
 0x787   :  { %4787 = vmatprep.mubr.msk.f32.mxu0 %vm5243_vm1, %v5242_v8 }
 0x83e   :  { %v1339_v62 = vpop.f32.mrf.mxu1 }
 0x840   :  { %v4774_v63 = vpop.f32.mrf.mxu1 }
 0x842   :  { %v1263_v0 = vpop.f32.mrf.mxu0  ;;  %v1495_v1 = vpop.f32.mrf.mxu1 }
 0x843   :  { %v1500_v3 = vmul.f32 0.35355338, %v1495_v1 }
 0x844   :  { %v4769_v4 = vpop.f32.mrf.mxu0  ;;  %v4784_v6 = vpop.f32.mrf.mxu1 }
 0x845   :  { %v1504_v7 = vsel %vm355_vm2, %v1500_v3, -inf  ;;  %v1947_v6 = vld [vmem:[%s5329_s6 + $0x18] sm:$0xff] }
 0x846   :  { %1505 = vmax.xlane.f32.xlu0 %v1504_v7  ;;  %v1417_v9 = vpop.f32.mrf.mxu0  ;;  %v1946_v7 = vld [vmem:[%s5329_s6 + $0x10] sm:$0xff] }
 0x847   :  { %v1499_v10 = vmul.f32 0.35355338, %v1417_v9  ;;  %v5656_v9 = vld [vmem:[%s5269_s9] sm:$0xff] }
 0x848   :  { %v4779_v11 = vpop.f32.mrf.mxu0 }
 0x849   :  { %v1501_v12 = vsel %vm355_vm2, %v1499_v10, -inf  ;;  %v1945_v11 = vld [vmem:[%s5329_s6 + $0x8] sm:$0xff] }
 0x84a   :  { %1502 = vmax.xlane.f32.xlu1 %v1501_v12 }
 0x8cf   :  { %v1506_v13 = vpop.xlane.xlu0 %1505 }
 0x8d0   :  { %v1508_v16 = vsub.f32 %v1500_v3, %v1506_v13  ;;  %v5662_v13 = vld [vmem:[%s5269_s9 + $0x8] sm:$0xff] }
 0x8d2   :  { %v1511_v17 = vmul.f32 1.442695, %v1508_v16  ;;  %v165_v16 = vld [vmem:[%s5274_s13 + $0x8] sm:$0xff] }
 0x8d3   :  { %v1503_v18 = vpop.xlane.xlu1 %1502 }
 0x8d4   :  { %5118 = vpow2.f32 %v1511_v17  ;;  %v1507_v19 = vsub.f32 %v1499_v10, %v1503_v18  ;;  %v164_v10 = vld [vmem:[%s5274_s13] sm:$0xff]  ;;  %v5666_v17 = vld [vmem:[%s5269_s9 + $0x10] sm:$0xff] }
 0x8d5   :  { %v1940_v12 = vadd.f32 %v164_v10, %v5656_v9  ;;  %v166_v18 = vld [vmem:[%s5274_s13 + $0x10] sm:$0xff] }
 0x8d6   :  { %v1509_v21 = vmul.f32 1.442695, %v1507_v19  ;;  %v1851_v19 = vld [vmem:[%s5319_s24 + $0x18] sm:$0xff] }
 0x8d8   :  { %5120 = vpow2.f32 %v1509_v21  ;;  %v1944_v21 = vld [vmem:[%s5329_s6] sm:$0xff]  ;;  %s6048_s6 = sld [smem:[#allocation10_spill]] }
 0x8e1   :  { %v5119_v23 = vpop.eup %5118 }
 0x8e2   :  { %v1516_v24 = vsel %vm355_vm2, %v5119_v23, 0.0 }
 0x8e3   :  { %1517 = vadd.xlane.f32.xlu1 %v1516_v24  ;;  %v1941_v24 = vadd.f32 %v165_v16, %v5662_v13 }
 0x8e5   :  { %v5121_v25 = vpop.eup %5120 }
 0x8e6   :  { %v1513_v26 = vsel %vm355_vm2, %v5121_v25, 0.0 }
 0x8e7   :  { %1514 = vadd.xlane.f32.xlu0 %v1513_v26  ;;  %v163_v26 = vld [vmem:[%s5269_s9 + $0x18] sm:$0xff]  ;;  %s6041_s9 = sld [smem:[#allocation6_spill]] }
 0x8f4   :  { %1599 = vrot.lane.b32.xlu1 %v5502_v20, %s5250_s15 }
 0x8f8   :  { %1677 = vrot.lane.b32.xlu1 %v5574_v30, %s5251_s16 }
 0x8fc   :  { %1685 = vrot.lane.b32.xlu1 %v1263_v0, %s5252_s18 }
 0x8fd   :  { %1523 = vrot.lane.b32.xlu0 %v5504_v22, %s5250_s15 }
 0x901   :  { %1679 = vrot.lane.b32.xlu0 %v5572_v28, %s5251_s16 }
 0x905   :  { %1687 = vrot.lane.b32.xlu0 %v1339_v62, %s5252_s18 }
 0x96c   :  { %v1518_v27 = vpop.xlane.xlu1 %1517 }
 0x96d   :  { %5122 = vrcp.f32 %v1518_v27  ;;  %v167_v27 = vld [vmem:[%s5274_s13 + $0x18] sm:$0xff]  ;;  %s6042_s13 = sld [smem:[#allocation5_spill]] }
 0x970   :  { %v1515_v20 = vpop.xlane.xlu0 %1514  ;;  %v1600_v29 = vpop.permute.xlu1 %1599 }
 0x971   :  { %5124 = vrcp.f32 %v1515_v20  ;;  %4791 = vmatpush3.msra.mxu1 %v1600_v29  ;;  %v1849_v20 = vld [vmem:[%s5319_s24 + $0x8] sm:$0xff]  ;;  %v1848_v29 = vld [vmem:[%s5319_s24] sm:$0xff] }
 0x972   :  { %4806 = vmatprep.subr.mxu1 %v1851_v19 }
 0x974   :  { %v1524_v30 = vpop.permute.xlu0 %1523  ;;  %v1678_v42 = vpop.permute.xlu1 %1677 }
 0x975   :  { %4786 = vmatpush3.msra.mxu0 %v1524_v30  ;;  %v1699_v45 = vsel %vm355_vm2, %v5536_v51, %v1678_v42  ;;  %v1943_v30 = vadd.f32 %v167_v27, %v163_v26 }
 0x976   :  { %4795 = vmatprep.subr.mxu0 %v1710_v33 }
 0x978   :  { %v1680_v41 = vpop.permute.xlu0 %1679  ;;  %v1686_v44 = vpop.permute.xlu1 %1685 }
 0x979   :  { %v1700_v47 = vsel %vm355_vm2, %v5538_v53, %v1680_v41  ;;  %v1702_v14 = vsel %vm1701_vm3, %v1699_v45, %v1686_v44 }
 0x97a   :  { %v5123_v31 = vpop.eup %5122 }
 0x97b   :  { %v1522_v32 = vmul.f32 %v5123_v31, %v5119_v23  ;;  %v1850_v23 = vld [vmem:[%s5319_s24 + $0x10] sm:$0xff]  ;;  %v2055_v31 = vld [vmem:[%s5339_s20 + $0x18] sm:$0xff]  ;;  %s6047_s24 = sld [smem:[#allocation14_spill]] }
 0x97c   :  { %v1688_v43 = vpop.permute.xlu0 %1687 }
 0x97d   :  { %4793 = vmatmul.mubr.msk.f32.vlgmr.msra.gmra.mxu1 %vm355_vm2, %v1522_v32  ;;  %v1703_v49 = vsel %vm1701_vm3, %v1700_v47, %v1688_v43 }
 0x97e   :  { %v5125_v22 = vpop.eup %5124  ;;  %4807 = vmatpush3.msra.mxu1 %v1851_v19 }
 0x97f   :  { %v1521_v28 = vmul.f32 %v5125_v22, %v5121_v25  ;;  %v1942_v25 = vadd.f32 %v166_v18, %v5666_v17  ;;  %4808 = vmatprep.subr.mxu1 %v1850_v23 }
 0x980   :  { %4809 = vmatpush3.msra.mxu1 %v1850_v23 }
 0x981   :  { %4788 = vmatmul.mubr.msk.f32.vlgmr.msra.gmra.mxu0 %vm355_vm2, %v1521_v28  ;;  %4810 = vmatprep.subr.mxu1 %v1849_v20 }
 0x982   :  { %4796 = vmatpush3.msra.mxu0 %v1710_v33  ;;  %4811 = vmatpush3.msra.mxu1 %v1849_v20 }
 0x983   :  { %4797 = vmatprep.subr.mxu0 %v1709_v34  ;;  %4812 = vmatprep.subr.mxu1 %v1848_v29 }
 0x984   :  { %4798 = vmatpush3.msra.mxu0 %v1709_v34  ;;  %4813 = vmatpush3.msra.mxu1 %v1848_v29 }
 0x985   :  { %4799 = vmatprep.subr.mxu0 %v1708_v35  ;;  %4831 = vmatprep.subr.mxu1 %v2055_v31 }
 0x986   :  { %4800 = vmatpush3.msra.mxu0 %v1708_v35 }
 0x987   :  { %4801 = vmatprep.subr.mxu0 %v1707_v36 }
 0x988   :  { %4802 = vmatpush3.msra.mxu0 %v1707_v36 }
 0x989   :  { %4817 = vmatprep.subr.mxu0 %v1947_v6 }
 0xa3d   :  { %v1671_v37 = vpop.f32.mrf.mxu1 }
 0xa3e   :  { %1695 = vrot.lane.b32.xlu0 %v1671_v37, %s5253_s22  ;;  %v4451_v37 = vld [vmem:[%s5309_s14] ss:$0 sm:$0xff]  ;;  %s6045_s14 = sld [smem:[#allocation9_spill]] }
 0xa3f   :  { %v4794_v38 = vpop.f32.mrf.mxu1 }
 0xa41   :  { %v1595_v39 = vpop.f32.mrf.mxu0 }
 0xa42   :  { %1693 = vrot.lane.b32.xlu1 %v1595_v39, %s5253_s22 }
 0xa43   :  { %v4789_v40 = vpop.f32.mrf.mxu0 }
 0xa44   :  { %v4452_v40 = vld [vmem:[%s5314_s19] ss:$0 sm:$0xff]  ;;  %s6046_s19 = sld [smem:[#allocation12_spill]] }
 0xab0   :  { %v1696_v46 = vpop.permute.xlu0 %1695 }
 0xab1   :  { %v1706_v52 = vsel %vm1704_vm4, %v1703_v49, %v1696_v46  ;;  %v2052_v49 = vld [vmem:[%s5339_s20] sm:$0xff] }
 0xab4   :  { %v1694_v48 = vpop.permute.xlu1 %1693 }
 0xab5   :  { %v1705_v50 = vsel %vm1704_vm4, %v1702_v14, %v1694_v48  ;;  %v2054_v14 = vld [vmem:[%s5339_s20 + $0x10] sm:$0xff]  ;;  %v2053_v48 = vld [vmem:[%s5339_s20 + $0x8] sm:$0xff]  ;;  %s6049_s20 = sld [smem:[#allocation11_spill]] }
 0xab6   :  { %4803 = vmatprep.mubr.msk.f32.mxu0 %vm181_vm0, %v1705_v50 }
 0xab7   :  { %4804 = vmatmul.mubr.msk.f32.vlgmr.msra.gmra.mxu0 %vm181_vm0, %v1706_v52 }
 0xab8   :  { %4818 = vmatpush3.msra.mxu0 %v1947_v6  ;;  %4825 = vmatprep.mubr.msk.f32.mxu0 %vm181_vm0, %v1940_v12 }
 0xab9   :  { %4819 = vmatprep.subr.mxu0 %v1946_v7 }
 0xaba   :  { %4820 = vmatpush3.msra.mxu0 %v1946_v7 }
 0xabb   :  { %4821 = vmatprep.subr.mxu0 %v1945_v11 }
 0xabc   :  { %4822 = vmatpush3.msra.mxu0 %v1945_v11 }
 0xabd   :  { %4823 = vmatprep.subr.mxu0 %v1944_v21 }
 0xabe   :  { %4824 = vmatpush3.msra.mxu0 %v1944_v21 }
 0xabf   :  { %4826 = vmatmul.mubr.msk.f32.vlgmr.msra.gmra.mxu0 %vm181_vm0, %v1941_v24  ;;  %4845 = vmatprep.subr.mxu0 %v5242_v8 }
 0xac0   :  { %4828 = vmatprep.mubr.msk.f32.mxu0 %vm181_vm0, %v1942_v25 }
 0xac3   :  { %4829 = vmatmul.mubr.msk.f32.gmra.mxu0 %vm181_vm0, %v1943_v30 }
 0xac4   :  { %4849 = vmatprep.mubr.msk.f32.mxu0 %vm5243_vm1, %v5242_v8 }
 0xb77   :  { %v4805_v51 = vpop.f32.mrf.mxu0 }
 0xb78   :  { %v1796_v55 = vadd.f32 %v4805_v51, %v4448_v54 }
 0xb79   :  { %v1790_v56 = vpop.f32.mrf.mxu0 }
 0xb7a   :  { %v1791_v57 = vadd.f32 %v4448_v54, %v1790_v56  ;;  %v1806_v53 = vsel %vm181_vm0, %v1796_v55, 0.0 }
 0xb7b   :  { %1807 = vadd.xlane.f32.xlu0 %v1806_v53  ;;  %v4453_v53 = vld [vmem:[%s6042_s13] ss:$0 sm:$0xff] }
 0xb7c   :  { %v1803_v58 = vsel %vm181_vm0, %v1791_v57, 0.0 }
 0xb7d   :  { %1804 = vadd.xlane.f32.xlu1 %v1803_v58 }
 0xc04   :  { %v1808_v59 = vpop.xlane.xlu0 %1807 }
 0xc05   :  { %v1811_v60 = vmul.f32 0.03125, %v1808_v59 }
 0xc06   :  { %v1805_v15 = vpop.xlane.xlu1 %1804 }
 0xc07   :  { %v5643_v61 = vsub.f32 %v1796_v55, %v1811_v60  ;;  %v1810_v62 = vmul.f32 0.03125, %v1805_v15 }
 0xc09   :  { %v5645_v63 = vsub.f32 %v1791_v57, %v1810_v62  ;;  %v1815_v0 = vmul.f32 %v5643_v61, %v5643_v61 }
 0xc0b   :  { %v1819_v1 = vsel %vm181_vm0, %v1815_v0, 0.0  ;;  %v1814_v3 = vmul.f32 %v5645_v63, %v5645_v63 }
 0xc0c   :  { %1820 = vadd.xlane.f32.xlu1 %v1819_v1 }
 0xc0d   :  { %v1816_v4 = vsel %vm181_vm0, %v1814_v3, 0.0 }
 0xc0e   :  { %1817 = vadd.xlane.f32.xlu0 %v1816_v4 }
 0xc95   :  { %v1821_v32 = vpop.xlane.xlu1 %1820 }
 0xc96   :  { %v1823_v22 = vmul.f32 0.03125, %v1821_v32 }
 0xc97   :  { %v1818_v28 = vpop.xlane.xlu0 %1817 }
 0xc98   :  { %v1825_v33 = vadd.f32 1e-05, %v1823_v22  ;;  %v1822_v34 = vmul.f32 0.03125, %v1818_v28 }
 0xc9a   :  { %5126 = vrsqrt.f32 %v1825_v33  ;;  %v1824_v35 = vadd.f32 1e-05, %v1822_v34 }
 0xc9c   :  { %5128 = vrsqrt.f32 %v1824_v35 }
 0xca7   :  { %v5127_v36 = vpop.eup %5126 }
 0xca8   :  { %v1829_v38 = vmul.f32 %v5127_v36, %v5643_v61  ;;  %v4461_v61 = vld [vmem:[%s6043_s3] ss:$0 sm:$0xff] }
 0xca9   :  { %v5129_v39 = vpop.eup %5128 }
 0xcaa   :  { %v1828_v41 = vmul.f32 %v5129_v39, %v5645_v63  ;;  %v1837_v42 = vmul.f32 %v4451_v37, %v1829_v38 }
 0xcac   :  { %v1836_v43 = vmul.f32 %v4451_v37, %v1828_v41  ;;  %v5690_v44 = vadd.f32 %v4452_v40, %v1837_v42 }
 0xcae   :  { %v5692_v45 = vadd.f32 %v4452_v40, %v1836_v43  ;;  %v1847_v47 = vadd.f32 %v5690_v44, %v5466_v5  ;;  %v4827_v5 = vpop.f32.mrf.mxu0 }
 0xcb0   :  { %v1846_v46 = vadd.f32 %v5692_v45, %v5459_v2  ;;  %v4456_v2 = vld [vmem:[%s6041_s9] ss:$0 sm:$0xff]  ;;  %v2033_v52 = vpop.f32.mrf.mxu0 }
 0xcb1   :  { %v5714_v50 = vadd.f32 %v4827_v5, %v4456_v2  ;;  %v5716_v54 = vadd.f32 %v4456_v2, %v2033_v52 }
 0xcb2   :  { %4814 = vmatprep.mubr.msk.f32.mxu1 %vm181_vm0, %v1846_v46  ;;  %v4830_v51 = vpop.f32.mrf.mxu0 }
 0xcb3   :  { %4815 = vmatmul.mubr.msk.f32.vlgmr.msra.gmra.mxu1 %vm181_vm0, %v1847_v47  ;;  %4846 = vmatpush3.xpose.msk.msra.mxu0 %vm355_vm2, %v5714_v50  ;;  %v5721_v55 = vadd.f32 %v4830_v51, %v4456_v2 }
 0xcb4   :  { %4832 = vmatpush3.msra.mxu1 %v2055_v31  ;;  %4839 = vmatprep.mubr.msk.f32.mxu1 %vm181_vm0, %v5656_v9  ;;  %v2043_v56 = vpop.f32.mrf.mxu0 }
 0xcb5   :  { %4833 = vmatprep.subr.mxu1 %v2054_v14  ;;  %4847 = vmatprep.subr.mxu0 %v5242_v8  ;;  %v5727_v57 = vadd.f32 %v4456_v2, %v2043_v56 }
 0xcb6   :  { %4834 = vmatpush3.msra.mxu1 %v2054_v14 }
 0xcb7   :  { %4835 = vmatprep.subr.mxu1 %v2053_v48  ;;  %4848 = vmatpush3.xpose.msk.msra.mxu0 %vm355_vm2, %v5716_v54 }
 0xcb8   :  { %4836 = vmatpush3.msra.mxu1 %v2053_v48  ;;  %4859 = vmatprep.subr.mxu0 %v5242_v8 }
 0xcb9   :  { %4837 = vmatprep.subr.mxu1 %v2052_v49 }
 0xcba   :  { %4838 = vmatpush3.msra.mxu1 %v2052_v49 }
 0xcbb   :  { %4852 = vmatprep.subr.mxu1 %v5242_v8  ;;  %4840 = vmatmul.mubr.msk.f32.vlgmr.msra.gmra.mxu1 %vm181_vm0, %v5662_v13 }
 0xcbc   :  { %4842 = vmatprep.mubr.msk.f32.mxu1 %vm181_vm0, %v5666_v17  ;;  %4853 = vmatpush3.xpose.msk.msra.mxu1 %vm355_vm2, %v5721_v55 }
 0xcbd   :  { %4854 = vmatprep.subr.mxu1 %v5242_v8 }
 0xcbf   :  { %4843 = vmatmul.mubr.msk.f32.gmra.mxu1 %vm181_vm0, %v163_v26 }
 0xcc0   :  { %4856 = vmatprep.mubr.msk.f32.mxu1 %vm5243_vm1, %v5242_v8  ;;  %4855 = vmatpush3.xpose.msk.msra.mxu1 %vm355_vm2, %v5727_v57 }
 0xcc1   :  { %4866 = vmatprep.subr.mxu1 %v5242_v8 }
 0xd73   :  { %v4816_v58 = vpop.f32.mrf.mxu1 }
 0xd74   :  { %v5735_v59 = vadd.f32 %v4816_v58, %v4453_v53 }
 0xd75   :  { %v1931_v60 = vpop.f32.mrf.mxu1 }
 0xd76   :  { %v5737_v15 = vadd.f32 %v4453_v53, %v1931_v60  ;;  %4857 = vmatmul.mubr.msk.f32.vlgmr.msra.gmra.mxu1 %vm355_vm2, %v5735_v59 }
 0xd77   :  { %4870 = vmatprep.mubr.msk.f32.mxu1 %vm5243_vm1, %v5242_v8 }
 0xd78   :  { %4850 = vmatmul.mubr.msk.f32.vlgmr.msra.gmra.mxu0 %vm355_vm2, %v5737_v15 }
 0xd79   :  { %4863 = vmatprep.mubr.msk.f32.mxu0 %vm5243_vm1, %v5242_v8 }
 0xd7b   :  { %v4841_v62 = vpop.f32.mrf.mxu1 }
 0xd7c   :  { %v5748_v63 = vadd.f32 %v4841_v62, %v4461_v61 }
 0xd7d   :  { %v2141_v0 = vpop.f32.mrf.mxu1 }
 0xd7e   :  { %v5750_v1 = vadd.f32 %v4461_v61, %v2141_v0  ;;  %4860 = vmatpush3.msra.mxu0 %v5748_v63 }
 0xd7f   :  { %v4844_v3 = vpop.f32.mrf.mxu1  ;;  %4861 = vmatprep.subr.mxu0 %v5242_v8 }
 0xd80   :  { %v5754_v4 = vadd.f32 %v4844_v3, %v4461_v61  ;;  %4862 = vmatpush3.msra.mxu0 %v5750_v1 }
 0xd81   :  { %v2151_v6 = vpop.f32.mrf.mxu1  ;;  %4873 = vmatprep.subr.mxu0 %v5242_v8 }
 0xd82   :  { %v5758_v7 = vadd.f32 %v4461_v61, %v2151_v6  ;;  %4867 = vmatpush3.msra.mxu1 %v5754_v4 }
 0xd83   :  { %4868 = vmatprep.subr.mxu1 %v5242_v8 }
 0xd84   :  { %4869 = vmatpush3.msra.mxu1 %v5758_v7 }
 0xd85   :  { %4880 = vmatprep.subr.mxu1 %v5242_v8 }
 0xe36   :  { %v2314_v9 = vpop.f32.mrf.mxu1 }
 0xe37   :  { %v2319_v10 = vmul.f32 0.35355338, %v2314_v9 }
 0xe38   :  { %v2235_v11 = vpop.f32.mrf.mxu0  ;;  %v4858_v12 = vpop.f32.mrf.mxu1 }
 0xe39   :  { %v2318_v13 = vmul.f32 0.35355338, %v2235_v11  ;;  %v2323_v16 = vsel %vm1701_vm3, %v2319_v10, -inf }
 0xe3a   :  { %2324 = vmax.xlane.f32.xlu1 %v2323_v16  ;;  %v4851_v17 = vpop.f32.mrf.mxu0 }
 0xe3b   :  { %v2320_v18 = vsel %vm1701_vm3, %v2318_v13, -inf }
 0xe3c   :  { %2321 = vmax.xlane.f32.xlu0 %v2320_v18 }
 0xec3   :  { %v2325_v19 = vpop.xlane.xlu1 %2324 }
 0xec4   :  { %v2327_v21 = vsub.f32 %v2319_v10, %v2325_v19 }
 0xec5   :  { %v2322_v23 = vpop.xlane.xlu0 %2321 }
 0xec6   :  { %v2330_v24 = vmul.f32 1.442695, %v2327_v21  ;;  %v2326_v25 = vsub.f32 %v2318_v13, %v2322_v23 }
 0xec8   :  { %5130 = vpow2.f32 %v2330_v24  ;;  %v2328_v26 = vmul.f32 1.442695, %v2326_v25 }
 0xeca   :  { %5132 = vpow2.f32 %v2328_v26 }
 0xed5   :  { %v5131_v27 = vpop.eup %5130 }
 0xed6   :  { %v2335_v20 = vsel %vm1701_vm3, %v5131_v27, 0.0 }
 0xed7   :  { %v5133_v29 = vpop.eup %5132  ;;  %2336 = vadd.xlane.f32.xlu1 %v2335_v20 }
 0xed8   :  { %v2332_v30 = vsel %vm1701_vm3, %v5133_v29, 0.0 }
 0xed9   :  { %2333 = vadd.xlane.f32.xlu0 %v2332_v30 }
 0xee8   :  { %2574 = vrot.lane.b32.xlu1 %v5721_v55, %s5246_s17 }
 0xeec   :  { %2490 = vrot.lane.b32.xlu1 %v5716_v54, %s5246_s17 }
 0xeef   :  { %2492 = vrot.lane.b32.xlu0 %v5714_v50, %s5246_s17 }
 0xef0   :  { %2488 = vrot.lane.b32.xlu1 %v5737_v15, %s5246_s17 }
 0xef3   :  { %2572 = vrot.lane.b32.xlu0 %v5727_v57, %s5246_s17 }
 0xef7   :  { %2570 = vrot.lane.b32.xlu0 %v5735_v59, %s5246_s17 }
 0xf60   :  { %v2337_v31 = vpop.xlane.xlu1 %2336 }
 0xf61   :  { %5134 = vrcp.f32 %v2337_v31 }
 0xf62   :  { %v2334_v32 = vpop.xlane.xlu0 %2333 }
 0xf63   :  { %5136 = vrcp.f32 %v2334_v32 }
 0xf64   :  { %v2575_v33 = vpop.permute.xlu1 %2574 }
 0xf66   :  { %v2493_v22 = vpop.permute.xlu0 %2492 }
 0xf68   :  { %v2491_v38 = vpop.permute.xlu1 %2490 }
 0xf6a   :  { %v2573_v37 = vpop.permute.xlu0 %2572 }
 0xf6c   :  { %v2489_v40 = vpop.permute.xlu1 %2488 }
 0xf6e   :  { %v5135_v28 = vpop.eup %5134  ;;  %v2571_v39 = vpop.permute.xlu0 %2570 }
 0xf6f   :  { %v2341_v34 = vmul.f32 %v5135_v28, %v5131_v27 }
 0xf70   :  { %v5137_v35 = vpop.eup %5136 }
 0xf71   :  { %4871 = vmatmul.mubr.msk.f32.vlgmr.msra.gmra.mxu1 %vm1701_vm3, %v2341_v34  ;;  %v2340_v36 = vmul.f32 %v5137_v35, %v5133_v29 }
 0xf72   :  { %4881 = vmatpush3.xpose.msk.msra.mxu1 %vm355_vm2, %v2575_v33  ;;  %4884 = vmatprep.mubr.msk.f32.mxu1 %vm5243_vm1, %v5242_v8 }
 0xf73   :  { %4864 = vmatmul.mubr.msk.f32.vlgmr.msra.gmra.mxu0 %vm1701_vm3, %v2340_v36  ;;  %4882 = vmatprep.subr.mxu1 %v5242_v8 }
 0xf74   :  { %4874 = vmatpush3.xpose.msk.msra.mxu0 %vm355_vm2, %v2493_v22  ;;  %4877 = vmatprep.mubr.msk.f32.mxu0 %vm5243_vm1, %v5242_v8 }
 0xf75   :  { %4875 = vmatprep.subr.mxu0 %v5242_v8 }
 0xf76   :  { %4883 = vmatpush3.xpose.msk.msra.mxu1 %vm355_vm2, %v2573_v37 }
 0xf77   :  { %4894 = vmatprep.subr.mxu1 %v5242_v8 }
 0xf78   :  { %4876 = vmatpush3.xpose.msk.msra.mxu0 %vm355_vm2, %v2491_v38 }
 0xf79   :  { %4885 = vmatmul.mubr.msk.f32.vlgmr.msra.gmra.mxu1 %vm355_vm2, %v2571_v39  ;;  %4887 = vmatprep.subr.mxu0 %v5242_v8 }
 0xf7a   :  { %4898 = vmatprep.mubr.msk.f32.mxu1 %vm5243_vm1, %v5242_v8 }
 0xf7b   :  { %4878 = vmatmul.mubr.msk.f32.vlgmr.msra.gmra.mxu0 %vm355_vm2, %v2489_v40 }
 0xf7c   :  { %4891 = vmatprep.mubr.msk.f32.mxu0 %vm5243_vm1, %v5242_v8 }
0x1031   :  { %v5800_v41 = vpop.f32.mrf.mxu1 }
0x1033   :  { %v5802_v42 = vpop.f32.mrf.mxu0  ;;  %v4872_v43 = vpop.f32.mrf.mxu1 }
0x1035   :  { %v4865_v46 = vpop.f32.mrf.mxu0 }
0x1039   :  { %v2648_v47 = vpop.f32.mrf.mxu1 }
0x103a   :  { %v2653_v14 = vmul.f32 0.35355338, %v2648_v47 }
0x103b   :  { %v2566_v48 = vpop.f32.mrf.mxu0  ;;  %v4886_v49 = vpop.f32.mrf.mxu1 }
0x103c   :  { %v2652_v2 = vmul.f32 0.35355338, %v2566_v48  ;;  %v2657_v5 = vsel %vm1701_vm3, %v2653_v14, -inf }
0x103d   :  { %2658 = vmax.xlane.f32.xlu0 %v2657_v5  ;;  %v4879_v52 = vpop.f32.mrf.mxu0 }
0x103e   :  { %v2654_v51 = vsel %vm1701_vm3, %v2652_v2, -inf }
0x103f   :  { %2655 = vmax.xlane.f32.xlu1 %v2654_v51 }
0x1050   :  { %2761 = vrot.lane.b32.xlu1 %v5754_v4, %s5246_s17 }
0x1053   :  { %2680 = vrot.lane.b32.xlu0 %v5748_v63, %s5246_s17 }
0x1054   :  { %2678 = vrot.lane.b32.xlu1 %v5750_v1, %s5246_s17 }
0x1057   :  { %2759 = vrot.lane.b32.xlu0 %v5758_v7, %s5246_s17  ;;  %s6060_s17 = sld [smem:[#allocation23_spill]] }
0x1058   :  { %2842 = vrot.lane.b32.xlu1 %v5714_v50, %s5248_s25 }
0x10c6   :  { %v2659_v56 = vpop.xlane.xlu0 %2658 }
0x10c7   :  { %v2661_v53 = vsub.f32 %v2653_v14, %v2659_v56 }
0x10c8   :  { %v2656_v58 = vpop.xlane.xlu1 %2655 }
0x10c9   :  { %v2664_v60 = vmul.f32 1.442695, %v2661_v53  ;;  %v2660_v61 = vsub.f32 %v2652_v2, %v2656_v58 }
0x10ca   :  { %v2681_v62 = vpop.permute.xlu0 %2680 }
0x10cb   :  { %5138 = vpow2.f32 %v2664_v60  ;;  %v2662_v0 = vmul.f32 1.442695, %v2660_v61  ;;  %4888 = vmatpush3.msra.mxu0 %v2681_v62 }
0x10cc   :  { %v2762_v3 = vpop.permute.xlu1 %2761  ;;  %4889 = vmatprep.subr.mxu0 %v5242_v8 }
0x10cd   :  { %5140 = vpow2.f32 %v2662_v0  ;;  %4895 = vmatpush3.msra.mxu1 %v2762_v3 }
0x10ce   :  { %v2760_v6 = vpop.permute.xlu0 %2759  ;;  %4896 = vmatprep.subr.mxu1 %v5242_v8 }
0x10cf   :  { %4897 = vmatpush3.msra.mxu1 %v2760_v6 }
0x10d0   :  { %v2679_v9 = vpop.permute.xlu1 %2678  ;;  %4908 = vmatprep.subr.mxu1 %v5242_v8 }
0x10d1   :  { %4890 = vmatpush3.msra.mxu0 %v2679_v9 }
0x10d2   :  { %4901 = vmatprep.subr.mxu0 %v5242_v8 }
0x10d4   :  { %v2843_v16 = vpop.permute.xlu1 %2842 }
0x10d8   :  { %v5139_v10 = vpop.eup %5138 }
0x10d9   :  { %v2669_v11 = vsel %vm1701_vm3, %v5139_v10, 0.0 }
0x10da   :  { %v5141_v12 = vpop.eup %5140  ;;  %2670 = vadd.xlane.f32.xlu1 %v2669_v11 }
0x10db   :  { %v2666_v13 = vsel %vm1701_vm3, %v5141_v12, 0.0 }
0x10dc   :  { %2667 = vadd.xlane.f32.xlu0 %v2666_v13 }
0x10eb   :  { %2840 = vrot.lane.b32.xlu1 %v5716_v54, %s5248_s25 }
0x10ef   :  { %2838 = vrot.lane.b32.xlu1 %v5737_v15, %s5248_s25 }
0x10f2   :  { %2924 = vrot.lane.b32.xlu0 %v5721_v55, %s5248_s25 }
0x10f6   :  { %2922 = vrot.lane.b32.xlu0 %v5727_v57, %s5248_s25 }
0x10fa   :  { %2920 = vrot.lane.b32.xlu0 %v5735_v59, %s5248_s25 }
0x1163   :  { %v2671_v17 = vpop.xlane.xlu1 %2670 }
0x1164   :  { %5142 = vrcp.f32 %v2671_v17 }
0x1165   :  { %v2668_v18 = vpop.xlane.xlu0 %2667 }
0x1166   :  { %5144 = vrcp.f32 %v2668_v18 }
0x1167   :  { %v2841_v27 = vpop.permute.xlu1 %2840 }
0x1169   :  { %v2925_v19 = vpop.permute.xlu0 %2924 }
0x116b   :  { %v2839_v29 = vpop.permute.xlu1 %2838 }
0x116d   :  { %v2923_v26 = vpop.permute.xlu0 %2922 }
0x1171   :  { %v5143_v21 = vpop.eup %5142  ;;  %v2921_v20 = vpop.permute.xlu0 %2920 }
0x1172   :  { %v2675_v23 = vmul.f32 %v5143_v21, %v5139_v10 }
0x1173   :  { %v5145_v24 = vpop.eup %5144 }
0x1174   :  { %4899 = vmatmul.mubr.msk.f32.vlgmr.msra.gmra.mxu1 %vm1701_vm3, %v2675_v23  ;;  %v2674_v25 = vmul.f32 %v5145_v24, %v5141_v12 }
0x1175   :  { %4909 = vmatpush3.xpose.msk.msra.mxu1 %vm355_vm2, %v2925_v19  ;;  %4912 = vmatprep.mubr.msk.f32.mxu1 %vm5243_vm1, %v5242_v8 }
0x1176   :  { %4892 = vmatmul.mubr.msk.f32.vlgmr.msra.gmra.mxu0 %vm1701_vm3, %v2674_v25  ;;  %4910 = vmatprep.subr.mxu1 %v5242_v8 }
0x1177   :  { %4902 = vmatpush3.xpose.msk.msra.mxu0 %vm355_vm2, %v2843_v16  ;;  %4905 = vmatprep.mubr.msk.f32.mxu0 %vm5243_vm1, %v5242_v8 }
0x1178   :  { %4903 = vmatprep.subr.mxu0 %v5242_v8 }
0x1179   :  { %4911 = vmatpush3.xpose.msk.msra.mxu1 %vm355_vm2, %v2923_v26 }
0x117a   :  { %4922 = vmatprep.subr.mxu1 %v5242_v8 }
0x117b   :  { %4904 = vmatpush3.xpose.msk.msra.mxu0 %vm355_vm2, %v2841_v27 }
0x117c   :  { %4913 = vmatmul.mubr.msk.f32.vlgmr.msra.gmra.mxu1 %vm355_vm2, %v2921_v20  ;;  %4915 = vmatprep.subr.mxu0 %v5242_v8 }
0x117d   :  { %4926 = vmatprep.mubr.msk.f32.mxu1 %vm5243_vm1, %v5242_v8 }
0x117e   :  { %4906 = vmatmul.mubr.msk.f32.vlgmr.msra.gmra.mxu0 %vm355_vm2, %v2839_v29 }
0x117f   :  { %4919 = vmatprep.mubr.msk.f32.mxu0 %vm5243_vm1, %v5242_v8 }
0x1234   :  { %v5852_v30 = vpop.f32.mrf.mxu1 }
0x1236   :  { %v5854_v31 = vpop.f32.mrf.mxu0  ;;  %v4900_v32 = vpop.f32.mrf.mxu1 }
0x1238   :  { %v4893_v22 = vpop.f32.mrf.mxu0 }
0x123c   :  { %v2998_v28 = vpop.f32.mrf.mxu1 }
0x123d   :  { %v3003_v33 = vmul.f32 0.35355338, %v2998_v28 }
0x123e   :  { %v2916_v34 = vpop.f32.mrf.mxu0  ;;  %v4914_v35 = vpop.f32.mrf.mxu1 }
0x123f   :  { %v3002_v36 = vmul.f32 0.35355338, %v2916_v34  ;;  %v3007_v37 = vsel %vm1701_vm3, %v3003_v33, -inf }
0x1240   :  { %3008 = vmax.xlane.f32.xlu0 %v3007_v37  ;;  %v4907_v38 = vpop.f32.mrf.mxu0 }
0x1241   :  { %v3004_v39 = vsel %vm1701_vm3, %v3002_v36, -inf  ;;  %v3563_v38 = vld [vmem:[%s6044_s8 + $0x18] sm:$0xff] }
0x1242   :  { %3005 = vmax.xlane.f32.xlu1 %v3004_v39  ;;  %v3562_v39 = vld [vmem:[%s6044_s8 + $0x10] sm:$0xff] }
0x1253   :  { %3107 = vrot.lane.b32.xlu1 %v5754_v4, %s5248_s25 }
0x1256   :  { %3028 = vrot.lane.b32.xlu0 %v5748_v63, %s5248_s25 }
0x1257   :  { %3026 = vrot.lane.b32.xlu1 %v5750_v1, %s5248_s25 }
0x125a   :  { %3105 = vrot.lane.b32.xlu0 %v5758_v7, %s5248_s25  ;;  %s5254_s25 = smov [#allocation2]  }
0x125b   :  { %3188 = vrot.lane.b32.xlu1 %v5714_v50, %s5250_s15  ;;  %s4367_s29 = sshll.u32 %s5254_s25, 4  ;;  %s4368_s29 = int_to_ptr.vmem [resolvable:$true] %s4367_s29 }
0x125c   :  { %p5187_p1 = scmp.lt.s32.totalorder %s4368_s29, %s4368_s29 }
0x12c9   :  { %v3009_v40 = vpop.xlane.xlu0 %3008 }
0x12ca   :  { %v3011_v43 = vsub.f32 %v3003_v33, %v3009_v40  ;;  %v3561_v40 = vld [vmem:[%s6044_s8 + $0x8] sm:$0xff] }
0x12cb   :  { %v3006_v46 = vpop.xlane.xlu1 %3005 }
0x12cc   :  { %v3014_v47 = vmul.f32 1.442695, %v3011_v43  ;;  %v3010_v14 = vsub.f32 %v3002_v36, %v3006_v46  ;;  %v3560_v43 = vld [vmem:[%s6044_s8] sm:$0xff] }
0x12cd   :  { %v3029_v48 = vpop.permute.xlu0 %3028 }
0x12ce   :  { %5146 = vpow2.f32 %v3014_v47  ;;  %v3012_v49 = vmul.f32 1.442695, %v3010_v14  ;;  %4916 = vmatpush3.msra.mxu0 %v3029_v48 }
0x12cf   :  { %v3108_v2 = vpop.permute.xlu1 %3107  ;;  %4917 = vmatprep.subr.mxu0 %v5242_v8 }
0x12d0   :  { %5148 = vpow2.f32 %v3012_v49  ;;  %4923 = vmatpush3.msra.mxu1 %v3108_v2 }
0x12d1   :  { %v3106_v5 = vpop.permute.xlu0 %3105  ;;  %4924 = vmatprep.subr.mxu1 %v5242_v8 }
0x12d2   :  { %4925 = vmatpush3.msra.mxu1 %v3106_v5 }
0x12d3   :  { %v3027_v52 = vpop.permute.xlu1 %3026  ;;  %4936 = vmatprep.subr.mxu1 %v5242_v8 }
0x12d4   :  { %4918 = vmatpush3.msra.mxu0 %v3027_v52 }
0x12d5   :  { %4929 = vmatprep.subr.mxu0 %v5242_v8 }
0x12d7   :  { %v3189_v58 = vpop.permute.xlu1 %3188 }
0x12db   :  { %v5147_v50 = vpop.eup %5146 }
0x12dc   :  { %v3019_v51 = vsel %vm1701_vm3, %v5147_v50, 0.0 }
0x12dd   :  { %v5149_v56 = vpop.eup %5148  ;;  %3020 = vadd.xlane.f32.xlu1 %v3019_v51 }
0x12de   :  { %v3016_v53 = vsel %vm1701_vm3, %v5149_v56, 0.0 }
0x12df   :  { %3017 = vadd.xlane.f32.xlu0 %v3016_v53 }
0x12ee   :  { %3186 = vrot.lane.b32.xlu1 %v5716_v54, %s5250_s15 }
0x12f2   :  { %3184 = vrot.lane.b32.xlu1 %v5737_v15, %s5250_s15 }
0x12f5   :  { %3270 = vrot.lane.b32.xlu0 %v5721_v55, %s5250_s15 }
0x12f9   :  { %3268 = vrot.lane.b32.xlu0 %v5727_v57, %s5250_s15 }
0x12fd   :  { %3266 = vrot.lane.b32.xlu0 %v5735_v59, %s5250_s15 }
0x1366   :  { %v3021_v60 = vpop.xlane.xlu1 %3020 }
0x1367   :  { %5150 = vrcp.f32 %v3021_v60 }
0x1368   :  { %v3018_v61 = vpop.xlane.xlu0 %3017 }
0x1369   :  { %5152 = vrcp.f32 %v3018_v61 }
0x136a   :  { %v3187_v55 = vpop.permute.xlu1 %3186 }
0x136c   :  { %v3271_v62 = vpop.permute.xlu0 %3270 }
0x136e   :  { %v3185_v59 = vpop.permute.xlu1 %3184 }
0x1370   :  { %v3269_v6 = vpop.permute.xlu0 %3268 }
0x1374   :  { %v5151_v0 = vpop.eup %5150  ;;  %v3267_v57 = vpop.permute.xlu0 %3266 }
0x1375   :  { %v3025_v54 = vmul.f32 %v5151_v0, %v5147_v50  ;;  %v4498_v0 = vld [vmem:[%s6045_s14] ss:$0 sm:$0xff] }
0x1376   :  { %v5153_v3 = vpop.eup %5152 }
0x1377   :  { %4927 = vmatmul.mubr.msk.f32.vlgmr.msra.gmra.mxu1 %vm1701_vm3, %v3025_v54  ;;  %v3024_v15 = vmul.f32 %v5153_v3, %v5149_v56 }
0x1378   :  { %4937 = vmatpush3.xpose.msk.msra.mxu1 %vm355_vm2, %v3271_v62  ;;  %4940 = vmatprep.mubr.msk.f32.mxu1 %vm5243_vm1, %v5242_v8 }
0x1379   :  { %4920 = vmatmul.mubr.msk.f32.vlgmr.msra.gmra.mxu0 %vm1701_vm3, %v3024_v15  ;;  %4938 = vmatprep.subr.mxu1 %v5242_v8 }
0x137a   :  { %4930 = vmatpush3.xpose.msk.msra.mxu0 %vm355_vm2, %v3189_v58  ;;  %4933 = vmatprep.mubr.msk.f32.mxu0 %vm5243_vm1, %v5242_v8 }
0x137b   :  { %4931 = vmatprep.subr.mxu0 %v5242_v8 }
0x137c   :  { %4939 = vmatpush3.xpose.msk.msra.mxu1 %vm355_vm2, %v3269_v6 }
0x137d   :  { %4950 = vmatprep.subr.mxu1 %v5242_v8 }
0x137e   :  { %4932 = vmatpush3.xpose.msk.msra.mxu0 %vm355_vm2, %v3187_v55 }
0x137f   :  { %4941 = vmatmul.mubr.msk.f32.vlgmr.msra.gmra.mxu1 %vm355_vm2, %v3267_v57  ;;  %4943 = vmatprep.subr.mxu0 %v5242_v8 }
0x1380   :  { %4954 = vmatprep.mubr.msk.f32.mxu1 %vm5243_vm1, %v5242_v8 }
0x1381   :  { %4934 = vmatmul.mubr.msk.f32.vlgmr.msra.gmra.mxu0 %vm355_vm2, %v3185_v59 }
0x1382   :  { %4947 = vmatprep.mubr.msk.f32.mxu0 %vm5243_vm1, %v5242_v8 }
0x1437   :  { %v3180_v9 = vpop.f32.mrf.mxu1 }
0x1439   :  { %v3101_v10 = vpop.f32.mrf.mxu0  ;;  %v4928_v11 = vpop.f32.mrf.mxu1 }
0x143b   :  { %v4921_v12 = vpop.f32.mrf.mxu0 }
0x143f   :  { %v3344_v13 = vpop.f32.mrf.mxu1 }
0x1440   :  { %v3349_v16 = vmul.f32 0.35355338, %v3344_v13 }
0x1441   :  { %v3262_v17 = vpop.f32.mrf.mxu0  ;;  %v4942_v18 = vpop.f32.mrf.mxu1 }
0x1442   :  { %v3348_v19 = vmul.f32 0.35355338, %v3262_v17  ;;  %v3353_v21 = vsel %vm1701_vm3, %v3349_v16, -inf  ;;  %v3701_v18 = vld [vmem:[%s6046_s19 + $0x18] sm:$0xff] }
0x1443   :  { %3354 = vmax.xlane.f32.xlu0 %v3353_v21  ;;  %v4935_v23 = vpop.f32.mrf.mxu0  ;;  %v3699_v21 = vld [vmem:[%s6046_s19 + $0x8] sm:$0xff] }
0x1444   :  { %v3350_v24 = vsel %vm1701_vm3, %v3348_v19, -inf  ;;  %v3698_v23 = vld [vmem:[%s6046_s19] sm:$0xff] }
0x1445   :  { %3351 = vmax.xlane.f32.xlu1 %v3350_v24  ;;  %v3799_v24 = vld [vmem:[%s6047_s24 + $0x38] sm:$0xff] }
0x1456   :  { %3453 = vrot.lane.b32.xlu1 %v5754_v4, %s5250_s15 }
0x1459   :  { %3374 = vrot.lane.b32.xlu0 %v5748_v63, %s5250_s15 }
0x14cc   :  { %v3355_v25 = vpop.xlane.xlu0 %3354 }
0x14cd   :  { %v3357_v26 = vsub.f32 %v3349_v16, %v3355_v25  ;;  %v3798_v25 = vld [vmem:[%s6047_s24 + $0x30] sm:$0xff] }
0x14ce   :  { %v3352_v27 = vpop.xlane.xlu1 %3351 }
0x14cf   :  { %v3360_v20 = vmul.f32 1.442695, %v3357_v26  ;;  %v3356_v29 = vsub.f32 %v3348_v19, %v3352_v27  ;;  %v3700_v19 = vld [vmem:[%s6046_s19 + $0x10] sm:$0xff]  ;;  %v3797_v26 = vld [vmem:[%s6047_s24 + $0x28] sm:$0xff]  ;;  %v3796_v27 = vld [vmem:[%s6047_s24 + $0x20] sm:$0xff] }
0x14d0   :  { %v3375_v32 = vpop.permute.xlu0 %3374 }
0x14d1   :  { %5154 = vpow2.f32 %v3360_v20  ;;  %v3358_v22 = vmul.f32 1.442695, %v3356_v29  ;;  %4944 = vmatpush3.msra.mxu0 %v3375_v32 }
0x14d2   :  { %v3454_v28 = vpop.permute.xlu1 %3453  ;;  %4945 = vmatprep.subr.mxu0 %v5242_v8 }
0x14d3   :  { %5156 = vpow2.f32 %v3358_v22  ;;  %4951 = vmatpush3.msra.mxu1 %v3454_v28 }
0x14d4   :  { %4952 = vmatprep.subr.mxu1 %v5242_v8 }
0x14de   :  { %v5155_v4 = vpop.eup %5154 }
0x14df   :  { %v3365_v33 = vsel %vm1701_vm3, %v5155_v4, 0.0 }
0x14e0   :  { %v5157_v63 = vpop.eup %5156  ;;  %3366 = vadd.xlane.f32.xlu1 %v3365_v33 }
0x14e1   :  { %v3362_v34 = vsel %vm1701_vm3, %v5157_v63, 0.0 }
0x14e2   :  { %3363 = vadd.xlane.f32.xlu0 %v3362_v34 }
0x14f1   :  { %3372 = vrot.lane.b32.xlu1 %v5750_v1, %s5250_s15 }
0x14f5   :  { %3532 = vrot.lane.b32.xlu1 %v5854_v31, %s5251_s16 }
0x14f8   :  { %3451 = vrot.lane.b32.xlu0 %v5758_v7, %s5250_s15  ;;  %s5182_s15 = scalar_lea.vmem %s4368_s29, 256 }
0x14f9   :  { %3540 = vrot.lane.b32.xlu1 %v3101_v10, %s5252_s18  ;;  %p5183_p0 = scmp.ne.s32.totalorder %s4368_s29, %s5182_s15  ;;  %p5188_p2 = scmp.lt.s32.totalorder %s5182_s15, %s5182_s15 }
0x14fb   :  { %p5189_p3 = por %p5188_p2, %p5187_p1 }
0x14fc   :  { %3534 = vrot.lane.b32.xlu0 %v5852_v30, %s5251_s16 }
0x14fd   :  { %p5190_p4 = pnand %p5189_p3, %p5183_p0 }
0x1500   :  { %3542 = vrot.lane.b32.xlu0 %v3180_v9, %s5252_s18 }
0x1569   :  { %v3367_v8 = vpop.xlane.xlu1 %3366 }
0x156a   :  { %5158 = vrcp.f32 %v3367_v8 }
0x156b   :  { %v3364_v35 = vpop.xlane.xlu0 %3363 }
0x156c   :  { %5160 = vrcp.f32 %v3364_v35 }
0x156d   :  { %v3373_v1 = vpop.permute.xlu1 %3372 }
0x156e   :  { %4946 = vmatpush3.msra.mxu0 %v3373_v1 }
0x156f   :  { %v3452_v31 = vpop.permute.xlu0 %3451  ;;  %4957 = vmatprep.subr.mxu0 %v3563_v38 }
0x1570   :  { %4953 = vmatpush3.msra.mxu1 %v3452_v31  ;;  %v4502_v31 = vld [vmem:[%s6049_s20] ss:$0 sm:$0xff] }
0x1571   :  { %v3533_v2 = vpop.permute.xlu1 %3532  ;;  %4968 = vmatprep.subr.mxu1 %v3701_v18 }
0x1572   :  { %v3554_v50 = vsel %vm355_vm2, %v5802_v42, %v3533_v2 }
0x1573   :  { %v3535_v49 = vpop.permute.xlu0 %3534 }
0x1574   :  { %v3555_v56 = vsel %vm355_vm2, %v5800_v41, %v3535_v49 }
0x1575   :  { %v3541_v52 = vpop.permute.xlu1 %3540 }
0x1576   :  { %v3556_v53 = vsel %vm1701_vm3, %v3554_v50, %v3541_v52 }
0x1577   :  { %v5159_v7 = vpop.eup %5158  ;;  %v3543_v5 = vpop.permute.xlu0 %3542 }
0x1578   :  { %v3371_v36 = vmul.f32 %v5159_v7, %v5155_v4  ;;  %v3557_v60 = vsel %vm1701_vm3, %v3555_v56, %v3543_v5  ;;  %v4506_v5 = vld [vmem:[%s6051_s26] ss:$0 sm:$0xff] }
0x1579   :  { %v5161_v37 = vpop.eup %5160 }
0x157a   :  { %4955 = vmatmul.mubr.msk.f32.vlgmr.msra.gmra.mxu1 %vm1701_vm3, %v3371_v36  ;;  %v3370_v30 = vmul.f32 %v5161_v37, %v5157_v63  ;;  %v4501_v63 = vld [vmem:[%s6048_s6] ss:$0 sm:$0xff] }
0x157b   :  { %4969 = vmatpush3.msra.mxu1 %v3701_v18  ;;  %v4510_v18 = vld [vmem:[%s6053_s1] ss:$0 sm:$0xff] }
0x157c   :  { %4948 = vmatmul.mubr.msk.f32.vlgmr.msra.gmra.mxu0 %vm1701_vm3, %v3370_v30  ;;  %4970 = vmatprep.subr.mxu1 %v3700_v19  ;;  %v3795_v30 = vld [vmem:[%s6047_s24 + $0x18] sm:$0xff] }
0x157d   :  { %4958 = vmatpush3.msra.mxu0 %v3563_v38  ;;  %4971 = vmatpush3.msra.mxu1 %v3700_v19  ;;  %v3794_v38 = vld [vmem:[%s6047_s24 + $0x10] sm:$0xff] }
0x157e   :  { %4959 = vmatprep.subr.mxu0 %v3562_v39  ;;  %4972 = vmatprep.subr.mxu1 %v3699_v21 }
0x157f   :  { %4960 = vmatpush3.msra.mxu0 %v3562_v39  ;;  %4973 = vmatpush3.msra.mxu1 %v3699_v21  ;;  %v3793_v39 = vld [vmem:[%s6047_s24 + $0x8] sm:$0xff] }
0x1580   :  { %4961 = vmatprep.subr.mxu0 %v3561_v40  ;;  %4974 = vmatprep.subr.mxu1 %v3698_v23 }
0x1581   :  { %4962 = vmatpush3.msra.mxu0 %v3561_v40  ;;  %4975 = vmatpush3.msra.mxu1 %v3698_v23  ;;  %v3792_v40 = vld [vmem:[%s6047_s24] sm:$0xff] }
0x1582   :  { %4963 = vmatprep.subr.mxu0 %v3560_v43 }
0x1583   :  { %4964 = vmatpush3.msra.mxu0 %v3560_v43  ;;  %v4503_v43 = vld [vmem:[%s6050_s23] ss:$0 sm:$0xff] }
0x1584   :  { %4979 = vmatprep.subr.mxu0 %v3799_v24 }
0x163a   :  { %v3526_v46 = vpop.f32.mrf.mxu1 }
0x163b   :  { %3550 = vrot.lane.b32.xlu0 %v3526_v46, %s5253_s22 }
0x163c   :  { %v3447_v47 = vpop.f32.mrf.mxu0  ;;  %v4956_v14 = vpop.f32.mrf.mxu1 }
0x163d   :  { %3548 = vrot.lane.b32.xlu1 %v3447_v47, %s5253_s22 }
0x163e   :  { %v4949_v48 = vpop.f32.mrf.mxu0 }
0x16ad   :  { %v3551_v51 = vpop.permute.xlu0 %3550 }
0x16ae   :  { %v3559_v62 = vsel %vm1704_vm4, %v3557_v60, %v3551_v51 }
0x16af   :  { %v3549_v58 = vpop.permute.xlu1 %3548 }
0x16b0   :  { %v3558_v61 = vsel %vm1704_vm4, %v3556_v53, %v3549_v58 }
0x16b1   :  { %4965 = vmatprep.mubr.msk.f32.mxu0 %vm181_vm0, %v3558_v61 }
0x16b2   :  { %4966 = vmatmul.mubr.msk.f32.vlgmr.msra.gmra.mxu0 %vm181_vm0, %v3559_v62 }
0x16b3   :  { %4980 = vmatpush3.msra.mxu0 %v3799_v24 }
0x16b4   :  { %4981 = vmatprep.subr.mxu0 %v3798_v25 }
0x16b5   :  { %4982 = vmatpush3.msra.mxu0 %v3798_v25 }
0x16b6   :  { %4983 = vmatprep.subr.mxu0 %v3797_v26 }
0x16b7   :  { %4984 = vmatpush3.msra.mxu0 %v3797_v26 }
0x16b8   :  { %4985 = vmatprep.subr.mxu0 %v3796_v27 }
0x16b9   :  { %4986 = vmatpush3.msra.mxu0 %v3796_v27 }
0x16ba   :  { %4987 = vmatprep.subr.mxu0 %v3795_v30 }
0x16bb   :  { %4988 = vmatpush3.msra.mxu0 %v3795_v30 }
0x16bc   :  { %4989 = vmatprep.subr.mxu0 %v3794_v38 }
0x16bd   :  { %4990 = vmatpush3.msra.mxu0 %v3794_v38 }
0x16be   :  { %4991 = vmatprep.subr.mxu0 %v3793_v39 }
0x16bf   :  { %4992 = vmatpush3.msra.mxu0 %v3793_v39 }
0x16c0   :  { %4993 = vmatprep.subr.mxu0 %v3792_v40 }
0x16c1   :  { %4994 = vmatpush3.msra.mxu0 %v3792_v40 }
0x1772   :  { %v4967_v54 = vpop.f32.mrf.mxu0 }
0x1773   :  { %v3649_v42 = vadd.f32 %v4967_v54, %v4498_v0 }
0x1774   :  { %v3643_v3 = vpop.f32.mrf.mxu0 }
0x1775   :  { %v3653_v15 = vadd.f32 %v3649_v42, %v5690_v44  ;;  %v3644_v41 = vadd.f32 %v4498_v0, %v3643_v3 }
0x1777   :  { %v3659_v6 = vsel %vm181_vm0, %v3653_v15, 0.0  ;;  %v3652_v55 = vadd.f32 %v3644_v41, %v5692_v45 }
0x1778   :  { %3660 = vadd.xlane.f32.xlu0 %v3659_v6 }
0x1779   :  { %v3656_v57 = vsel %vm181_vm0, %v3652_v55, 0.0 }
0x177a   :  { %3657 = vadd.xlane.f32.xlu1 %v3656_v57 }
0x1801   :  { %v3661_v59 = vpop.xlane.xlu0 %3660 }
0x1802   :  { %v3663_v9 = vmul.f32 0.03125, %v3661_v59 }
0x1803   :  { %v3658_v10 = vpop.xlane.xlu1 %3657 }
0x1804   :  { %v3665_v11 = vsub.f32 %v3653_v15, %v3663_v9  ;;  %v3662_v12 = vmul.f32 0.03125, %v3658_v10 }
0x1806   :  { %v3664_v13 = vsub.f32 %v3652_v55, %v3662_v12  ;;  %v3667_v44 = vmul.f32 %v3665_v11, %v3665_v11 }
0x1808   :  { %v3671_v16 = vsel %vm181_vm0, %v3667_v44, 0.0  ;;  %v3666_v17 = vmul.f32 %v3664_v13, %v3664_v13 }
0x1809   :  { %3672 = vadd.xlane.f32.xlu1 %v3671_v16  ;;  %v4509_v16 = vld [vmem:[%s6052_s28] ss:$0 sm:$0xff] }
0x180a   :  { %v3668_v45 = vsel %vm181_vm0, %v3666_v17, 0.0 }
0x180b   :  { %3669 = vadd.xlane.f32.xlu0 %v3668_v45 }
0x1892   :  { %v3673_v20 = vpop.xlane.xlu1 %3672 }
0x1893   :  { %v3675_v29 = vmul.f32 0.03125, %v3673_v20 }
0x1894   :  { %v3670_v32 = vpop.xlane.xlu0 %3669 }
0x1895   :  { %v3677_v22 = vadd.f32 1e-05, %v3675_v29  ;;  %v3674_v28 = vmul.f32 0.03125, %v3670_v32 }
0x1897   :  { %5162 = vrsqrt.f32 %v3677_v22  ;;  %v3676_v4 = vadd.f32 1e-05, %v3674_v28 }
0x1899   :  { %5164 = vrsqrt.f32 %v3676_v4 }
0x18a4   :  { %v5163_v33 = vpop.eup %5162 }
0x18a5   :  { %v3681_v34 = vmul.f32 %v5163_v33, %v3665_v11 }
0x18a6   :  { %v5165_v8 = vpop.eup %5164 }
0x18a7   :  { %v3680_v35 = vmul.f32 %v5165_v8, %v3664_v13  ;;  %v3689_v1 = vmul.f32 %v4501_v63, %v3681_v34 }
0x18a9   :  { %v3688_v7 = vmul.f32 %v4501_v63, %v3680_v35  ;;  %v3697_v37 = vadd.f32 %v4502_v31, %v3689_v1  ;;  %v3982_v35 = vld [vmem:[%s6054_s2 + $0x18] sm:$0xff]  ;;  %v3981_v1 = vld [vmem:[%s6054_s2 + $0x10] sm:$0xff] }
0x18aa   :  { %4998 = vmatprep.subr.mxu1 %v3982_v35 }
0x18ab   :  { %v3696_v36 = vadd.f32 %v4502_v31, %v3688_v7  ;;  %v3980_v31 = vld [vmem:[%s6054_s2 + $0x8] sm:$0xff]  ;;  %v3979_v7 = vld [vmem:[%s6054_s2] sm:$0xff] }
0x18ad   :  { %4976 = vmatprep.mubr.msk.f32.mxu1 %vm181_vm0, %v3696_v36 }
0x18ae   :  { %4977 = vmatmul.mubr.msk.f32.vlgmr.msra.gmra.mxu1 %vm181_vm0, %v3697_v37 }
0x18af   :  { %4999 = vmatpush3.msra.mxu1 %v3982_v35 }
0x18b0   :  { %5000 = vmatprep.subr.mxu1 %v3981_v1 }
0x18b1   :  { %5001 = vmatpush3.msra.mxu1 %v3981_v1 }
0x18b2   :  { %5002 = vmatprep.subr.mxu1 %v3980_v31 }
0x18b3   :  { %5003 = vmatpush3.msra.mxu1 %v3980_v31 }
0x18b4   :  { %5004 = vmatprep.subr.mxu1 %v3979_v7 }
0x18b5   :  { %5005 = vmatpush3.msra.mxu1 %v3979_v7 }
0x196e   :  { %v4978_v46 = vpop.f32.mrf.mxu1 }
0x196f   :  { %v3787_v47 = vadd.f32 %v4978_v46, %v4503_v43 }
0x1970   :  { %v3781_v14 = vpop.f32.mrf.mxu1 }
0x1971   :  { %v3782_v48 = vadd.f32 %v4503_v43, %v3781_v14  ;;  %v3791_v2 = vmax.f32 %v3787_v47, 0.0  ;;  %v4511_v47 = vld [vmem:[%s6056_s10] ss:$0 sm:$0xff] }
0x1973   :  { %v3790_v49 = vmax.f32 %v3782_v48, 0.0 }
0x1975   :  { %4995 = vmatprep.mubr.msk.f32.mxu0 %vm3807_vm5, %v3790_v49 }
0x1976   :  { %4996 = vmatmul.mubr.msk.f32.vlgmr.msra.gmra.mxu0 %vm3807_vm5, %v3791_v2 }
0x1a36   :  { %v4997_v52 = vpop.f32.mrf.mxu0 }
0x1a37   :  { %v3886_v50 = vadd.f32 %v4997_v52, %v4506_v5 }
0x1a38   :  { %v3880_v51 = vpop.f32.mrf.mxu0 }
0x1a39   :  { %v3890_v56 = vadd.f32 %v3886_v50, %v3697_v37  ;;  %v3881_v53 = vadd.f32 %v4506_v5, %v3880_v51  ;;  %v4512_v5 = vld [vmem:[%s6057_s11] ss:$0 sm:$0xff] }
0x1a3b   :  { %v3889_v58 = vadd.f32 %v3881_v53, %v3696_v36  ;;  %v3896_v60 = vsel %vm181_vm0, %v3890_v56, 0.0  ;;  %v4076_v36 = vld [vmem:[%s6055_s7 + $0x18] sm:$0xff]  ;;  %v4074_v53 = vld [vmem:[%s6055_s7 + $0x8] sm:$0xff] }
0x1a3c   :  { %3897 = vadd.xlane.f32.xlu1 %v3896_v60  ;;  %5009 = vmatprep.subr.mxu1 %v4076_v36  ;;  %v4164_v60 = vld [vmem:[%s6058_s0 + $0x18] sm:$0xff] }
0x1a3d   :  { %v3893_v61 = vsel %vm181_vm0, %v3889_v58, 0.0  ;;  %5020 = vmatprep.subr.mxu0 %v4164_v60 }
0x1a3e   :  { %3894 = vadd.xlane.f32.xlu0 %v3893_v61  ;;  %5021 = vmatpush3.msra.mxu0 %v4164_v60  ;;  %v4163_v61 = vld [vmem:[%s6058_s0 + $0x10] sm:$0xff] }
0x1a3f   :  { %5022 = vmatprep.subr.mxu0 %v4163_v61 }
0x1a40   :  { %5023 = vmatpush3.msra.mxu0 %v4163_v61 }
0x1ac5   :  { %v3898_v62 = vpop.xlane.xlu1 %3897 }
0x1ac6   :  { %v3900_v0 = vmul.f32 0.03125, %v3898_v62  ;;  %v4162_v62 = vld [vmem:[%s6058_s0 + $0x8] sm:$0xff] }
0x1ac7   :  { %v3895_v54 = vpop.xlane.xlu0 %3894  ;;  %5024 = vmatprep.subr.mxu0 %v4162_v62 }
0x1ac8   :  { %v3902_v42 = vsub.f32 %v3890_v56, %v3900_v0  ;;  %v3899_v3 = vmul.f32 0.03125, %v3895_v54  ;;  %v4075_v56 = vld [vmem:[%s6055_s7 + $0x10] sm:$0xff]  ;;  %5025 = vmatpush3.msra.mxu0 %v4162_v62  ;;  %v4161_v0 = vld [vmem:[%s6058_s0] sm:$0xff] }
0x1ac9   :  { %5026 = vmatprep.subr.mxu0 %v4161_v0  ;;  %v4513_v54 = vld [vmem:[%s6059_s5] ss:$0 sm:$0xff] }
0x1aca   :  { %v3901_v15 = vsub.f32 %v3889_v58, %v3899_v3  ;;  %v3904_v41 = vmul.f32 %v3902_v42, %v3902_v42  ;;  %v4073_v58 = vld [vmem:[%s6055_s7] sm:$0xff]  ;;  %5027 = vmatpush3.msra.mxu0 %v4161_v0 }
0x1acc   :  { %v3908_v6 = vsel %vm181_vm0, %v3904_v41, 0.0  ;;  %v3903_v55 = vmul.f32 %v3901_v15, %v3901_v15 }
0x1acd   :  { %3909 = vadd.xlane.f32.xlu1 %v3908_v6  ;;  %v4516_v6 = vld [vmem:[%s6060_s17] ss:$0 sm:$0xff] }
0x1ace   :  { %v3905_v57 = vsel %vm181_vm0, %v3903_v55, 0.0 }
0x1acf   :  { %3906 = vadd.xlane.f32.xlu0 %v3905_v57 }
0x1b56   :  { %v3910_v59 = vpop.xlane.xlu1 %3909 }
0x1b57   :  { %v3912_v9 = vmul.f32 0.03125, %v3910_v59 }
0x1b58   :  { %v3907_v10 = vpop.xlane.xlu0 %3906 }
0x1b59   :  { %v3914_v11 = vadd.f32 1e-05, %v3912_v9  ;;  %v3911_v12 = vmul.f32 0.03125, %v3907_v10 }
0x1b5b   :  { %5166 = vrsqrt.f32 %v3914_v11  ;;  %v3913_v13 = vadd.f32 1e-05, %v3911_v12  ;;  %v4258_v12 = vld [vmem:[%s5439_s12 + $0x18] sm:$0xff] }
0x1b5d   :  { %5168 = vrsqrt.f32 %v3913_v13  ;;  %v4257_v13 = vld [vmem:[%s5439_s12 + $0x10] sm:$0xff] }
0x1b68   :  { %v5167_v44 = vpop.eup %5166 }
0x1b69   :  { %v3918_v17 = vmul.f32 %v5167_v44, %v3902_v42  ;;  %v4256_v44 = vld [vmem:[%s5439_s12 + $0x8] sm:$0xff] }
0x1b6a   :  { %v5169_v45 = vpop.eup %5168 }
0x1b6b   :  { %v3926_v19 = vmul.f32 %v4509_v16, %v3918_v17  ;;  %v3917_v21 = vmul.f32 %v5169_v45, %v3901_v15  ;;  %v4519_v17 = vld [vmem:[%s6061_s21] ss:$0 sm:$0xff] }
0x1b6d   :  { %v3934_v23 = vadd.f32 %v4510_v18, %v3926_v19  ;;  %v3925_v24 = vmul.f32 %v4509_v16, %v3917_v21  ;;  %v4255_v16 = vld [vmem:[%s5439_s12] sm:$0xff] }
0x1b6f   :  { %v3940_v25 = vsel %vm181_vm0, %v3934_v23, 0.0  ;;  %v3933_v26 = vadd.f32 %v4510_v18, %v3925_v24 }
0x1b70   :  { %3941 = vadd.xlane.f32.xlu1 %v3940_v25 }
0x1b71   :  { %v3937_v27 = vsel %vm181_vm0, %v3933_v26, 0.0 }
0x1b72   :  { %3938 = vadd.xlane.f32.xlu0 %v3937_v27 }
0x1bf9   :  { %v3942_v20 = vpop.xlane.xlu1 %3941 }
0x1bfa   :  { %v3944_v29 = vmul.f32 0.03125, %v3942_v20 }
0x1bfb   :  { %v3939_v32 = vpop.xlane.xlu0 %3938 }
0x1bfc   :  { %v3946_v22 = vsub.f32 %v3934_v23, %v3944_v29  ;;  %v3943_v28 = vmul.f32 0.03125, %v3939_v32 }
0x1bfe   :  { %v3945_v4 = vsub.f32 %v3933_v26, %v3943_v28  ;;  %v3948_v33 = vmul.f32 %v3946_v22, %v3946_v22 }
0x1c00   :  { %v3952_v63 = vsel %vm181_vm0, %v3948_v33, 0.0  ;;  %v3947_v34 = vmul.f32 %v3945_v4, %v3945_v4 }
0x1c01   :  { %3953 = vadd.xlane.f32.xlu1 %v3952_v63 }
0x1c02   :  { %v3949_v8 = vsel %vm181_vm0, %v3947_v34, 0.0 }
0x1c03   :  { %3950 = vadd.xlane.f32.xlu0 %v3949_v8 }
0x1c8a   :  { %v3954_v37 = vpop.xlane.xlu1 %3953 }
0x1c8b   :  { %v3956_v30 = vmul.f32 0.03125, %v3954_v37 }
0x1c8c   :  { %v3951_v38 = vpop.xlane.xlu0 %3950 }
0x1c8d   :  { %v3958_v39 = vadd.f32 1e-05, %v3956_v30  ;;  %v3955_v40 = vmul.f32 0.03125, %v3951_v38 }
0x1c8f   :  { %5170 = vrsqrt.f32 %v3958_v39  ;;  %v3957_v43 = vadd.f32 1e-05, %v3955_v40 }
0x1c91   :  { %5172 = vrsqrt.f32 %v3957_v43 }
0x1c9c   :  { %v5171_v46 = vpop.eup %5170 }
0x1c9d   :  { %v3962_v14 = vmul.f32 %v5171_v46, %v3946_v22 }
0x1c9e   :  { %v5173_v48 = vpop.eup %5172 }
0x1c9f   :  { %v3961_v49 = vmul.f32 %v5173_v48, %v3945_v4  ;;  %v3970_v2 = vmul.f32 %v4511_v47, %v3962_v14 }
0x1ca1   :  { %v3969_v52 = vmul.f32 %v4511_v47, %v3961_v49  ;;  %v3978_v51 = vadd.f32 %v4512_v5, %v3970_v2 }
0x1ca3   :  { %v3977_v50 = vadd.f32 %v4512_v5, %v3969_v52 }
0x1ca5   :  { %5006 = vmatprep.mubr.msk.f32.mxu1 %vm181_vm0, %v3977_v50 }
0x1ca6   :  { %5007 = vmatmul.mubr.msk.f32.vlgmr.msra.gmra.mxu1 %vm181_vm0, %v3978_v51 }
0x1ca7   :  { %5010 = vmatpush3.msra.mxu1 %v4076_v36  ;;  %5017 = vmatprep.mubr.msk.f32.mxu1 %vm181_vm0, %v3977_v50 }
0x1ca8   :  { %5011 = vmatprep.subr.mxu1 %v4075_v56 }
0x1ca9   :  { %5012 = vmatpush3.msra.mxu1 %v4075_v56 }
0x1caa   :  { %5013 = vmatprep.subr.mxu1 %v4074_v53 }
0x1cab   :  { %5014 = vmatpush3.msra.mxu1 %v4074_v53 }
0x1cac   :  { %5015 = vmatprep.subr.mxu1 %v4073_v58 }
0x1cad   :  { %5016 = vmatpush3.msra.mxu1 %v4073_v58 }
0x1cae   :  { %5018 = vmatmul.mubr.msk.f32.vlgmr.msra.gmra.mxu1 %vm181_vm0, %v3978_v51  ;;  %5031 = vmatprep.subr.mxu1 %v4258_v12 }
0x1caf   :  { %5032 = vmatpush3.msra.mxu1 %v4258_v12 }
0x1cb0   :  { %5033 = vmatprep.subr.mxu1 %v4257_v13 }
0x1cb1   :  { %5034 = vmatpush3.msra.mxu1 %v4257_v13 }
0x1cb2   :  { %5035 = vmatprep.subr.mxu1 %v4256_v44 }
0x1cb3   :  { %5036 = vmatpush3.msra.mxu1 %v4256_v44 }
0x1cb4   :  { %5037 = vmatprep.subr.mxu1 %v4255_v16 }
0x1cb5   :  { %5038 = vmatpush3.msra.mxu1 %v4255_v16 }
0x1d66   :  { %v5008_v42 = vpop.f32.mrf.mxu1 }
0x1d67   :  { %v4068_v3 = vadd.f32 %v5008_v42, %v4513_v54 }
0x1d68   :  { %v4062_v15 = vpop.f32.mrf.mxu1 }
0x1d69   :  { %4072 = vst.msk [vmem:[#allocation2 + $0x8] sm:$0xff] %vm355_vm2, %v4068_v3  ;;  %v4063_v41 = vadd.f32 %v4513_v54, %v4062_v15 }
0x1d6b   :  { %4071 = vst.msk [vmem:[#allocation2] sm:$0xff] %vm355_vm2, %v4063_v41 }
0x1d6e   :  { %v5019_v55 = vpop.f32.mrf.mxu1 }
0x1d6f   :  { %v4156_v57 = vadd.f32 %v5019_v55, %v4516_v6 }
0x1d70   :  { %v4150_v59 = vpop.f32.mrf.mxu1 }
0x1d71   :  { %v4151_v9 = vadd.f32 %v4516_v6, %v4150_v59  ;;  %v4160_v11 = vmax.f32 %v4156_v57, 0.0 }
0x1d73   :  { %v4159_v10 = vmax.f32 %v4151_v9, 0.0 }
0x1d75   :  { %5028 = vmatprep.mubr.msk.f32.mxu0 %vm181_vm0, %v4159_v10 }
0x1d76   :  { %5029 = vmatmul.mubr.msk.f32.vlgmr.msra.gmra.mxu0 %vm181_vm0, %v4160_v11 }
0x1e36   :  { %v5030_v45 = vpop.f32.mrf.mxu0 }
0x1e37   :  { %v4250_v18 = vadd.f32 %v5030_v45, %v4519_v17 }
0x1e38   :  { %v4244_v19 = vpop.f32.mrf.mxu0 }
0x1e39   :  { %v4245_v21 = vadd.f32 %v4519_v17, %v4244_v19  ;;  %v4254_v24 = vmax.f32 %v4250_v18, 0.0 }
0x1e3b   :  { %v4253_v23 = vmax.f32 %v4245_v21, 0.0 }
0x1e3d   :  { %5039 = vmatprep.mubr.msk.f32.mxu1 %vm181_vm0, %v4253_v23 }
0x1e3e   :  { %5040 = vmatmul.mubr.msk.f32.vlgmr.msra.gmra.mxu1 %vm181_vm0, %v4254_v24 }
0x1e3f   :  { %5193 = shalt.err (!%p5190_p4)
}
0x1e40   :  { %s5255_s12 = smov 128   ;;  %v4522_v25 = vld [vmem:[%s5444_s27] ss:$0 sm:$0xff]  ;;  %vm4359_vm6 = vcmask 31744  }
0x1e41   :  { %4373 = dma.vmem_to_hbm [thread:$0]  %s4368_s29, 256, %s5449_s4, [#allocation3], %s5255_s12, %s5255_s12, %s5251_s16  }
0x1efe   :  { %v5041_v26 = vpop.f32.mrf.mxu1 }
0x1eff   :  { %v4344_v27 = vadd.f32 %v5041_v26, %v4522_v25 }
0x1f00   :  { %v4338_v20 = vpop.f32.mrf.mxu1 }
0x1f01   :  { %v4526_v29 = vmul.f32 -1.442695, %v4344_v27  ;;  %v4339_v32 = vadd.f32 %v4522_v25, %v4338_v20 }
0x1f03   :  { %5174 = vpow2.f32 %v4526_v29  ;;  %v4525_v22 = vmul.f32 -1.442695, %v4339_v32 }
0x1f05   :  { %5176 = vpow2.f32 %v4525_v22 }
0x1f10   :  { %v5175_v28 = vpop.eup %5174 }
0x1f11   :  { %v4354_v4 = vadd.f32 1.0, %v5175_v28 }
0x1f12   :  { %v5177_v33 = vpop.eup %5176 }
0x1f13   :  { %5178 = vrcp.f32 %v4354_v4  ;;  %v4353_v63 = vadd.f32 1.0, %v5177_v33 }
0x1f15   :  { %5180 = vrcp.f32 %v4353_v63 }
0x1f20   :  { %v5179_v34 = vpop.eup %5178 }
0x1f21   :  { %4361 = vst.msk [vmem:[%s5454_s30 + $0x8] sm:$0xff] %vm4359_vm6, %v5179_v34 }
0x1f22   :  { %v5181_v8 = vpop.eup %5180 }
0x1f23   :  { %4360 = vst.msk [vmem:[%s5454_s30] sm:$0xff] %vm4359_vm6, %v5181_v8 }
0x1f24   :  { %5202 = dma.done.wait [#allocation3], 256  }
0x1f25   :  { %5203 = vsyncadd [#allocation3], 4294967040 }
0x1f26   :  { %4381 = vsyncpa [#allocation3], 1 }

</bundles_post_ra>
